<compile_context>
chip_gen: v7x
topology: tpu7x:2x2x1
jax: 0.10.0
libtpu: 0.0.40
codegen_flags: <defaults>
</compile_context>

<pallas_src>
import functools

import jax
import jax.numpy as jnp
import numpy as np
from jax.experimental import pallas as pl
from jax.experimental.pallas import tpu as pltpu

NEG_SLOPE = 0.2
BN_EPS = 1e-5
KSIZE = 4


def _round_up(x, m):
    return (x + m - 1) // m * m


# ----------------------------------------------------------------------------
# Pallas kernel: one full conv layer (matmul + bias + BN + LeakyReLU) per call
# ----------------------------------------------------------------------------
def fused_conv_layer_kernel(p_ref, w_ref, b_ref, g_ref, bt_ref, o_ref, *,
                            m_valid, apply_bn, apply_lrelu):
    """y = LeakyReLU(BatchNorm(patches @ W + bias)) in one VMEM-resident step.

    p_ref : (m_pad, K)      bf16 im2col patches (rows >= m_valid are zero pad)
    w_ref : (K, c_pad)      bf16 weights (output channels padded to 128 lanes)
    b_ref/g_ref/bt_ref : (1, c_pad) f32 bias / BN gamma / BN beta
    o_ref : (m_pad, c_pad)  bf16 for hidden layers, f32 for the final layer

    The whole layer is a single grid step, so the conv output never leaves
    VMEM before BatchNorm / LeakyReLU are applied and there is no per-K-step
    grid overhead.  BN uses training-mode batch statistics over the true
    m_valid rows (padded rows masked out).
    """
    y = jnp.dot(p_ref[...], w_ref[...], preferred_element_type=jnp.float32)
    y = y + b_ref[...]

    if apply_bn:
        m_pad = y.shape[0]
        if m_valid == m_pad:
            mean = jnp.mean(y, axis=0, keepdims=True)
            diff = y - mean
            var = jnp.mean(diff * diff, axis=0, keepdims=True)
        else:
            # Mask out the zero-padded rows so batch statistics are exact.
            row = jax.lax.broadcasted_iota(jnp.int32, y.shape, 0)
            mask = (row < m_valid).astype(jnp.float32)
            inv_m = 1.0 / m_valid
            mean = jnp.sum(y * mask, axis=0, keepdims=True) * inv_m
            diff = (y - mean) * mask
            var = jnp.sum(diff * diff, axis=0, keepdims=True) * inv_m
        y = (y - mean) * jax.lax.rsqrt(var + BN_EPS) * g_ref[...] + bt_ref[...]

    if apply_lrelu:
        y = jnp.maximum(y, NEG_SLOPE * y)

    o_ref[...] = y.astype(o_ref.dtype)


# ----------------------------------------------------------------------------
# Wrappers (glue: im2col, padding, parameter plumbing)
# ----------------------------------------------------------------------------
def _im2col(x, k, stride, pad):
    """x: (N, H, W, C) NHWC -> (N*Ho*Wo, k*k*C) patches (same dtype as x)."""
    n, h, w, c = x.shape
    xp = jnp.pad(x, ((0, 0), (pad, pad), (pad, pad), (0, 0)))
    ho = (h + 2 * pad - k) // stride + 1
    wo = (w + 2 * pad - k) // stride + 1
    cols = []
    for di in range(k):
        for dj in range(k):
            cols.append(xp[:, di:di + ho * stride:stride,
                           dj:dj + wo * stride:stride, :])
    cols = jnp.stack(cols, axis=3)                 # (N, Ho, Wo, k*k, C)
    return cols.reshape(n * ho * wo, k * k * c), ho, wo


def conv_layer_pallas(x_nhwc, layer, *, stride, apply_bn, apply_lrelu,
                      out_dtype):
    wmat = layer["wmat"]                           # (k*k*C_in, c_pad) bf16
    patches, ho, wo = _im2col(x_nhwc, KSIZE, stride, 1)
    m, kdim = patches.shape
    assert kdim == wmat.shape[0]
    m_pad = _round_up(m, 16)                       # bf16 sublane packing
    if m_pad != m:
        patches = jnp.pad(patches, ((0, m_pad - m), (0, 0)))
    c_pad = wmat.shape[1]

    out = pl.pallas_call(
        functools.partial(fused_conv_layer_kernel, m_valid=m,
                          apply_bn=apply_bn, apply_lrelu=apply_lrelu),
        out_shape=jax.ShapeDtypeStruct((m_pad, c_pad), out_dtype),
        # Explicit headroom (review: v5e default scoped VMEM is 16 MiB);
        # the largest layer uses ~4.3 MiB of VMEM.
        compiler_params=pltpu.CompilerParams(
            vmem_limit_bytes=32 * 1024 * 1024),
    )(patches, wmat, layer["bias"], layer["gamma"], layer["beta"])
    return out, m, ho, wo


# ----------------------------------------------------------------------------
# Discriminator
# ----------------------------------------------------------------------------
def make_cfg(in_channels):
    # (C_in, C_out, stride, has_batchnorm)
    return [(in_channels, 64, 2, False),
            (64, 128, 2, True),
            (128, 256, 2, True),
            (256, 512, 1, True),
            (512, 1, 1, False)]


def init_params(key, in_channels):
    cfg = make_cfg(in_channels)
    params = {}
    for idx, (cin, cout, _, bn) in enumerate(cfg, start=1):
        key, wk = jax.random.split(key)
        params[f"w{idx}"] = 0.02 * jax.random.normal(
            wk, (cout, cin, KSIZE, KSIZE), jnp.float32)
        params[f"b{idx}"] = jnp.zeros((cout,), jnp.float32)
        if bn:
            params[f"gamma{idx}"] = jnp.ones((cout,), jnp.float32)
            params[f"beta{idx}"] = jnp.zeros((cout,), jnp.float32)
    return params, cfg


def prepare_params(params, cfg):
    """One-time weight prep (hoisted out of the forward pass):
    HWIO transpose + reshape to a matmul matrix, pad output channels to a
    multiple of 128 lanes, cast weights to bf16; pad bias/gamma/beta."""
    layers = []
    for idx, (cin, cout, _, bn) in enumerate(cfg, start=1):
        c_pad = _round_up(cout, 128)
        w = params[f"w{idx}"]                                  # (cout,cin,4,4)
        wmat = jnp.transpose(w, (2, 3, 1, 0)).reshape(KSIZE * KSIZE * cin, cout)
        wmat = jnp.pad(wmat, ((0, 0), (0, c_pad - cout))).astype(jnp.bfloat16)
        bias = jnp.pad(params[f"b{idx}"], (0, c_pad - cout)).reshape(1, c_pad)
        if bn:
            gamma = jnp.pad(params[f"gamma{idx}"],
                            (0, c_pad - cout)).reshape(1, c_pad)
            beta = jnp.pad(params[f"beta{idx}"],
                           (0, c_pad - cout)).reshape(1, c_pad)
        else:
            gamma = jnp.ones((1, c_pad), jnp.float32)
            beta = jnp.zeros((1, c_pad), jnp.float32)
        layers.append(dict(wmat=wmat, bias=bias, gamma=gamma, beta=beta))
    return layers


def discriminator_forward(x_nchw, layers, cfg):
    # NCHW -> NHWC; bf16 activations between layers (halves HBM traffic).
    x = jnp.transpose(x_nchw, (0, 2, 3, 1)).astype(jnp.bfloat16)
    n = x.shape[0]
    n_layers = len(cfg)
    for idx, (_, cout, stride, bn) in enumerate(cfg, start=1):
        is_last = idx == n_layers
        y, m, ho, wo = conv_layer_pallas(
            x, layers[idx - 1], stride=stride, apply_bn=bn,
            apply_lrelu=not is_last,
            out_dtype=jnp.float32 if is_last else jnp.bfloat16)
        y = y[:m, :cout]
        if is_last:
            # AdaptiveAvgPool2d(1) + Sigmoid tail: 8 scalars of plain JAX glue.
            logits = jnp.mean(y.reshape(n, ho * wo), axis=1)
            return jax.nn.sigmoid(logits).reshape(n, 1, 1, 1)
        x = y.reshape(n, ho, wo, cout)


# ----------------------------------------------------------------------------
# Pure-JAX references (fp32, and bf16-operand variant mirroring the kernel)
# ----------------------------------------------------------------------------
def reference_forward(x_nchw, params, cfg, *, compute_dtype=jnp.float32):
    x = jnp.transpose(x_nchw, (0, 2, 3, 1)).astype(jnp.float32)

    def conv(x, w, b, s):
        y = jax.lax.conv_general_dilated(
            x.astype(compute_dtype),
            jnp.transpose(w, (2, 3, 1, 0)).astype(compute_dtype),
            window_strides=(s, s), padding=[(1, 1), (1, 1)],
            dimension_numbers=("NHWC", "HWIO", "NHWC"),
            preferred_element_type=jnp.float32)
        return y + b

    def bn(x):
        mean = jnp.mean(x, axis=(0, 1, 2), keepdims=True)
        var = jnp.mean((x - mean) ** 2, axis=(0, 1, 2), keepdims=True)
        return (x - mean) * jax.lax.rsqrt(var + BN_EPS)

    n_layers = len(cfg)
    for idx, (_, _, stride, has_bn) in enumerate(cfg, start=1):
        x = conv(x, params[f"w{idx}"], params[f"b{idx}"], stride)
        if has_bn:
            x = bn(x)
        if idx != n_layers:
            x = jnp.maximum(x, NEG_SLOPE * x)
    out = jax.nn.sigmoid(jnp.mean(x, axis=(1, 2, 3)))
    return out.reshape(-1, 1, 1, 1)


if __name__ == "__main__":
    key = jax.random.PRNGKey(0)
    in_channels = 4
    pkey, xkey = jax.random.split(key)
    params, cfg = init_params(pkey, in_channels)
    layers = prepare_params(params, cfg)   # hoisted one-time weight prep

    # 32x32 spatial is the smallest power-of-two input this architecture
    # supports end-to-end (16x16 collapses to zero width at the last conv).
    x = jax.random.normal(xkey, (2, in_channels, 32, 32), jnp.float32)  # NCHW

    fwd = jax.jit(lambda xx, ll: discriminator_forward(xx, ll, cfg))
    out = jax.block_until_ready(fwd(x, layers))

    # bf16-operand reference (same arithmetic as the kernel) — tight check.
    ref_bf16 = jax.block_until_ready(
        reference_forward(x, params, cfg, compute_dtype=jnp.bfloat16))
    # fp32 reference — loose check accounting for bf16 MXU operands.
    ref_f32 = jax.block_until_ready(
        reference_forward(x, params, cfg, compute_dtype=jnp.float32))

    assert out.shape == (2, 1, 1, 1), out.shape
    out_np = np.asarray(out, dtype=np.float32)
    assert np.allclose(out_np, np.asarray(ref_bf16, dtype=np.float32),
                       atol=5e-3, rtol=5e-3), (out_np, np.asarray(ref_bf16))
    assert np.allclose(out_np, np.asarray(ref_f32, dtype=np.float32),
                       atol=2e-2, rtol=2e-2), (out_np, np.asarray(ref_f32))
    print("KERNEL_OK")
</pallas_src>

<mosaic_0001>
module attributes {stable_mosaic.version = 11 : i64} {
  func.func @fused_conv_layer_kernel(%arg0: memref<512x64xbf16, #tpu.memory_space<vmem>>, %arg1: memref<64x128xbf16, #tpu.memory_space<vmem>>, %arg2: memref<1x128xf32, #tpu.memory_space<vmem>>, %arg3: memref<1x128xf32, #tpu.memory_space<vmem>>, %arg4: memref<1x128xf32, #tpu.memory_space<vmem>>, %arg5: memref<512x128xbf16, #tpu.memory_space<vmem>>) attributes {dimension_semantics = [], scalar_prefetch = 0 : i64, scratch_operands = 0 : i64, tpu.core_type = #tpu.core_type<tc>} {
    %c0 = arith.constant 0 : index
    %c0_0 = arith.constant 0 : index
    %0 = vector.load %arg0[%c0, %c0_0] : memref<512x64xbf16, #tpu.memory_space<vmem>>, vector<512x64xbf16>
    %c0_1 = arith.constant 0 : index
    %c0_2 = arith.constant 0 : index
    %1 = vector.load %arg1[%c0_1, %c0_2] : memref<64x128xbf16, #tpu.memory_space<vmem>>, vector<64x128xbf16>
    %cst = arith.constant dense<0.000000e+00> : vector<512x128xf32>
    %2 = tpu.matmul %0, %1, %cst {dimension_numbers = #tpu.dot_dimension_numbers<[1], [0], [0], [1], [0, 0, 1, 1], [], []>} : vector<512x64xbf16>, vector<64x128xbf16>, vector<512x128xf32> -> vector<512x128xf32>
    %c0_3 = arith.constant 0 : index
    %c0_4 = arith.constant 0 : index
    %3 = vector.load %arg2[%c0_3, %c0_4] : memref<1x128xf32, #tpu.memory_space<vmem>>, vector<1x128xf32>
    %4 = vector.broadcast %3 : vector<1x128xf32> to vector<512x128xf32>
    %5 = arith.addf %2, %4 : vector<512x128xf32>
    %cst_5 = arith.constant 2.000000e-01 : f32
    %6 = vector.broadcast %cst_5 : f32 to vector<512x128xf32>
    %7 = arith.mulf %6, %5 : vector<512x128xf32>
    %8 = arith.maximumf %5, %7 : vector<512x128xf32>
    %9 = arith.truncf %8 : vector<512x128xf32> to vector<512x128xbf16>
    %c0_6 = arith.constant 0 : index
    %c0_7 = arith.constant 0 : index
    %10 = vector.load %arg5[%c0_6, %c0_7] : memref<512x128xbf16, #tpu.memory_space<vmem>>, vector<512x128xbf16>
    tpu.vector_store %arg5[%c0_6, %c0_7], %9 {strides = array<i32>} : memref<512x128xbf16, #tpu.memory_space<vmem>>, vector<512x128xbf16>,
    return
  }
}

module attributes {stable_mosaic.version = 11 : i64} {
  func.func @fused_conv_layer_kernel(%arg0: memref<128x1024xbf16, #tpu.memory_space<vmem>>, %arg1: memref<1024x128xbf16, #tpu.memory_space<vmem>>, %arg2: memref<1x128xf32, #tpu.memory_space<vmem>>, %arg3: memref<1x128xf32, #tpu.memory_space<vmem>>, %arg4: memref<1x128xf32, #tpu.memory_space<vmem>>, %arg5: memref<128x128xbf16, #tpu.memory_space<vmem>>) attributes {dimension_semantics = [], scalar_prefetch = 0 : i64, scratch_operands = 0 : i64, tpu.core_type = #tpu.core_type<tc>} {
    %c0 = arith.constant 0 : index
    %c0_0 = arith.constant 0 : index
    %0 = vector.load %arg0[%c0, %c0_0] : memref<128x1024xbf16, #tpu.memory_space<vmem>>, vector<128x1024xbf16>
    %c0_1 = arith.constant 0 : index
    %c0_2 = arith.constant 0 : index
    %1 = vector.load %arg1[%c0_1, %c0_2] : memref<1024x128xbf16, #tpu.memory_space<vmem>>, vector<1024x128xbf16>
    %cst = arith.constant dense<0.000000e+00> : vector<128x128xf32>
    %2 = tpu.matmul %0, %1, %cst {dimension_numbers = #tpu.dot_dimension_numbers<[1], [0], [0], [1], [0, 0, 1, 1], [], []>} : vector<128x1024xbf16>, vector<1024x128xbf16>, vector<128x128xf32> -> vector<128x128xf32>
    %c0_3 = arith.constant 0 : index
    %c0_4 = arith.constant 0 : index
    %3 = vector.load %arg2[%c0_3, %c0_4] : memref<1x128xf32, #tpu.memory_space<vmem>>, vector<1x128xf32>
    %4 = vector.broadcast %3 : vector<1x128xf32> to vector<128x128xf32>
    %5 = arith.addf %2, %4 : vector<128x128xf32>
    %cst_5 = arith.constant dense<0.000000e+00> : vector<128xf32>
    %6 = vector.multi_reduction <add>, %5, %cst_5 [0] : vector<128x128xf32> to vector<128xf32>
    %7 = vector.shape_cast %6 : vector<128xf32> to vector<1x128xf32>
    %cst_6 = arith.constant 1.280000e+02 : f32
    %8 = vector.broadcast %cst_6 : f32 to vector<1x128xf32>
    %9 = arith.divf %7, %8 : vector<1x128xf32>
    %10 = vector.broadcast %9 : vector<1x128xf32> to vector<128x128xf32>
    %11 = arith.subf %5, %10 : vector<128x128xf32>
    %12 = arith.mulf %11, %11 : vector<128x128xf32>
    %cst_7 = arith.constant dense<0.000000e+00> : vector<128xf32>
    %13 = vector.multi_reduction <add>, %12, %cst_7 [0] : vector<128x128xf32> to vector<128xf32>
    %14 = vector.shape_cast %13 : vector<128xf32> to vector<1x128xf32>
    %cst_8 = arith.constant 1.280000e+02 : f32
    %15 = vector.broadcast %cst_8 : f32 to vector<1x128xf32>
    %16 = arith.divf %14, %15 : vector<1x128xf32>
    %17 = vector.broadcast %9 : vector<1x128xf32> to vector<128x128xf32>
    %18 = arith.subf %5, %17 : vector<128x128xf32>
    %cst_9 = arith.constant 9.99999974E-6 : f32
    %19 = vector.broadcast %cst_9 : f32 to vector<1x128xf32>
    %20 = arith.addf %16, %19 : vector<1x128xf32>
    %21 = math.rsqrt %20 : vector<1x128xf32>
    %22 = vector.broadcast %21 : vector<1x128xf32> to vector<128x128xf32>
    %23 = arith.mulf %18, %22 : vector<128x128xf32>
    %c0_10 = arith.constant 0 : index
    %c0_11 = arith.constant 0 : index
    %24 = vector.load %arg3[%c0_10, %c0_11] : memref<1x128xf32, #tpu.memory_space<vmem>>, vector<1x128xf32>
    %25 = vector.broadcast %24 : vector<1x128xf32> to vector<128x128xf32>
    %26 = arith.mulf %23, %25 : vector<128x128xf32>
    %c0_12 = arith.constant 0 : index
    %c0_13 = arith.constant 0 : index
    %27 = vector.load %arg4[%c0_12, %c0_13] : memref<1x128xf32, #tpu.memory_space<vmem>>, vector<1x128xf32>
    %28 = vector.broadcast %27 : vector<1x128xf32> to vector<128x128xf32>
    %29 = arith.addf %26, %28 : vector<128x128xf32>
    %cst_14 = arith.constant 2.000000e-01 : f32
    %30 = vector.broadcast %cst_14 : f32 to vector<128x128xf32>
    %31 = arith.mulf %30, %29 : vector<128x128xf32>
    %32 = arith.maximumf %29, %31 : vector<128x128xf32>
    %33 = arith.truncf %32 : vector<128x128xf32> to vector<128x128xbf16>
    %c0_15 = arith.constant 0 : index
    %c0_16 = arith.constant 0 : index
    %34 = vector.load %arg5[%c0_15, %c0_16] : memref<128x128xbf16, #tpu.memory_space<vmem>>, vector<128x128xbf16>
    tpu.vector_store %arg5[%c0_15, %c0_16], %33 {strides = array<i32>} : memref<128x128xbf16, #tpu.memory_space<vmem>>, vector<128x128xbf16>,
    return
  }
}

module attributes {stable_mosaic.version = 11 : i64} {
  func.func @fused_conv_layer_kernel(%arg0: memref<32x2048xbf16, #tpu.memory_space<vmem>>, %arg1: memref<2048x256xbf16, #tpu.memory_space<vmem>>, %arg2: memref<1x256xf32, #tpu.memory_space<vmem>>, %arg3: memref<1x256xf32, #tpu.memory_space<vmem>>, %arg4: memref<1x256xf32, #tpu.memory_space<vmem>>, %arg5: memref<32x256xbf16, #tpu.memory_space<vmem>>) attributes {dimension_semantics = [], scalar_prefetch = 0 : i64, scratch_operands = 0 : i64, tpu.core_type = #tpu.core_type<tc>} {
    %c0 = arith.constant 0 : index
    %c0_0 = arith.constant 0 : index
    %0 = vector.load %arg0[%c0, %c0_0] : memref<32x2048xbf16, #tpu.memory_space<vmem>>, vector<32x2048xbf16>
    %c0_1 = arith.constant 0 : index
    %c0_2 = arith.constant 0 : index
    %1 = vector.load %arg1[%c0_1, %c0_2] : memref<2048x256xbf16, #tpu.memory_space<vmem>>, vector<2048x256xbf16>
    %cst = arith.constant dense<0.000000e+00> : vector<32x256xf32>
    %2 = tpu.matmul %0, %1, %cst {dimension_numbers = #tpu.dot_dimension_numbers<[1], [0], [0], [1], [0, 0, 1, 1], [], []>} : vector<32x2048xbf16>, vector<2048x256xbf16>, vector<32x256xf32> -> vector<32x256xf32>
    %c0_3 = arith.constant 0 : index
    %c0_4 = arith.constant 0 : index
    %3 = vector.load %arg2[%c0_3, %c0_4] : memref<1x256xf32, #tpu.memory_space<vmem>>, vector<1x256xf32>
    %4 = vector.broadcast %3 : vector<1x256xf32> to vector<32x256xf32>
    %5 = arith.addf %2, %4 : vector<32x256xf32>
    %cst_5 = arith.constant dense<0.000000e+00> : vector<256xf32>
    %6 = vector.multi_reduction <add>, %5, %cst_5 [0] : vector<32x256xf32> to vector<256xf32>
    %7 = vector.shape_cast %6 : vector<256xf32> to vector<1x256xf32>
    %cst_6 = arith.constant 3.200000e+01 : f32
    %8 = vector.broadcast %cst_6 : f32 to vector<1x256xf32>
    %9 = arith.divf %7, %8 : vector<1x256xf32>
    %10 = vector.broadcast %9 : vector<1x256xf32> to vector<32x256xf32>
    %11 = arith.subf %5, %10 : vector<32x256xf32>
    %12 = arith.mulf %11, %11 : vector<32x256xf32>
    %cst_7 = arith.constant dense<0.000000e+00> : vector<256xf32>
    %13 = vector.multi_reduction <add>, %12, %cst_7 [0] : vector<32x256xf32> to vector<256xf32>
    %14 = vector.shape_cast %13 : vector<256xf32> to vector<1x256xf32>
    %cst_8 = arith.constant 3.200000e+01 : f32
    %15 = vector.broadcast %cst_8 : f32 to vector<1x256xf32>
    %16 = arith.divf %14, %15 : vector<1x256xf32>
    %17 = vector.broadcast %9 : vector<1x256xf32> to vector<32x256xf32>
    %18 = arith.subf %5, %17 : vector<32x256xf32>
    %cst_9 = arith.constant 9.99999974E-6 : f32
    %19 = vector.broadcast %cst_9 : f32 to vector<1x256xf32>
    %20 = arith.addf %16, %19 : vector<1x256xf32>
    %21 = math.rsqrt %20 : vector<1x256xf32>
    %22 = vector.broadcast %21 : vector<1x256xf32> to vector<32x256xf32>
    %23 = arith.mulf %18, %22 : vector<32x256xf32>
    %c0_10 = arith.constant 0 : index
    %c0_11 = arith.constant 0 : index
    %24 = vector.load %arg3[%c0_10, %c0_11] : memref<1x256xf32, #tpu.memory_space<vmem>>, vector<1x256xf32>
    %25 = vector.broadcast %24 : vector<1x256xf32> to vector<32x256xf32>
    %26 = arith.mulf %23, %25 : vector<32x256xf32>
    %c0_12 = arith.constant 0 : index
    %c0_13 = arith.constant 0 : index
    %27 = vector.load %arg4[%c0_12, %c0_13] : memref<1x256xf32, #tpu.memory_space<vmem>>, vector<1x256xf32>
    %28 = vector.broadcast %27 : vector<1x256xf32> to vector<32x256xf32>
    %29 = arith.addf %26, %28 : vector<32x256xf32>
    %cst_14 = arith.constant 2.000000e-01 : f32
    %30 = vector.broadcast %cst_14 : f32 to vector<32x256xf32>
    %31 = arith.mulf %30, %29 : vector<32x256xf32>
    %32 = arith.maximumf %29, %31 : vector<32x256xf32>
    %33 = arith.truncf %32 : vector<32x256xf32> to vector<32x256xbf16>
    %c0_15 = arith.constant 0 : index
    %c0_16 = arith.constant 0 : index
    %34 = vector.load %arg5[%c0_15, %c0_16] : memref<32x256xbf16, #tpu.memory_space<vmem>>, vector<32x256xbf16>
    tpu.vector_store %arg5[%c0_15, %c0_16], %33 {strides = array<i32>} : memref<32x256xbf16, #tpu.memory_space<vmem>>, vector<32x256xbf16>,
    return
  }
}

module attributes {stable_mosaic.version = 11 : i64} {
  func.func @fused_conv_layer_kernel(%arg0: memref<32x4096xbf16, #tpu.memory_space<vmem>>, %arg1: memref<4096x512xbf16, #tpu.memory_space<vmem>>, %arg2: memref<1x512xf32, #tpu.memory_space<vmem>>, %arg3: memref<1x512xf32, #tpu.memory_space<vmem>>, %arg4: memref<1x512xf32, #tpu.memory_space<vmem>>, %arg5: memref<32x512xbf16, #tpu.memory_space<vmem>>) attributes {dimension_semantics = [], scalar_prefetch = 0 : i64, scratch_operands = 0 : i64, tpu.core_type = #tpu.core_type<tc>} {
    %c0 = arith.constant 0 : index
    %c0_0 = arith.constant 0 : index
    %0 = vector.load %arg0[%c0, %c0_0] : memref<32x4096xbf16, #tpu.memory_space<vmem>>, vector<32x4096xbf16>
    %c0_1 = arith.constant 0 : index
    %c0_2 = arith.constant 0 : index
    %1 = vector.load %arg1[%c0_1, %c0_2] : memref<4096x512xbf16, #tpu.memory_space<vmem>>, vector<4096x512xbf16>
    %cst = arith.constant dense<0.000000e+00> : vector<32x512xf32>
    %2 = tpu.matmul %0, %1, %cst {dimension_numbers = #tpu.dot_dimension_numbers<[1], [0], [0], [1], [0, 0, 1, 1], [], []>} : vector<32x4096xbf16>, vector<4096x512xbf16>, vector<32x512xf32> -> vector<32x512xf32>
    %c0_3 = arith.constant 0 : index
    %c0_4 = arith.constant 0 : index
    %3 = vector.load %arg2[%c0_3, %c0_4] : memref<1x512xf32, #tpu.memory_space<vmem>>, vector<1x512xf32>
    %4 = vector.broadcast %3 : vector<1x512xf32> to vector<32x512xf32>
    %5 = arith.addf %2, %4 : vector<32x512xf32>
    %6 = tpu.iota {dimensions = array<i32: 0>} : vector<32x512xi32>
    %c18_i32 = arith.constant 18 : i32
    %7 = vector.broadcast %c18_i32 : i32 to vector<32x512xi32>
    %8 = arith.cmpi slt, %6, %7 : vector<32x512xi32>
    %9 = arith.extui %8 : vector<32x512xi1> to vector<32x512xi32>
    %10 = arith.sitofp %9 : vector<32x512xi32> to vector<32x512xf32>
    %11 = arith.mulf %5, %10 : vector<32x512xf32>
    %cst_5 = arith.constant dense<0.000000e+00> : vector<512xf32>
    %12 = vector.multi_reduction <add>, %11, %cst_5 [0] : vector<32x512xf32> to vector<512xf32>
    %13 = vector.shape_cast %12 : vector<512xf32> to vector<1x512xf32>
    %cst_6 = arith.constant 0.055555556 : f32
    %14 = vector.broadcast %cst_6 : f32 to vector<1x512xf32>
    %15 = arith.mulf %13, %14 : vector<1x512xf32>
    %16 = vector.broadcast %15 : vector<1x512xf32> to vector<32x512xf32>
    %17 = arith.subf %5, %16 : vector<32x512xf32>
    %18 = arith.mulf %17, %10 : vector<32x512xf32>
    %19 = arith.mulf %18, %18 : vector<32x512xf32>
    %cst_7 = arith.constant dense<0.000000e+00> : vector<512xf32>
    %20 = vector.multi_reduction <add>, %19, %cst_7 [0] : vector<32x512xf32> to vector<512xf32>
    %21 = vector.shape_cast %20 : vector<512xf32> to vector<1x512xf32>
    %cst_8 = arith.constant 0.055555556 : f32
    %22 = vector.broadcast %cst_8 : f32 to vector<1x512xf32>
    %23 = arith.mulf %21, %22 : vector<1x512xf32>
    %24 = vector.broadcast %15 : vector<1x512xf32> to vector<32x512xf32>
    %25 = arith.subf %5, %24 : vector<32x512xf32>
    %cst_9 = arith.constant 9.99999974E-6 : f32
    %26 = vector.broadcast %cst_9 : f32 to vector<1x512xf32>
    %27 = arith.addf %23, %26 : vector<1x512xf32>
    %28 = math.rsqrt %27 : vector<1x512xf32>
    %29 = vector.broadcast %28 : vector<1x512xf32> to vector<32x512xf32>
    %30 = arith.mulf %25, %29 : vector<32x512xf32>
    %c0_10 = arith.constant 0 : index
    %c0_11 = arith.constant 0 : index
    %31 = vector.load %arg3[%c0_10, %c0_11] : memref<1x512xf32, #tpu.memory_space<vmem>>, vector<1x512xf32>
    %32 = vector.broadcast %31 : vector<1x512xf32> to vector<32x512xf32>
    %33 = arith.mulf %30, %32 : vector<32x512xf32>
    %c0_12 = arith.constant 0 : index
    %c0_13 = arith.constant 0 : index
    %34 = vector.load %arg4[%c0_12, %c0_13] : memref<1x512xf32, #tpu.memory_space<vmem>>, vector<1x512xf32>
    %35 = vector.broadcast %34 : vector<1x512xf32> to vector<32x512xf32>
    %36 = arith.addf %33, %35 : vector<32x512xf32>
    %cst_14 = arith.constant 2.000000e-01 : f32
    %37 = vector.broadcast %cst_14 : f32 to vector<32x512xf32>
    %38 = arith.mulf %37, %36 : vector<32x512xf32>
    %39 = arith.maximumf %36, %38 : vector<32x512xf32>
    %40 = arith.truncf %39 : vector<32x512xf32> to vector<32x512xbf16>
    %c0_15 = arith.constant 0 : index
    %c0_16 = arith.constant 0 : index
    %41 = vector.load %arg5[%c0_15, %c0_16] : memref<32x512xbf16, #tpu.memory_space<vmem>>, vector<32x512xbf16>
    tpu.vector_store %arg5[%c0_15, %c0_16], %40 {strides = array<i32>} : memref<32x512xbf16, #tpu.memory_space<vmem>>, vector<32x512xbf16>,
    return
  }
}

module attributes {stable_mosaic.version = 11 : i64} {
  func.func @fused_conv_layer_kernel(%arg0: memref<16x8192xbf16, #tpu.memory_space<vmem>>, %arg1: memref<8192x128xbf16, #tpu.memory_space<vmem>>, %arg2: memref<1x128xf32, #tpu.memory_space<vmem>>, %arg3: memref<1x128xf32, #tpu.memory_space<vmem>>, %arg4: memref<1x128xf32, #tpu.memory_space<vmem>>, %arg5: memref<16x128xf32, #tpu.memory_space<vmem>>) attributes {dimension_semantics = [], scalar_prefetch = 0 : i64, scratch_operands = 0 : i64, tpu.core_type = #tpu.core_type<tc>} {
    %c0 = arith.constant 0 : index
    %c0_0 = arith.constant 0 : index
    %0 = vector.load %arg0[%c0, %c0_0] : memref<16x8192xbf16, #tpu.memory_space<vmem>>, vector<16x8192xbf16>
    %c0_1 = arith.constant 0 : index
    %c0_2 = arith.constant 0 : index
    %1 = vector.load %arg1[%c0_1, %c0_2] : memref<8192x128xbf16, #tpu.memory_space<vmem>>, vector<8192x128xbf16>
    %cst = arith.constant dense<0.000000e+00> : vector<16x128xf32>
    %2 = tpu.matmul %0, %1, %cst {dimension_numbers = #tpu.dot_dimension_numbers<[1], [0], [0], [1], [0, 0, 1, 1], [], []>} : vector<16x8192xbf16>, vector<8192x128xbf16>, vector<16x128xf32> -> vector<16x128xf32>
    %c0_3 = arith.constant 0 : index
    %c0_4 = arith.constant 0 : index
    %3 = vector.load %arg2[%c0_3, %c0_4] : memref<1x128xf32, #tpu.memory_space<vmem>>, vector<1x128xf32>
    %4 = vector.broadcast %3 : vector<1x128xf32> to vector<16x128xf32>
    %5 = arith.addf %2, %4 : vector<16x128xf32>
    %c0_5 = arith.constant 0 : index
    %c0_6 = arith.constant 0 : index
    %6 = vector.load %arg5[%c0_5, %c0_6] : memref<16x128xf32, #tpu.memory_space<vmem>>, vector<16x128xf32>
    tpu.vector_store %arg5[%c0_5, %c0_6], %5 {strides = array<i32>} : memref<16x128xf32, #tpu.memory_space<vmem>>, vector<16x128xf32>,
    return
  }
}

</mosaic_0001>

<bundles_post_ra>
// kernel: _lambda_.5
= control target key start
LH: loop header
LB: loop body
LE: loop exit
PB: predicated region body
PF: predicated region fallthrough
CT: control target
= control target key end

     0   :  { %vm284_vm0 = vcmask 523264   ;;  %s1997_s1 = inlined_call_operand.vmem [shape: bf16[64,128], index: 1, kind: input, shape index: {}]   ;;  %s1998_s3 = inlined_call_operand.vmem [shape: f32[1,128], index: 3, kind: input, shape index: {}]   ;;  %s1999_s4 = inlined_call_operand.vmem [shape: f32[1,128], index: 4, kind: input, shape index: {}]   ;;  %s2000_s0 = inlined_call_operand.vmem [shape: bf16[512,64], index: 0, kind: input, shape index: {}]   ;;  %s2001_s2 = inlined_call_operand.vmem [shape: f32[1,128], index: 2, kind: input, shape index: {}]   ;;  %s2002_s5 = inlined_call_operand.vmem [shape: bf16[512,128], index: 5, kind: output, shape index: {}]  }
   0x1   :  { %v1626_v0 = vld [vmem:[%s1997_s1] sm:$0xff]   ;;  %v1627_v1 = vld [vmem:[%s1997_s1 + $0x8] sm:$0xff]   ;;  %v1628_v2 = vld [vmem:[%s1997_s1 + $0x10] sm:$0xff]  }
   0x2   :  { %1546 = vmatprep.subr.bf16.mxu0 %v1626_v0  ;;  %1618 = vmatprep.subr.bf16.mxu1 %v1626_v0  ;;  %v1630_v3 = vld [vmem:[%s2000_s0] sm:$0xff]   ;;  %v1629_v5 = vld [vmem:[%s1997_s1 + $0x18] sm:$0xff]   ;;  %v1632_v6 = vld [vmem:[%s2000_s0 + $0x8] sm:$0xff]  }
   0x3   :  { %1547 = vmatpush3.bf16.msra.mxu0 %v1626_v0  ;;  %1622 = vmatpush3.bf16.msra.mxu1 %v1626_v0  ;;  %v1631_v4 = vld [vmem:[%s2000_s0 + $0x80] sm:$0xff]   ;;  %v1633_v7 = vld [vmem:[%s2000_s0 + $0x88] sm:$0xff]   ;;  %v1634_v8 = vld [vmem:[%s2000_s0 + $0x10] sm:$0xff]  }
   0x4   :  { %1548 = vmatprep.subr.bf16.mxu0 %v1627_v1  ;;  %1619 = vmatprep.subr.bf16.mxu1 %v1627_v1  ;;  %v1635_v9 = vld [vmem:[%s2000_s0 + $0x90] sm:$0xff]   ;;  %v1636_v10 = vld [vmem:[%s2000_s0 + $0x18] sm:$0xff]   ;;  %v1638_v12 = vld [vmem:[%s2000_s0 + $0x20] sm:$0xff]  }
   0x5   :  { %1554 = vmatprep.mubr.msk.bf16.mxu0 %vm284_vm0, %v1630_v3  ;;  %1586 = vmatprep.mubr.msk.bf16.mxu1 %vm284_vm0, %v1631_v4  ;;  %v1637_v11 = vld [vmem:[%s2000_s0 + $0x98] sm:$0xff]   ;;  %v1639_v13 = vld [vmem:[%s2000_s0 + $0xa0] sm:$0xff]   ;;  %v1640_v14 = vld [vmem:[%s2000_s0 + $0x28] sm:$0xff]  }
   0x6   :  { %v1641_v15 = vld [vmem:[%s2000_s0 + $0xa8] sm:$0xff]   ;;  %v1642_v16 = vld [vmem:[%s2000_s0 + $0x30] sm:$0xff]   ;;  %v1644_v18 = vld [vmem:[%s2000_s0 + $0x38] sm:$0xff]  }
   0x7   :  { %1549 = vmatpush3.bf16.msra.mxu0 %v1627_v1  ;;  %1623 = vmatpush3.bf16.msra.mxu1 %v1627_v1  ;;  %v1643_v17 = vld [vmem:[%s2000_s0 + $0xb0] sm:$0xff]   ;;  %v1645_v19 = vld [vmem:[%s2000_s0 + $0xb8] sm:$0xff]   ;;  %v1646_v20 = vld [vmem:[%s2000_s0 + $0x40] sm:$0xff]  }
   0x8   :  { %1550 = vmatprep.subr.bf16.mxu0 %v1628_v2  ;;  %1620 = vmatprep.subr.bf16.mxu1 %v1628_v2  ;;  %v1647_v21 = vld [vmem:[%s2000_s0 + $0xc0] sm:$0xff]   ;;  %v1648_v22 = vld [vmem:[%s2000_s0 + $0x48] sm:$0xff]   ;;  %v1650_v24 = vld [vmem:[%s2000_s0 + $0x50] sm:$0xff]  }
   0x9   :  { %v1649_v23 = vld [vmem:[%s2000_s0 + $0xc8] sm:$0xff]   ;;  %v1651_v25 = vld [vmem:[%s2000_s0 + $0xd0] sm:$0xff]   ;;  %v1652_v26 = vld [vmem:[%s2000_s0 + $0x58] sm:$0xff]  }
   0xa   :  { %v1653_v27 = vld [vmem:[%s2000_s0 + $0xd8] sm:$0xff]   ;;  %v1654_v28 = vld [vmem:[%s2000_s0 + $0x60] sm:$0xff]   ;;  %v1656_v30 = vld [vmem:[%s2000_s0 + $0x68] sm:$0xff]  }
   0xb   :  { %1551 = vmatpush3.bf16.msra.mxu0 %v1628_v2  ;;  %1624 = vmatpush3.bf16.msra.mxu1 %v1628_v2  ;;  %v1655_v29 = vld [vmem:[%s2000_s0 + $0xe0] sm:$0xff]   ;;  %v1657_v31 = vld [vmem:[%s2000_s0 + $0xe8] sm:$0xff]   ;;  %v1658_v32 = vld [vmem:[%s2000_s0 + $0x70] sm:$0xff]  }
   0xc   :  { %1552 = vmatprep.subr.bf16.mxu0 %v1629_v5  ;;  %1621 = vmatprep.subr.bf16.mxu1 %v1629_v5  ;;  %v1659_v33 = vld [vmem:[%s2000_s0 + $0xf0] sm:$0xff]   ;;  %v1660_v34 = vld [vmem:[%s2000_s0 + $0x78] sm:$0xff]   ;;  %v1835_v36 = vld [vmem:[%s2001_s2] ss:$0 sm:$0xff] }
   0xd   :  { %v1661_v35 = vld [vmem:[%s2000_s0 + $0xf8] sm:$0xff]  }
   0xf   :  { %1553 = vmatpush3.bf16.msra.mxu0 %v1629_v5  ;;  %1625 = vmatpush3.bf16.msra.mxu1 %v1629_v5 }
  0x12   :  { %1555 = vmatmul.mubr.msk.bf16.vlgmr.msra.gmra.mrb[0].mxu0 %vm284_vm0, %v1632_v6  ;;  %1587 = vmatmul.mubr.msk.bf16.vlgmr.msra.gmra.mrb[0].mxu1 %vm284_vm0, %v1633_v7 }
  0x13   :  { %1558 = vmatprep.mubr.msk.bf16.mxu0 %vm284_vm0, %v1634_v8  ;;  %1590 = vmatprep.mubr.msk.bf16.mxu1 %vm284_vm0, %v1635_v9 }
  0x1a   :  { %1559 = vmatmul.mubr.msk.bf16.gmra.mrb[4].mxu0 %vm284_vm0, %v1636_v10  ;;  %1591 = vmatmul.mubr.msk.bf16.gmra.mrb[4].mxu1 %vm284_vm0, %v1637_v11 }
  0x1b   :  { %1562 = vmatprep.mubr.msk.bf16.mxu0 %vm284_vm0, %v1638_v12  ;;  %1594 = vmatprep.mubr.msk.bf16.mxu1 %vm284_vm0, %v1639_v13 }
  0x22   :  { %1563 = vmatmul.mubr.msk.bf16.gmra.mrb[8].mxu0 %vm284_vm0, %v1640_v14  ;;  %1595 = vmatmul.mubr.msk.bf16.gmra.mrb[8].mxu1 %vm284_vm0, %v1641_v15 }
  0x23   :  { %1566 = vmatprep.mubr.msk.bf16.mxu0 %vm284_vm0, %v1642_v16  ;;  %1598 = vmatprep.mubr.msk.bf16.mxu1 %vm284_vm0, %v1643_v17 }
  0x2a   :  { %1567 = vmatmul.mubr.msk.bf16.gmra.mrb[12].mxu0 %vm284_vm0, %v1644_v18  ;;  %1599 = vmatmul.mubr.msk.bf16.gmra.mrb[12].mxu1 %vm284_vm0, %v1645_v19 }
  0x2b   :  { %1570 = vmatprep.mubr.msk.bf16.mxu0 %vm284_vm0, %v1646_v20  ;;  %1602 = vmatprep.mubr.msk.bf16.mxu1 %vm284_vm0, %v1647_v21 }
  0x32   :  { %1571 = vmatmul.mubr.msk.bf16.gmra.mrb[16].mxu0 %vm284_vm0, %v1648_v22  ;;  %1603 = vmatmul.mubr.msk.bf16.gmra.mrb[16].mxu1 %vm284_vm0, %v1649_v23 }
  0x33   :  { %1574 = vmatprep.mubr.msk.bf16.mxu0 %vm284_vm0, %v1650_v24  ;;  %1606 = vmatprep.mubr.msk.bf16.mxu1 %vm284_vm0, %v1651_v25 }
  0x3a   :  { %1575 = vmatmul.mubr.msk.bf16.gmra.mrb[20].mxu0 %vm284_vm0, %v1652_v26  ;;  %1607 = vmatmul.mubr.msk.bf16.gmra.mrb[20].mxu1 %vm284_vm0, %v1653_v27 }
  0x3b   :  { %1578 = vmatprep.mubr.msk.bf16.mxu0 %vm284_vm0, %v1654_v28  ;;  %1610 = vmatprep.mubr.msk.bf16.mxu1 %vm284_vm0, %v1655_v29 }
  0x42   :  { %1579 = vmatmul.mubr.msk.bf16.gmra.mrb[24].mxu0 %vm284_vm0, %v1656_v30  ;;  %1611 = vmatmul.mubr.msk.bf16.gmra.mrb[24].mxu1 %vm284_vm0, %v1657_v31 }
  0x43   :  { %1582 = vmatprep.mubr.msk.bf16.mxu0 %vm284_vm0, %v1658_v32  ;;  %1614 = vmatprep.mubr.msk.bf16.mxu1 %vm284_vm0, %v1659_v33 }
  0x4a   :  { %1583 = vmatmul.mubr.msk.bf16.gmra.mrb[28].mxu0 %vm284_vm0, %v1660_v34  ;;  %1615 = vmatmul.mubr.msk.bf16.gmra.mrb[28].mxu1 %vm284_vm0, %v1661_v35 }
  0xe5   :  { %v1556_v37 = vpop.f32.mrb[0].mxu0  ;;  %v1588_v38 = vpop.f32.mrb[0].mxu1 }
  0xe6   :  { %v424_v39 = vadd.f32 %v1556_v37, %v1835_v36  ;;  %v552_v40 = vadd.f32 %v1588_v38, %v1835_v36  ;;  %v415_v41 = vpop.f32.mrb[1].mxu0  ;;  %v543_v42 = vpop.f32.mrb[1].mxu1 }
  0xe7   :  { %v416_v43 = vadd.f32 %v1835_v36, %v415_v41  ;;  %v544_v44 = vadd.f32 %v1835_v36, %v543_v42  ;;  %v1557_v45 = vpop.f32.mrb[2].mxu0  ;;  %v1589_v46 = vpop.f32.mrb[2].mxu1 }
  0xe8   :  { %v672_v47 = vmul.f32 0.2, %v424_v39  ;;  %v704_v48 = vmul.f32 0.2, %v552_v40  ;;  %v427_v49 = vadd.f32 %v1557_v45, %v1835_v36  ;;  %v555_v50 = vadd.f32 %v1589_v46, %v1835_v36  ;;  %v418_v51 = vpop.f32.mrb[3].mxu0  ;;  %v546_v52 = vpop.f32.mrb[3].mxu1 }
  0xe9   :  { %v670_v53 = vmul.f32 0.2, %v416_v43  ;;  %v702_v54 = vmul.f32 0.2, %v544_v44  ;;  %v419_v55 = vadd.f32 %v1835_v36, %v418_v51  ;;  %v547_v56 = vadd.f32 %v1835_v36, %v546_v52 }
  0xea   :  { %v673_v57 = vmul.f32 0.2, %v427_v49  ;;  %v705_v58 = vmul.f32 0.2, %v555_v50  ;;  %v736_v61 = vmax.f32 %v424_v39, %v672_v47  ;;  %v768_v62 = vmax.f32 %v552_v40, %v704_v48 }
  0xeb   :  { %v671_v59 = vmul.f32 0.2, %v419_v55  ;;  %v703_v60 = vmul.f32 0.2, %v547_v56  ;;  %v734_v1 = vmax.f32 %v416_v43, %v670_v53  ;;  %v766_v2 = vmax.f32 %v544_v44, %v702_v54 }
  0xec   :  { %v737_v63 = vmax.f32 %v427_v49, %v673_v57  ;;  %v769_v0 = vmax.f32 %v555_v50, %v705_v58 }
  0xed   :  { %v735_v3 = vmax.f32 %v419_v55, %v671_v59  ;;  %v767_v4 = vmax.f32 %v547_v56, %v703_v60  ;;  %v1560_v5 = vpop.f32.mrb[4].mxu0  ;;  %v1592_v6 = vpop.f32.mrb[4].mxu1 }
  0xee   :  { %v1327_v7 = vpack.c.bf16 %v737_v63, %v736_v61  ;;  %v1407_v8 = vpack.c.bf16 %v769_v0, %v768_v62  ;;  %v440_v9 = vadd.f32 %v1560_v5, %v1835_v36  ;;  %v568_v10 = vadd.f32 %v1592_v6, %v1835_v36  ;;  %v431_v11 = vpop.f32.mrb[5].mxu0  ;;  %v559_v12 = vpop.f32.mrb[5].mxu1 }
  0xef   :  { %v1322_v13 = vpack.c.bf16 %v735_v3, %v734_v1  ;;  %v1402_v14 = vpack.c.bf16 %v767_v4, %v766_v2  ;;  %v432_v15 = vadd.f32 %v1835_v36, %v431_v11  ;;  %v560_v16 = vadd.f32 %v1835_v36, %v559_v12  ;;  %v1561_v17 = vpop.f32.mrb[6].mxu0  ;;  %v1593_v18 = vpop.f32.mrb[6].mxu1 }
  0xf0   :  { %1479 = vst [vmem:[%s2002_s5 + $0x8] sm:$0xff] %v1327_v7   ;;  %1495 = vst [vmem:[%s2002_s5 + $0x88] sm:$0xff] %v1407_v8   ;;  %v676_v19 = vmul.f32 0.2, %v440_v9  ;;  %v708_v20 = vmul.f32 0.2, %v568_v10  ;;  %v443_v21 = vadd.f32 %v1561_v17, %v1835_v36  ;;  %v571_v22 = vadd.f32 %v1593_v18, %v1835_v36 }
  0xf1   :  { %v434_v23 = vpop.f32.mrb[7].mxu0  ;;  %v562_v24 = vpop.f32.mrb[7].mxu1  ;;  %1323 = vst [vmem:[%s2002_s5] sm:$0xff] %v1322_v13   ;;  %1494 = vst [vmem:[%s2002_s5 + $0x80] sm:$0xff] %v1402_v14   ;;  %v674_v25 = vmul.f32 0.2, %v432_v15 }
  0xf2   :  { %v706_v26 = vmul.f32 0.2, %v560_v16  ;;  %v435_v27 = vadd.f32 %v1835_v36, %v434_v23  ;;  %v563_v28 = vadd.f32 %v1835_v36, %v562_v24  ;;  %v677_v29 = vmul.f32 0.2, %v443_v21 }
  0xf3   :  { %v709_v30 = vmul.f32 0.2, %v571_v22  ;;  %v740_v33 = vmax.f32 %v440_v9, %v676_v19  ;;  %v772_v34 = vmax.f32 %v568_v10, %v708_v20  ;;  %v738_v38 = vmax.f32 %v432_v15, %v674_v25 }
  0xf4   :  { %v675_v31 = vmul.f32 0.2, %v435_v27  ;;  %v707_v32 = vmul.f32 0.2, %v563_v28  ;;  %v741_v35 = vmax.f32 %v443_v21, %v677_v29  ;;  %v770_v39 = vmax.f32 %v560_v16, %v706_v26 }
  0xf5   :  { %v773_v37 = vmax.f32 %v571_v22, %v709_v30  ;;  %v1564_v42 = vpop.f32.mrb[8].mxu0  ;;  %v1596_v43 = vpop.f32.mrb[8].mxu1 }
  0xf6   :  { %v739_v40 = vmax.f32 %v435_v27, %v675_v31  ;;  %v771_v41 = vmax.f32 %v563_v28, %v707_v32  ;;  %v1337_v44 = vpack.c.bf16 %v741_v35, %v740_v33  ;;  %v456_v46 = vadd.f32 %v1564_v42, %v1835_v36  ;;  %v447_v48 = vpop.f32.mrb[9].mxu0  ;;  %v575_v49 = vpop.f32.mrb[9].mxu1 }
  0xf7   :  { %v1417_v45 = vpack.c.bf16 %v773_v37, %v772_v34  ;;  %v584_v47 = vadd.f32 %v1596_v43, %v1835_v36  ;;  %v448_v52 = vadd.f32 %v1835_v36, %v447_v48  ;;  %v576_v53 = vadd.f32 %v1835_v36, %v575_v49  ;;  %v1565_v54 = vpop.f32.mrb[10].mxu0  ;;  %v1597_v55 = vpop.f32.mrb[10].mxu1 }
  0xf8   :  { %v1332_v50 = vpack.c.bf16 %v739_v40, %v738_v38  ;;  %v1412_v51 = vpack.c.bf16 %v771_v41, %v770_v39  ;;  %1481 = vst [vmem:[%s2002_s5 + $0x18] sm:$0xff] %v1337_v44   ;;  %v680_v56 = vmul.f32 0.2, %v456_v46  ;;  %v459_v58 = vadd.f32 %v1565_v54, %v1835_v36  ;;  %v450_v60 = vpop.f32.mrb[11].mxu0  ;;  %v578_v61 = vpop.f32.mrb[11].mxu1 }
  0xf9   :  { %1497 = vst [vmem:[%s2002_s5 + $0x98] sm:$0xff] %v1417_v45   ;;  %v712_v57 = vmul.f32 0.2, %v584_v47  ;;  %v587_v59 = vadd.f32 %v1597_v55, %v1835_v36  ;;  %v678_v62 = vmul.f32 0.2, %v448_v52  ;;  %v451_v0 = vadd.f32 %v1835_v36, %v450_v60 }
  0xfa   :  { %1480 = vst [vmem:[%s2002_s5 + $0x10] sm:$0xff] %v1332_v50   ;;  %1496 = vst [vmem:[%s2002_s5 + $0x90] sm:$0xff] %v1412_v51   ;;  %v710_v63 = vmul.f32 0.2, %v576_v53  ;;  %v579_v1 = vadd.f32 %v1835_v36, %v578_v61  ;;  %v681_v2 = vmul.f32 0.2, %v459_v58  ;;  %v744_v6 = vmax.f32 %v456_v46, %v680_v56 }
  0xfb   :  { %v713_v3 = vmul.f32 0.2, %v587_v59  ;;  %v679_v4 = vmul.f32 0.2, %v451_v0  ;;  %v776_v7 = vmax.f32 %v584_v47, %v712_v57  ;;  %v742_v10 = vmax.f32 %v448_v52, %v678_v62 }
  0xfc   :  { %v711_v5 = vmul.f32 0.2, %v579_v1  ;;  %v745_v8 = vmax.f32 %v459_v58, %v681_v2  ;;  %v774_v11 = vmax.f32 %v576_v53, %v710_v63 }
  0xfd   :  { %v777_v9 = vmax.f32 %v587_v59, %v713_v3  ;;  %v743_v12 = vmax.f32 %v451_v0, %v679_v4  ;;  %v1568_v14 = vpop.f32.mrb[12].mxu0  ;;  %v1600_v15 = vpop.f32.mrb[12].mxu1 }
  0xfe   :  { %v775_v13 = vmax.f32 %v579_v1, %v711_v5  ;;  %v1347_v16 = vpack.c.bf16 %v745_v8, %v744_v6  ;;  %v472_v18 = vadd.f32 %v1568_v14, %v1835_v36  ;;  %v600_v19 = vadd.f32 %v1600_v15, %v1835_v36  ;;  %v463_v20 = vpop.f32.mrb[13].mxu0  ;;  %v591_v21 = vpop.f32.mrb[13].mxu1 }
  0xff   :  { %v1427_v17 = vpack.c.bf16 %v777_v9, %v776_v7  ;;  %v1342_v22 = vpack.c.bf16 %v743_v12, %v742_v10  ;;  %v464_v24 = vadd.f32 %v1835_v36, %v463_v20  ;;  %v592_v25 = vadd.f32 %v1835_v36, %v591_v21  ;;  %v1569_v26 = vpop.f32.mrb[14].mxu0  ;;  %v1601_v27 = vpop.f32.mrb[14].mxu1 }
 0x100   :  { %v1422_v23 = vpack.c.bf16 %v775_v13, %v774_v11  ;;  %1483 = vst [vmem:[%s2002_s5 + $0x28] sm:$0xff] %v1347_v16   ;;  %v684_v28 = vmul.f32 0.2, %v472_v18  ;;  %v716_v29 = vmul.f32 0.2, %v600_v19  ;;  %v475_v30 = vadd.f32 %v1569_v26, %v1835_v36  ;;  %v466_v32 = vpop.f32.mrb[15].mxu0 }
 0x101   :  { %1499 = vst [vmem:[%s2002_s5 + $0xa8] sm:$0xff] %v1427_v17   ;;  %v603_v31 = vadd.f32 %v1601_v27, %v1835_v36  ;;  %v594_v33 = vpop.f32.mrb[15].mxu1  ;;  %1482 = vst [vmem:[%s2002_s5 + $0x20] sm:$0xff] %v1342_v22   ;;  %v682_v34 = vmul.f32 0.2, %v464_v24  ;;  %v467_v37 = vadd.f32 %v1835_v36, %v466_v32 }
 0x102   :  { %1498 = vst [vmem:[%s2002_s5 + $0xa0] sm:$0xff] %v1422_v23   ;;  %v714_v35 = vmul.f32 0.2, %v592_v25  ;;  %v595_v38 = vadd.f32 %v1835_v36, %v594_v33  ;;  %v685_v39 = vmul.f32 0.2, %v475_v30  ;;  %v748_v43 = vmax.f32 %v472_v18, %v684_v28 }
 0x103   :  { %v717_v40 = vmul.f32 0.2, %v603_v31  ;;  %v683_v41 = vmul.f32 0.2, %v467_v37  ;;  %v780_v44 = vmax.f32 %v600_v19, %v716_v29  ;;  %v746_v47 = vmax.f32 %v464_v24, %v682_v34 }
 0x104   :  { %v715_v42 = vmul.f32 0.2, %v595_v38  ;;  %v749_v45 = vmax.f32 %v475_v30, %v685_v39  ;;  %v778_v48 = vmax.f32 %v592_v25, %v714_v35 }
 0x105   :  { %v781_v46 = vmax.f32 %v603_v31, %v717_v40  ;;  %v747_v49 = vmax.f32 %v467_v37, %v683_v41  ;;  %v1572_v51 = vpop.f32.mrb[16].mxu0  ;;  %v1604_v52 = vpop.f32.mrb[16].mxu1 }
 0x106   :  { %v779_v50 = vmax.f32 %v595_v38, %v715_v42  ;;  %v1357_v53 = vpack.c.bf16 %v749_v45, %v748_v43  ;;  %v488_v55 = vadd.f32 %v1572_v51, %v1835_v36  ;;  %v616_v56 = vadd.f32 %v1604_v52, %v1835_v36  ;;  %v479_v57 = vpop.f32.mrb[17].mxu0  ;;  %v607_v58 = vpop.f32.mrb[17].mxu1 }
 0x107   :  { %v1437_v54 = vpack.c.bf16 %v781_v46, %v780_v44  ;;  %v1352_v59 = vpack.c.bf16 %v747_v49, %v746_v47  ;;  %v480_v61 = vadd.f32 %v1835_v36, %v479_v57  ;;  %v608_v62 = vadd.f32 %v1835_v36, %v607_v58  ;;  %v1573_v63 = vpop.f32.mrb[18].mxu0  ;;  %v1605_v0 = vpop.f32.mrb[18].mxu1 }
 0x108   :  { %v1432_v60 = vpack.c.bf16 %v779_v50, %v778_v48  ;;  %1485 = vst [vmem:[%s2002_s5 + $0x38] sm:$0xff] %v1357_v53   ;;  %v688_v1 = vmul.f32 0.2, %v488_v55  ;;  %v720_v2 = vmul.f32 0.2, %v616_v56  ;;  %v491_v3 = vadd.f32 %v1573_v63, %v1835_v36  ;;  %v482_v5 = vpop.f32.mrb[19].mxu0 }
 0x109   :  { %1501 = vst [vmem:[%s2002_s5 + $0xb8] sm:$0xff] %v1437_v54   ;;  %v619_v4 = vadd.f32 %v1605_v0, %v1835_v36  ;;  %v610_v6 = vpop.f32.mrb[19].mxu1  ;;  %1484 = vst [vmem:[%s2002_s5 + $0x30] sm:$0xff] %v1352_v59   ;;  %v686_v7 = vmul.f32 0.2, %v480_v61  ;;  %v483_v9 = vadd.f32 %v1835_v36, %v482_v5 }
 0x10a   :  { %1500 = vst [vmem:[%s2002_s5 + $0xb0] sm:$0xff] %v1432_v60   ;;  %v718_v8 = vmul.f32 0.2, %v608_v62  ;;  %v611_v10 = vadd.f32 %v1835_v36, %v610_v6  ;;  %v689_v11 = vmul.f32 0.2, %v491_v3  ;;  %v752_v15 = vmax.f32 %v488_v55, %v688_v1 }
 0x10b   :  { %v721_v12 = vmul.f32 0.2, %v619_v4  ;;  %v687_v13 = vmul.f32 0.2, %v483_v9  ;;  %v784_v16 = vmax.f32 %v616_v56, %v720_v2  ;;  %v750_v19 = vmax.f32 %v480_v61, %v686_v7 }
 0x10c   :  { %v719_v14 = vmul.f32 0.2, %v611_v10  ;;  %v753_v17 = vmax.f32 %v491_v3, %v689_v11  ;;  %v782_v20 = vmax.f32 %v608_v62, %v718_v8 }
 0x10d   :  { %v785_v18 = vmax.f32 %v619_v4, %v721_v12  ;;  %v751_v21 = vmax.f32 %v483_v9, %v687_v13  ;;  %v1576_v23 = vpop.f32.mrb[20].mxu0  ;;  %v1608_v24 = vpop.f32.mrb[20].mxu1 }
 0x10e   :  { %v783_v22 = vmax.f32 %v611_v10, %v719_v14  ;;  %v1367_v25 = vpack.c.bf16 %v753_v17, %v752_v15  ;;  %v504_v27 = vadd.f32 %v1576_v23, %v1835_v36  ;;  %v632_v28 = vadd.f32 %v1608_v24, %v1835_v36  ;;  %v495_v29 = vpop.f32.mrb[21].mxu0  ;;  %v623_v30 = vpop.f32.mrb[21].mxu1 }
 0x10f   :  { %v1447_v26 = vpack.c.bf16 %v785_v18, %v784_v16  ;;  %v1362_v31 = vpack.c.bf16 %v751_v21, %v750_v19  ;;  %v496_v33 = vadd.f32 %v1835_v36, %v495_v29  ;;  %v624_v34 = vadd.f32 %v1835_v36, %v623_v30  ;;  %v1577_v35 = vpop.f32.mrb[22].mxu0  ;;  %v1609_v37 = vpop.f32.mrb[22].mxu1 }
 0x110   :  { %v1442_v32 = vpack.c.bf16 %v783_v22, %v782_v20  ;;  %1487 = vst [vmem:[%s2002_s5 + $0x48] sm:$0xff] %v1367_v25   ;;  %v692_v38 = vmul.f32 0.2, %v504_v27  ;;  %v724_v39 = vmul.f32 0.2, %v632_v28  ;;  %v507_v40 = vadd.f32 %v1577_v35, %v1835_v36  ;;  %v498_v42 = vpop.f32.mrb[23].mxu0 }
 0x111   :  { %1503 = vst [vmem:[%s2002_s5 + $0xc8] sm:$0xff] %v1447_v26   ;;  %v635_v41 = vadd.f32 %v1609_v37, %v1835_v36  ;;  %v626_v43 = vpop.f32.mrb[23].mxu1  ;;  %1486 = vst [vmem:[%s2002_s5 + $0x40] sm:$0xff] %v1362_v31   ;;  %v690_v44 = vmul.f32 0.2, %v496_v33  ;;  %v499_v46 = vadd.f32 %v1835_v36, %v498_v42 }
 0x112   :  { %1502 = vst [vmem:[%s2002_s5 + $0xc0] sm:$0xff] %v1442_v32   ;;  %v722_v45 = vmul.f32 0.2, %v624_v34  ;;  %v627_v47 = vadd.f32 %v1835_v36, %v626_v43  ;;  %v693_v48 = vmul.f32 0.2, %v507_v40  ;;  %v756_v52 = vmax.f32 %v504_v27, %v692_v38 }
 0x113   :  { %v725_v49 = vmul.f32 0.2, %v635_v41  ;;  %v691_v50 = vmul.f32 0.2, %v499_v46  ;;  %v788_v53 = vmax.f32 %v632_v28, %v724_v39  ;;  %v754_v56 = vmax.f32 %v496_v33, %v690_v44 }
 0x114   :  { %v723_v51 = vmul.f32 0.2, %v627_v47  ;;  %v757_v54 = vmax.f32 %v507_v40, %v693_v48  ;;  %v786_v57 = vmax.f32 %v624_v34, %v722_v45 }
 0x115   :  { %v789_v55 = vmax.f32 %v635_v41, %v725_v49  ;;  %v755_v58 = vmax.f32 %v499_v46, %v691_v50  ;;  %v1580_v60 = vpop.f32.mrb[24].mxu0  ;;  %v1612_v61 = vpop.f32.mrb[24].mxu1 }
 0x116   :  { %v787_v59 = vmax.f32 %v627_v47, %v723_v51  ;;  %v1377_v62 = vpack.c.bf16 %v757_v54, %v756_v52  ;;  %v520_v0 = vadd.f32 %v1580_v60, %v1835_v36  ;;  %v648_v1 = vadd.f32 %v1612_v61, %v1835_v36  ;;  %v511_v2 = vpop.f32.mrb[25].mxu0  ;;  %v639_v3 = vpop.f32.mrb[25].mxu1 }
 0x117   :  { %v1457_v63 = vpack.c.bf16 %v789_v55, %v788_v53  ;;  %v1372_v4 = vpack.c.bf16 %v755_v58, %v754_v56  ;;  %v512_v6 = vadd.f32 %v1835_v36, %v511_v2  ;;  %v640_v7 = vadd.f32 %v1835_v36, %v639_v3  ;;  %v1581_v8 = vpop.f32.mrb[26].mxu0  ;;  %v1613_v9 = vpop.f32.mrb[26].mxu1 }
 0x118   :  { %v1452_v5 = vpack.c.bf16 %v787_v59, %v786_v57  ;;  %1489 = vst [vmem:[%s2002_s5 + $0x58] sm:$0xff] %v1377_v62   ;;  %v696_v10 = vmul.f32 0.2, %v520_v0  ;;  %v728_v11 = vmul.f32 0.2, %v648_v1  ;;  %v523_v12 = vadd.f32 %v1581_v8, %v1835_v36  ;;  %v514_v14 = vpop.f32.mrb[27].mxu0 }
 0x119   :  { %1505 = vst [vmem:[%s2002_s5 + $0xd8] sm:$0xff] %v1457_v63   ;;  %v651_v13 = vadd.f32 %v1613_v9, %v1835_v36  ;;  %v642_v15 = vpop.f32.mrb[27].mxu1  ;;  %1488 = vst [vmem:[%s2002_s5 + $0x50] sm:$0xff] %v1372_v4   ;;  %v694_v16 = vmul.f32 0.2, %v512_v6  ;;  %v515_v18 = vadd.f32 %v1835_v36, %v514_v14 }
 0x11a   :  { %1504 = vst [vmem:[%s2002_s5 + $0xd0] sm:$0xff] %v1452_v5   ;;  %v726_v17 = vmul.f32 0.2, %v640_v7  ;;  %v643_v19 = vadd.f32 %v1835_v36, %v642_v15  ;;  %v697_v20 = vmul.f32 0.2, %v523_v12  ;;  %v760_v24 = vmax.f32 %v520_v0, %v696_v10 }
 0x11b   :  { %v729_v21 = vmul.f32 0.2, %v651_v13  ;;  %v695_v22 = vmul.f32 0.2, %v515_v18  ;;  %v792_v25 = vmax.f32 %v648_v1, %v728_v11  ;;  %v758_v28 = vmax.f32 %v512_v6, %v694_v16 }
 0x11c   :  { %v727_v23 = vmul.f32 0.2, %v643_v19  ;;  %v761_v26 = vmax.f32 %v523_v12, %v697_v20  ;;  %v790_v29 = vmax.f32 %v640_v7, %v726_v17 }
 0x11d   :  { %v793_v27 = vmax.f32 %v651_v13, %v729_v21  ;;  %v759_v30 = vmax.f32 %v515_v18, %v695_v22  ;;  %v1584_v32 = vpop.f32.mrb[28].mxu0  ;;  %v1616_v33 = vpop.f32.mrb[28].mxu1 }
 0x11e   :  { %v791_v31 = vmax.f32 %v643_v19, %v727_v23  ;;  %v1387_v34 = vpack.c.bf16 %v761_v26, %v760_v24  ;;  %v536_v37 = vadd.f32 %v1584_v32, %v1835_v36  ;;  %v664_v38 = vadd.f32 %v1616_v33, %v1835_v36  ;;  %v527_v39 = vpop.f32.mrb[29].mxu0  ;;  %v655_v40 = vpop.f32.mrb[29].mxu1 }
 0x11f   :  { %v1467_v35 = vpack.c.bf16 %v793_v27, %v792_v25  ;;  %v1382_v41 = vpack.c.bf16 %v759_v30, %v758_v28  ;;  %v528_v43 = vadd.f32 %v1835_v36, %v527_v39  ;;  %v656_v44 = vadd.f32 %v1835_v36, %v655_v40  ;;  %v1585_v45 = vpop.f32.mrb[30].mxu0  ;;  %v1617_v46 = vpop.f32.mrb[30].mxu1 }
 0x120   :  { %v1462_v42 = vpack.c.bf16 %v791_v31, %v790_v29  ;;  %1491 = vst [vmem:[%s2002_s5 + $0x68] sm:$0xff] %v1387_v34   ;;  %v700_v47 = vmul.f32 0.2, %v536_v37  ;;  %v732_v48 = vmul.f32 0.2, %v664_v38  ;;  %v539_v49 = vadd.f32 %v1585_v45, %v1835_v36  ;;  %v530_v51 = vpop.f32.mrb[31].mxu0 }
 0x121   :  { %1507 = vst [vmem:[%s2002_s5 + $0xe8] sm:$0xff] %v1467_v35   ;;  %v667_v50 = vadd.f32 %v1617_v46, %v1835_v36  ;;  %v658_v52 = vpop.f32.mrb[31].mxu1  ;;  %1490 = vst [vmem:[%s2002_s5 + $0x60] sm:$0xff] %v1382_v41   ;;  %v698_v53 = vmul.f32 0.2, %v528_v43  ;;  %v531_v55 = vadd.f32 %v1835_v36, %v530_v51 }
 0x122   :  { %1506 = vst [vmem:[%s2002_s5 + $0xe0] sm:$0xff] %v1462_v42   ;;  %v730_v54 = vmul.f32 0.2, %v656_v44  ;;  %v659_v56 = vadd.f32 %v1835_v36, %v658_v52  ;;  %v701_v57 = vmul.f32 0.2, %v539_v49  ;;  %v764_v61 = vmax.f32 %v536_v37, %v700_v47 }
 0x123   :  { %v733_v58 = vmul.f32 0.2, %v667_v50  ;;  %v699_v59 = vmul.f32 0.2, %v531_v55  ;;  %v796_v62 = vmax.f32 %v664_v38, %v732_v48  ;;  %v762_v1 = vmax.f32 %v528_v43, %v698_v53 }
 0x124   :  { %v731_v60 = vmul.f32 0.2, %v659_v56  ;;  %v765_v63 = vmax.f32 %v539_v49, %v701_v57  ;;  %v794_v2 = vmax.f32 %v656_v44, %v730_v54 }
 0x125   :  { %v797_v0 = vmax.f32 %v667_v50, %v733_v58  ;;  %v763_v3 = vmax.f32 %v531_v55, %v699_v59 }
 0x126   :  { %v795_v4 = vmax.f32 %v659_v56, %v731_v60  ;;  %v1397_v5 = vpack.c.bf16 %v765_v63, %v764_v61 }
 0x127   :  { %v1477_v6 = vpack.c.bf16 %v797_v0, %v796_v62  ;;  %v1392_v7 = vpack.c.bf16 %v763_v3, %v762_v1 }
 0x128   :  { %v1472_v8 = vpack.c.bf16 %v795_v4, %v794_v2  ;;  %1493 = vst [vmem:[%s2002_s5 + $0x78] sm:$0xff] %v1397_v5  }
 0x129   :  { %1509 = vst [vmem:[%s2002_s5 + $0xf8] sm:$0xff] %v1477_v6   ;;  %1492 = vst [vmem:[%s2002_s5 + $0x70] sm:$0xff] %v1392_v7  }
 0x12a   :  { %1508 = vst [vmem:[%s2002_s5 + $0xf0] sm:$0xff] %v1472_v8  }

// kernel: _lambda_.6
= control target key start
LH: loop header
LB: loop body
LE: loop exit
PB: predicated region body
PF: predicated region fallthrough
CT: control target
= control target key end

     0   :  { %s2654_s1 = inlined_call_operand.vmem [shape: bf16[1024,128], index: 1, kind: input, shape index: {}]   ;;  %s2655_s0 = inlined_call_operand.vmem [shape: bf16[128,1024], index: 0, kind: input, shape index: {}]   ;;  %s2656_s2 = inlined_call_operand.vmem [shape: f32[1,128], index: 2, kind: input, shape index: {}]   ;;  %s2657_s3 = inlined_call_operand.vmem [shape: f32[1,128], index: 3, kind: input, shape index: {}]   ;;  %s2658_s4 = inlined_call_operand.vmem [shape: f32[1,128], index: 4, kind: input, shape index: {}]   ;;  %s2659_s5 = inlined_call_operand.vmem [shape: bf16[128,128], index: 5, kind: output, shape index: {}]  }
   0x1   :  { %v2035_v0 = vld [vmem:[%s2654_s1 + $0x40] sm:$0xff]   ;;  %v2039_v4 = vld [vmem:[%s2654_s1 + $0x48] sm:$0xff]   ;;  %v2043_v8 = vld [vmem:[%s2654_s1 + $0x50] sm:$0xff]  }
   0x2   :  { %v2036_v1 = vld [vmem:[%s2654_s1 + $0xc0] sm:$0xff]   ;;  %1779 = vmatprep.subr.bf16.mxu0 %v2035_v0  ;;  %v2040_v5 = vld [vmem:[%s2654_s1 + $0xc8] sm:$0xff]   ;;  %v2044_v9 = vld [vmem:[%s2654_s1 + $0xd0] sm:$0xff]  }
   0x3   :  { %v2037_v2 = vld [vmem:[%s2654_s1] sm:$0xff]   ;;  %1843 = vmatprep.subr.bf16.mxu1 %v2036_v1  ;;  %v2041_v6 = vld [vmem:[%s2654_s1 + $0x8] sm:$0xff]   ;;  %v2045_v10 = vld [vmem:[%s2654_s1 + $0x10] sm:$0xff]  }
   0x4   :  { %v2038_v3 = vld [vmem:[%s2654_s1 + $0x80] sm:$0xff]   ;;  %1780 = vmatpush3.bf16.msra.mxu0 %v2037_v2  ;;  %v2042_v7 = vld [vmem:[%s2654_s1 + $0x88] sm:$0xff]   ;;  %v2046_v11 = vld [vmem:[%s2654_s1 + $0x90] sm:$0xff]  }
   0x5   :  { %1844 = vmatpush3.bf16.msra.mxu1 %v2038_v3  ;;  %1781 = vmatprep.subr.bf16.mxu0 %v2039_v4  ;;  %v2047_v12 = vld [vmem:[%s2654_s1 + $0x58] sm:$0xff]   ;;  %v2051_v16 = vld [vmem:[%s2654_s1 + $0x60] sm:$0xff]   ;;  %v2055_v20 = vld [vmem:[%s2654_s1 + $0x68] sm:$0xff]  }
   0x6   :  { %1845 = vmatprep.subr.bf16.mxu1 %v2040_v5  ;;  %v2048_v13 = vld [vmem:[%s2654_s1 + $0xd8] sm:$0xff]   ;;  %v2052_v17 = vld [vmem:[%s2654_s1 + $0xe0] sm:$0xff]   ;;  %v2056_v21 = vld [vmem:[%s2654_s1 + $0xe8] sm:$0xff]  }
   0x7   :  { %v2049_v14 = vld [vmem:[%s2654_s1 + $0x18] sm:$0xff]   ;;  %v2053_v18 = vld [vmem:[%s2654_s1 + $0x20] sm:$0xff]   ;;  %v2057_v22 = vld [vmem:[%s2654_s1 + $0x28] sm:$0xff]  }
   0x8   :  { %1782 = vmatpush3.bf16.msra.mxu0 %v2041_v6  ;;  %v2050_v15 = vld [vmem:[%s2654_s1 + $0x98] sm:$0xff]   ;;  %v2054_v19 = vld [vmem:[%s2654_s1 + $0xa0] sm:$0xff]   ;;  %v2058_v23 = vld [vmem:[%s2654_s1 + $0xa8] sm:$0xff]  }
   0x9   :  { %1846 = vmatpush3.bf16.msra.mxu1 %v2042_v7  ;;  %1783 = vmatprep.subr.bf16.mxu0 %v2043_v8  ;;  %v2059_v24 = vld [vmem:[%s2654_s1 + $0x70] sm:$0xff]   ;;  %v2063_v28 = vld [vmem:[%s2654_s1 + $0x78] sm:$0xff]   ;;  %v21_v32 = vld [vmem:[%s2655_s0] sm:$0xff] }
   0xa   :  { %1847 = vmatprep.subr.bf16.mxu1 %v2044_v9  ;;  %v2060_v25 = vld [vmem:[%s2654_s1 + $0xf0] sm:$0xff]   ;;  %v2064_v29 = vld [vmem:[%s2654_s1 + $0xf8] sm:$0xff]   ;;  %v25_v33 = vld [vmem:[%s2655_s0 + $0x20] sm:$0xff] }
   0xb   :  { %v2061_v26 = vld [vmem:[%s2654_s1 + $0x30] sm:$0xff]   ;;  %v2065_v30 = vld [vmem:[%s2654_s1 + $0x38] sm:$0xff]   ;;  %v22_v34 = vld [vmem:[%s2655_s0 + $0x8] sm:$0xff]  ;;  %v1570_v35 = vcombine.low %v21_v32, %v25_v33  ;;  %v1571_v36 = vcombine.high %v21_v32, %v25_v33 }
   0xc   :  { %1784 = vmatpush3.bf16.msra.mxu0 %v2045_v10  ;;  %v2062_v27 = vld [vmem:[%s2654_s1 + $0xb0] sm:$0xff]   ;;  %v2066_v31 = vld [vmem:[%s2654_s1 + $0xb8] sm:$0xff]   ;;  %v26_v37 = vld [vmem:[%s2655_s0 + $0x28] sm:$0xff] }
   0xd   :  { %1848 = vmatpush3.bf16.msra.mxu1 %v2046_v11  ;;  %1785 = vmatprep.subr.bf16.mxu0 %v2047_v12  ;;  %v1572_v38 = vcombine.low %v22_v34, %v26_v37  ;;  %v1573_v39 = vcombine.high %v22_v34, %v26_v37  ;;  %v2067_v40 = vld [vmem:[%s2654_s1 + $0x140] sm:$0xff]   ;;  %v30_v47 = vld [vmem:[%s2655_s0 + $0x48] sm:$0xff]  ;;  %v2075_v62 = vld [vmem:[%s2654_s1 + $0x150] sm:$0xff]  }
   0xe   :  { %1849 = vmatprep.subr.bf16.mxu1 %v2048_v13  ;;  %956 = vmatprep.mubr.bf16.mxu0 %v1571_v36  ;;  %v2068_v41 = vld [vmem:[%s2654_s1 + $0x100] sm:$0xff]   ;;  %v34_v48 = vld [vmem:[%s2655_s0 + $0x68] sm:$0xff]  ;;  %v2076_v63 = vld [vmem:[%s2654_s1 + $0x110] sm:$0xff]  }
   0xf   :  { %1053 = vmatprep.mubr.bf16.mxu1 %v1573_v39  ;;  %v2069_v42 = vld [vmem:[%s2654_s1 + $0x1c0] sm:$0xff]   ;;  %v1581_v49 = vcombine.high %v30_v47, %v34_v48  ;;  %v2071_v50 = vld [vmem:[%s2654_s1 + $0x148] sm:$0xff]   ;;  %v1580_v53 = vcombine.low %v30_v47, %v34_v48  ;;  %v2077_v0 = vld [vmem:[%s2654_s1 + $0x1d0] sm:$0xff]  }
  0x10   :  { %1786 = vmatpush3.bf16.msra.mxu0 %v2049_v14  ;;  %v2070_v43 = vld [vmem:[%s2654_s1 + $0x180] sm:$0xff]   ;;  %v2072_v52 = vld [vmem:[%s2654_s1 + $0x108] sm:$0xff]   ;;  %v2078_v1 = vld [vmem:[%s2654_s1 + $0x190] sm:$0xff]  }
  0x11   :  { %1850 = vmatpush3.bf16.msra.mxu1 %v2050_v15  ;;  %1787 = vmatprep.subr.bf16.mxu0 %v2051_v16  ;;  %v29_v44 = vld [vmem:[%s2655_s0 + $0x40] sm:$0xff]  ;;  %v2073_v54 = vld [vmem:[%s2654_s1 + $0x1c8] sm:$0xff]   ;;  %v2079_v10 = vld [vmem:[%s2654_s1 + $0x158] sm:$0xff]  }
  0x12   :  { %1851 = vmatprep.subr.bf16.mxu1 %v2052_v17  ;;  %v33_v45 = vld [vmem:[%s2655_s0 + $0x60] sm:$0xff]  ;;  %v2074_v55 = vld [vmem:[%s2654_s1 + $0x188] sm:$0xff]   ;;  %v2080_v11 = vld [vmem:[%s2654_s1 + $0x118] sm:$0xff]  }
  0x13   :  { %v1579_v46 = vcombine.high %v29_v44, %v33_v45  ;;  %v1578_v51 = vcombine.low %v29_v44, %v33_v45  ;;  %v37_v56 = vld [vmem:[%s2655_s0 + $0x80] sm:$0xff]  ;;  %v38_v58 = vld [vmem:[%s2655_s0 + $0x88] sm:$0xff]  ;;  %v2081_v12 = vld [vmem:[%s2654_s1 + $0x1d8] sm:$0xff]  }
  0x14   :  { %1788 = vmatpush3.bf16.msra.mxu0 %v2053_v18  ;;  %v41_v57 = vld [vmem:[%s2655_s0 + $0xa0] sm:$0xff]  ;;  %v42_v59 = vld [vmem:[%s2655_s0 + $0xa8] sm:$0xff]  ;;  %v2082_v13 = vld [vmem:[%s2654_s1 + $0x198] sm:$0xff]  }
  0x15   :  { %1852 = vmatpush3.bf16.msra.mxu1 %v2054_v19  ;;  %1789 = vmatprep.subr.bf16.mxu0 %v2055_v20  ;;  %v1587_v60 = vcombine.high %v37_v56, %v41_v57  ;;  %v1589_v61 = vcombine.high %v38_v58, %v42_v59  ;;  %v1586_v2 = vcombine.low %v37_v56, %v41_v57  ;;  %v45_v3 = vld [vmem:[%s2655_s0 + $0xc0] sm:$0xff]  ;;  %v46_v5 = vld [vmem:[%s2655_s0 + $0xc8] sm:$0xff]  ;;  %v2092_v39 = vld [vmem:[%s2654_s1 + $0x130] sm:$0xff]  }
  0x16   :  { %1853 = vmatprep.subr.bf16.mxu1 %v2056_v21  ;;  %v49_v4 = vld [vmem:[%s2655_s0 + $0xe0] sm:$0xff]  ;;  %v1588_v6 = vcombine.low %v38_v58, %v42_v59  ;;  %v50_v8 = vld [vmem:[%s2655_s0 + $0xe8] sm:$0xff]  ;;  %v2096_v48 = vld [vmem:[%s2654_s1 + $0x138] sm:$0xff]  }
  0x17   :  { %v1595_v7 = vcombine.high %v45_v3, %v49_v4  ;;  %v1597_v9 = vcombine.high %v46_v5, %v50_v8  ;;  %v53_v14 = vld [vmem:[%s2655_s0 + $0x100] sm:$0xff]  ;;  %v54_v16 = vld [vmem:[%s2655_s0 + $0x108] sm:$0xff]  ;;  %v1594_v19 = vcombine.low %v45_v3, %v49_v4  ;;  %v1596_v21 = vcombine.low %v46_v5, %v50_v8  ;;  %v32_v8 = vld [vmem:[%s2655_s0 + $0x58] sm:$0xff] }
  0x18   :  { %1790 = vmatpush3.bf16.msra.mxu0 %v2057_v22  ;;  %v57_v15 = vld [vmem:[%s2655_s0 + $0x120] sm:$0xff]  ;;  %v58_v17 = vld [vmem:[%s2655_s0 + $0x128] sm:$0xff] }
  0x19   :  { %1854 = vmatpush3.bf16.msra.mxu1 %v2058_v23  ;;  %1791 = vmatprep.subr.bf16.mxu0 %v2059_v24  ;;  %v2083_v18 = vld [vmem:[%s2654_s1 + $0x160] sm:$0xff]   ;;  %v1603_v22 = vcombine.high %v53_v14, %v57_v15  ;;  %v1605_v24 = vcombine.high %v54_v16, %v58_v17  ;;  %v2089_v32 = vld [vmem:[%s2654_s1 + $0x1e8] sm:$0xff]   ;;  %v1602_v34 = vcombine.low %v53_v14, %v57_v15  ;;  %v39_v14 = vld [vmem:[%s2655_s0 + $0x90] sm:$0xff] }
  0x1a   :  { %1855 = vmatprep.subr.bf16.mxu1 %v2060_v25  ;;  %v2084_v20 = vld [vmem:[%s2654_s1 + $0x120] sm:$0xff]   ;;  %v2090_v33 = vld [vmem:[%s2654_s1 + $0x1a8] sm:$0xff]   ;;  %v43_v15 = vld [vmem:[%s2655_s0 + $0xb0] sm:$0xff] }
  0x1b   :  { %v2085_v23 = vld [vmem:[%s2654_s1 + $0x1e0] sm:$0xff]   ;;  %v70_v44 = vld [vmem:[%s2655_s0 + $0x188] sm:$0xff] }
  0x1c   :  { %1792 = vmatpush3.bf16.msra.mxu0 %v2061_v26  ;;  %v2086_v25 = vld [vmem:[%s2654_s1 + $0x1a0] sm:$0xff]   ;;  %v74_v45 = vld [vmem:[%s2655_s0 + $0x1a8] sm:$0xff] }
  0x1d   :  { %1856 = vmatpush3.bf16.msra.mxu1 %v2062_v27  ;;  %1793 = vmatprep.subr.bf16.mxu0 %v2063_v28  ;;  %v61_v26 = vld [vmem:[%s2655_s0 + $0x140] sm:$0xff]  ;;  %v2087_v28 = vld [vmem:[%s2654_s1 + $0x168] sm:$0xff]   ;;  %v1620_v59 = vcombine.low %v70_v44, %v74_v45 }
  0x1e   :  { %1857 = vmatprep.subr.bf16.mxu1 %v2064_v29  ;;  %v65_v27 = vld [vmem:[%s2655_s0 + $0x160] sm:$0xff]  ;;  %v62_v29 = vld [vmem:[%s2655_s0 + $0x148] sm:$0xff] }
  0x1f   :  { %v1611_v36 = vcombine.high %v61_v26, %v65_v27  ;;  %v1610_v47 = vcombine.low %v61_v26, %v65_v27  ;;  %v78_v56 = vld [vmem:[%s2655_s0 + $0x1c8] sm:$0xff]  ;;  %v1590_v26 = vcombine.low %v39_v14, %v43_v15 }
  0x20   :  { %1794 = vmatpush3.bf16.msra.mxu0 %v2065_v30  ;;  %v66_v30 = vld [vmem:[%s2655_s0 + $0x168] sm:$0xff] }
  0x21   :  { %1858 = vmatpush3.bf16.msra.mxu1 %v2066_v31  ;;  %1907 = vmatprep.subr.bf16.mxu0 %v2067_v40  ;;  %v2088_v31 = vld [vmem:[%s2654_s1 + $0x128] sm:$0xff]   ;;  %v1613_v37 = vcombine.high %v62_v29, %v66_v30  ;;  %v2093_v40 = vld [vmem:[%s2654_s1 + $0x1f0] sm:$0xff]  }
  0x22   :  { %1971 = vmatprep.subr.bf16.mxu1 %v2069_v42  ;;  %v73_v42 = vld [vmem:[%s2655_s0 + $0x1a0] sm:$0xff]  ;;  %v82_v57 = vld [vmem:[%s2655_s0 + $0x1e8] sm:$0xff] }
  0x23   :  { %957 = vmatmul.mubr.bf16.vlgmr.msra.gmra.mrb[0].mxu0 %v1570_v35  ;;  %v1604_v35 = vcombine.low %v54_v16, %v58_v17  ;;  %v1628_v3 = vcombine.low %v78_v56, %v82_v57  ;;  %v40_v16 = vld [vmem:[%s2655_s0 + $0x98] sm:$0xff] }
  0x24   :  { %1054 = vmatmul.mubr.bf16.vlgmr.msra.gmra.mrb[0].mxu1 %v1572_v38  ;;  %1908 = vmatpush3.bf16.msra.mxu0 %v2068_v41  ;;  %v2091_v38 = vld [vmem:[%s2654_s1 + $0x170] sm:$0xff]   ;;  %v69_v41 = vld [vmem:[%s2655_s0 + $0x180] sm:$0xff]  ;;  %v44_v17 = vld [vmem:[%s2655_s0 + $0xb8] sm:$0xff] }
  0x25   :  { %1972 = vmatpush3.bf16.msra.mxu1 %v2070_v43  ;;  %964 = vmatprep.mubr.bf16.mxu0 %v1579_v46  ;;  %v2094_v43 = vld [vmem:[%s2654_s1 + $0x1b0] sm:$0xff]   ;;  %v2095_v46 = vld [vmem:[%s2654_s1 + $0x178] sm:$0xff]   ;;  %v1618_v58 = vcombine.low %v69_v41, %v73_v42  ;;  %v1592_v27 = vcombine.low %v40_v16, %v44_v17 }
  0x26   :  { %1061 = vmatprep.mubr.bf16.mxu1 %v1581_v49  ;;  %1909 = vmatprep.subr.bf16.mxu0 %v2071_v50  ;;  %v1612_v49 = vcombine.low %v62_v29, %v66_v30  ;;  %v1619_v50 = vcombine.high %v69_v41, %v73_v42  ;;  %v55_v30 = vld [vmem:[%s2655_s0 + $0x110] sm:$0xff]  ;;  %v68_v41 = vld [vmem:[%s2655_s0 + $0x178] sm:$0xff] }
  0x27   :  { %1973 = vmatprep.subr.bf16.mxu1 %v2073_v54  ;;  %v77_v54 = vld [vmem:[%s2655_s0 + $0x1c0] sm:$0xff] }
  0x28   :  { %1910 = vmatpush3.bf16.msra.mxu0 %v2072_v52  ;;  %v1621_v52 = vcombine.high %v70_v44, %v74_v45 }
  0x29   :  { %1974 = vmatpush3.bf16.msra.mxu1 %v2074_v55  ;;  %1911 = vmatprep.subr.bf16.mxu0 %v2075_v62  ;;  %v81_v55 = vld [vmem:[%s2655_s0 + $0x1e0] sm:$0xff]  ;;  %v23_v62 = vld [vmem:[%s2655_s0 + $0x10] sm:$0xff] }
  0x2a   :  { %1975 = vmatprep.subr.bf16.mxu1 %v2077_v0  ;;  %v24_v0 = vld [vmem:[%s2655_s0 + $0x18] sm:$0xff] }
  0x2b   :  { %965 = vmatmul.mubr.bf16.gmra.mrb[4].mxu0 %v1578_v51  ;;  %v2097_v51 = vld [vmem:[%s2654_s1 + $0x1f8] sm:$0xff]  }
  0x2c   :  { %1062 = vmatmul.mubr.bf16.gmra.mrb[4].mxu1 %v1580_v53  ;;  %972 = vmatprep.mubr.bf16.mxu0 %v1587_v60  ;;  %v2098_v53 = vld [vmem:[%s2654_s1 + $0x1b8] sm:$0xff]   ;;  %v1627_v60 = vcombine.high %v77_v54, %v81_v55 }
  0x2d   :  { %1069 = vmatprep.mubr.bf16.mxu1 %v1589_v61  ;;  %1912 = vmatpush3.bf16.msra.mxu0 %v2076_v63  ;;  %v1629_v61 = vcombine.high %v78_v56, %v82_v57  ;;  %v27_v63 = vld [vmem:[%s2655_s0 + $0x30] sm:$0xff]  ;;  %v80_v56 = vld [vmem:[%s2655_s0 + $0x1d8] sm:$0xff] }
  0x2e   :  { %1976 = vmatpush3.bf16.msra.mxu1 %v2078_v1  ;;  %1913 = vmatprep.subr.bf16.mxu0 %v2079_v10  ;;  %v28_v1 = vld [vmem:[%s2655_s0 + $0x38] sm:$0xff]  ;;  %v1575_v4 = vcombine.high %v23_v62, %v27_v63  ;;  %v1574_v10 = vcombine.low %v23_v62, %v27_v63 }
  0x2f   :  { %1977 = vmatprep.subr.bf16.mxu1 %v2081_v12  ;;  %v1577_v5 = vcombine.high %v24_v0, %v28_v1  ;;  %v84_v57 = vld [vmem:[%s2655_s0 + $0x1f8] sm:$0xff] }
  0x30   :  { %v1632_v63 = vcombine.low %v80_v56, %v84_v57 }
  0x31   :  { %1914 = vmatpush3.bf16.msra.mxu0 %v2080_v11  ;;  %v1576_v11 = vcombine.low %v24_v0, %v28_v1 }
  0x32   :  { %1978 = vmatpush3.bf16.msra.mxu1 %v2082_v13  ;;  %1915 = vmatprep.subr.bf16.mxu0 %v2083_v18 }
  0x33   :  { %973 = vmatmul.mubr.bf16.gmra.mrb[8].mxu0 %v1586_v2  ;;  %1979 = vmatprep.subr.bf16.mxu1 %v2085_v23  ;;  %v1626_v2 = vcombine.low %v77_v54, %v81_v55  ;;  %v51_v23 = vld [vmem:[%s2655_s0 + $0xf0] sm:$0xff] }
  0x34   :  { %1070 = vmatmul.mubr.bf16.gmra.mrb[8].mxu1 %v1588_v6  ;;  %980 = vmatprep.mubr.bf16.mxu0 %v1595_v7  ;;  %v31_v6 = vld [vmem:[%s2655_s0 + $0x50] sm:$0xff] }
  0x35   :  { %1077 = vmatprep.mubr.bf16.mxu1 %v1597_v9  ;;  %1916 = vmatpush3.bf16.msra.mxu0 %v2084_v20  ;;  %v35_v7 = vld [vmem:[%s2655_s0 + $0x70] sm:$0xff]  ;;  %v36_v9 = vld [vmem:[%s2655_s0 + $0x78] sm:$0xff]  ;;  %v1591_v20 = vcombine.high %v39_v14, %v43_v15 }
  0x36   :  { %1980 = vmatpush3.bf16.msra.mxu1 %v2086_v25  ;;  %1917 = vmatprep.subr.bf16.mxu0 %v2087_v28  ;;  %v1583_v12 = vcombine.high %v31_v6, %v35_v7  ;;  %v1585_v13 = vcombine.high %v32_v8, %v36_v9  ;;  %v1582_v18 = vcombine.low %v31_v6, %v35_v7  ;;  %v52_v25 = vld [vmem:[%s2655_s0 + $0xf8] sm:$0xff]  ;;  %v79_v54 = vld [vmem:[%s2655_s0 + $0x1d0] sm:$0xff] }
  0x37   :  { %1981 = vmatprep.subr.bf16.mxu1 %v2089_v32  ;;  %v56_v32 = vld [vmem:[%s2655_s0 + $0x118] sm:$0xff]  ;;  %v83_v55 = vld [vmem:[%s2655_s0 + $0x1f0] sm:$0xff] }
  0x38   :  { %v1630_v62 = vcombine.low %v79_v54, %v83_v55 }
  0x39   :  { %1918 = vmatpush3.bf16.msra.mxu0 %v2088_v31  ;;  %v59_v31 = vld [vmem:[%s2655_s0 + $0x130] sm:$0xff] }
  0x3a   :  { %1982 = vmatpush3.bf16.msra.mxu1 %v2090_v33  ;;  %1919 = vmatprep.subr.bf16.mxu0 %v2091_v38  ;;  %v60_v33 = vld [vmem:[%s2655_s0 + $0x138] sm:$0xff]  ;;  %v63_v38 = vld [vmem:[%s2655_s0 + $0x150] sm:$0xff]  ;;  %v1606_v42 = vcombine.low %v55_v30, %v59_v31 }
  0x3b   :  { %981 = vmatmul.mubr.bf16.gmra.mrb[12].mxu0 %v1594_v19  ;;  %1983 = vmatprep.subr.bf16.mxu1 %v2093_v40  ;;  %v1584_v19 = vcombine.low %v32_v8, %v36_v9  ;;  %v64_v40 = vld [vmem:[%s2655_s0 + $0x158] sm:$0xff] }
  0x3c   :  { %1078 = vmatmul.mubr.bf16.gmra.mrb[12].mxu1 %v1596_v21  ;;  %988 = vmatprep.mubr.bf16.mxu0 %v1603_v22  ;;  %v1593_v21 = vcombine.high %v40_v16, %v44_v17  ;;  %v47_v22 = vld [vmem:[%s2655_s0 + $0xd0] sm:$0xff]  ;;  %v1617_v45 = vcombine.high %v64_v40, %v68_v41 }
  0x3d   :  { %1085 = vmatprep.mubr.bf16.mxu1 %v1605_v24  ;;  %1920 = vmatpush3.bf16.msra.mxu0 %v2092_v39  ;;  %v48_v24 = vld [vmem:[%s2655_s0 + $0xd8] sm:$0xff]  ;;  %v1599_v28 = vcombine.high %v47_v22, %v51_v23  ;;  %v67_v39 = vld [vmem:[%s2655_s0 + $0x170] sm:$0xff] }
  0x3e   :  { %1984 = vmatpush3.bf16.msra.mxu1 %v2094_v43  ;;  %1921 = vmatprep.subr.bf16.mxu0 %v2095_v46  ;;  %v1601_v29 = vcombine.high %v48_v24, %v52_v25  ;;  %v1608_v43 = vcombine.low %v56_v32, %v60_v33  ;;  %v1615_v44 = vcombine.high %v63_v38, %v67_v39  ;;  %v71_v46 = vld [vmem:[%s2655_s0 + $0x190] sm:$0xff] }
  0x3f   :  { %1985 = vmatprep.subr.bf16.mxu1 %v2097_v51  ;;  %v1616_v51 = vcombine.low %v64_v40, %v68_v41 }
  0x41   :  { %1922 = vmatpush3.bf16.msra.mxu0 %v2096_v48  ;;  %v72_v48 = vld [vmem:[%s2655_s0 + $0x198] sm:$0xff] }
  0x42   :  { %1986 = vmatpush3.bf16.msra.mxu1 %v2098_v53 }
  0x43   :  { %989 = vmatmul.mubr.bf16.gmra.mrb[16].mxu0 %v1602_v34  ;;  %v1598_v34 = vcombine.low %v47_v22, %v51_v23 }
  0x44   :  { %1086 = vmatmul.mubr.bf16.gmra.mrb[16].mxu1 %v1604_v35  ;;  %996 = vmatprep.mubr.bf16.mxu0 %v1611_v36  ;;  %v1600_v35 = vcombine.low %v48_v24, %v52_v25  ;;  %v1607_v36 = vcombine.high %v55_v30, %v59_v31 }
  0x45   :  { %1093 = vmatprep.mubr.bf16.mxu1 %v1613_v37  ;;  %v1609_v37 = vcombine.high %v56_v32, %v60_v33 }
  0x4b   :  { %997 = vmatmul.mubr.bf16.gmra.mrb[20].mxu0 %v1610_v47  ;;  %v75_v47 = vld [vmem:[%s2655_s0 + $0x1b0] sm:$0xff] }
  0x4c   :  { %1094 = vmatmul.mubr.bf16.gmra.mrb[20].mxu1 %v1612_v49  ;;  %1004 = vmatprep.mubr.bf16.mxu0 %v1619_v50  ;;  %v76_v49 = vld [vmem:[%s2655_s0 + $0x1b8] sm:$0xff]  ;;  %v1614_v50 = vcombine.low %v63_v38, %v67_v39 }
  0x4d   :  { %1101 = vmatprep.mubr.bf16.mxu1 %v1621_v52  ;;  %v1623_v52 = vcombine.high %v71_v46, %v75_v47  ;;  %v1625_v53 = vcombine.high %v72_v48, %v76_v49 }
  0x53   :  { %1005 = vmatmul.mubr.bf16.gmra.mrb[24].mxu0 %v1618_v58  ;;  %v1622_v58 = vcombine.low %v71_v46, %v75_v47 }
  0x54   :  { %1102 = vmatmul.mubr.bf16.gmra.mrb[24].mxu1 %v1620_v59  ;;  %1012 = vmatprep.mubr.bf16.mxu0 %v1627_v60  ;;  %v1624_v59 = vcombine.low %v72_v48, %v76_v49  ;;  %v1631_v60 = vcombine.high %v79_v54, %v83_v55 }
  0x55   :  { %1109 = vmatprep.mubr.bf16.mxu1 %v1629_v61  ;;  %v1633_v61 = vcombine.high %v80_v56, %v84_v57 }
  0x5b   :  { %1013 = vmatmul.mubr.bf16.gmra.mrb[28].mxu0 %v1626_v2  ;;  %v2518_v2 = vld [vmem:[%s2656_s2] ss:$0 sm:$0xff] }
  0x5c   :  { %1110 = vmatmul.mubr.bf16.gmra.mrb[28].mxu1 %v1628_v3  ;;  %1150 = vmatprep.mubr.bf16.mxu0 %v1575_v4 }
  0x5d   :  { %1247 = vmatprep.mubr.bf16.mxu1 %v1577_v5 }
  0x63   :  { %1151 = vmatmul.mubr.bf16.vlgmr.msra.gmra.mrb[32].mxu0 %v1574_v10 }
  0x64   :  { %1248 = vmatmul.mubr.bf16.vlgmr.msra.gmra.mrb[32].mxu1 %v1576_v11  ;;  %1158 = vmatprep.mubr.bf16.mxu0 %v1583_v12 }
  0x65   :  { %1255 = vmatprep.mubr.bf16.mxu1 %v1585_v13 }
  0x6b   :  { %1159 = vmatmul.mubr.bf16.gmra.mrb[36].mxu0 %v1582_v18 }
  0x6c   :  { %1256 = vmatmul.mubr.bf16.gmra.mrb[36].mxu1 %v1584_v19  ;;  %1166 = vmatprep.mubr.bf16.mxu0 %v1591_v20 }
  0x6d   :  { %1263 = vmatprep.mubr.bf16.mxu1 %v1593_v21 }
  0x73   :  { %1167 = vmatmul.mubr.bf16.gmra.mrb[40].mxu0 %v1590_v26 }
  0x74   :  { %1264 = vmatmul.mubr.bf16.gmra.mrb[40].mxu1 %v1592_v27  ;;  %1174 = vmatprep.mubr.bf16.mxu0 %v1599_v28 }
  0x75   :  { %1271 = vmatprep.mubr.bf16.mxu1 %v1601_v29 }
  0x7b   :  { %1175 = vmatmul.mubr.bf16.gmra.mrb[44].mxu0 %v1598_v34 }
  0x7c   :  { %1272 = vmatmul.mubr.bf16.gmra.mrb[44].mxu1 %v1600_v35  ;;  %1182 = vmatprep.mubr.bf16.mxu0 %v1607_v36 }
  0x7d   :  { %1279 = vmatprep.mubr.bf16.mxu1 %v1609_v37 }
  0x83   :  { %1183 = vmatmul.mubr.bf16.gmra.mrb[48].mxu0 %v1606_v42 }
  0x84   :  { %1280 = vmatmul.mubr.bf16.gmra.mrb[48].mxu1 %v1608_v43  ;;  %1190 = vmatprep.mubr.bf16.mxu0 %v1615_v44 }
  0x85   :  { %1287 = vmatprep.mubr.bf16.mxu1 %v1617_v45 }
  0x8b   :  { %1191 = vmatmul.mubr.bf16.gmra.mrb[52].mxu0 %v1614_v50 }
  0x8c   :  { %1288 = vmatmul.mubr.bf16.gmra.mrb[52].mxu1 %v1616_v51  ;;  %1198 = vmatprep.mubr.bf16.mxu0 %v1623_v52 }
  0x8d   :  { %1295 = vmatprep.mubr.bf16.mxu1 %v1625_v53 }
  0x93   :  { %1199 = vmatmul.mubr.bf16.gmra.mrb[56].mxu0 %v1622_v58 }
  0x94   :  { %1296 = vmatmul.mubr.bf16.gmra.mrb[56].mxu1 %v1624_v59  ;;  %1206 = vmatprep.mubr.bf16.mxu0 %v1631_v60 }
  0x95   :  { %1303 = vmatprep.mubr.bf16.mxu1 %v1633_v61 }
  0x9b   :  { %1207 = vmatmul.mubr.bf16.gmra.mrb[60].mxu0 %v1630_v62 }
  0x9c   :  { %1304 = vmatmul.mubr.bf16.gmra.mrb[60].mxu1 %v1632_v63 }
  0xf6   :  { %v1795_v0 = vpop.f32.mrb[0].mxu0 }
  0xf7   :  { %v1859_v1 = vpop.f32.mrb[0].mxu1  ;;  %v1796_v3 = vpop.f32.mrb[1].mxu0 }
  0xf8   :  { %v1797_v4 = vadd.f32 %v1796_v3, %v1795_v0  ;;  %v1860_v5 = vpop.f32.mrb[1].mxu1  ;;  %v1798_v6 = vpop.f32.mrb[2].mxu0 }
  0xf9   :  { %v1861_v7 = vadd.f32 %v1860_v5, %v1859_v1  ;;  %v1862_v8 = vpop.f32.mrb[2].mxu1  ;;  %v1799_v9 = vpop.f32.mrb[3].mxu0 }
  0xfa   :  { %v959_v10 = vadd.f32 %v1797_v4, %v2518_v2  ;;  %v1800_v11 = vadd.f32 %v1799_v9, %v1798_v6  ;;  %v1863_v12 = vpop.f32.mrb[3].mxu1 }
  0xfb   :  { %v1864_v13 = vadd.f32 %v1863_v12, %v1862_v8 }
  0xfc   :  { %v2521_v14 = vadd.f32 %v1861_v7, %v959_v10  ;;  %v962_v15 = vadd.f32 %v1800_v11, %v2518_v2 }
  0xfe   :  { %v2524_v16 = vadd.f32 %v1864_v13, %v962_v15  ;;  %v1801_v17 = vpop.f32.mrb[4].mxu0 }
  0xff   :  { %v1865_v18 = vpop.f32.mrb[4].mxu1  ;;  %v1802_v19 = vpop.f32.mrb[5].mxu0 }
 0x100   :  { %v1803_v20 = vadd.f32 %v1802_v19, %v1801_v17  ;;  %v1866_v21 = vpop.f32.mrb[5].mxu1  ;;  %v1804_v22 = vpop.f32.mrb[6].mxu0 }
 0x101   :  { %v1867_v23 = vadd.f32 %v1866_v21, %v1865_v18  ;;  %v1868_v24 = vpop.f32.mrb[6].mxu1  ;;  %v1805_v25 = vpop.f32.mrb[7].mxu0 }
 0x102   :  { %v967_v26 = vadd.f32 %v1803_v20, %v2518_v2  ;;  %v1806_v27 = vadd.f32 %v1805_v25, %v1804_v22  ;;  %v1869_v28 = vpop.f32.mrb[7].mxu1 }
 0x103   :  { %v1870_v29 = vadd.f32 %v1869_v28, %v1868_v24 }
 0x104   :  { %v2527_v30 = vadd.f32 %v1867_v23, %v967_v26  ;;  %v970_v31 = vadd.f32 %v1806_v27, %v2518_v2 }
 0x106   :  { %v2530_v32 = vadd.f32 %v1870_v29, %v970_v31  ;;  %v1807_v33 = vpop.f32.mrb[8].mxu0 }
 0x107   :  { %v1871_v34 = vpop.f32.mrb[8].mxu1  ;;  %v1808_v35 = vpop.f32.mrb[9].mxu0 }
 0x108   :  { %v1809_v36 = vadd.f32 %v1808_v35, %v1807_v33  ;;  %v1872_v37 = vpop.f32.mrb[9].mxu1  ;;  %v1810_v38 = vpop.f32.mrb[10].mxu0 }
 0x109   :  { %v1873_v39 = vadd.f32 %v1872_v37, %v1871_v34  ;;  %v1874_v40 = vpop.f32.mrb[10].mxu1  ;;  %v1811_v41 = vpop.f32.mrb[11].mxu0 }
 0x10a   :  { %v975_v42 = vadd.f32 %v1809_v36, %v2518_v2  ;;  %v1812_v43 = vadd.f32 %v1811_v41, %v1810_v38  ;;  %v1875_v44 = vpop.f32.mrb[11].mxu1 }
 0x10b   :  { %v1876_v45 = vadd.f32 %v1875_v44, %v1874_v40 }
 0x10c   :  { %v2533_v46 = vadd.f32 %v1873_v39, %v975_v42  ;;  %v978_v47 = vadd.f32 %v1812_v43, %v2518_v2 }
 0x10e   :  { %v2536_v48 = vadd.f32 %v1876_v45, %v978_v47  ;;  %v1813_v49 = vpop.f32.mrb[12].mxu0 }
 0x10f   :  { %v1877_v50 = vpop.f32.mrb[12].mxu1  ;;  %v1814_v51 = vpop.f32.mrb[13].mxu0 }
 0x110   :  { %v1815_v52 = vadd.f32 %v1814_v51, %v1813_v49  ;;  %v1878_v53 = vpop.f32.mrb[13].mxu1  ;;  %v1816_v54 = vpop.f32.mrb[14].mxu0 }
 0x111   :  { %v1879_v55 = vadd.f32 %v1878_v53, %v1877_v50  ;;  %v1880_v56 = vpop.f32.mrb[14].mxu1  ;;  %v1817_v57 = vpop.f32.mrb[15].mxu0 }
 0x112   :  { %v983_v58 = vadd.f32 %v1815_v52, %v2518_v2  ;;  %v1818_v59 = vadd.f32 %v1817_v57, %v1816_v54  ;;  %v1881_v60 = vpop.f32.mrb[15].mxu1 }
 0x113   :  { %v1882_v61 = vadd.f32 %v1881_v60, %v1880_v56 }
 0x114   :  { %v2539_v62 = vadd.f32 %v1879_v55, %v983_v58  ;;  %v986_v63 = vadd.f32 %v1818_v59, %v2518_v2 }
 0x116   :  { %v2542_v0 = vadd.f32 %v1882_v61, %v986_v63  ;;  %v1819_v1 = vpop.f32.mrb[16].mxu0 }
 0x117   :  { %v1883_v3 = vpop.f32.mrb[16].mxu1  ;;  %v1820_v4 = vpop.f32.mrb[17].mxu0 }
 0x118   :  { %v1821_v5 = vadd.f32 %v1820_v4, %v1819_v1  ;;  %v1884_v6 = vpop.f32.mrb[17].mxu1  ;;  %v1822_v7 = vpop.f32.mrb[18].mxu0 }
 0x119   :  { %v1885_v8 = vadd.f32 %v1884_v6, %v1883_v3  ;;  %v1886_v9 = vpop.f32.mrb[18].mxu1  ;;  %v1823_v10 = vpop.f32.mrb[19].mxu0 }
 0x11a   :  { %v991_v11 = vadd.f32 %v1821_v5, %v2518_v2  ;;  %v1824_v12 = vadd.f32 %v1823_v10, %v1822_v7  ;;  %v1887_v13 = vpop.f32.mrb[19].mxu1 }
 0x11b   :  { %v1888_v15 = vadd.f32 %v1887_v13, %v1886_v9 }
 0x11c   :  { %v2545_v17 = vadd.f32 %v1885_v8, %v991_v11  ;;  %v994_v18 = vadd.f32 %v1824_v12, %v2518_v2 }
 0x11e   :  { %v2548_v19 = vadd.f32 %v1888_v15, %v994_v18  ;;  %v1825_v20 = vpop.f32.mrb[20].mxu0 }
 0x11f   :  { %v1889_v21 = vpop.f32.mrb[20].mxu1  ;;  %v1826_v22 = vpop.f32.mrb[21].mxu0 }
 0x120   :  { %v1827_v23 = vadd.f32 %v1826_v22, %v1825_v20  ;;  %v1890_v24 = vpop.f32.mrb[21].mxu1  ;;  %v1828_v25 = vpop.f32.mrb[22].mxu0 }
 0x121   :  { %v1891_v26 = vadd.f32 %v1890_v24, %v1889_v21  ;;  %v1892_v27 = vpop.f32.mrb[22].mxu1  ;;  %v1829_v28 = vpop.f32.mrb[23].mxu0 }
 0x122   :  { %v999_v29 = vadd.f32 %v1827_v23, %v2518_v2  ;;  %v1830_v31 = vadd.f32 %v1829_v28, %v1828_v25  ;;  %v1893_v33 = vpop.f32.mrb[23].mxu1 }
 0x123   :  { %v1894_v34 = vadd.f32 %v1893_v33, %v1892_v27 }
 0x124   :  { %v2551_v35 = vadd.f32 %v1891_v26, %v999_v29  ;;  %v1002_v36 = vadd.f32 %v1830_v31, %v2518_v2 }
 0x126   :  { %v2554_v37 = vadd.f32 %v1894_v34, %v1002_v36  ;;  %v1831_v38 = vpop.f32.mrb[24].mxu0 }
 0x127   :  { %v1895_v39 = vpop.f32.mrb[24].mxu1  ;;  %v1832_v40 = vpop.f32.mrb[25].mxu0 }
 0x128   :  { %v1833_v41 = vadd.f32 %v1832_v40, %v1831_v38  ;;  %v1896_v42 = vpop.f32.mrb[25].mxu1  ;;  %v1834_v43 = vpop.f32.mrb[26].mxu0 }
 0x129   :  { %v1897_v44 = vadd.f32 %v1896_v42, %v1895_v39  ;;  %v1898_v45 = vpop.f32.mrb[26].mxu1  ;;  %v1835_v47 = vpop.f32.mrb[27].mxu0 }
 0x12a   :  { %v1007_v49 = vadd.f32 %v1833_v41, %v2518_v2  ;;  %v1836_v50 = vadd.f32 %v1835_v47, %v1834_v43  ;;  %v1899_v51 = vpop.f32.mrb[27].mxu1 }
 0x12b   :  { %v1900_v52 = vadd.f32 %v1899_v51, %v1898_v45 }
 0x12c   :  { %v2557_v53 = vadd.f32 %v1897_v44, %v1007_v49  ;;  %v1010_v54 = vadd.f32 %v1836_v50, %v2518_v2 }
 0x12e   :  { %v2560_v55 = vadd.f32 %v1900_v52, %v1010_v54  ;;  %v1837_v56 = vpop.f32.mrb[28].mxu0 }
 0x12f   :  { %v1901_v57 = vpop.f32.mrb[28].mxu1  ;;  %v1838_v58 = vpop.f32.mrb[29].mxu0 }
 0x130   :  { %v1839_v59 = vadd.f32 %v1838_v58, %v1837_v56  ;;  %v1902_v60 = vpop.f32.mrb[29].mxu1  ;;  %v1840_v61 = vpop.f32.mrb[30].mxu0 }
 0x131   :  { %v1903_v63 = vadd.f32 %v1902_v60, %v1901_v57  ;;  %v1904_v1 = vpop.f32.mrb[30].mxu1  ;;  %v1841_v3 = vpop.f32.mrb[31].mxu0 }
 0x132   :  { %v1015_v4 = vadd.f32 %v1839_v59, %v2518_v2  ;;  %v1842_v5 = vadd.f32 %v1841_v3, %v1840_v61  ;;  %v1905_v6 = vpop.f32.mrb[31].mxu1 }
 0x133   :  { %v1906_v7 = vadd.f32 %v1905_v6, %v1904_v1 }
 0x134   :  { %v2563_v8 = vadd.f32 %v1903_v63, %v1015_v4  ;;  %v1018_v9 = vadd.f32 %v1842_v5, %v2518_v2 }
 0x136   :  { %v2566_v10 = vadd.f32 %v1906_v7, %v1018_v9  ;;  %v1923_v11 = vpop.f32.mrb[32].mxu0 }
 0x137   :  { %v1987_v12 = vpop.f32.mrb[32].mxu1  ;;  %v1924_v13 = vpop.f32.mrb[33].mxu0 }
 0x138   :  { %v1925_v15 = vadd.f32 %v1924_v13, %v1923_v11  ;;  %v1988_v18 = vpop.f32.mrb[33].mxu1  ;;  %v1926_v20 = vpop.f32.mrb[34].mxu0 }
 0x139   :  { %v1989_v21 = vadd.f32 %v1988_v18, %v1987_v12  ;;  %v1990_v22 = vpop.f32.mrb[34].mxu1  ;;  %v1927_v23 = vpop.f32.mrb[35].mxu0 }
 0x13a   :  { %v1153_v24 = vadd.f32 %v1925_v15, %v2521_v14  ;;  %v1928_v25 = vadd.f32 %v1927_v23, %v1926_v20  ;;  %v1991_v26 = vpop.f32.mrb[35].mxu1 }
 0x13b   :  { %v1992_v27 = vadd.f32 %v1991_v26, %v1990_v22 }
 0x13c   :  { %v2569_v28 = vadd.f32 %v1989_v21, %v1153_v24  ;;  %v1156_v2 = vadd.f32 %v1928_v25, %v2524_v16 }
 0x13e   :  { %v2572_v29 = vadd.f32 %v1992_v27, %v1156_v2  ;;  %v1929_v31 = vpop.f32.mrb[36].mxu0 }
 0x13f   :  { %v1993_v33 = vpop.f32.mrb[36].mxu1  ;;  %v1930_v34 = vpop.f32.mrb[37].mxu0 }
 0x140   :  { %v1312_v36 = vadd.f32 %v2572_v29, %v2569_v28  ;;  %v1931_v38 = vadd.f32 %v1930_v34, %v1929_v31  ;;  %v1994_v39 = vpop.f32.mrb[37].mxu1  ;;  %v1932_v40 = vpop.f32.mrb[38].mxu0 }
 0x141   :  { %v1995_v41 = vadd.f32 %v1994_v39, %v1993_v33  ;;  %v1996_v14 = vpop.f32.mrb[38].mxu1  ;;  %v1933_v42 = vpop.f32.mrb[39].mxu0 }
 0x142   :  { %v1161_v43 = vadd.f32 %v1931_v38, %v2527_v30  ;;  %v1934_v44 = vadd.f32 %v1933_v42, %v1932_v40  ;;  %v1997_v45 = vpop.f32.mrb[39].mxu1 }
 0x143   :  { %v1998_v47 = vadd.f32 %v1997_v45, %v1996_v14 }
 0x144   :  { %v2577_v16 = vadd.f32 %v1995_v41, %v1161_v43  ;;  %v1164_v49 = vadd.f32 %v1934_v44, %v2530_v32 }
 0x146   :  { %v1313_v50 = vadd.f32 %v1312_v36, %v2577_v16  ;;  %v2581_v51 = vadd.f32 %v1998_v47, %v1164_v49  ;;  %v1935_v52 = vpop.f32.mrb[40].mxu0 }
 0x147   :  { %v1999_v54 = vpop.f32.mrb[40].mxu1  ;;  %v1936_v56 = vpop.f32.mrb[41].mxu0 }
 0x148   :  { %v1314_v57 = vadd.f32 %v1313_v50, %v2581_v51  ;;  %v1937_v58 = vadd.f32 %v1936_v56, %v1935_v52  ;;  %v2000_v59 = vpop.f32.mrb[41].mxu1  ;;  %v1938_v60 = vpop.f32.mrb[42].mxu0 }
 0x149   :  { %v2001_v30 = vadd.f32 %v2000_v59, %v1999_v54  ;;  %v2002_v61 = vpop.f32.mrb[42].mxu1  ;;  %v1939_v63 = vpop.f32.mrb[43].mxu0 }
 0x14a   :  { %v1169_v1 = vadd.f32 %v1937_v58, %v2533_v46  ;;  %v1940_v3 = vadd.f32 %v1939_v63, %v1938_v60  ;;  %v2003_v4 = vpop.f32.mrb[43].mxu1 }
 0x14b   :  { %v2004_v32 = vadd.f32 %v2003_v4, %v2002_v61 }
 0x14c   :  { %v2585_v5 = vadd.f32 %v2001_v30, %v1169_v1  ;;  %v1172_v6 = vadd.f32 %v1940_v3, %v2536_v48 }
 0x14e   :  { %v1315_v7 = vadd.f32 %v1314_v57, %v2585_v5  ;;  %v2589_v9 = vadd.f32 %v2004_v32, %v1172_v6  ;;  %v1941_v11 = vpop.f32.mrb[44].mxu0 }
 0x14f   :  { %v2005_v12 = vpop.f32.mrb[44].mxu1  ;;  %v1942_v13 = vpop.f32.mrb[45].mxu0 }
 0x150   :  { %v1316_v15 = vadd.f32 %v1315_v7, %v2589_v9  ;;  %v1943_v18 = vadd.f32 %v1942_v13, %v1941_v11  ;;  %v2006_v20 = vpop.f32.mrb[45].mxu1  ;;  %v1944_v21 = vpop.f32.mrb[46].mxu0 }
 0x151   :  { %v2007_v46 = vadd.f32 %v2006_v20, %v2005_v12  ;;  %v2008_v22 = vpop.f32.mrb[46].mxu1  ;;  %v1945_v23 = vpop.f32.mrb[47].mxu0 }
 0x152   :  { %v1177_v24 = vadd.f32 %v1943_v18, %v2539_v62  ;;  %v1946_v25 = vadd.f32 %v1945_v23, %v1944_v21  ;;  %v2009_v26 = vpop.f32.mrb[47].mxu1 }
 0x153   :  { %v2010_v48 = vadd.f32 %v2009_v26, %v2008_v22 }
 0x154   :  { %v2593_v27 = vadd.f32 %v2007_v46, %v1177_v24  ;;  %v1180_v2 = vadd.f32 %v1946_v25, %v2542_v0 }
 0x156   :  { %v1317_v31 = vadd.f32 %v1316_v15, %v2593_v27  ;;  %v2597_v33 = vadd.f32 %v2010_v48, %v1180_v2  ;;  %v1947_v34 = vpop.f32.mrb[48].mxu0 }
 0x157   :  { %v2011_v36 = vpop.f32.mrb[48].mxu1  ;;  %v1948_v38 = vpop.f32.mrb[49].mxu0 }
 0x158   :  { %v1318_v39 = vadd.f32 %v1317_v31, %v2597_v33  ;;  %v1949_v40 = vadd.f32 %v1948_v38, %v1947_v34  ;;  %v2012_v41 = vpop.f32.mrb[49].mxu1  ;;  %v1950_v14 = vpop.f32.mrb[50].mxu0 }
 0x159   :  { %v2013_v62 = vadd.f32 %v2012_v41, %v2011_v36  ;;  %v2014_v42 = vpop.f32.mrb[50].mxu1  ;;  %v1951_v43 = vpop.f32.mrb[51].mxu0 }
 0x15a   :  { %v1185_v44 = vadd.f32 %v1949_v40, %v2545_v17  ;;  %v1952_v45 = vadd.f32 %v1951_v43, %v1950_v14  ;;  %v2015_v47 = vpop.f32.mrb[51].mxu1 }
 0x15b   :  { %v2016_v0 = vadd.f32 %v2015_v47, %v2014_v42 }
 0x15c   :  { %v2601_v49 = vadd.f32 %v2013_v62, %v1185_v44  ;;  %v1188_v50 = vadd.f32 %v1952_v45, %v2548_v19 }
 0x15e   :  { %v1319_v52 = vadd.f32 %v1318_v39, %v2601_v49  ;;  %v2605_v54 = vadd.f32 %v2016_v0, %v1188_v50  ;;  %v1953_v56 = vpop.f32.mrb[52].mxu0 }
 0x15f   :  { %v2017_v57 = vpop.f32.mrb[52].mxu1  ;;  %v1954_v58 = vpop.f32.mrb[53].mxu0 }
 0x160   :  { %v1320_v59 = vadd.f32 %v1319_v52, %v2605_v54  ;;  %v1955_v60 = vadd.f32 %v1954_v58, %v1953_v56  ;;  %v2018_v30 = vpop.f32.mrb[53].mxu1  ;;  %v1956_v61 = vpop.f32.mrb[54].mxu0 }
 0x161   :  { %v2019_v17 = vadd.f32 %v2018_v30, %v2017_v57  ;;  %v2020_v63 = vpop.f32.mrb[54].mxu1  ;;  %v1957_v1 = vpop.f32.mrb[55].mxu0 }
 0x162   :  { %v1193_v3 = vadd.f32 %v1955_v60, %v2551_v35  ;;  %v1958_v4 = vadd.f32 %v1957_v1, %v1956_v61  ;;  %v2021_v32 = vpop.f32.mrb[55].mxu1 }
 0x163   :  { %v2022_v19 = vadd.f32 %v2021_v32, %v2020_v63 }
 0x164   :  { %v1290_v6 = vadd.f32 %v2019_v17, %v1193_v3  ;;  %v1196_v7 = vadd.f32 %v1958_v4, %v2554_v37 }
 0x166   :  { %v1321_v11 = vadd.f32 %v1320_v59, %v1290_v6  ;;  %v1293_v12 = vadd.f32 %v2022_v19, %v1196_v7  ;;  %v1959_v13 = vpop.f32.mrb[56].mxu0 }
 0x167   :  { %v2023_v15 = vpop.f32.mrb[56].mxu1  ;;  %v1960_v18 = vpop.f32.mrb[57].mxu0 }
 0x168   :  { %v1322_v20 = vadd.f32 %v1321_v11, %v1293_v12  ;;  %v1961_v21 = vadd.f32 %v1960_v18, %v1959_v13  ;;  %v2024_v46 = vpop.f32.mrb[57].mxu1  ;;  %v1962_v22 = vpop.f32.mrb[58].mxu0 }
 0x169   :  { %v2025_v23 = vadd.f32 %v2024_v46, %v2023_v15  ;;  %v2026_v24 = vpop.f32.mrb[58].mxu1  ;;  %v1963_v25 = vpop.f32.mrb[59].mxu0 }
 0x16a   :  { %v1201_v35 = vadd.f32 %v1961_v21, %v2557_v53  ;;  %v1964_v26 = vadd.f32 %v1963_v25, %v1962_v22  ;;  %v2027_v48 = vpop.f32.mrb[59].mxu1 }
 0x16b   :  { %v2028_v2 = vadd.f32 %v2027_v48, %v2026_v24 }
 0x16c   :  { %v1298_v31 = vadd.f32 %v2025_v23, %v1201_v35  ;;  %v1204_v37 = vadd.f32 %v1964_v26, %v2560_v55 }
 0x16e   :  { %v1323_v34 = vadd.f32 %v1322_v20, %v1298_v31  ;;  %v1301_v36 = vadd.f32 %v2028_v2, %v1204_v37  ;;  %v1965_v38 = vpop.f32.mrb[60].mxu0 }
 0x16f   :  { %v2029_v39 = vpop.f32.mrb[60].mxu1  ;;  %v1966_v40 = vpop.f32.mrb[61].mxu0 }
 0x170   :  { %v1324_v41 = vadd.f32 %v1323_v34, %v1301_v36  ;;  %v1967_v14 = vadd.f32 %v1966_v40, %v1965_v38  ;;  %v2030_v62 = vpop.f32.mrb[61].mxu1  ;;  %v1968_v42 = vpop.f32.mrb[62].mxu0 }
 0x171   :  { %v2031_v43 = vadd.f32 %v2030_v62, %v2029_v39  ;;  %v2032_v44 = vpop.f32.mrb[62].mxu1  ;;  %v1969_v45 = vpop.f32.mrb[63].mxu0 }
 0x172   :  { %v1209_v53 = vadd.f32 %v1967_v14, %v2563_v8  ;;  %v1970_v47 = vadd.f32 %v1969_v45, %v1968_v42  ;;  %v2033_v0 = vpop.f32.mrb[63].mxu1 }
 0x173   :  { %v2034_v50 = vadd.f32 %v2033_v0, %v2032_v44 }
 0x174   :  { %v1306_v52 = vadd.f32 %v2031_v43, %v1209_v53  ;;  %v1212_v55 = vadd.f32 %v1970_v47, %v2566_v10 }
 0x176   :  { %v1325_v56 = vadd.f32 %v1324_v41, %v1306_v52  ;;  %v1309_v57 = vadd.f32 %v2034_v50, %v1212_v55 }
 0x178   :  { %v1326_v58 = vadd.f32 %v1325_v56, %v1309_v57 }
 0x17a   :  { %v1327_v59 = vrot.slane %v1326_v58, 4 }
 0x17c   :  { %v1328_v60 = vadd.f32 %v1327_v59, %v1326_v58 }
 0x17e   :  { %v1329_v30 = vrot.slane %v1328_v60, 2 }
 0x180   :  { %v1330_v61 = vadd.f32 %v1329_v30, %v1328_v60 }
 0x182   :  { %v1331_v17 = vrot.slane %v1330_v61, 1 }
 0x184   :  { %v1332_v63 = vadd.f32 %v1331_v17, %v1330_v61 }
 0x186   :  { %v1334_v1 = vmul.f32 0.0078125, %v1332_v63 }
 0x188   :  { %v1335_v3 = vsub.f32 %v2569_v28, %v1334_v1  ;;  %v1336_v8 = vsub.f32 %v2572_v29, %v1334_v1  ;;  %v1337_v4 = vsub.f32 %v2577_v16, %v1334_v1  ;;  %v1338_v32 = vsub.f32 %v2581_v51, %v1334_v1 }
 0x189   :  { %v1339_v10 = vsub.f32 %v2585_v5, %v1334_v1  ;;  %v1340_v19 = vsub.f32 %v2589_v9, %v1334_v1  ;;  %v1341_v7 = vsub.f32 %v2593_v27, %v1334_v1  ;;  %v1342_v11 = vsub.f32 %v2597_v33, %v1334_v1 }
 0x18a   :  { %v1343_v13 = vsub.f32 %v2601_v49, %v1334_v1  ;;  %v1344_v15 = vsub.f32 %v2605_v54, %v1334_v1  ;;  %v1345_v18 = vsub.f32 %v1290_v6, %v1334_v1  ;;  %v1346_v28 = vsub.f32 %v1293_v12, %v1334_v1 }
 0x18b   :  { %v1347_v20 = vsub.f32 %v1298_v31, %v1334_v1  ;;  %v1348_v29 = vsub.f32 %v1301_v36, %v1334_v1  ;;  %v1349_v21 = vsub.f32 %v1306_v52, %v1334_v1  ;;  %v1350_v16 = vsub.f32 %v1309_v57, %v1334_v1 }
 0x18c   :  { %v1351_v46 = vmul.f32 %v1335_v3, %v1335_v3  ;;  %v1352_v51 = vmul.f32 %v1336_v8, %v1336_v8  ;;  %v1353_v22 = vmul.f32 %v1337_v4, %v1337_v4  ;;  %v1354_v23 = vmul.f32 %v1338_v32, %v1338_v32 }
 0x18d   :  { %v1355_v24 = vmul.f32 %v1339_v10, %v1339_v10  ;;  %v1356_v25 = vmul.f32 %v1340_v19, %v1340_v19  ;;  %v1357_v35 = vmul.f32 %v1341_v7, %v1341_v7  ;;  %v1358_v26 = vmul.f32 %v1342_v11, %v1342_v11 }
 0x18e   :  { %v1367_v5 = vadd.f32 %v1352_v51, %v1351_v46  ;;  %v1359_v6 = vmul.f32 %v1343_v13, %v1343_v13  ;;  %v1360_v48 = vmul.f32 %v1344_v15, %v1344_v15  ;;  %v1361_v31 = vmul.f32 %v1345_v18, %v1345_v18  ;;  %v1698_v46 = vld [vmem:[%s2657_s3] ss:$0 sm:$0xff] }
 0x18f   :  { %v1362_v34 = vmul.f32 %v1346_v28, %v1346_v28  ;;  %v1363_v38 = vmul.f32 %v1347_v20, %v1347_v20  ;;  %v1364_v40 = vmul.f32 %v1348_v29, %v1348_v29  ;;  %v1365_v14 = vmul.f32 %v1349_v21, %v1349_v21 }
 0x190   :  { %v1368_v9 = vadd.f32 %v1367_v5, %v1353_v22  ;;  %v1366_v42 = vmul.f32 %v1350_v16, %v1350_v16 }
 0x192   :  { %v1369_v27 = vadd.f32 %v1368_v9, %v1354_v23 }
 0x194   :  { %v1370_v33 = vadd.f32 %v1369_v27, %v1355_v24 }
 0x196   :  { %v1371_v49 = vadd.f32 %v1370_v33, %v1356_v25 }
 0x198   :  { %v1372_v54 = vadd.f32 %v1371_v49, %v1357_v35 }
 0x19a   :  { %v1373_v12 = vadd.f32 %v1372_v54, %v1358_v26 }
 0x19c   :  { %v1374_v2 = vadd.f32 %v1373_v12, %v1359_v6 }
 0x19e   :  { %v1375_v37 = vadd.f32 %v1374_v2, %v1360_v48 }
 0x1a0   :  { %v1376_v36 = vadd.f32 %v1375_v37, %v1361_v31 }
 0x1a2   :  { %v1377_v39 = vadd.f32 %v1376_v36, %v1362_v34 }
 0x1a4   :  { %v1378_v41 = vadd.f32 %v1377_v39, %v1363_v38 }
 0x1a6   :  { %v1379_v62 = vadd.f32 %v1378_v41, %v1364_v40 }
 0x1a8   :  { %v1380_v43 = vadd.f32 %v1379_v62, %v1365_v14 }
 0x1aa   :  { %v1381_v44 = vadd.f32 %v1380_v43, %v1366_v42 }
 0x1ac   :  { %v1382_v45 = vrot.slane %v1381_v44, 4 }
 0x1ae   :  { %v1383_v53 = vadd.f32 %v1382_v45, %v1381_v44 }
 0x1b0   :  { %v1384_v47 = vrot.slane %v1383_v53, 2 }
 0x1b2   :  { %v1385_v0 = vadd.f32 %v1384_v47, %v1383_v53 }
 0x1b4   :  { %v1386_v50 = vrot.slane %v1385_v0, 1 }
 0x1b6   :  { %v1387_v52 = vadd.f32 %v1386_v50, %v1385_v0 }
 0x1b8   :  { %v1388_v55 = vmul.f32 0.0078125, %v1387_v52 }
 0x1ba   :  { %v1389_v56 = vadd.f32 1e-05, %v1388_v55 }
 0x1bc   :  { %2099 = vrsqrt.f32 %v1389_v56 }
 0x1c6   :  { %v2100_v57 = vpop.eup %2099 }
 0x1c7   :  { %v1391_v58 = vmul.f32 %v2100_v57, %v1335_v3  ;;  %v1392_v59 = vmul.f32 %v2100_v57, %v1336_v8  ;;  %v1393_v60 = vmul.f32 %v2100_v57, %v1337_v4  ;;  %v1394_v30 = vmul.f32 %v2100_v57, %v1338_v32 }
 0x1c8   :  { %v1395_v61 = vmul.f32 %v2100_v57, %v1339_v10  ;;  %v1396_v17 = vmul.f32 %v2100_v57, %v1340_v19  ;;  %v1397_v63 = vmul.f32 %v2100_v57, %v1341_v7  ;;  %v1398_v1 = vmul.f32 %v2100_v57, %v1342_v11  ;;  %v1699_v7 = vld [vmem:[%s2658_s4] ss:$0 sm:$0xff] }
 0x1c9   :  { %v1399_v51 = vmul.f32 %v2100_v57, %v1343_v13  ;;  %v1400_v22 = vmul.f32 %v2100_v57, %v1344_v15  ;;  %v1401_v5 = vmul.f32 %v2100_v57, %v1345_v18  ;;  %v1402_v23 = vmul.f32 %v2100_v57, %v1346_v28 }
 0x1ca   :  { %v1403_v9 = vmul.f32 %v2100_v57, %v1347_v20  ;;  %v1404_v24 = vmul.f32 %v2100_v57, %v1348_v29  ;;  %v1405_v27 = vmul.f32 %v2100_v57, %v1349_v21  ;;  %v1406_v25 = vmul.f32 %v2100_v57, %v1350_v16 }
 0x1cb   :  { %v1414_v3 = vmul.f32 %v1698_v46, %v1391_v58  ;;  %v1415_v8 = vmul.f32 %v1698_v46, %v1392_v59  ;;  %v1416_v4 = vmul.f32 %v1698_v46, %v1393_v60  ;;  %v1417_v32 = vmul.f32 %v1698_v46, %v1394_v30 }
 0x1cc   :  { %v1418_v10 = vmul.f32 %v1698_v46, %v1395_v61  ;;  %v1419_v19 = vmul.f32 %v1698_v46, %v1396_v17  ;;  %v1420_v11 = vmul.f32 %v1698_v46, %v1397_v63  ;;  %v1421_v33 = vmul.f32 %v1698_v46, %v1398_v1 }
 0x1cd   :  { %v1422_v13 = vmul.f32 %v1698_v46, %v1399_v51  ;;  %v1423_v15 = vmul.f32 %v1698_v46, %v1400_v22  ;;  %v1424_v18 = vmul.f32 %v1698_v46, %v1401_v5  ;;  %v1425_v28 = vmul.f32 %v1698_v46, %v1402_v23 }
 0x1ce   :  { %v1426_v20 = vmul.f32 %v1698_v46, %v1403_v9  ;;  %v1427_v29 = vmul.f32 %v1698_v46, %v1404_v24  ;;  %v1428_v21 = vmul.f32 %v1698_v46, %v1405_v27  ;;  %v1437_v16 = vadd.f32 %v1699_v7, %v1414_v3 }
 0x1cf   :  { %v1438_v35 = vadd.f32 %v1699_v7, %v1415_v8  ;;  %v1439_v49 = vadd.f32 %v1699_v7, %v1416_v4  ;;  %v1429_v26 = vmul.f32 %v1698_v46, %v1406_v25  ;;  %v1440_v54 = vadd.f32 %v1699_v7, %v1417_v32 }
 0x1d0   :  { %v1441_v6 = vadd.f32 %v1699_v7, %v1418_v10  ;;  %v1442_v12 = vadd.f32 %v1699_v7, %v1419_v19  ;;  %v1443_v48 = vadd.f32 %v1699_v7, %v1420_v11  ;;  %v1444_v2 = vadd.f32 %v1699_v7, %v1421_v33 }
 0x1d1   :  { %v1445_v31 = vadd.f32 %v1699_v7, %v1422_v13  ;;  %v1446_v37 = vadd.f32 %v1699_v7, %v1423_v15  ;;  %v1447_v34 = vadd.f32 %v1699_v7, %v1424_v18  ;;  %v1448_v36 = vadd.f32 %v1699_v7, %v1425_v28 }
 0x1d2   :  { %v1449_v38 = vadd.f32 %v1699_v7, %v1426_v20  ;;  %v1450_v39 = vadd.f32 %v1699_v7, %v1427_v29  ;;  %v1451_v40 = vadd.f32 %v1699_v7, %v1428_v21  ;;  %v1453_v41 = vmul.f32 0.2, %v1437_v16 }
 0x1d3   :  { %v1454_v14 = vmul.f32 0.2, %v1438_v35  ;;  %v1455_v62 = vmul.f32 0.2, %v1439_v49  ;;  %v1452_v42 = vadd.f32 %v1699_v7, %v1429_v26  ;;  %v1456_v43 = vmul.f32 0.2, %v1440_v54 }
 0x1d4   :  { %v1457_v44 = vmul.f32 0.2, %v1441_v6  ;;  %v1458_v45 = vmul.f32 0.2, %v1442_v12  ;;  %v1459_v53 = vmul.f32 0.2, %v1443_v48  ;;  %v1469_v50 = vmax.f32 %v1437_v16, %v1453_v41 }
 0x1d5   :  { %v1460_v47 = vmul.f32 0.2, %v1444_v2  ;;  %v1461_v0 = vmul.f32 0.2, %v1445_v31  ;;  %v1462_v52 = vmul.f32 0.2, %v1446_v37  ;;  %v1470_v57 = vmax.f32 %v1438_v35, %v1454_v14 }
 0x1d6   :  { %v1463_v55 = vmul.f32 0.2, %v1447_v34  ;;  %v1464_v56 = vmul.f32 0.2, %v1448_v36  ;;  %v1465_v58 = vmul.f32 0.2, %v1449_v38  ;;  %v1471_v30 = vmax.f32 %v1439_v49, %v1455_v62 }
 0x1d7   :  { %v1466_v59 = vmul.f32 0.2, %v1450_v39  ;;  %v1467_v60 = vmul.f32 0.2, %v1451_v40  ;;  %v1468_v61 = vmul.f32 0.2, %v1452_v42  ;;  %v1472_v17 = vmax.f32 %v1440_v54, %v1456_v43 }
 0x1d8   :  { %v1473_v63 = vmax.f32 %v1441_v6, %v1457_v44  ;;  %v1474_v1 = vmax.f32 %v1442_v12, %v1458_v45  ;;  %v1475_v46 = vmax.f32 %v1443_v48, %v1459_v53  ;;  %v1476_v51 = vmax.f32 %v1444_v2, %v1460_v47 }
 0x1d9   :  { %v1477_v22 = vmax.f32 %v1445_v31, %v1461_v0  ;;  %v1478_v5 = vmax.f32 %v1446_v37, %v1462_v52  ;;  %v1479_v23 = vmax.f32 %v1447_v34, %v1463_v55  ;;  %v1480_v9 = vmax.f32 %v1448_v36, %v1464_v56 }
 0x1da   :  { %v1481_v24 = vmax.f32 %v1449_v38, %v1465_v58  ;;  %v1482_v27 = vmax.f32 %v1450_v39, %v1466_v59  ;;  %v1483_v25 = vmax.f32 %v1451_v40, %v1467_v60  ;;  %v1484_v3 = vmax.f32 %v1452_v42, %v1468_v61 }
 0x1db   :  { %v1735_v8 = vpack.c.bf16 %v1470_v57, %v1469_v50  ;;  %v1740_v4 = vpack.c.bf16 %v1472_v17, %v1471_v30  ;;  %v1745_v32 = vpack.c.bf16 %v1474_v1, %v1473_v63  ;;  %v1750_v10 = vpack.c.bf16 %v1476_v51, %v1475_v46 }
 0x1dc   :  { %v1755_v19 = vpack.c.bf16 %v1478_v5, %v1477_v22  ;;  %v1760_v7 = vpack.c.bf16 %v1480_v9, %v1479_v23  ;;  %v1765_v11 = vpack.c.bf16 %v1482_v27, %v1481_v24  ;;  %v1770_v33 = vpack.c.bf16 %v1484_v3, %v1483_v25 }
 0x1dd   :  { %1736 = vst [vmem:[%s2659_s5] sm:$0xff] %v1735_v8   ;;  %1772 = vst [vmem:[%s2659_s5 + $0x8] sm:$0xff] %v1740_v4  }
 0x1de   :  { %1773 = vst [vmem:[%s2659_s5 + $0x10] sm:$0xff] %v1745_v32   ;;  %1774 = vst [vmem:[%s2659_s5 + $0x18] sm:$0xff] %v1750_v10  }
 0x1df   :  { %1775 = vst [vmem:[%s2659_s5 + $0x20] sm:$0xff] %v1755_v19   ;;  %1776 = vst [vmem:[%s2659_s5 + $0x28] sm:$0xff] %v1760_v7  }
 0x1e0   :  { %1777 = vst [vmem:[%s2659_s5 + $0x30] sm:$0xff] %v1765_v11   ;;  %1778 = vst [vmem:[%s2659_s5 + $0x38] sm:$0xff] %v1770_v33  }

// kernel: _lambda_.7
= control target key start
LH: loop header
LB: loop body
LE: loop exit
PB: predicated region body
PF: predicated region fallthrough
CT: control target
= control target key end

     0   :  { %s4062_s1 = inlined_call_operand.vmem [shape: bf16[2048,256], index: 1, kind: input, shape index: {}]   ;;  %s4063_s0 = inlined_call_operand.vmem [shape: bf16[32,2048], index: 0, kind: input, shape index: {}]   ;;  %s4064_s2 = inlined_call_operand.vmem [shape: f32[1,256], index: 2, kind: input, shape index: {}]   ;;  %s4065_s3 = inlined_call_operand.vmem [shape: f32[1,256], index: 3, kind: input, shape index: {}]   ;;  %s4066_s4 = inlined_call_operand.vmem [shape: f32[1,256], index: 4, kind: input, shape index: {}]   ;;  %s4067_s5 = inlined_call_operand.vmem [shape: bf16[32,256], index: 5, kind: output, shape index: {}]  }
   0x1   :  { %v2701_v0 = vld [vmem:[%s4062_s1 + $0x4] ss:$8 sps:$4 sm:$0xff]   ;;  %v2705_v2 = vld [vmem:[%s4062_s1] ss:$8 sps:$4 sm:$0xff]   ;;  %v2707_v4 = vld [vmem:[%s4062_s1 + $0x14] ss:$8 sps:$4 sm:$0xff]  }
   0x2   :  { %v2703_v1 = vld [vmem:[%s4062_s1 + $0x404] ss:$8 sps:$4 sm:$0xff]   ;;  %1760 = vmatprep.subr.bf16.mxu1 %v2701_v0  ;;  %v2706_v3 = vld [vmem:[%s4062_s1 + $0x400] ss:$8 sps:$4 sm:$0xff]   ;;  %v2709_v5 = vld [vmem:[%s4062_s1 + $0x414] ss:$8 sps:$4 sm:$0xff]  }
   0x3   :  { %1972 = vmatprep.subr.bf16.mxu0 %v2703_v1  ;;  %1761 = vmatpush1.bf16.msra.mxu1 %v2705_v2  ;;  %v2711_v6 = vld [vmem:[%s4062_s1 + $0x10] ss:$8 sps:$4 sm:$0xff]   ;;  %v2713_v8 = vld [vmem:[%s4062_s1 + $0x24] ss:$8 sps:$4 sm:$0xff]   ;;  %v2717_v10 = vld [vmem:[%s4062_s1 + $0x20] ss:$8 sps:$4 sm:$0xff]  }
   0x4   :  { %1973 = vmatpush1.bf16.msra.mxu0 %v2706_v3  ;;  %1762 = vmatprep.subr.bf16.mxu1 %v2707_v4  ;;  %v2712_v7 = vld [vmem:[%s4062_s1 + $0x410] ss:$8 sps:$4 sm:$0xff]   ;;  %v2715_v9 = vld [vmem:[%s4062_s1 + $0x424] ss:$8 sps:$4 sm:$0xff]   ;;  %v2718_v11 = vld [vmem:[%s4062_s1 + $0x420] ss:$8 sps:$4 sm:$0xff]  }
   0x5   :  { %1974 = vmatprep.subr.bf16.mxu0 %v2709_v5  ;;  %v2719_v12 = vld [vmem:[%s4062_s1 + $0x34] ss:$8 sps:$4 sm:$0xff]   ;;  %v2723_v14 = vld [vmem:[%s4062_s1 + $0x30] ss:$8 sps:$4 sm:$0xff]   ;;  %v2725_v16 = vld [vmem:[%s4062_s1 + $0x44] ss:$8 sps:$4 sm:$0xff]  }
   0x6   :  { %v2721_v13 = vld [vmem:[%s4062_s1 + $0x434] ss:$8 sps:$4 sm:$0xff]   ;;  %v2724_v15 = vld [vmem:[%s4062_s1 + $0x430] ss:$8 sps:$4 sm:$0xff]   ;;  %v2727_v17 = vld [vmem:[%s4062_s1 + $0x444] ss:$8 sps:$4 sm:$0xff]  }
   0x7   :  { %1763 = vmatpush1.bf16.msra.mxu1 %v2711_v6  ;;  %v2729_v18 = vld [vmem:[%s4062_s1 + $0x40] ss:$8 sps:$4 sm:$0xff]   ;;  %v2731_v20 = vld [vmem:[%s4062_s1 + $0x54] ss:$8 sps:$4 sm:$0xff]   ;;  %v2735_v22 = vld [vmem:[%s4062_s1 + $0x50] ss:$8 sps:$4 sm:$0xff]  }
   0x8   :  { %1975 = vmatpush1.bf16.msra.mxu0 %v2712_v7  ;;  %1764 = vmatprep.subr.bf16.mxu1 %v2713_v8  ;;  %v2730_v19 = vld [vmem:[%s4062_s1 + $0x440] ss:$8 sps:$4 sm:$0xff]   ;;  %v2733_v21 = vld [vmem:[%s4062_s1 + $0x454] ss:$8 sps:$4 sm:$0xff]   ;;  %v2736_v23 = vld [vmem:[%s4062_s1 + $0x450] ss:$8 sps:$4 sm:$0xff]  }
   0x9   :  { %1976 = vmatprep.subr.bf16.mxu0 %v2715_v9  ;;  %v2737_v24 = vld [vmem:[%s4062_s1 + $0x64] ss:$8 sps:$4 sm:$0xff]   ;;  %v2741_v26 = vld [vmem:[%s4062_s1 + $0x60] ss:$8 sps:$4 sm:$0xff]   ;;  %v2743_v28 = vld [vmem:[%s4062_s1 + $0x74] ss:$8 sps:$4 sm:$0xff]  }
   0xa   :  { %v2739_v25 = vld [vmem:[%s4062_s1 + $0x464] ss:$8 sps:$4 sm:$0xff]   ;;  %v2742_v27 = vld [vmem:[%s4062_s1 + $0x460] ss:$8 sps:$4 sm:$0xff]   ;;  %v2745_v29 = vld [vmem:[%s4062_s1 + $0x474] ss:$8 sps:$4 sm:$0xff]  }
   0xb   :  { %1765 = vmatpush1.bf16.msra.mxu1 %v2717_v10  ;;  %v2747_v30 = vld [vmem:[%s4062_s1 + $0x70] ss:$8 sps:$4 sm:$0xff]   ;;  %v2749_v32 = vld [vmem:[%s4062_s1 + $0x84] ss:$8 sps:$4 sm:$0xff]   ;;  %v2753_v34 = vld [vmem:[%s4062_s1 + $0x80] ss:$8 sps:$4 sm:$0xff]  }
   0xc   :  { %1977 = vmatpush1.bf16.msra.mxu0 %v2718_v11  ;;  %1766 = vmatprep.subr.bf16.mxu1 %v2719_v12  ;;  %v2748_v31 = vld [vmem:[%s4062_s1 + $0x470] ss:$8 sps:$4 sm:$0xff]   ;;  %v2751_v33 = vld [vmem:[%s4062_s1 + $0x484] ss:$8 sps:$4 sm:$0xff]   ;;  %v2754_v35 = vld [vmem:[%s4062_s1 + $0x480] ss:$8 sps:$4 sm:$0xff]  }
   0xd   :  { %1978 = vmatprep.subr.bf16.mxu0 %v2721_v13  ;;  %v2755_v36 = vld [vmem:[%s4062_s1 + $0x94] ss:$8 sps:$4 sm:$0xff]   ;;  %v2759_v38 = vld [vmem:[%s4062_s1 + $0x90] ss:$8 sps:$4 sm:$0xff]   ;;  %v2761_v40 = vld [vmem:[%s4062_s1 + $0xa4] ss:$8 sps:$4 sm:$0xff]  }
   0xe   :  { %v2757_v37 = vld [vmem:[%s4062_s1 + $0x494] ss:$8 sps:$4 sm:$0xff]   ;;  %v2760_v39 = vld [vmem:[%s4062_s1 + $0x490] ss:$8 sps:$4 sm:$0xff]   ;;  %v2763_v41 = vld [vmem:[%s4062_s1 + $0x4a4] ss:$8 sps:$4 sm:$0xff]  }
   0xf   :  { %1767 = vmatpush1.bf16.msra.mxu1 %v2723_v14  ;;  %v2765_v42 = vld [vmem:[%s4062_s1 + $0xa0] ss:$8 sps:$4 sm:$0xff]   ;;  %v2767_v44 = vld [vmem:[%s4062_s1 + $0xb4] ss:$8 sps:$4 sm:$0xff]   ;;  %v2771_v46 = vld [vmem:[%s4062_s1 + $0xb0] ss:$8 sps:$4 sm:$0xff]  }
  0x10   :  { %1979 = vmatpush1.bf16.msra.mxu0 %v2724_v15  ;;  %1768 = vmatprep.subr.bf16.mxu1 %v2725_v16  ;;  %v2766_v43 = vld [vmem:[%s4062_s1 + $0x4a0] ss:$8 sps:$4 sm:$0xff]   ;;  %v2769_v45 = vld [vmem:[%s4062_s1 + $0x4b4] ss:$8 sps:$4 sm:$0xff]   ;;  %v2772_v47 = vld [vmem:[%s4062_s1 + $0x4b0] ss:$8 sps:$4 sm:$0xff]  }
  0x11   :  { %1980 = vmatprep.subr.bf16.mxu0 %v2727_v17  ;;  %v20_v48 = vld [vmem:[%s4063_s0] sm:$0xff]  ;;  %v2779_v58 = vld [vmem:[%s4062_s1 + $0xd4] ss:$8 sps:$4 sm:$0xff]   ;;  %v2783_v60 = vld [vmem:[%s4062_s1 + $0xd0] ss:$8 sps:$4 sm:$0xff]  }
  0x12   :  { %v28_v49 = vld [vmem:[%s4063_s0 + $0x40] sm:$0xff]  ;;  %v2781_v59 = vld [vmem:[%s4062_s1 + $0x4d4] ss:$8 sps:$4 sm:$0xff]   ;;  %v2784_v61 = vld [vmem:[%s4062_s1 + $0x4d0] ss:$8 sps:$4 sm:$0xff]  }
  0x13   :  { %1769 = vmatpush1.bf16.msra.mxu1 %v2729_v18  ;;  %v2773_v50 = vld [vmem:[%s4062_s1 + $0xc4] ss:$8 sps:$4 sm:$0xff]   ;;  %v2342_v52 = vcombine.high %v20_v48, %v28_v49  ;;  %v2777_v56 = vld [vmem:[%s4062_s1 + $0xc0] ss:$8 sps:$4 sm:$0xff]   ;;  %v2791_v2 = vld [vmem:[%s4062_s1 + $0xf4] ss:$8 sps:$4 sm:$0xff]   ;;  %v2341_v8 = vcombine.low %v20_v48, %v28_v49 }
  0x14   :  { %1981 = vmatpush1.bf16.msra.mxu0 %v2730_v19  ;;  %1770 = vmatprep.subr.bf16.mxu1 %v2731_v20  ;;  %v2775_v51 = vld [vmem:[%s4062_s1 + $0x4c4] ss:$8 sps:$4 sm:$0xff]   ;;  %v2778_v57 = vld [vmem:[%s4062_s1 + $0x4c0] ss:$8 sps:$4 sm:$0xff]   ;;  %v2793_v3 = vld [vmem:[%s4062_s1 + $0x4f4] ss:$8 sps:$4 sm:$0xff]  }
  0x15   :  { %1982 = vmatprep.subr.bf16.mxu0 %v2733_v21  ;;  %v24_v53 = vld [vmem:[%s4063_s0 + $0x20] sm:$0xff]  ;;  %1792 = vmatprep.mubr.bf16.mxu1 %v2342_v52  ;;  %v2795_v4 = vld [vmem:[%s4062_s1 + $0xf0] ss:$8 sps:$4 sm:$0xff]   ;;  %v2805_v12 = vld [vmem:[%s4062_s1 + $0x114] ss:$8 sps:$4 sm:$0xff]  }
  0x16   :  { %v32_v54 = vld [vmem:[%s4063_s0 + $0x60] sm:$0xff]  ;;  %v2796_v5 = vld [vmem:[%s4062_s1 + $0x4f0] ss:$8 sps:$4 sm:$0xff]   ;;  %v2808_v13 = vld [vmem:[%s4062_s1 + $0x514] ss:$8 sps:$4 sm:$0xff]  }
  0x17   :  { %1771 = vmatpush1.bf16.msra.mxu1 %v2735_v22  ;;  %v2350_v55 = vcombine.high %v24_v53, %v32_v54  ;;  %v2785_v62 = vld [vmem:[%s4062_s1 + $0xe4] ss:$8 sps:$4 sm:$0xff]   ;;  %v2789_v0 = vld [vmem:[%s4062_s1 + $0xe0] ss:$8 sps:$4 sm:$0xff]   ;;  %v2349_v10 = vcombine.low %v24_v53, %v32_v54  ;;  %v2803_v14 = vld [vmem:[%s4062_s1 + $0x110] ss:$8 sps:$4 sm:$0xff]  }
  0x18   :  { %1983 = vmatpush1.bf16.msra.mxu0 %v2736_v23  ;;  %1772 = vmatprep.subr.bf16.mxu1 %v2737_v24  ;;  %v2787_v63 = vld [vmem:[%s4062_s1 + $0x4e4] ss:$8 sps:$4 sm:$0xff]   ;;  %v2790_v1 = vld [vmem:[%s4062_s1 + $0x4e0] ss:$8 sps:$4 sm:$0xff]   ;;  %v2806_v15 = vld [vmem:[%s4062_s1 + $0x510] ss:$8 sps:$4 sm:$0xff]  }
  0x19   :  { %1984 = vmatprep.subr.bf16.mxu0 %v2739_v25  ;;  %2004 = vmatprep.mubr.bf16.mxu0 %v2350_v55  ;;  %v2799_v6 = vld [vmem:[%s4062_s1 + $0x104] ss:$8 sps:$4 sm:$0xff]   ;;  %v2797_v9 = vld [vmem:[%s4062_s1 + $0x100] ss:$8 sps:$4 sm:$0xff]   ;;  %v2817_v20 = vld [vmem:[%s4062_s1 + $0x134] ss:$8 sps:$4 sm:$0xff]  }
  0x1a   :  { %v2802_v7 = vld [vmem:[%s4062_s1 + $0x504] ss:$8 sps:$4 sm:$0xff]   ;;  %v2800_v11 = vld [vmem:[%s4062_s1 + $0x500] ss:$8 sps:$4 sm:$0xff]   ;;  %v2820_v21 = vld [vmem:[%s4062_s1 + $0x534] ss:$8 sps:$4 sm:$0xff]  }
  0x1b   :  { %1773 = vmatpush1.bf16.msra.mxu1 %v2741_v26  ;;  %v2811_v16 = vld [vmem:[%s4062_s1 + $0x124] ss:$8 sps:$4 sm:$0xff]   ;;  %v2809_v18 = vld [vmem:[%s4062_s1 + $0x120] ss:$8 sps:$4 sm:$0xff]   ;;  %v2815_v22 = vld [vmem:[%s4062_s1 + $0x130] ss:$8 sps:$4 sm:$0xff]  }
  0x1c   :  { %1985 = vmatpush1.bf16.msra.mxu0 %v2742_v27  ;;  %1774 = vmatprep.subr.bf16.mxu1 %v2743_v28  ;;  %v2814_v17 = vld [vmem:[%s4062_s1 + $0x524] ss:$8 sps:$4 sm:$0xff]   ;;  %v2812_v19 = vld [vmem:[%s4062_s1 + $0x520] ss:$8 sps:$4 sm:$0xff]   ;;  %v2818_v23 = vld [vmem:[%s4062_s1 + $0x530] ss:$8 sps:$4 sm:$0xff]  }
  0x1d   :  { %1986 = vmatprep.subr.bf16.mxu0 %v2745_v29  ;;  %v2823_v24 = vld [vmem:[%s4062_s1 + $0x144] ss:$8 sps:$4 sm:$0xff]   ;;  %v2821_v26 = vld [vmem:[%s4062_s1 + $0x140] ss:$8 sps:$4 sm:$0xff]   ;;  %v2829_v28 = vld [vmem:[%s4062_s1 + $0x154] ss:$8 sps:$4 sm:$0xff]  }
  0x1e   :  { %v2826_v25 = vld [vmem:[%s4062_s1 + $0x544] ss:$8 sps:$4 sm:$0xff]   ;;  %v2824_v27 = vld [vmem:[%s4062_s1 + $0x540] ss:$8 sps:$4 sm:$0xff]   ;;  %v2832_v29 = vld [vmem:[%s4062_s1 + $0x554] ss:$8 sps:$4 sm:$0xff]  }
  0x1f   :  { %1775 = vmatpush1.bf16.msra.mxu1 %v2747_v30  ;;  %v36_v30 = vld [vmem:[%s4063_s0 + $0x80] sm:$0xff]  ;;  %v3440_v49 = vld [vmem:[%s4063_s0 + $0x28] sm:$0xff]  ;;  %v2842_v52 = vld [vmem:[%s4062_s1 + $0x570] ss:$8 sps:$4 sm:$0xff]  }
  0x20   :  { %1987 = vmatpush1.bf16.msra.mxu0 %v2748_v31  ;;  %1776 = vmatprep.subr.bf16.mxu1 %v2749_v32  ;;  %v44_v31 = vld [vmem:[%s4063_s0 + $0xc0] sm:$0xff]  ;;  %v2827_v32 = vld [vmem:[%s4062_s1 + $0x150] ss:$8 sps:$4 sm:$0xff]  }
  0x21   :  { %1988 = vmatprep.subr.bf16.mxu0 %v2751_v33  ;;  %v2358_v33 = vcombine.high %v36_v30, %v44_v31  ;;  %v2847_v54 = vld [vmem:[%s4062_s1 + $0x184] ss:$8 sps:$4 sm:$0xff]  }
  0x22   :  { %v2850_v55 = vld [vmem:[%s4062_s1 + $0x584] ss:$8 sps:$4 sm:$0xff]  }
  0x23   :  { %1777 = vmatpush1.bf16.msra.mxu1 %v2753_v34  ;;  %v2830_v34 = vld [vmem:[%s4062_s1 + $0x550] ss:$8 sps:$4 sm:$0xff]  }
  0x24   :  { %1989 = vmatpush1.bf16.msra.mxu0 %v2754_v35  ;;  %1778 = vmatprep.subr.bf16.mxu1 %v2755_v36  ;;  %v40_v35 = vld [vmem:[%s4063_s0 + $0xa0] sm:$0xff] }
  0x25   :  { %1990 = vmatprep.subr.bf16.mxu0 %v2757_v37  ;;  %v48_v36 = vld [vmem:[%s4063_s0 + $0xe0] sm:$0xff]  ;;  %v2357_v37 = vcombine.low %v36_v30, %v44_v31  ;;  %v2901_v30 = vld [vmem:[%s4062_s1 + $0x214] ss:$8 sps:$4 sm:$0xff]  }
  0x26   :  { %v2904_v31 = vld [vmem:[%s4062_s1 + $0x614] ss:$8 sps:$4 sm:$0xff]  }
  0x27   :  { %1779 = vmatpush1.bf16.msra.mxu1 %v2759_v38  ;;  %v2835_v38 = vld [vmem:[%s4062_s1 + $0x164] ss:$8 sps:$4 sm:$0xff]  }
  0x28   :  { %1991 = vmatpush1.bf16.msra.mxu0 %v2760_v39  ;;  %1780 = vmatprep.subr.bf16.mxu1 %v2761_v40  ;;  %v2366_v39 = vcombine.high %v40_v35, %v48_v36  ;;  %v2365_v40 = vcombine.low %v40_v35, %v48_v36  ;;  %v2899_v36 = vld [vmem:[%s4062_s1 + $0x210] ss:$8 sps:$4 sm:$0xff]  }
  0x29   :  { %1992 = vmatprep.subr.bf16.mxu0 %v2763_v41  ;;  %v2838_v41 = vld [vmem:[%s4062_s1 + $0x564] ss:$8 sps:$4 sm:$0xff]  }
  0x2b   :  { %1781 = vmatpush1.bf16.msra.mxu1 %v2765_v42  ;;  %v2833_v42 = vld [vmem:[%s4062_s1 + $0x160] ss:$8 sps:$4 sm:$0xff]  }
  0x2c   :  { %1993 = vmatpush1.bf16.msra.mxu0 %v2766_v43  ;;  %1782 = vmatprep.subr.bf16.mxu1 %v2767_v44  ;;  %v2836_v43 = vld [vmem:[%s4062_s1 + $0x560] ss:$8 sps:$4 sm:$0xff]  }
  0x2d   :  { %1994 = vmatprep.subr.bf16.mxu0 %v2769_v45  ;;  %v3422_v44 = vld [vmem:[%s4063_s0 + $0x8] sm:$0xff] }
  0x2e   :  { %v3427_v45 = vld [vmem:[%s4063_s0 + $0x48] sm:$0xff] }
  0x2f   :  { %1783 = vmatpush1.bf16.msra.mxu1 %v2771_v46  ;;  %v2841_v46 = vld [vmem:[%s4062_s1 + $0x174] ss:$8 sps:$4 sm:$0xff]   ;;  %v2344_v48 = vcombine.high %v3422_v44, %v3427_v45 }
  0x30   :  { %1995 = vmatpush1.bf16.msra.mxu0 %v2772_v47  ;;  %1784 = vmatprep.subr.bf16.mxu1 %v2773_v50  ;;  %v2844_v47 = vld [vmem:[%s4062_s1 + $0x574] ss:$8 sps:$4 sm:$0xff]   ;;  %v3445_v50 = vld [vmem:[%s4063_s0 + $0x68] sm:$0xff] }
  0x31   :  { %1996 = vmatprep.subr.bf16.mxu0 %v2775_v51  ;;  %v2839_v51 = vld [vmem:[%s4062_s1 + $0x170] ss:$8 sps:$4 sm:$0xff]   ;;  %v2352_v53 = vcombine.high %v3440_v49, %v3445_v50 }
  0x33   :  { %1785 = vmatpush1.bf16.msra.mxu1 %v2777_v56  ;;  %v2845_v56 = vld [vmem:[%s4062_s1 + $0x180] ss:$8 sps:$4 sm:$0xff]  }
  0x34   :  { %1997 = vmatpush1.bf16.msra.mxu0 %v2778_v57  ;;  %1786 = vmatprep.subr.bf16.mxu1 %v2779_v58  ;;  %v2848_v57 = vld [vmem:[%s4062_s1 + $0x580] ss:$8 sps:$4 sm:$0xff]   ;;  %v2853_v58 = vld [vmem:[%s4062_s1 + $0x194] ss:$8 sps:$4 sm:$0xff]  }
  0x35   :  { %1998 = vmatprep.subr.bf16.mxu0 %v2781_v59  ;;  %v2856_v59 = vld [vmem:[%s4062_s1 + $0x594] ss:$8 sps:$4 sm:$0xff]  }
  0x37   :  { %1787 = vmatpush1.bf16.msra.mxu1 %v2783_v60  ;;  %v2851_v60 = vld [vmem:[%s4062_s1 + $0x190] ss:$8 sps:$4 sm:$0xff]  }
  0x38   :  { %1999 = vmatpush1.bf16.msra.mxu0 %v2784_v61  ;;  %1788 = vmatprep.subr.bf16.mxu1 %v2785_v62  ;;  %v2854_v61 = vld [vmem:[%s4062_s1 + $0x590] ss:$8 sps:$4 sm:$0xff]   ;;  %v2859_v62 = vld [vmem:[%s4062_s1 + $0x1a4] ss:$8 sps:$4 sm:$0xff]  }
  0x39   :  { %2000 = vmatprep.subr.bf16.mxu0 %v2787_v63  ;;  %v2862_v63 = vld [vmem:[%s4062_s1 + $0x5a4] ss:$8 sps:$4 sm:$0xff]  }
  0x3b   :  { %1789 = vmatpush1.bf16.msra.mxu1 %v2789_v0  ;;  %v2857_v0 = vld [vmem:[%s4062_s1 + $0x1a0] ss:$8 sps:$4 sm:$0xff]  }
  0x3c   :  { %2001 = vmatpush1.bf16.msra.mxu0 %v2790_v1  ;;  %1790 = vmatprep.subr.bf16.mxu1 %v2791_v2  ;;  %v2860_v1 = vld [vmem:[%s4062_s1 + $0x5a0] ss:$8 sps:$4 sm:$0xff]   ;;  %v2865_v2 = vld [vmem:[%s4062_s1 + $0x1b4] ss:$8 sps:$4 sm:$0xff]  }
  0x3d   :  { %2002 = vmatprep.subr.bf16.mxu0 %v2793_v3  ;;  %v2868_v3 = vld [vmem:[%s4062_s1 + $0x5b4] ss:$8 sps:$4 sm:$0xff]  }
  0x3f   :  { %1791 = vmatpush1.bf16.msra.mxu1 %v2795_v4  ;;  %v2863_v4 = vld [vmem:[%s4062_s1 + $0x1b0] ss:$8 sps:$4 sm:$0xff]  }
  0x40   :  { %2003 = vmatpush1.bf16.msra.mxu0 %v2796_v5  ;;  %1813 = vmatprep.subr.bf16.mxu1 %v2799_v6  ;;  %v2866_v5 = vld [vmem:[%s4062_s1 + $0x5b0] ss:$8 sps:$4 sm:$0xff]   ;;  %v2871_v6 = vld [vmem:[%s4062_s1 + $0x1c4] ss:$8 sps:$4 sm:$0xff]  }
  0x41   :  { %2025 = vmatprep.subr.bf16.mxu0 %v2802_v7  ;;  %v2874_v7 = vld [vmem:[%s4062_s1 + $0x5c4] ss:$8 sps:$4 sm:$0xff]  }
  0x42   :  { %1793 = vmatmul.mubr.bf16.vlgmr.msra.gmra.mrb[0].mxu1 %v2341_v8  ;;  %v2869_v8 = vld [vmem:[%s4062_s1 + $0x1c0] ss:$8 sps:$4 sm:$0xff]  }
  0x43   :  { %2005 = vmatmul.mubr.bf16.vlgmr.msra.gmra.mrb[0].mxu0 %v2349_v10  ;;  %1814 = vmatpush1.bf16.msra.mxu1 %v2797_v9  ;;  %v2872_v9 = vld [vmem:[%s4062_s1 + $0x5c0] ss:$8 sps:$4 sm:$0xff]   ;;  %v2877_v10 = vld [vmem:[%s4062_s1 + $0x1d4] ss:$8 sps:$4 sm:$0xff]  }
  0x44   :  { %2026 = vmatpush1.bf16.msra.mxu0 %v2800_v11  ;;  %1815 = vmatprep.subr.bf16.mxu1 %v2805_v12  ;;  %v2880_v11 = vld [vmem:[%s4062_s1 + $0x5d4] ss:$8 sps:$4 sm:$0xff]   ;;  %v2875_v12 = vld [vmem:[%s4062_s1 + $0x1d0] ss:$8 sps:$4 sm:$0xff]  }
  0x45   :  { %2027 = vmatprep.subr.bf16.mxu0 %v2808_v13  ;;  %1802 = vmatprep.mubr.bf16.mxu1 %v2358_v33  ;;  %v2878_v13 = vld [vmem:[%s4062_s1 + $0x5d0] ss:$8 sps:$4 sm:$0xff]   ;;  %v49_v33 = vld [vmem:[%s4063_s0 + $0xe8] sm:$0xff] }
  0x46   :  { %2014 = vmatprep.mubr.bf16.mxu0 %v2366_v39  ;;  %v2910_v39 = vld [vmem:[%s4062_s1 + $0x624] ss:$8 sps:$4 sm:$0xff]  }
  0x47   :  { %1816 = vmatpush1.bf16.msra.mxu1 %v2803_v14  ;;  %v2883_v14 = vld [vmem:[%s4062_s1 + $0x1e4] ss:$8 sps:$4 sm:$0xff]  }
  0x48   :  { %2028 = vmatpush1.bf16.msra.mxu0 %v2806_v15  ;;  %1817 = vmatprep.subr.bf16.mxu1 %v2811_v16  ;;  %v2886_v15 = vld [vmem:[%s4062_s1 + $0x5e4] ss:$8 sps:$4 sm:$0xff]   ;;  %v2881_v16 = vld [vmem:[%s4062_s1 + $0x1e0] ss:$8 sps:$4 sm:$0xff]  }
  0x49   :  { %2029 = vmatprep.subr.bf16.mxu0 %v2814_v17  ;;  %v2884_v17 = vld [vmem:[%s4062_s1 + $0x5e0] ss:$8 sps:$4 sm:$0xff]  }
  0x4a   :  { %1803 = vmatmul.mubr.bf16.gmra.mrb[4].mxu1 %v2357_v37  ;;  %v2902_v37 = vld [vmem:[%s4062_s1 + $0x610] ss:$8 sps:$4 sm:$0xff]  }
  0x4b   :  { %1818 = vmatpush1.bf16.msra.mxu1 %v2809_v18  ;;  %2015 = vmatmul.mubr.bf16.gmra.mrb[4].mxu0 %v2365_v40  ;;  %v2889_v18 = vld [vmem:[%s4062_s1 + $0x1f4] ss:$8 sps:$4 sm:$0xff]   ;;  %v2905_v40 = vld [vmem:[%s4062_s1 + $0x220] ss:$8 sps:$4 sm:$0xff]  }
  0x4c   :  { %2030 = vmatpush1.bf16.msra.mxu0 %v2812_v19  ;;  %1819 = vmatprep.subr.bf16.mxu1 %v2817_v20  ;;  %v2892_v19 = vld [vmem:[%s4062_s1 + $0x5f4] ss:$8 sps:$4 sm:$0xff]   ;;  %v2887_v20 = vld [vmem:[%s4062_s1 + $0x1f0] ss:$8 sps:$4 sm:$0xff]  }
  0x4d   :  { %2031 = vmatprep.subr.bf16.mxu0 %v2820_v21  ;;  %1845 = vmatprep.mubr.bf16.mxu1 %v2344_v48  ;;  %v2890_v21 = vld [vmem:[%s4062_s1 + $0x5f0] ss:$8 sps:$4 sm:$0xff]   ;;  %v2913_v48 = vld [vmem:[%s4062_s1 + $0x234] ss:$8 sps:$4 sm:$0xff]  }
  0x4e   :  { %2057 = vmatprep.mubr.bf16.mxu0 %v2352_v53  ;;  %v2914_v53 = vld [vmem:[%s4062_s1 + $0x630] ss:$8 sps:$4 sm:$0xff]  }
  0x4f   :  { %1820 = vmatpush1.bf16.msra.mxu1 %v2815_v22  ;;  %v2895_v22 = vld [vmem:[%s4062_s1 + $0x204] ss:$8 sps:$4 sm:$0xff]  }
  0x50   :  { %2032 = vmatpush1.bf16.msra.mxu0 %v2818_v23  ;;  %1821 = vmatprep.subr.bf16.mxu1 %v2823_v24  ;;  %v2898_v23 = vld [vmem:[%s4062_s1 + $0x604] ss:$8 sps:$4 sm:$0xff]   ;;  %v2893_v24 = vld [vmem:[%s4062_s1 + $0x200] ss:$8 sps:$4 sm:$0xff]  }
  0x51   :  { %2033 = vmatprep.subr.bf16.mxu0 %v2826_v25  ;;  %v2896_v25 = vld [vmem:[%s4062_s1 + $0x600] ss:$8 sps:$4 sm:$0xff]  }
  0x53   :  { %1822 = vmatpush1.bf16.msra.mxu1 %v2821_v26  ;;  %v37_v26 = vld [vmem:[%s4063_s0 + $0x88] sm:$0xff] }
  0x54   :  { %2034 = vmatpush1.bf16.msra.mxu0 %v2824_v27  ;;  %1823 = vmatprep.subr.bf16.mxu1 %v2829_v28  ;;  %v2343_v27 = vcombine.low %v3422_v44, %v3427_v45  ;;  %v2351_v28 = vcombine.low %v3440_v49, %v3445_v50  ;;  %v3611_v45 = vld [vmem:[%s4063_s0 + $0x50] sm:$0xff] }
  0x55   :  { %2035 = vmatprep.subr.bf16.mxu0 %v2832_v29  ;;  %v45_v29 = vld [vmem:[%s4063_s0 + $0xc8] sm:$0xff]  ;;  %v2916_v49 = vld [vmem:[%s4062_s1 + $0x634] ss:$8 sps:$4 sm:$0xff]  }
  0x57   :  { %1824 = vmatpush1.bf16.msra.mxu1 %v2827_v32  ;;  %v41_v32 = vld [vmem:[%s4063_s0 + $0xa8] sm:$0xff] }
  0x58   :  { %2036 = vmatpush1.bf16.msra.mxu0 %v2830_v34  ;;  %1825 = vmatprep.subr.bf16.mxu1 %v2835_v38  ;;  %v2360_v34 = vcombine.high %v37_v26, %v45_v29  ;;  %v2368_v35 = vcombine.high %v41_v32, %v49_v33  ;;  %v2907_v38 = vld [vmem:[%s4062_s1 + $0x224] ss:$8 sps:$4 sm:$0xff]   ;;  %v2367_v44 = vcombine.low %v41_v32, %v49_v33  ;;  %v2977_v32 = vld [vmem:[%s4062_s1 + $0x2e0] ss:$8 sps:$4 sm:$0xff]  }
  0x59   :  { %2037 = vmatprep.subr.bf16.mxu0 %v2838_v41  ;;  %v2908_v41 = vld [vmem:[%s4062_s1 + $0x620] ss:$8 sps:$4 sm:$0xff]  }
  0x5a   :  { %v2980_v33 = vld [vmem:[%s4062_s1 + $0x6e0] ss:$8 sps:$4 sm:$0xff]  }
  0x5b   :  { %1826 = vmatpush1.bf16.msra.mxu1 %v2833_v42  ;;  %v3606_v42 = vld [vmem:[%s4063_s0 + $0x10] sm:$0xff] }
  0x5c   :  { %2038 = vmatpush1.bf16.msra.mxu0 %v2836_v43  ;;  %1827 = vmatprep.subr.bf16.mxu1 %v2841_v46  ;;  %v2359_v43 = vcombine.low %v37_v26, %v45_v29  ;;  %v3616_v46 = vld [vmem:[%s4063_s0 + $0x30] sm:$0xff]  ;;  %v2346_v50 = vcombine.high %v3606_v42, %v3611_v45 }
  0x5d   :  { %2039 = vmatprep.subr.bf16.mxu0 %v2844_v47  ;;  %v3621_v47 = vld [vmem:[%s4063_s0 + $0x70] sm:$0xff] }
  0x5e   :  { %v2973_v26 = vld [vmem:[%s4062_s1 + $0x2d4] ss:$8 sps:$4 sm:$0xff]   ;;  %v2974_v29 = vld [vmem:[%s4062_s1 + $0x6d0] ss:$8 sps:$4 sm:$0xff]  }
  0x5f   :  { %1828 = vmatpush1.bf16.msra.mxu1 %v2839_v51  ;;  %v2354_v51 = vcombine.high %v3616_v46, %v3621_v47 }
  0x60   :  { %2040 = vmatpush1.bf16.msra.mxu0 %v2842_v52  ;;  %1829 = vmatprep.subr.bf16.mxu1 %v2847_v54  ;;  %v2911_v52 = vld [vmem:[%s4062_s1 + $0x230] ss:$8 sps:$4 sm:$0xff]   ;;  %v2919_v54 = vld [vmem:[%s4062_s1 + $0x244] ss:$8 sps:$4 sm:$0xff]  }
  0x61   :  { %2041 = vmatprep.subr.bf16.mxu0 %v2850_v55  ;;  %v2922_v55 = vld [vmem:[%s4062_s1 + $0x644] ss:$8 sps:$4 sm:$0xff]  }
  0x63   :  { %1830 = vmatpush1.bf16.msra.mxu1 %v2845_v56  ;;  %v2917_v56 = vld [vmem:[%s4062_s1 + $0x240] ss:$8 sps:$4 sm:$0xff]  }
  0x64   :  { %2042 = vmatpush1.bf16.msra.mxu0 %v2848_v57  ;;  %1831 = vmatprep.subr.bf16.mxu1 %v2853_v58  ;;  %v2920_v57 = vld [vmem:[%s4062_s1 + $0x640] ss:$8 sps:$4 sm:$0xff]   ;;  %v2925_v58 = vld [vmem:[%s4062_s1 + $0x254] ss:$8 sps:$4 sm:$0xff]  }
  0x65   :  { %2043 = vmatprep.subr.bf16.mxu0 %v2856_v59  ;;  %v2928_v59 = vld [vmem:[%s4062_s1 + $0x654] ss:$8 sps:$4 sm:$0xff]  }
  0x67   :  { %1832 = vmatpush1.bf16.msra.mxu1 %v2851_v60  ;;  %v2923_v60 = vld [vmem:[%s4062_s1 + $0x250] ss:$8 sps:$4 sm:$0xff]  }
  0x68   :  { %2044 = vmatpush1.bf16.msra.mxu0 %v2854_v61  ;;  %1833 = vmatprep.subr.bf16.mxu1 %v2859_v62  ;;  %v2926_v61 = vld [vmem:[%s4062_s1 + $0x650] ss:$8 sps:$4 sm:$0xff]   ;;  %v2931_v62 = vld [vmem:[%s4062_s1 + $0x264] ss:$8 sps:$4 sm:$0xff]  }
  0x69   :  { %2045 = vmatprep.subr.bf16.mxu0 %v2862_v63  ;;  %v2934_v63 = vld [vmem:[%s4062_s1 + $0x664] ss:$8 sps:$4 sm:$0xff]  }
  0x6b   :  { %1834 = vmatpush1.bf16.msra.mxu1 %v2857_v0  ;;  %v2929_v0 = vld [vmem:[%s4062_s1 + $0x260] ss:$8 sps:$4 sm:$0xff]  }
  0x6c   :  { %2046 = vmatpush1.bf16.msra.mxu0 %v2860_v1  ;;  %1835 = vmatprep.subr.bf16.mxu1 %v2865_v2  ;;  %v2932_v1 = vld [vmem:[%s4062_s1 + $0x660] ss:$8 sps:$4 sm:$0xff]   ;;  %v2937_v2 = vld [vmem:[%s4062_s1 + $0x274] ss:$8 sps:$4 sm:$0xff]  }
  0x6d   :  { %2047 = vmatprep.subr.bf16.mxu0 %v2868_v3  ;;  %v2940_v3 = vld [vmem:[%s4062_s1 + $0x674] ss:$8 sps:$4 sm:$0xff]  }
  0x6f   :  { %1836 = vmatpush1.bf16.msra.mxu1 %v2863_v4  ;;  %v2935_v4 = vld [vmem:[%s4062_s1 + $0x270] ss:$8 sps:$4 sm:$0xff]  }
  0x70   :  { %2048 = vmatpush1.bf16.msra.mxu0 %v2866_v5  ;;  %1837 = vmatprep.subr.bf16.mxu1 %v2871_v6  ;;  %v2938_v5 = vld [vmem:[%s4062_s1 + $0x670] ss:$8 sps:$4 sm:$0xff]   ;;  %v2943_v6 = vld [vmem:[%s4062_s1 + $0x284] ss:$8 sps:$4 sm:$0xff]  }
  0x71   :  { %2049 = vmatprep.subr.bf16.mxu0 %v2874_v7  ;;  %v2946_v7 = vld [vmem:[%s4062_s1 + $0x684] ss:$8 sps:$4 sm:$0xff]  }
  0x73   :  { %1838 = vmatpush1.bf16.msra.mxu1 %v2869_v8  ;;  %v2941_v8 = vld [vmem:[%s4062_s1 + $0x280] ss:$8 sps:$4 sm:$0xff]  }
  0x74   :  { %2050 = vmatpush1.bf16.msra.mxu0 %v2872_v9  ;;  %1839 = vmatprep.subr.bf16.mxu1 %v2877_v10  ;;  %v2944_v9 = vld [vmem:[%s4062_s1 + $0x680] ss:$8 sps:$4 sm:$0xff]   ;;  %v2949_v10 = vld [vmem:[%s4062_s1 + $0x294] ss:$8 sps:$4 sm:$0xff]  }
  0x75   :  { %2051 = vmatprep.subr.bf16.mxu0 %v2880_v11  ;;  %v2952_v11 = vld [vmem:[%s4062_s1 + $0x694] ss:$8 sps:$4 sm:$0xff]  }
  0x77   :  { %1840 = vmatpush1.bf16.msra.mxu1 %v2875_v12  ;;  %v2947_v12 = vld [vmem:[%s4062_s1 + $0x290] ss:$8 sps:$4 sm:$0xff]  }
  0x78   :  { %2052 = vmatpush1.bf16.msra.mxu0 %v2878_v13  ;;  %1841 = vmatprep.subr.bf16.mxu1 %v2883_v14  ;;  %v2950_v13 = vld [vmem:[%s4062_s1 + $0x690] ss:$8 sps:$4 sm:$0xff]   ;;  %v2955_v14 = vld [vmem:[%s4062_s1 + $0x2a4] ss:$8 sps:$4 sm:$0xff]  }
  0x79   :  { %2053 = vmatprep.subr.bf16.mxu0 %v2886_v15  ;;  %v2958_v15 = vld [vmem:[%s4062_s1 + $0x6a4] ss:$8 sps:$4 sm:$0xff]  }
  0x7b   :  { %1842 = vmatpush1.bf16.msra.mxu1 %v2881_v16  ;;  %v2953_v16 = vld [vmem:[%s4062_s1 + $0x2a0] ss:$8 sps:$4 sm:$0xff]  }
  0x7c   :  { %2054 = vmatpush1.bf16.msra.mxu0 %v2884_v17  ;;  %1843 = vmatprep.subr.bf16.mxu1 %v2889_v18  ;;  %v2956_v17 = vld [vmem:[%s4062_s1 + $0x6a0] ss:$8 sps:$4 sm:$0xff]   ;;  %v2961_v18 = vld [vmem:[%s4062_s1 + $0x2b4] ss:$8 sps:$4 sm:$0xff]  }
  0x7d   :  { %2055 = vmatprep.subr.bf16.mxu0 %v2892_v19  ;;  %v2964_v19 = vld [vmem:[%s4062_s1 + $0x6b4] ss:$8 sps:$4 sm:$0xff]  }
  0x7f   :  { %1844 = vmatpush1.bf16.msra.mxu1 %v2887_v20  ;;  %v2959_v20 = vld [vmem:[%s4062_s1 + $0x2b0] ss:$8 sps:$4 sm:$0xff]  }
  0x80   :  { %2056 = vmatpush1.bf16.msra.mxu0 %v2890_v21  ;;  %1866 = vmatprep.subr.bf16.mxu1 %v2895_v22  ;;  %v2962_v21 = vld [vmem:[%s4062_s1 + $0x6b0] ss:$8 sps:$4 sm:$0xff]   ;;  %v2967_v22 = vld [vmem:[%s4062_s1 + $0x2c4] ss:$8 sps:$4 sm:$0xff]  }
  0x81   :  { %2078 = vmatprep.subr.bf16.mxu0 %v2898_v23  ;;  %v2970_v23 = vld [vmem:[%s4062_s1 + $0x6c4] ss:$8 sps:$4 sm:$0xff]  }
  0x82   :  { %1846 = vmatmul.mubr.bf16.vlgmr.msra.gmra.mrb[0].mxu1 %v2343_v27  ;;  %v2976_v27 = vld [vmem:[%s4062_s1 + $0x6d4] ss:$8 sps:$4 sm:$0xff]  }
  0x83   :  { %2058 = vmatmul.mubr.bf16.vlgmr.msra.gmra.mrb[0].mxu0 %v2351_v28  ;;  %1867 = vmatpush1.bf16.msra.mxu1 %v2893_v24  ;;  %v2965_v24 = vld [vmem:[%s4062_s1 + $0x2c0] ss:$8 sps:$4 sm:$0xff]   ;;  %v2971_v28 = vld [vmem:[%s4062_s1 + $0x2d0] ss:$8 sps:$4 sm:$0xff]  }
  0x84   :  { %2079 = vmatpush1.bf16.msra.mxu0 %v2896_v25  ;;  %1868 = vmatprep.subr.bf16.mxu1 %v2901_v30  ;;  %v2968_v25 = vld [vmem:[%s4062_s1 + $0x6c0] ss:$8 sps:$4 sm:$0xff]   ;;  %v2979_v30 = vld [vmem:[%s4062_s1 + $0x2e4] ss:$8 sps:$4 sm:$0xff]  }
  0x85   :  { %2080 = vmatprep.subr.bf16.mxu0 %v2904_v31  ;;  %1855 = vmatprep.mubr.bf16.mxu1 %v2360_v34  ;;  %v2982_v31 = vld [vmem:[%s4062_s1 + $0x6e4] ss:$8 sps:$4 sm:$0xff]   ;;  %v2985_v34 = vld [vmem:[%s4062_s1 + $0x2f4] ss:$8 sps:$4 sm:$0xff]  }
  0x86   :  { %2067 = vmatprep.mubr.bf16.mxu0 %v2368_v35  ;;  %v2988_v35 = vld [vmem:[%s4062_s1 + $0x6f4] ss:$8 sps:$4 sm:$0xff]  }
  0x87   :  { %1869 = vmatpush1.bf16.msra.mxu1 %v2899_v36  ;;  %v2983_v36 = vld [vmem:[%s4062_s1 + $0x2f0] ss:$8 sps:$4 sm:$0xff]  }
  0x88   :  { %2081 = vmatpush1.bf16.msra.mxu0 %v2902_v37  ;;  %1870 = vmatprep.subr.bf16.mxu1 %v2907_v38  ;;  %v2986_v37 = vld [vmem:[%s4062_s1 + $0x6f0] ss:$8 sps:$4 sm:$0xff]   ;;  %v2991_v38 = vld [vmem:[%s4062_s1 + $0x304] ss:$8 sps:$4 sm:$0xff]  }
  0x89   :  { %2082 = vmatprep.subr.bf16.mxu0 %v2910_v39  ;;  %v2994_v39 = vld [vmem:[%s4062_s1 + $0x704] ss:$8 sps:$4 sm:$0xff]  }
  0x8a   :  { %1856 = vmatmul.mubr.bf16.gmra.mrb[4].mxu1 %v2359_v43  ;;  %v2353_v43 = vcombine.low %v3616_v46, %v3621_v47  ;;  %v2997_v46 = vld [vmem:[%s4062_s1 + $0x314] ss:$8 sps:$4 sm:$0xff]  }
  0x8b   :  { %2068 = vmatmul.mubr.bf16.gmra.mrb[4].mxu0 %v2367_v44  ;;  %1871 = vmatpush1.bf16.msra.mxu1 %v2905_v40  ;;  %v38_v40 = vld [vmem:[%s4063_s0 + $0x90] sm:$0xff] }
  0x8c   :  { %2083 = vmatpush1.bf16.msra.mxu0 %v2908_v41  ;;  %1872 = vmatprep.subr.bf16.mxu1 %v2913_v48  ;;  %v2345_v41 = vcombine.low %v3606_v42, %v3611_v45  ;;  %v46_v44 = vld [vmem:[%s4063_s0 + $0xd0] sm:$0xff]  ;;  %v2989_v42 = vld [vmem:[%s4062_s1 + $0x300] ss:$8 sps:$4 sm:$0xff]  }
  0x8d   :  { %2084 = vmatprep.subr.bf16.mxu0 %v2916_v49  ;;  %1898 = vmatprep.mubr.bf16.mxu1 %v2346_v50  ;;  %v42_v48 = vld [vmem:[%s4063_s0 + $0xb0] sm:$0xff]  ;;  %v2992_v45 = vld [vmem:[%s4062_s1 + $0x700] ss:$8 sps:$4 sm:$0xff]   ;;  %v2362_v50 = vcombine.high %v38_v40, %v46_v44 }
  0x8e   :  { %2110 = vmatprep.mubr.bf16.mxu0 %v2354_v51  ;;  %v50_v49 = vld [vmem:[%s4063_s0 + $0xf0] sm:$0xff] }
  0x8f   :  { %1873 = vmatpush1.bf16.msra.mxu1 %v2911_v52  ;;  %v3000_v47 = vld [vmem:[%s4062_s1 + $0x714] ss:$8 sps:$4 sm:$0xff]   ;;  %v2370_v51 = vcombine.high %v42_v48, %v50_v49  ;;  %v2995_v52 = vld [vmem:[%s4062_s1 + $0x310] ss:$8 sps:$4 sm:$0xff]  }
  0x90   :  { %2085 = vmatpush1.bf16.msra.mxu0 %v2914_v53  ;;  %1874 = vmatprep.subr.bf16.mxu1 %v2919_v54  ;;  %v2998_v53 = vld [vmem:[%s4062_s1 + $0x710] ss:$8 sps:$4 sm:$0xff]   ;;  %v3003_v54 = vld [vmem:[%s4062_s1 + $0x324] ss:$8 sps:$4 sm:$0xff]  }
  0x91   :  { %2086 = vmatprep.subr.bf16.mxu0 %v2922_v55  ;;  %v3006_v55 = vld [vmem:[%s4062_s1 + $0x724] ss:$8 sps:$4 sm:$0xff]  }
  0x93   :  { %1875 = vmatpush1.bf16.msra.mxu1 %v2917_v56  ;;  %v3832_v56 = vld [vmem:[%s4063_s0 + $0x18] sm:$0xff] }
  0x94   :  { %2087 = vmatpush1.bf16.msra.mxu0 %v2920_v57  ;;  %1876 = vmatprep.subr.bf16.mxu1 %v2925_v58  ;;  %v2361_v57 = vcombine.low %v38_v40, %v46_v44  ;;  %v2369_v58 = vcombine.low %v42_v48, %v50_v49  ;;  %v3061_v40 = vld [vmem:[%s4062_s1 + $0x3c0] ss:$8 sps:$4 sm:$0xff]   ;;  %v3072_v44 = vld [vmem:[%s4062_s1 + $0x7d4] ss:$8 sps:$4 sm:$0xff]   ;;  %v3067_v48 = vld [vmem:[%s4062_s1 + $0x3d0] ss:$8 sps:$4 sm:$0xff]  }
  0x95   :  { %2088 = vmatprep.subr.bf16.mxu0 %v2928_v59  ;;  %v3837_v59 = vld [vmem:[%s4063_s0 + $0x58] sm:$0xff] }
  0x96   :  { %v3070_v49 = vld [vmem:[%s4062_s1 + $0x7d0] ss:$8 sps:$4 sm:$0xff]  }
  0x97   :  { %1877 = vmatpush1.bf16.msra.mxu1 %v2923_v60  ;;  %v3842_v60 = vld [vmem:[%s4063_s0 + $0x38] sm:$0xff] }
  0x98   :  { %2089 = vmatpush1.bf16.msra.mxu0 %v2926_v61  ;;  %1878 = vmatprep.subr.bf16.mxu1 %v2931_v62  ;;  %v3847_v61 = vld [vmem:[%s4063_s0 + $0x78] sm:$0xff]  ;;  %v3001_v62 = vld [vmem:[%s4062_s1 + $0x320] ss:$8 sps:$4 sm:$0xff]  }
  0x99   :  { %2090 = vmatprep.subr.bf16.mxu0 %v2934_v63  ;;  %v3004_v63 = vld [vmem:[%s4062_s1 + $0x720] ss:$8 sps:$4 sm:$0xff]  }
  0x9b   :  { %1879 = vmatpush1.bf16.msra.mxu1 %v2929_v0  ;;  %v3009_v0 = vld [vmem:[%s4062_s1 + $0x334] ss:$8 sps:$4 sm:$0xff]  }
  0x9c   :  { %2091 = vmatpush1.bf16.msra.mxu0 %v2932_v1  ;;  %1880 = vmatprep.subr.bf16.mxu1 %v2937_v2  ;;  %v3012_v1 = vld [vmem:[%s4062_s1 + $0x734] ss:$8 sps:$4 sm:$0xff]   ;;  %v2348_v2 = vcombine.high %v3832_v56, %v3837_v59 }
  0x9d   :  { %2092 = vmatprep.subr.bf16.mxu0 %v2940_v3  ;;  %v2356_v3 = vcombine.high %v3842_v60, %v3847_v61 }
  0x9f   :  { %1881 = vmatpush1.bf16.msra.mxu1 %v2935_v4  ;;  %v3007_v4 = vld [vmem:[%s4062_s1 + $0x330] ss:$8 sps:$4 sm:$0xff]  }
  0xa0   :  { %2093 = vmatpush1.bf16.msra.mxu0 %v2938_v5  ;;  %1882 = vmatprep.subr.bf16.mxu1 %v2943_v6  ;;  %v3010_v5 = vld [vmem:[%s4062_s1 + $0x730] ss:$8 sps:$4 sm:$0xff]   ;;  %v3015_v6 = vld [vmem:[%s4062_s1 + $0x344] ss:$8 sps:$4 sm:$0xff]  }
  0xa1   :  { %2094 = vmatprep.subr.bf16.mxu0 %v2946_v7  ;;  %v3018_v7 = vld [vmem:[%s4062_s1 + $0x744] ss:$8 sps:$4 sm:$0xff]  }
  0xa3   :  { %1883 = vmatpush1.bf16.msra.mxu1 %v2941_v8  ;;  %v3013_v8 = vld [vmem:[%s4062_s1 + $0x340] ss:$8 sps:$4 sm:$0xff]  }
  0xa4   :  { %2095 = vmatpush1.bf16.msra.mxu0 %v2944_v9  ;;  %1884 = vmatprep.subr.bf16.mxu1 %v2949_v10  ;;  %v3016_v9 = vld [vmem:[%s4062_s1 + $0x740] ss:$8 sps:$4 sm:$0xff]   ;;  %v3021_v10 = vld [vmem:[%s4062_s1 + $0x354] ss:$8 sps:$4 sm:$0xff]  }
  0xa5   :  { %2096 = vmatprep.subr.bf16.mxu0 %v2952_v11  ;;  %v3024_v11 = vld [vmem:[%s4062_s1 + $0x754] ss:$8 sps:$4 sm:$0xff]  }
  0xa7   :  { %1885 = vmatpush1.bf16.msra.mxu1 %v2947_v12  ;;  %v3019_v12 = vld [vmem:[%s4062_s1 + $0x350] ss:$8 sps:$4 sm:$0xff]  }
  0xa8   :  { %2097 = vmatpush1.bf16.msra.mxu0 %v2950_v13  ;;  %1886 = vmatprep.subr.bf16.mxu1 %v2955_v14  ;;  %v3022_v13 = vld [vmem:[%s4062_s1 + $0x750] ss:$8 sps:$4 sm:$0xff]   ;;  %v3027_v14 = vld [vmem:[%s4062_s1 + $0x364] ss:$8 sps:$4 sm:$0xff]  }
  0xa9   :  { %2098 = vmatprep.subr.bf16.mxu0 %v2958_v15  ;;  %v3030_v15 = vld [vmem:[%s4062_s1 + $0x764] ss:$8 sps:$4 sm:$0xff]  }
  0xab   :  { %1887 = vmatpush1.bf16.msra.mxu1 %v2953_v16  ;;  %v3025_v16 = vld [vmem:[%s4062_s1 + $0x360] ss:$8 sps:$4 sm:$0xff]  }
  0xac   :  { %2099 = vmatpush1.bf16.msra.mxu0 %v2956_v17  ;;  %1888 = vmatprep.subr.bf16.mxu1 %v2961_v18  ;;  %v3028_v17 = vld [vmem:[%s4062_s1 + $0x760] ss:$8 sps:$4 sm:$0xff]   ;;  %v3033_v18 = vld [vmem:[%s4062_s1 + $0x374] ss:$8 sps:$4 sm:$0xff]  }
  0xad   :  { %2100 = vmatprep.subr.bf16.mxu0 %v2964_v19  ;;  %v3036_v19 = vld [vmem:[%s4062_s1 + $0x774] ss:$8 sps:$4 sm:$0xff]  }
  0xaf   :  { %1889 = vmatpush1.bf16.msra.mxu1 %v2959_v20  ;;  %v3031_v20 = vld [vmem:[%s4062_s1 + $0x370] ss:$8 sps:$4 sm:$0xff]  }
  0xb0   :  { %2101 = vmatpush1.bf16.msra.mxu0 %v2962_v21  ;;  %1890 = vmatprep.subr.bf16.mxu1 %v2967_v22  ;;  %v3034_v21 = vld [vmem:[%s4062_s1 + $0x770] ss:$8 sps:$4 sm:$0xff]   ;;  %v3039_v22 = vld [vmem:[%s4062_s1 + $0x384] ss:$8 sps:$4 sm:$0xff]  }
  0xb1   :  { %2102 = vmatprep.subr.bf16.mxu0 %v2970_v23  ;;  %v3042_v23 = vld [vmem:[%s4062_s1 + $0x784] ss:$8 sps:$4 sm:$0xff]  }
  0xb3   :  { %1891 = vmatpush1.bf16.msra.mxu1 %v2965_v24  ;;  %v3037_v24 = vld [vmem:[%s4062_s1 + $0x380] ss:$8 sps:$4 sm:$0xff]  }
  0xb4   :  { %2103 = vmatpush1.bf16.msra.mxu0 %v2968_v25  ;;  %1892 = vmatprep.subr.bf16.mxu1 %v2973_v26  ;;  %v3040_v25 = vld [vmem:[%s4062_s1 + $0x780] ss:$8 sps:$4 sm:$0xff]   ;;  %v3045_v26 = vld [vmem:[%s4062_s1 + $0x394] ss:$8 sps:$4 sm:$0xff]  }
  0xb5   :  { %2104 = vmatprep.subr.bf16.mxu0 %v2976_v27  ;;  %v3048_v27 = vld [vmem:[%s4062_s1 + $0x794] ss:$8 sps:$4 sm:$0xff]  }
  0xb7   :  { %1893 = vmatpush1.bf16.msra.mxu1 %v2971_v28  ;;  %v3043_v28 = vld [vmem:[%s4062_s1 + $0x390] ss:$8 sps:$4 sm:$0xff]  }
  0xb8   :  { %2105 = vmatpush1.bf16.msra.mxu0 %v2974_v29  ;;  %1894 = vmatprep.subr.bf16.mxu1 %v2979_v30  ;;  %v3046_v29 = vld [vmem:[%s4062_s1 + $0x790] ss:$8 sps:$4 sm:$0xff]   ;;  %v3051_v30 = vld [vmem:[%s4062_s1 + $0x3a4] ss:$8 sps:$4 sm:$0xff]  }
  0xb9   :  { %2106 = vmatprep.subr.bf16.mxu0 %v2982_v31  ;;  %v3054_v31 = vld [vmem:[%s4062_s1 + $0x7a4] ss:$8 sps:$4 sm:$0xff]  }
  0xbb   :  { %1895 = vmatpush1.bf16.msra.mxu1 %v2977_v32  ;;  %v3049_v32 = vld [vmem:[%s4062_s1 + $0x3a0] ss:$8 sps:$4 sm:$0xff]  }
  0xbc   :  { %2107 = vmatpush1.bf16.msra.mxu0 %v2980_v33  ;;  %1896 = vmatprep.subr.bf16.mxu1 %v2985_v34  ;;  %v3052_v33 = vld [vmem:[%s4062_s1 + $0x7a0] ss:$8 sps:$4 sm:$0xff]   ;;  %v3057_v34 = vld [vmem:[%s4062_s1 + $0x3b4] ss:$8 sps:$4 sm:$0xff]  }
  0xbd   :  { %2108 = vmatprep.subr.bf16.mxu0 %v2988_v35  ;;  %v3060_v35 = vld [vmem:[%s4062_s1 + $0x7b4] ss:$8 sps:$4 sm:$0xff]  }
  0xbf   :  { %1897 = vmatpush1.bf16.msra.mxu1 %v2983_v36  ;;  %v3055_v36 = vld [vmem:[%s4062_s1 + $0x3b0] ss:$8 sps:$4 sm:$0xff]  }
  0xc0   :  { %2109 = vmatpush1.bf16.msra.mxu0 %v2986_v37  ;;  %1919 = vmatprep.subr.bf16.mxu1 %v2991_v38  ;;  %v3058_v37 = vld [vmem:[%s4062_s1 + $0x7b0] ss:$8 sps:$4 sm:$0xff]   ;;  %v3063_v38 = vld [vmem:[%s4062_s1 + $0x3c4] ss:$8 sps:$4 sm:$0xff]  }
  0xc1   :  { %2131 = vmatprep.subr.bf16.mxu0 %v2994_v39  ;;  %v3066_v39 = vld [vmem:[%s4062_s1 + $0x7c4] ss:$8 sps:$4 sm:$0xff]  }
  0xc2   :  { %1899 = vmatmul.mubr.bf16.vlgmr.msra.gmra.mrb[0].mxu1 %v2345_v41  ;;  %v3064_v41 = vld [vmem:[%s4062_s1 + $0x7c0] ss:$8 sps:$4 sm:$0xff]  }
  0xc3   :  { %2111 = vmatmul.mubr.bf16.vlgmr.msra.gmra.mrb[0].mxu0 %v2353_v43  ;;  %1920 = vmatpush1.bf16.msra.mxu1 %v2989_v42  ;;  %v3069_v43 = vld [vmem:[%s4062_s1 + $0x3d4] ss:$8 sps:$4 sm:$0xff]   ;;  %v3075_v42 = vld [vmem:[%s4062_s1 + $0x3e4] ss:$8 sps:$4 sm:$0xff]  }
  0xc4   :  { %2132 = vmatpush1.bf16.msra.mxu0 %v2992_v45  ;;  %1921 = vmatprep.subr.bf16.mxu1 %v2997_v46  ;;  %v3078_v45 = vld [vmem:[%s4062_s1 + $0x7e4] ss:$8 sps:$4 sm:$0xff]   ;;  %v3073_v46 = vld [vmem:[%s4062_s1 + $0x3e0] ss:$8 sps:$4 sm:$0xff]  }
  0xc5   :  { %2133 = vmatprep.subr.bf16.mxu0 %v3000_v47  ;;  %1908 = vmatprep.mubr.bf16.mxu1 %v2362_v50  ;;  %v3076_v47 = vld [vmem:[%s4062_s1 + $0x7e0] ss:$8 sps:$4 sm:$0xff]   ;;  %v3081_v50 = vld [vmem:[%s4062_s1 + $0x3f4] ss:$8 sps:$4 sm:$0xff]  }
  0xc6   :  { %2120 = vmatprep.mubr.bf16.mxu0 %v2370_v51  ;;  %v3084_v51 = vld [vmem:[%s4062_s1 + $0x7f4] ss:$8 sps:$4 sm:$0xff]  }
  0xc7   :  { %1922 = vmatpush1.bf16.msra.mxu1 %v2995_v52  ;;  %v3079_v52 = vld [vmem:[%s4062_s1 + $0x3f0] ss:$8 sps:$4 sm:$0xff]  }
  0xc8   :  { %2134 = vmatpush1.bf16.msra.mxu0 %v2998_v53  ;;  %1923 = vmatprep.subr.bf16.mxu1 %v3003_v54  ;;  %v3082_v53 = vld [vmem:[%s4062_s1 + $0x7f0] ss:$8 sps:$4 sm:$0xff]  }
  0xc9   :  { %2135 = vmatprep.subr.bf16.mxu0 %v3006_v55  ;;  %v39_v54 = vld [vmem:[%s4063_s0 + $0x98] sm:$0xff] }
  0xca   :  { %1909 = vmatmul.mubr.bf16.gmra.mrb[4].mxu1 %v2361_v57  ;;  %v47_v55 = vld [vmem:[%s4063_s0 + $0xd8] sm:$0xff] }
  0xcb   :  { %2121 = vmatmul.mubr.bf16.gmra.mrb[4].mxu0 %v2369_v58  ;;  %1924 = vmatpush1.bf16.msra.mxu1 %v3001_v62  ;;  %v43_v57 = vld [vmem:[%s4063_s0 + $0xb8] sm:$0xff]  ;;  %v2347_v62 = vcombine.low %v3832_v56, %v3837_v59  ;;  %v308_v56 = vld [vmem:[%s4064_s2] sm:$0x3] }
  0xcc   :  { %2136 = vmatpush1.bf16.msra.mxu0 %v3004_v63  ;;  %1925 = vmatprep.subr.bf16.mxu1 %v3009_v0  ;;  %v51_v58 = vld [vmem:[%s4063_s0 + $0xf8] sm:$0xff]  ;;  %v2355_v63 = vcombine.low %v3842_v60, %v3847_v61  ;;  %v2364_v0 = vcombine.high %v39_v54, %v47_v55 }
  0xcd   :  { %2137 = vmatprep.subr.bf16.mxu0 %v3012_v1  ;;  %1951 = vmatprep.mubr.bf16.mxu1 %v2348_v2  ;;  %v2372_v1 = vcombine.high %v43_v57, %v51_v58  ;;  %v2363_v2 = vcombine.low %v39_v54, %v47_v55 }
  0xce   :  { %2163 = vmatprep.mubr.bf16.mxu0 %v2356_v3  ;;  %v2371_v3 = vcombine.low %v43_v57, %v51_v58 }
  0xcf   :  { %1926 = vmatpush1.bf16.msra.mxu1 %v3007_v4  ;;  %v310_v4 = vlaneseq }
  0xd0   :  { %2138 = vmatpush1.bf16.msra.mxu0 %v3010_v5  ;;  %1927 = vmatprep.subr.bf16.mxu1 %v3015_v6 }
  0xd1   :  { %2139 = vmatprep.subr.bf16.mxu0 %v3018_v7  ;;  %v311_v5 = vshrl.u32 %v310_v4, 7 }
  0xd3   :  { %1928 = vmatpush1.bf16.msra.mxu1 %v3013_v8  ;;  %v4031_v6 = vsub.s32 0, %v311_v5  ;;  %v4036_v59 = vsub.s32 1, %v311_v5 }
  0xd4   :  { %2140 = vmatpush1.bf16.msra.mxu0 %v3016_v9  ;;  %1929 = vmatprep.subr.bf16.mxu1 %v3021_v10 }
  0xd5   :  { %2141 = vmatprep.subr.bf16.mxu0 %v3024_v11  ;;  %v313_v60 = vrot.slane %v308_v56, %v4031_v6  ;;  %v317_v61 = vrot.slane %v308_v56, %v4036_v59 }
  0xd7   :  { %1930 = vmatpush1.bf16.msra.mxu1 %v3019_v12 }
  0xd8   :  { %2142 = vmatpush1.bf16.msra.mxu0 %v3022_v13  ;;  %1931 = vmatprep.subr.bf16.mxu1 %v3027_v14 }
  0xd9   :  { %2143 = vmatprep.subr.bf16.mxu0 %v3030_v15 }
  0xdb   :  { %1932 = vmatpush1.bf16.msra.mxu1 %v3025_v16 }
  0xdc   :  { %2144 = vmatpush1.bf16.msra.mxu0 %v3028_v17  ;;  %1933 = vmatprep.subr.bf16.mxu1 %v3033_v18 }
  0xdd   :  { %2145 = vmatprep.subr.bf16.mxu0 %v3036_v19 }
  0xdf   :  { %1934 = vmatpush1.bf16.msra.mxu1 %v3031_v20 }
  0xe0   :  { %2146 = vmatpush1.bf16.msra.mxu0 %v3034_v21  ;;  %1935 = vmatprep.subr.bf16.mxu1 %v3039_v22 }
  0xe1   :  { %2147 = vmatprep.subr.bf16.mxu0 %v3042_v23 }
  0xe3   :  { %1936 = vmatpush1.bf16.msra.mxu1 %v3037_v24 }
  0xe4   :  { %2148 = vmatpush1.bf16.msra.mxu0 %v3040_v25  ;;  %1937 = vmatprep.subr.bf16.mxu1 %v3045_v26 }
  0xe5   :  { %2149 = vmatprep.subr.bf16.mxu0 %v3048_v27 }
  0xe7   :  { %1938 = vmatpush1.bf16.msra.mxu1 %v3043_v28 }
  0xe8   :  { %2150 = vmatpush1.bf16.msra.mxu0 %v3046_v29  ;;  %1939 = vmatprep.subr.bf16.mxu1 %v3051_v30 }
  0xe9   :  { %2151 = vmatprep.subr.bf16.mxu0 %v3054_v31 }
  0xeb   :  { %1940 = vmatpush1.bf16.msra.mxu1 %v3049_v32 }
  0xec   :  { %2152 = vmatpush1.bf16.msra.mxu0 %v3052_v33  ;;  %1941 = vmatprep.subr.bf16.mxu1 %v3057_v34 }
  0xed   :  { %2153 = vmatprep.subr.bf16.mxu0 %v3060_v35 }
  0xef   :  { %1942 = vmatpush1.bf16.msra.mxu1 %v3055_v36 }
  0xf0   :  { %2154 = vmatpush1.bf16.msra.mxu0 %v3058_v37  ;;  %1943 = vmatprep.subr.bf16.mxu1 %v3063_v38 }
  0xf1   :  { %2155 = vmatprep.subr.bf16.mxu0 %v3066_v39 }
  0xf3   :  { %1944 = vmatpush1.bf16.msra.mxu1 %v3061_v40 }
  0xf4   :  { %2156 = vmatpush1.bf16.msra.mxu0 %v3064_v41  ;;  %1945 = vmatprep.subr.bf16.mxu1 %v3069_v43 }
  0xf5   :  { %2157 = vmatprep.subr.bf16.mxu0 %v3072_v44 }
  0xf7   :  { %1946 = vmatpush1.bf16.msra.mxu1 %v3067_v48 }
  0xf8   :  { %2158 = vmatpush1.bf16.msra.mxu0 %v3070_v49  ;;  %1947 = vmatprep.subr.bf16.mxu1 %v3075_v42 }
  0xf9   :  { %2159 = vmatprep.subr.bf16.mxu0 %v3078_v45 }
  0xfb   :  { %1948 = vmatpush1.bf16.msra.mxu1 %v3073_v46 }
  0xfc   :  { %2160 = vmatpush1.bf16.msra.mxu0 %v3076_v47  ;;  %1949 = vmatprep.subr.bf16.mxu1 %v3081_v50 }
  0xfd   :  { %2161 = vmatprep.subr.bf16.mxu0 %v3084_v51 }
  0xff   :  { %1950 = vmatpush1.bf16.msra.mxu1 %v3079_v52 }
 0x100   :  { %2162 = vmatpush1.bf16.msra.mxu0 %v3082_v53 }
 0x102   :  { %1952 = vmatmul.mubr.bf16.vlgmr.msra.gmra.mrb[0].mxu1 %v2347_v62 }
 0x103   :  { %2164 = vmatmul.mubr.bf16.vlgmr.msra.gmra.mrb[0].mxu0 %v2355_v63  ;;  %1961 = vmatprep.mubr.bf16.mxu1 %v2364_v0 }
 0x104   :  { %2173 = vmatprep.mubr.bf16.mxu0 %v2372_v1 }
 0x10a   :  { %1962 = vmatmul.mubr.bf16.gmra.mrb[4].mxu1 %v2363_v2 }
 0x10b   :  { %2174 = vmatmul.mubr.bf16.gmra.mrb[4].mxu0 %v2371_v3 }
 0x1d5   :  { %v1953_v7 = vpop.f32.mrb[0].mxu1 }
 0x1d6   :  { %v2165_v8 = vpop.f32.mrb[0].mxu0  ;;  %v2637_v9 = vadd.f32 %v1953_v7, %v313_v60  ;;  %v1955_v10 = vpop.f32.mrb[1].mxu1 }
 0x1d7   :  { %v2167_v11 = vpop.f32.mrb[1].mxu0  ;;  %v2639_v12 = vadd.f32 %v1955_v10, %v317_v61  ;;  %v1957_v13 = vpop.f32.mrb[2].mxu1 }
 0x1d8   :  { %v2169_v14 = vpop.f32.mrb[2].mxu0  ;;  %v2638_v15 = vadd.f32 %v2637_v9, %v2165_v8  ;;  %v2641_v16 = vadd.f32 %v1957_v13, %v313_v60  ;;  %v1959_v17 = vpop.f32.mrb[3].mxu1 }
 0x1d9   :  { %v2171_v18 = vpop.f32.mrb[3].mxu0  ;;  %v2640_v19 = vadd.f32 %v2639_v12, %v2167_v11  ;;  %v2643_v20 = vadd.f32 %v1959_v17, %v317_v61 }
 0x1da   :  { %v2642_v21 = vadd.f32 %v2641_v16, %v2169_v14 }
 0x1db   :  { %v2644_v22 = vadd.f32 %v2643_v20, %v2171_v18 }
 0x1dc   :  { %v2184_v23 = vadd.f32 %v2642_v21, %v2638_v15 }
 0x1dd   :  { %v2193_v24 = vadd.f32 %v2644_v22, %v2640_v19  ;;  %v1963_v25 = vpop.f32.mrb[4].mxu1 }
 0x1de   :  { %v2175_v26 = vpop.f32.mrb[4].mxu0  ;;  %v2645_v27 = vadd.f32 %v1963_v25, %v313_v60  ;;  %v1965_v28 = vpop.f32.mrb[5].mxu1 }
 0x1df   :  { %v2177_v29 = vpop.f32.mrb[5].mxu0  ;;  %v2647_v30 = vadd.f32 %v1965_v28, %v317_v61  ;;  %v1967_v31 = vpop.f32.mrb[6].mxu1 }
 0x1e0   :  { %v2179_v32 = vpop.f32.mrb[6].mxu0  ;;  %v2646_v33 = vadd.f32 %v2645_v27, %v2175_v26  ;;  %v2649_v34 = vadd.f32 %v1967_v31, %v313_v60  ;;  %v1969_v35 = vpop.f32.mrb[7].mxu1 }
 0x1e1   :  { %v2181_v36 = vpop.f32.mrb[7].mxu0  ;;  %v2648_v37 = vadd.f32 %v2647_v30, %v2177_v29  ;;  %v2651_v38 = vadd.f32 %v1969_v35, %v317_v61  ;;  %v2253_v35 = vld [vmem:[%s4065_s3] sm:$0x3] }
 0x1e2   :  { %v2185_v39 = vadd.f32 %v2646_v33, %v2184_v23  ;;  %v2650_v40 = vadd.f32 %v2649_v34, %v2179_v32 }
 0x1e3   :  { %v2194_v41 = vadd.f32 %v2648_v37, %v2193_v24  ;;  %v2652_v43 = vadd.f32 %v2651_v38, %v2181_v36  ;;  %v2273_v36 = vld [vmem:[%s4066_s4] sm:$0x3] }
 0x1e4   :  { %v2186_v44 = vadd.f32 %v2650_v40, %v2185_v39  ;;  %v2278_v39 = vrot.slane %v2273_v36, %v4031_v6 }
 0x1e5   :  { %v2195_v48 = vadd.f32 %v2652_v43, %v2194_v41  ;;  %v2282_v41 = vrot.slane %v2273_v36, %v4036_v59 }
 0x1e6   :  { %v2187_v49 = vrot.slane %v2186_v44, 4 }
 0x1e7   :  { %v2196_v42 = vrot.slane %v2195_v48, 4 }
 0x1e8   :  { %v2188_v45 = vadd.f32 %v2187_v49, %v2186_v44 }
 0x1e9   :  { %v2197_v46 = vadd.f32 %v2196_v42, %v2195_v48 }
 0x1ea   :  { %v2189_v47 = vrot.slane %v2188_v45, 2 }
 0x1eb   :  { %v2198_v50 = vrot.slane %v2197_v46, 2 }
 0x1ec   :  { %v2190_v51 = vadd.f32 %v2189_v47, %v2188_v45 }
 0x1ed   :  { %v2199_v52 = vadd.f32 %v2198_v50, %v2197_v46 }
 0x1ee   :  { %v2191_v53 = vrot.slane %v2190_v51, 1 }
 0x1ef   :  { %v2200_v54 = vrot.slane %v2199_v52, 1 }
 0x1f0   :  { %v2192_v55 = vadd.f32 %v2191_v53, %v2190_v51 }
 0x1f1   :  { %v2201_v57 = vadd.f32 %v2200_v54, %v2199_v52 }
 0x1f2   :  { %v2203_v58 = vmul.f32 0.03125, %v2192_v55 }
 0x1f3   :  { %v2204_v62 = vmul.f32 0.03125, %v2201_v57 }
 0x1f4   :  { %v2205_v63 = vsub.f32 %v2638_v15, %v2203_v58  ;;  %v2207_v0 = vsub.f32 %v2642_v21, %v2203_v58  ;;  %v2209_v1 = vsub.f32 %v2646_v33, %v2203_v58  ;;  %v2211_v2 = vsub.f32 %v2650_v40, %v2203_v58 }
 0x1f5   :  { %v2206_v3 = vsub.f32 %v2640_v19, %v2204_v62  ;;  %v2208_v4 = vsub.f32 %v2644_v22, %v2204_v62  ;;  %v2210_v5 = vsub.f32 %v2648_v37, %v2204_v62  ;;  %v2212_v56 = vsub.f32 %v2652_v43, %v2204_v62 }
 0x1f6   :  { %v2213_v60 = vmul.f32 %v2205_v63, %v2205_v63  ;;  %v2215_v61 = vmul.f32 %v2207_v0, %v2207_v0  ;;  %v2217_v9 = vmul.f32 %v2209_v1, %v2209_v1  ;;  %v2219_v13 = vmul.f32 %v2211_v2, %v2211_v2 }
 0x1f7   :  { %v2214_v7 = vmul.f32 %v2206_v3, %v2206_v3  ;;  %v2216_v8 = vmul.f32 %v2208_v4, %v2208_v4  ;;  %v2218_v11 = vmul.f32 %v2210_v5, %v2210_v5  ;;  %v2220_v16 = vmul.f32 %v2212_v56, %v2212_v56 }
 0x1f8   :  { %v2221_v10 = vadd.f32 %v2215_v61, %v2213_v60  ;;  %v2258_v37 = vrot.slane %v2253_v35, %v4031_v6  ;;  %v2262_v40 = vrot.slane %v2253_v35, %v4036_v59 }
 0x1f9   :  { %v2230_v12 = vadd.f32 %v2216_v8, %v2214_v7 }
 0x1fa   :  { %v2222_v14 = vadd.f32 %v2221_v10, %v2217_v9 }
 0x1fb   :  { %v2231_v17 = vadd.f32 %v2230_v12, %v2218_v11 }
 0x1fc   :  { %v2223_v15 = vadd.f32 %v2222_v14, %v2219_v13 }
 0x1fd   :  { %v2232_v18 = vadd.f32 %v2231_v17, %v2220_v16 }
 0x1fe   :  { %v2224_v20 = vrot.slane %v2223_v15, 4 }
 0x1ff   :  { %v2233_v21 = vrot.slane %v2232_v18, 4 }
 0x200   :  { %v2225_v19 = vadd.f32 %v2224_v20, %v2223_v15 }
 0x201   :  { %v2234_v22 = vadd.f32 %v2233_v21, %v2232_v18 }
 0x202   :  { %v2226_v23 = vrot.slane %v2225_v19, 2 }
 0x203   :  { %v2235_v24 = vrot.slane %v2234_v22, 2 }
 0x204   :  { %v2227_v25 = vadd.f32 %v2226_v23, %v2225_v19 }
 0x205   :  { %v2236_v26 = vadd.f32 %v2235_v24, %v2234_v22 }
 0x206   :  { %v2228_v27 = vrot.slane %v2227_v25, 1 }
 0x207   :  { %v2237_v28 = vrot.slane %v2236_v26, 1 }
 0x208   :  { %v2229_v29 = vadd.f32 %v2228_v27, %v2227_v25 }
 0x209   :  { %v2238_v30 = vadd.f32 %v2237_v28, %v2236_v26 }
 0x20a   :  { %v2239_v31 = vmul.f32 0.03125, %v2229_v29 }
 0x20b   :  { %v2240_v32 = vmul.f32 0.03125, %v2238_v30 }
 0x20c   :  { %v2241_v33 = vadd.f32 1e-05, %v2239_v31 }
 0x20d   :  { %v2242_v34 = vadd.f32 1e-05, %v2240_v32 }
 0x20e   :  { %3085 = vrsqrt.f32 %v2241_v33 }
 0x20f   :  { %3087 = vrsqrt.f32 %v2242_v34 }
 0x218   :  { %v3086_v38 = vpop.eup %3085 }
 0x219   :  { %v3088_v43 = vpop.eup %3087  ;;  %v2245_v44 = vmul.f32 %v3086_v38, %v2205_v63  ;;  %v2247_v48 = vmul.f32 %v3086_v38, %v2207_v0  ;;  %v2249_v49 = vmul.f32 %v3086_v38, %v2209_v1  ;;  %v2251_v42 = vmul.f32 %v3086_v38, %v2211_v2 }
 0x21a   :  { %v2246_v45 = vmul.f32 %v3088_v43, %v2206_v3  ;;  %v2248_v46 = vmul.f32 %v3088_v43, %v2208_v4  ;;  %v2250_v47 = vmul.f32 %v3088_v43, %v2210_v5  ;;  %v2252_v50 = vmul.f32 %v3088_v43, %v2212_v56 }
 0x21b   :  { %v2265_v51 = vmul.f32 %v2258_v37, %v2245_v44  ;;  %v2267_v52 = vmul.f32 %v2258_v37, %v2247_v48  ;;  %v2269_v53 = vmul.f32 %v2258_v37, %v2249_v49  ;;  %v2271_v54 = vmul.f32 %v2258_v37, %v2251_v42 }
 0x21c   :  { %v2266_v55 = vmul.f32 %v2262_v40, %v2246_v45  ;;  %v2268_v57 = vmul.f32 %v2262_v40, %v2248_v46  ;;  %v2270_v6 = vmul.f32 %v2262_v40, %v2250_v47  ;;  %v2272_v58 = vmul.f32 %v2262_v40, %v2252_v50 }
 0x21d   :  { %v2285_v62 = vadd.f32 %v2278_v39, %v2265_v51  ;;  %v2287_v60 = vadd.f32 %v2278_v39, %v2267_v52  ;;  %v2289_v59 = vadd.f32 %v2278_v39, %v2269_v53  ;;  %v2291_v61 = vadd.f32 %v2278_v39, %v2271_v54 }
 0x21e   :  { %v2286_v63 = vadd.f32 %v2282_v41, %v2266_v55  ;;  %v2288_v0 = vadd.f32 %v2282_v41, %v2268_v57  ;;  %v2290_v1 = vadd.f32 %v2282_v41, %v2270_v6  ;;  %v2292_v2 = vadd.f32 %v2282_v41, %v2272_v58 }
 0x21f   :  { %v2293_v3 = vmul.f32 0.2, %v2285_v62  ;;  %v2295_v4 = vmul.f32 0.2, %v2287_v60  ;;  %v2297_v5 = vmul.f32 0.2, %v2289_v59 }
 0x220   :  { %v2299_v56 = vmul.f32 0.2, %v2291_v61  ;;  %v2294_v7 = vmul.f32 0.2, %v2286_v63  ;;  %v2296_v8 = vmul.f32 0.2, %v2288_v0 }
 0x221   :  { %v2301_v9 = vmax.f32 %v2285_v62, %v2293_v3  ;;  %v2303_v10 = vmax.f32 %v2287_v60, %v2295_v4  ;;  %v2305_v11 = vmax.f32 %v2289_v59, %v2297_v5  ;;  %v2298_v12 = vmul.f32 0.2, %v2290_v1 }
 0x222   :  { %v2307_v13 = vmax.f32 %v2291_v61, %v2299_v56  ;;  %v2300_v14 = vmul.f32 0.2, %v2292_v2  ;;  %v2302_v16 = vmax.f32 %v2286_v63, %v2294_v7  ;;  %v2304_v17 = vmax.f32 %v2288_v0, %v2296_v8 }
 0x223   :  { %v2306_v15 = vmax.f32 %v2290_v1, %v2298_v12 }
 0x224   :  { %v2308_v18 = vmax.f32 %v2292_v2, %v2300_v14  ;;  %v2633_v20 = vpack.c.bf16 %v2302_v16, %v2301_v9  ;;  %v2634_v21 = vpack.c.bf16 %v2304_v17, %v2303_v10 }
 0x225   :  { %v2635_v19 = vpack.c.bf16 %v2306_v15, %v2305_v11 }
 0x226   :  { %v2636_v22 = vpack.c.bf16 %v2308_v18, %v2307_v13  ;;  %2333 = vst [vmem:[%s4067_s5] sm:$0xff] %v2633_v20  ;;  %2334 = vst [vmem:[%s4067_s5 + $0x8] sm:$0xff] %v2634_v21 }
 0x227   :  { %2335 = vst [vmem:[%s4067_s5 + $0x10] sm:$0xff] %v2635_v19 }
 0x228   :  { %2336 = vst [vmem:[%s4067_s5 + $0x18] sm:$0xff] %v2636_v22 }

// kernel: _lambda_.8
= control target key start
LH: loop header
LB: loop body
LE: loop exit
PB: predicated region body
PF: predicated region fallthrough
CT: control target
= control target key end

     0   :  { %s15173_s1 = inlined_call_operand.vmem [shape: bf16[4096,512], index: 1, kind: input, shape index: {}]   ;;  %s15174_s0 = inlined_call_operand.vmem [shape: bf16[32,4096], index: 0, kind: input, shape index: {}]   ;;  %s15175_s2 = inlined_call_operand.vmem [shape: f32[1,512], index: 2, kind: input, shape index: {}]   ;;  %s15176_s3 = inlined_call_operand.vmem [shape: f32[1,512], index: 3, kind: input, shape index: {}]   ;;  %s15177_s4 = inlined_call_operand.vmem [shape: f32[1,512], index: 4, kind: input, shape index: {}]   ;;  %s15178_s5 = inlined_call_operand.vmem [shape: bf16[32,512], index: 5, kind: output, shape index: {}]  }
   0x1   :  { %v9981_v0 = vld [vmem:[%s15173_s1 + $0x4] ss:$16 sps:$4 sm:$0xff]   ;;  %v9983_v1 = vld [vmem:[%s15173_s1 + $0xc] ss:$16 sps:$4 sm:$0xff]   ;;  %v9985_v2 = vld [vmem:[%s15173_s1] ss:$16 sps:$4 sm:$0xff]  }
   0x2   :  { %6570 = vmatprep.subr.bf16.mxu0 %v9981_v0  ;;  %v9986_v3 = vld [vmem:[%s15173_s1 + $0x8] ss:$16 sps:$4 sm:$0xff]   ;;  %7418 = vmatprep.subr.bf16.mxu1 %v9983_v1  ;;  %v9987_v4 = vld [vmem:[%s15173_s1 + $0x24] ss:$16 sps:$4 sm:$0xff]   ;;  %v9989_v5 = vld [vmem:[%s15173_s1 + $0x2c] ss:$16 sps:$4 sm:$0xff]  }
   0x3   :  { %6571 = vmatpush1.bf16.msra.mxu0 %v9985_v2  ;;  %7419 = vmatpush1.bf16.msra.mxu1 %v9986_v3  ;;  %v9991_v6 = vld [vmem:[%s15173_s1 + $0x20] ss:$16 sps:$4 sm:$0xff]   ;;  %v9992_v7 = vld [vmem:[%s15173_s1 + $0x28] ss:$16 sps:$4 sm:$0xff]   ;;  %v9993_v8 = vld [vmem:[%s15173_s1 + $0x44] ss:$16 sps:$4 sm:$0xff]  }
   0x4   :  { %6572 = vmatprep.subr.bf16.mxu0 %v9987_v4  ;;  %7420 = vmatprep.subr.bf16.mxu1 %v9989_v5  ;;  %v9995_v9 = vld [vmem:[%s15173_s1 + $0x4c] ss:$16 sps:$4 sm:$0xff]   ;;  %v9997_v10 = vld [vmem:[%s15173_s1 + $0x40] ss:$16 sps:$4 sm:$0xff]   ;;  %v9998_v11 = vld [vmem:[%s15173_s1 + $0x48] ss:$16 sps:$4 sm:$0xff]  }
   0x5   :  { %v9999_v12 = vld [vmem:[%s15173_s1 + $0x64] ss:$16 sps:$4 sm:$0xff]   ;;  %v10001_v13 = vld [vmem:[%s15173_s1 + $0x6c] ss:$16 sps:$4 sm:$0xff]   ;;  %v10003_v14 = vld [vmem:[%s15173_s1 + $0x60] ss:$16 sps:$4 sm:$0xff]  }
   0x6   :  { %v10004_v15 = vld [vmem:[%s15173_s1 + $0x68] ss:$16 sps:$4 sm:$0xff]   ;;  %v10005_v16 = vld [vmem:[%s15173_s1 + $0x84] ss:$16 sps:$4 sm:$0xff]   ;;  %v10007_v17 = vld [vmem:[%s15173_s1 + $0x8c] ss:$16 sps:$4 sm:$0xff]  }
   0x7   :  { %6573 = vmatpush1.bf16.msra.mxu0 %v9991_v6  ;;  %7421 = vmatpush1.bf16.msra.mxu1 %v9992_v7  ;;  %v10009_v18 = vld [vmem:[%s15173_s1 + $0x80] ss:$16 sps:$4 sm:$0xff]   ;;  %v10010_v19 = vld [vmem:[%s15173_s1 + $0x88] ss:$16 sps:$4 sm:$0xff]   ;;  %v10011_v20 = vld [vmem:[%s15173_s1 + $0xa4] ss:$16 sps:$4 sm:$0xff]  }
   0x8   :  { %6574 = vmatprep.subr.bf16.mxu0 %v9993_v8  ;;  %7422 = vmatprep.subr.bf16.mxu1 %v9995_v9  ;;  %v10013_v21 = vld [vmem:[%s15173_s1 + $0xac] ss:$16 sps:$4 sm:$0xff]   ;;  %v10015_v22 = vld [vmem:[%s15173_s1 + $0xa0] ss:$16 sps:$4 sm:$0xff]   ;;  %v10016_v23 = vld [vmem:[%s15173_s1 + $0xa8] ss:$16 sps:$4 sm:$0xff]  }
   0x9   :  { %v10017_v24 = vld [vmem:[%s15173_s1 + $0xc4] ss:$16 sps:$4 sm:$0xff]   ;;  %v10019_v25 = vld [vmem:[%s15173_s1 + $0xcc] ss:$16 sps:$4 sm:$0xff]   ;;  %v10021_v26 = vld [vmem:[%s15173_s1 + $0xc0] ss:$16 sps:$4 sm:$0xff]  }
   0xa   :  { %v10022_v27 = vld [vmem:[%s15173_s1 + $0xc8] ss:$16 sps:$4 sm:$0xff]   ;;  %v10023_v28 = vld [vmem:[%s15173_s1 + $0xe4] ss:$16 sps:$4 sm:$0xff]   ;;  %v10025_v29 = vld [vmem:[%s15173_s1 + $0xec] ss:$16 sps:$4 sm:$0xff]  }
   0xb   :  { %6575 = vmatpush1.bf16.msra.mxu0 %v9997_v10  ;;  %7423 = vmatpush1.bf16.msra.mxu1 %v9998_v11  ;;  %v10027_v30 = vld [vmem:[%s15173_s1 + $0xe0] ss:$16 sps:$4 sm:$0xff]   ;;  %v10028_v31 = vld [vmem:[%s15173_s1 + $0xe8] ss:$16 sps:$4 sm:$0xff]   ;;  %v10029_v32 = vld [vmem:[%s15173_s1 + $0x104] ss:$16 sps:$4 sm:$0xff]  }
   0xc   :  { %6576 = vmatprep.subr.bf16.mxu0 %v9999_v12  ;;  %7424 = vmatprep.subr.bf16.mxu1 %v10001_v13  ;;  %v10031_v33 = vld [vmem:[%s15173_s1 + $0x10c] ss:$16 sps:$4 sm:$0xff]   ;;  %v10033_v34 = vld [vmem:[%s15173_s1 + $0x100] ss:$16 sps:$4 sm:$0xff]   ;;  %v10034_v35 = vld [vmem:[%s15173_s1 + $0x108] ss:$16 sps:$4 sm:$0xff]  }
   0xd   :  { %v10035_v36 = vld [vmem:[%s15173_s1 + $0x124] ss:$16 sps:$4 sm:$0xff]   ;;  %v10037_v37 = vld [vmem:[%s15173_s1 + $0x12c] ss:$16 sps:$4 sm:$0xff]   ;;  %v10039_v38 = vld [vmem:[%s15173_s1 + $0x120] ss:$16 sps:$4 sm:$0xff]  }
   0xe   :  { %v10040_v39 = vld [vmem:[%s15173_s1 + $0x128] ss:$16 sps:$4 sm:$0xff]   ;;  %v10041_v40 = vld [vmem:[%s15173_s1 + $0x144] ss:$16 sps:$4 sm:$0xff]   ;;  %v10043_v41 = vld [vmem:[%s15173_s1 + $0x14c] ss:$16 sps:$4 sm:$0xff]  }
   0xf   :  { %6577 = vmatpush1.bf16.msra.mxu0 %v10003_v14  ;;  %7425 = vmatpush1.bf16.msra.mxu1 %v10004_v15  ;;  %v10045_v42 = vld [vmem:[%s15173_s1 + $0x140] ss:$16 sps:$4 sm:$0xff]   ;;  %v10046_v43 = vld [vmem:[%s15173_s1 + $0x148] ss:$16 sps:$4 sm:$0xff]   ;;  %v10047_v44 = vld [vmem:[%s15173_s1 + $0x164] ss:$16 sps:$4 sm:$0xff]  }
  0x10   :  { %6578 = vmatprep.subr.bf16.mxu0 %v10005_v16  ;;  %7426 = vmatprep.subr.bf16.mxu1 %v10007_v17  ;;  %v10049_v45 = vld [vmem:[%s15173_s1 + $0x16c] ss:$16 sps:$4 sm:$0xff]   ;;  %v20_v46 = vld [vmem:[%s15174_s0] sm:$0xff]  ;;  %v10052_v49 = vld [vmem:[%s15173_s1 + $0x168] ss:$16 sps:$4 sm:$0xff]  }
  0x11   :  { %v36_v47 = vld [vmem:[%s15174_s0 + $0x80] sm:$0xff]  ;;  %v10055_v52 = vld [vmem:[%s15173_s1 + $0x18c] ss:$16 sps:$4 sm:$0xff]   ;;  %v10058_v54 = vld [vmem:[%s15173_s1 + $0x188] ss:$16 sps:$4 sm:$0xff]  }
  0x12   :  { %v10051_v48 = vld [vmem:[%s15173_s1 + $0x160] ss:$16 sps:$4 sm:$0xff]   ;;  %v8620_v50 = vcombine.high %v20_v46, %v36_v47  ;;  %v10053_v51 = vld [vmem:[%s15173_s1 + $0x184] ss:$16 sps:$4 sm:$0xff]   ;;  %v10061_v56 = vld [vmem:[%s15173_s1 + $0x1ac] ss:$16 sps:$4 sm:$0xff]   ;;  %v8619_v5 = vcombine.low %v20_v46, %v36_v47 }
  0x13   :  { %6579 = vmatpush1.bf16.msra.mxu0 %v10009_v18  ;;  %7427 = vmatpush1.bf16.msra.mxu1 %v10010_v19  ;;  %v10057_v53 = vld [vmem:[%s15173_s1 + $0x180] ss:$16 sps:$4 sm:$0xff]   ;;  %v10059_v55 = vld [vmem:[%s15173_s1 + $0x1a4] ss:$16 sps:$4 sm:$0xff]   ;;  %v10064_v58 = vld [vmem:[%s15173_s1 + $0x1a8] ss:$16 sps:$4 sm:$0xff]  }
  0x14   :  { %6580 = vmatprep.subr.bf16.mxu0 %v10011_v20  ;;  %7428 = vmatprep.subr.bf16.mxu1 %v10013_v21  ;;  %v10063_v57 = vld [vmem:[%s15173_s1 + $0x1a0] ss:$16 sps:$4 sm:$0xff]   ;;  %v10065_v59 = vld [vmem:[%s15173_s1 + $0x1c4] ss:$16 sps:$4 sm:$0xff]   ;;  %v10067_v60 = vld [vmem:[%s15173_s1 + $0x1cc] ss:$16 sps:$4 sm:$0xff]  }
  0x15   :  { %6602 = vmatprep.mubr.bf16.mxu0 %v8620_v50  ;;  %7450 = vmatprep.mubr.bf16.mxu1 %v8620_v50  ;;  %v10069_v61 = vld [vmem:[%s15173_s1 + $0x1c0] ss:$16 sps:$4 sm:$0xff]   ;;  %v10070_v62 = vld [vmem:[%s15173_s1 + $0x1c8] ss:$16 sps:$4 sm:$0xff]   ;;  %v10071_v63 = vld [vmem:[%s15173_s1 + $0x1e4] ss:$16 sps:$4 sm:$0xff]  }
  0x16   :  { %v10073_v0 = vld [vmem:[%s15173_s1 + $0x1ec] ss:$16 sps:$4 sm:$0xff]   ;;  %v10075_v1 = vld [vmem:[%s15173_s1 + $0x1e0] ss:$16 sps:$4 sm:$0xff]   ;;  %v10076_v2 = vld [vmem:[%s15173_s1 + $0x1e8] ss:$16 sps:$4 sm:$0xff]  }
  0x17   :  { %6581 = vmatpush1.bf16.msra.mxu0 %v10015_v22  ;;  %7429 = vmatpush1.bf16.msra.mxu1 %v10016_v23  ;;  %v10079_v3 = vld [vmem:[%s15173_s1 + $0x204] ss:$16 sps:$4 sm:$0xff]   ;;  %v10082_v4 = vld [vmem:[%s15173_s1 + $0x20c] ss:$16 sps:$4 sm:$0xff]   ;;  %v10077_v6 = vld [vmem:[%s15173_s1 + $0x200] ss:$16 sps:$4 sm:$0xff]  }
  0x18   :  { %6582 = vmatprep.subr.bf16.mxu0 %v10017_v24  ;;  %7430 = vmatprep.subr.bf16.mxu1 %v10019_v25  ;;  %v10080_v7 = vld [vmem:[%s15173_s1 + $0x208] ss:$16 sps:$4 sm:$0xff]   ;;  %v10085_v8 = vld [vmem:[%s15173_s1 + $0x224] ss:$16 sps:$4 sm:$0xff]   ;;  %v10088_v9 = vld [vmem:[%s15173_s1 + $0x22c] ss:$16 sps:$4 sm:$0xff]  }
  0x19   :  { %v10083_v10 = vld [vmem:[%s15173_s1 + $0x220] ss:$16 sps:$4 sm:$0xff]   ;;  %v10086_v11 = vld [vmem:[%s15173_s1 + $0x228] ss:$16 sps:$4 sm:$0xff]   ;;  %v10091_v12 = vld [vmem:[%s15173_s1 + $0x244] ss:$16 sps:$4 sm:$0xff]  }
  0x1a   :  { %v10094_v13 = vld [vmem:[%s15173_s1 + $0x24c] ss:$16 sps:$4 sm:$0xff]   ;;  %v10089_v14 = vld [vmem:[%s15173_s1 + $0x240] ss:$16 sps:$4 sm:$0xff]   ;;  %v10092_v15 = vld [vmem:[%s15173_s1 + $0x248] ss:$16 sps:$4 sm:$0xff]  }
  0x1b   :  { %6583 = vmatpush1.bf16.msra.mxu0 %v10021_v26  ;;  %7431 = vmatpush1.bf16.msra.mxu1 %v10022_v27  ;;  %v10097_v16 = vld [vmem:[%s15173_s1 + $0x264] ss:$16 sps:$4 sm:$0xff]   ;;  %v10100_v17 = vld [vmem:[%s15173_s1 + $0x26c] ss:$16 sps:$4 sm:$0xff]   ;;  %v10095_v18 = vld [vmem:[%s15173_s1 + $0x260] ss:$16 sps:$4 sm:$0xff]  }
  0x1c   :  { %6584 = vmatprep.subr.bf16.mxu0 %v10023_v28  ;;  %7432 = vmatprep.subr.bf16.mxu1 %v10025_v29  ;;  %v10098_v19 = vld [vmem:[%s15173_s1 + $0x268] ss:$16 sps:$4 sm:$0xff]   ;;  %v10103_v20 = vld [vmem:[%s15173_s1 + $0x284] ss:$16 sps:$4 sm:$0xff]   ;;  %v10106_v21 = vld [vmem:[%s15173_s1 + $0x28c] ss:$16 sps:$4 sm:$0xff]  }
  0x1d   :  { %v10101_v22 = vld [vmem:[%s15173_s1 + $0x280] ss:$16 sps:$4 sm:$0xff]   ;;  %v10104_v23 = vld [vmem:[%s15173_s1 + $0x288] ss:$16 sps:$4 sm:$0xff]   ;;  %v10109_v24 = vld [vmem:[%s15173_s1 + $0x2a4] ss:$16 sps:$4 sm:$0xff]  }
  0x1e   :  { %v10112_v25 = vld [vmem:[%s15173_s1 + $0x2ac] ss:$16 sps:$4 sm:$0xff]   ;;  %v52_v26 = vld [vmem:[%s15174_s0 + $0x100] sm:$0xff]  ;;  %v10128_v46 = vld [vmem:[%s15173_s1 + $0x308] ss:$16 sps:$4 sm:$0xff]  }
  0x1f   :  { %6585 = vmatpush1.bf16.msra.mxu0 %v10027_v30  ;;  %7433 = vmatpush1.bf16.msra.mxu1 %v10028_v31  ;;  %v68_v27 = vld [vmem:[%s15174_s0 + $0x180] sm:$0xff]  ;;  %v10110_v30 = vld [vmem:[%s15173_s1 + $0x2a8] ss:$16 sps:$4 sm:$0xff]  }
  0x20   :  { %6586 = vmatprep.subr.bf16.mxu0 %v10029_v32  ;;  %7434 = vmatprep.subr.bf16.mxu1 %v10031_v33  ;;  %v8652_v28 = vcombine.high %v52_v26, %v68_v27  ;;  %v10107_v29 = vld [vmem:[%s15173_s1 + $0x2a0] ss:$16 sps:$4 sm:$0xff]   ;;  %v8651_v31 = vcombine.low %v52_v26, %v68_v27  ;;  %v10115_v32 = vld [vmem:[%s15173_s1 + $0x2c4] ss:$16 sps:$4 sm:$0xff]   ;;  %v10118_v33 = vld [vmem:[%s15173_s1 + $0x2cc] ss:$16 sps:$4 sm:$0xff]  }
  0x21   :  { %v10133_v47 = vld [vmem:[%s15173_s1 + $0x324] ss:$16 sps:$4 sm:$0xff]   ;;  %v10134_v50 = vld [vmem:[%s15173_s1 + $0x328] ss:$16 sps:$4 sm:$0xff]  }
  0x22   :  { %v12010_v27 = vld [vmem:[%s15174_s0 + $0x90] sm:$0xff] }
  0x23   :  { %6587 = vmatpush1.bf16.msra.mxu0 %v10033_v34  ;;  %7435 = vmatpush1.bf16.msra.mxu1 %v10034_v35  ;;  %v11841_v34 = vld [vmem:[%s15174_s0 + $0x8] sm:$0xff] }
  0x24   :  { %6588 = vmatprep.subr.bf16.mxu0 %v10035_v36  ;;  %7436 = vmatprep.subr.bf16.mxu1 %v10037_v37  ;;  %v11846_v35 = vld [vmem:[%s15174_s0 + $0x88] sm:$0xff]  ;;  %v10113_v36 = vld [vmem:[%s15173_s1 + $0x2c0] ss:$16 sps:$4 sm:$0xff]  }
  0x25   :  { %v10116_v37 = vld [vmem:[%s15173_s1 + $0x2c8] ss:$16 sps:$4 sm:$0xff]  }
  0x27   :  { %6589 = vmatpush1.bf16.msra.mxu0 %v10039_v38  ;;  %7437 = vmatpush1.bf16.msra.mxu1 %v10040_v39  ;;  %v8622_v38 = vcombine.high %v11841_v34, %v11846_v35  ;;  %v10121_v39 = vld [vmem:[%s15173_s1 + $0x2e4] ss:$16 sps:$4 sm:$0xff]  }
  0x28   :  { %6590 = vmatprep.subr.bf16.mxu0 %v10041_v40  ;;  %7438 = vmatprep.subr.bf16.mxu1 %v10043_v41  ;;  %v10124_v40 = vld [vmem:[%s15173_s1 + $0x2ec] ss:$16 sps:$4 sm:$0xff]   ;;  %v10119_v41 = vld [vmem:[%s15173_s1 + $0x2e0] ss:$16 sps:$4 sm:$0xff]  }
  0x2b   :  { %6591 = vmatpush1.bf16.msra.mxu0 %v10045_v42  ;;  %7439 = vmatpush1.bf16.msra.mxu1 %v10046_v43  ;;  %v10122_v42 = vld [vmem:[%s15173_s1 + $0x2e8] ss:$16 sps:$4 sm:$0xff]   ;;  %v10127_v43 = vld [vmem:[%s15173_s1 + $0x304] ss:$16 sps:$4 sm:$0xff]  }
  0x2c   :  { %6592 = vmatprep.subr.bf16.mxu0 %v10047_v44  ;;  %7440 = vmatprep.subr.bf16.mxu1 %v10049_v45  ;;  %v10130_v44 = vld [vmem:[%s15173_s1 + $0x30c] ss:$16 sps:$4 sm:$0xff]   ;;  %v10125_v45 = vld [vmem:[%s15173_s1 + $0x300] ss:$16 sps:$4 sm:$0xff]  }
  0x2f   :  { %6593 = vmatpush1.bf16.msra.mxu0 %v10051_v48  ;;  %7441 = vmatpush1.bf16.msra.mxu1 %v10052_v49  ;;  %v10136_v48 = vld [vmem:[%s15173_s1 + $0x32c] ss:$16 sps:$4 sm:$0xff]   ;;  %v10131_v49 = vld [vmem:[%s15173_s1 + $0x320] ss:$16 sps:$4 sm:$0xff]  }
  0x30   :  { %6594 = vmatprep.subr.bf16.mxu0 %v10053_v51  ;;  %7442 = vmatprep.subr.bf16.mxu1 %v10055_v52  ;;  %v10139_v51 = vld [vmem:[%s15173_s1 + $0x344] ss:$16 sps:$4 sm:$0xff]   ;;  %v10142_v52 = vld [vmem:[%s15173_s1 + $0x34c] ss:$16 sps:$4 sm:$0xff]  }
  0x33   :  { %6595 = vmatpush1.bf16.msra.mxu0 %v10057_v53  ;;  %7443 = vmatpush1.bf16.msra.mxu1 %v10058_v54  ;;  %v10137_v53 = vld [vmem:[%s15173_s1 + $0x340] ss:$16 sps:$4 sm:$0xff]   ;;  %v10140_v54 = vld [vmem:[%s15173_s1 + $0x348] ss:$16 sps:$4 sm:$0xff]  }
  0x34   :  { %6596 = vmatprep.subr.bf16.mxu0 %v10059_v55  ;;  %7444 = vmatprep.subr.bf16.mxu1 %v10061_v56  ;;  %v10145_v55 = vld [vmem:[%s15173_s1 + $0x364] ss:$16 sps:$4 sm:$0xff]   ;;  %v10148_v56 = vld [vmem:[%s15173_s1 + $0x36c] ss:$16 sps:$4 sm:$0xff]  }
  0x37   :  { %6597 = vmatpush1.bf16.msra.mxu0 %v10063_v57  ;;  %7445 = vmatpush1.bf16.msra.mxu1 %v10064_v58  ;;  %v10143_v57 = vld [vmem:[%s15173_s1 + $0x360] ss:$16 sps:$4 sm:$0xff]   ;;  %v10146_v58 = vld [vmem:[%s15173_s1 + $0x368] ss:$16 sps:$4 sm:$0xff]  }
  0x38   :  { %6598 = vmatprep.subr.bf16.mxu0 %v10065_v59  ;;  %7446 = vmatprep.subr.bf16.mxu1 %v10067_v60  ;;  %v10151_v59 = vld [vmem:[%s15173_s1 + $0x384] ss:$16 sps:$4 sm:$0xff]   ;;  %v10154_v60 = vld [vmem:[%s15173_s1 + $0x38c] ss:$16 sps:$4 sm:$0xff]  }
  0x3b   :  { %6599 = vmatpush1.bf16.msra.mxu0 %v10069_v61  ;;  %7447 = vmatpush1.bf16.msra.mxu1 %v10070_v62  ;;  %v10149_v61 = vld [vmem:[%s15173_s1 + $0x380] ss:$16 sps:$4 sm:$0xff]   ;;  %v10152_v62 = vld [vmem:[%s15173_s1 + $0x388] ss:$16 sps:$4 sm:$0xff]  }
  0x3c   :  { %6600 = vmatprep.subr.bf16.mxu0 %v10071_v63  ;;  %7448 = vmatprep.subr.bf16.mxu1 %v10073_v0  ;;  %v10157_v63 = vld [vmem:[%s15173_s1 + $0x3a4] ss:$16 sps:$4 sm:$0xff]   ;;  %v10160_v0 = vld [vmem:[%s15173_s1 + $0x3ac] ss:$16 sps:$4 sm:$0xff]  }
  0x3f   :  { %6601 = vmatpush1.bf16.msra.mxu0 %v10075_v1  ;;  %7449 = vmatpush1.bf16.msra.mxu1 %v10076_v2  ;;  %v10155_v1 = vld [vmem:[%s15173_s1 + $0x3a0] ss:$16 sps:$4 sm:$0xff]   ;;  %v10158_v2 = vld [vmem:[%s15173_s1 + $0x3a8] ss:$16 sps:$4 sm:$0xff]  }
  0x40   :  { %6623 = vmatprep.subr.bf16.mxu0 %v10079_v3  ;;  %7471 = vmatprep.subr.bf16.mxu1 %v10082_v4  ;;  %v10163_v3 = vld [vmem:[%s15173_s1 + $0x3c4] ss:$16 sps:$4 sm:$0xff]   ;;  %v10166_v4 = vld [vmem:[%s15173_s1 + $0x3cc] ss:$16 sps:$4 sm:$0xff]  }
  0x42   :  { %6603 = vmatmul.mubr.bf16.vlgmr.msra.gmra.mrb[0].mxu0 %v8619_v5  ;;  %7451 = vmatmul.mubr.bf16.vlgmr.msra.gmra.mrb[0].mxu1 %v8619_v5  ;;  %v10161_v5 = vld [vmem:[%s15173_s1 + $0x3c0] ss:$16 sps:$4 sm:$0xff]  }
  0x43   :  { %6624 = vmatpush1.bf16.msra.mxu0 %v10077_v6  ;;  %7472 = vmatpush1.bf16.msra.mxu1 %v10080_v7  ;;  %v10164_v6 = vld [vmem:[%s15173_s1 + $0x3c8] ss:$16 sps:$4 sm:$0xff]   ;;  %v10169_v7 = vld [vmem:[%s15173_s1 + $0x3e4] ss:$16 sps:$4 sm:$0xff]  }
  0x44   :  { %6625 = vmatprep.subr.bf16.mxu0 %v10085_v8  ;;  %7473 = vmatprep.subr.bf16.mxu1 %v10088_v9  ;;  %v10172_v8 = vld [vmem:[%s15173_s1 + $0x3ec] ss:$16 sps:$4 sm:$0xff]   ;;  %v10167_v9 = vld [vmem:[%s15173_s1 + $0x3e0] ss:$16 sps:$4 sm:$0xff]  }
  0x45   :  { %6612 = vmatprep.mubr.bf16.mxu0 %v8652_v28  ;;  %7460 = vmatprep.mubr.bf16.mxu1 %v8652_v28  ;;  %v10185_v28 = vld [vmem:[%s15173_s1 + $0x440] ss:$16 sps:$4 sm:$0xff]  }
  0x47   :  { %6626 = vmatpush1.bf16.msra.mxu0 %v10083_v10  ;;  %7474 = vmatpush1.bf16.msra.mxu1 %v10086_v11  ;;  %v10170_v10 = vld [vmem:[%s15173_s1 + $0x3e8] ss:$16 sps:$4 sm:$0xff]   ;;  %v10175_v11 = vld [vmem:[%s15173_s1 + $0x404] ss:$16 sps:$4 sm:$0xff]  }
  0x48   :  { %6627 = vmatprep.subr.bf16.mxu0 %v10091_v12  ;;  %7475 = vmatprep.subr.bf16.mxu1 %v10094_v13  ;;  %v10178_v12 = vld [vmem:[%s15173_s1 + $0x40c] ss:$16 sps:$4 sm:$0xff]   ;;  %v10173_v13 = vld [vmem:[%s15173_s1 + $0x400] ss:$16 sps:$4 sm:$0xff]  }
  0x4a   :  { %6613 = vmatmul.mubr.bf16.gmra.mrb[4].mxu0 %v8651_v31  ;;  %7461 = vmatmul.mubr.bf16.gmra.mrb[4].mxu1 %v8651_v31  ;;  %v10196_v31 = vld [vmem:[%s15173_s1 + $0x46c] ss:$16 sps:$4 sm:$0xff]  }
  0x4b   :  { %6628 = vmatpush1.bf16.msra.mxu0 %v10089_v14  ;;  %7476 = vmatpush1.bf16.msra.mxu1 %v10092_v15  ;;  %v10176_v14 = vld [vmem:[%s15173_s1 + $0x408] ss:$16 sps:$4 sm:$0xff]   ;;  %v8621_v15 = vcombine.low %v11841_v34, %v11846_v35  ;;  %v10199_v35 = vld [vmem:[%s15173_s1 + $0x484] ss:$16 sps:$4 sm:$0xff]  }
  0x4c   :  { %6629 = vmatprep.subr.bf16.mxu0 %v10097_v16  ;;  %7477 = vmatprep.subr.bf16.mxu1 %v10100_v17  ;;  %v53_v16 = vld [vmem:[%s15174_s0 + $0x108] sm:$0xff] }
  0x4d   :  { %6655 = vmatprep.mubr.bf16.mxu0 %v8622_v38  ;;  %7503 = vmatprep.mubr.bf16.mxu1 %v8622_v38  ;;  %v69_v17 = vld [vmem:[%s15174_s0 + $0x188] sm:$0xff] }
  0x4e   :  { %v8653_v26 = vcombine.low %v53_v16, %v69_v17  ;;  %v10194_v34 = vld [vmem:[%s15173_s1 + $0x468] ss:$16 sps:$4 sm:$0xff]  }
  0x4f   :  { %6630 = vmatpush1.bf16.msra.mxu0 %v10095_v18  ;;  %7478 = vmatpush1.bf16.msra.mxu1 %v10098_v19  ;;  %v10181_v18 = vld [vmem:[%s15173_s1 + $0x424] ss:$16 sps:$4 sm:$0xff]   ;;  %v10184_v19 = vld [vmem:[%s15173_s1 + $0x42c] ss:$16 sps:$4 sm:$0xff]   ;;  %v10200_v38 = vld [vmem:[%s15173_s1 + $0x488] ss:$16 sps:$4 sm:$0xff]  }
  0x50   :  { %6631 = vmatprep.subr.bf16.mxu0 %v10103_v20  ;;  %7479 = vmatprep.subr.bf16.mxu1 %v10106_v21  ;;  %v8654_v20 = vcombine.high %v53_v16, %v69_v17  ;;  %v10179_v21 = vld [vmem:[%s15173_s1 + $0x420] ss:$16 sps:$4 sm:$0xff]   ;;  %v10268_v16 = vld [vmem:[%s15173_s1 + $0x5ec] ss:$16 sps:$4 sm:$0xff]  }
  0x51   :  { %v10263_v17 = vld [vmem:[%s15173_s1 + $0x5e0] ss:$16 sps:$4 sm:$0xff]  }
  0x53   :  { %6632 = vmatpush1.bf16.msra.mxu0 %v10101_v22  ;;  %7480 = vmatpush1.bf16.msra.mxu1 %v10104_v23  ;;  %v10182_v22 = vld [vmem:[%s15173_s1 + $0x428] ss:$16 sps:$4 sm:$0xff]   ;;  %v10187_v23 = vld [vmem:[%s15173_s1 + $0x444] ss:$16 sps:$4 sm:$0xff]  }
  0x54   :  { %6633 = vmatprep.subr.bf16.mxu0 %v10109_v24  ;;  %7481 = vmatprep.subr.bf16.mxu1 %v10112_v25  ;;  %v10190_v24 = vld [vmem:[%s15173_s1 + $0x44c] ss:$16 sps:$4 sm:$0xff]   ;;  %v12005_v25 = vld [vmem:[%s15174_s0 + $0x10] sm:$0xff] }
  0x57   :  { %6634 = vmatpush1.bf16.msra.mxu0 %v10107_v29  ;;  %7482 = vmatpush1.bf16.msra.mxu1 %v10110_v30  ;;  %v10188_v29 = vld [vmem:[%s15173_s1 + $0x448] ss:$16 sps:$4 sm:$0xff]   ;;  %v10193_v30 = vld [vmem:[%s15173_s1 + $0x464] ss:$16 sps:$4 sm:$0xff]  }
  0x58   :  { %6635 = vmatprep.subr.bf16.mxu0 %v10115_v32  ;;  %7483 = vmatprep.subr.bf16.mxu1 %v10118_v33  ;;  %v8624_v32 = vcombine.high %v12005_v25, %v12010_v27  ;;  %v10191_v33 = vld [vmem:[%s15173_s1 + $0x460] ss:$16 sps:$4 sm:$0xff]  }
  0x5b   :  { %6636 = vmatpush1.bf16.msra.mxu0 %v10113_v36  ;;  %7484 = vmatpush1.bf16.msra.mxu1 %v10116_v37  ;;  %v10202_v36 = vld [vmem:[%s15173_s1 + $0x48c] ss:$16 sps:$4 sm:$0xff]   ;;  %v10197_v37 = vld [vmem:[%s15173_s1 + $0x480] ss:$16 sps:$4 sm:$0xff]  }
  0x5c   :  { %6637 = vmatprep.subr.bf16.mxu0 %v10121_v39  ;;  %7485 = vmatprep.subr.bf16.mxu1 %v10124_v40  ;;  %v10205_v39 = vld [vmem:[%s15173_s1 + $0x4a4] ss:$16 sps:$4 sm:$0xff]   ;;  %v10208_v40 = vld [vmem:[%s15173_s1 + $0x4ac] ss:$16 sps:$4 sm:$0xff]  }
  0x5f   :  { %6638 = vmatpush1.bf16.msra.mxu0 %v10119_v41  ;;  %7486 = vmatpush1.bf16.msra.mxu1 %v10122_v42  ;;  %v10203_v41 = vld [vmem:[%s15173_s1 + $0x4a0] ss:$16 sps:$4 sm:$0xff]   ;;  %v10206_v42 = vld [vmem:[%s15173_s1 + $0x4a8] ss:$16 sps:$4 sm:$0xff]  }
  0x60   :  { %6639 = vmatprep.subr.bf16.mxu0 %v10127_v43  ;;  %7487 = vmatprep.subr.bf16.mxu1 %v10130_v44  ;;  %v10211_v43 = vld [vmem:[%s15173_s1 + $0x4c4] ss:$16 sps:$4 sm:$0xff]   ;;  %v10214_v44 = vld [vmem:[%s15173_s1 + $0x4cc] ss:$16 sps:$4 sm:$0xff]  }
  0x63   :  { %6640 = vmatpush1.bf16.msra.mxu0 %v10125_v45  ;;  %7488 = vmatpush1.bf16.msra.mxu1 %v10128_v46  ;;  %v10209_v45 = vld [vmem:[%s15173_s1 + $0x4c0] ss:$16 sps:$4 sm:$0xff]   ;;  %v10212_v46 = vld [vmem:[%s15173_s1 + $0x4c8] ss:$16 sps:$4 sm:$0xff]  }
  0x64   :  { %6641 = vmatprep.subr.bf16.mxu0 %v10133_v47  ;;  %7489 = vmatprep.subr.bf16.mxu1 %v10136_v48  ;;  %v10217_v47 = vld [vmem:[%s15173_s1 + $0x4e4] ss:$16 sps:$4 sm:$0xff]   ;;  %v10220_v48 = vld [vmem:[%s15173_s1 + $0x4ec] ss:$16 sps:$4 sm:$0xff]  }
  0x67   :  { %6642 = vmatpush1.bf16.msra.mxu0 %v10131_v49  ;;  %7490 = vmatpush1.bf16.msra.mxu1 %v10134_v50  ;;  %v10215_v49 = vld [vmem:[%s15173_s1 + $0x4e0] ss:$16 sps:$4 sm:$0xff]   ;;  %v10218_v50 = vld [vmem:[%s15173_s1 + $0x4e8] ss:$16 sps:$4 sm:$0xff]  }
  0x68   :  { %6643 = vmatprep.subr.bf16.mxu0 %v10139_v51  ;;  %7491 = vmatprep.subr.bf16.mxu1 %v10142_v52  ;;  %v10223_v51 = vld [vmem:[%s15173_s1 + $0x504] ss:$16 sps:$4 sm:$0xff]   ;;  %v10226_v52 = vld [vmem:[%s15173_s1 + $0x50c] ss:$16 sps:$4 sm:$0xff]  }
  0x6b   :  { %6644 = vmatpush1.bf16.msra.mxu0 %v10137_v53  ;;  %7492 = vmatpush1.bf16.msra.mxu1 %v10140_v54  ;;  %v10221_v53 = vld [vmem:[%s15173_s1 + $0x500] ss:$16 sps:$4 sm:$0xff]   ;;  %v10224_v54 = vld [vmem:[%s15173_s1 + $0x508] ss:$16 sps:$4 sm:$0xff]  }
  0x6c   :  { %6645 = vmatprep.subr.bf16.mxu0 %v10145_v55  ;;  %7493 = vmatprep.subr.bf16.mxu1 %v10148_v56  ;;  %v10229_v55 = vld [vmem:[%s15173_s1 + $0x524] ss:$16 sps:$4 sm:$0xff]   ;;  %v10232_v56 = vld [vmem:[%s15173_s1 + $0x52c] ss:$16 sps:$4 sm:$0xff]  }
  0x6f   :  { %6646 = vmatpush1.bf16.msra.mxu0 %v10143_v57  ;;  %7494 = vmatpush1.bf16.msra.mxu1 %v10146_v58  ;;  %v10227_v57 = vld [vmem:[%s15173_s1 + $0x520] ss:$16 sps:$4 sm:$0xff]   ;;  %v10230_v58 = vld [vmem:[%s15173_s1 + $0x528] ss:$16 sps:$4 sm:$0xff]  }
  0x70   :  { %6647 = vmatprep.subr.bf16.mxu0 %v10151_v59  ;;  %7495 = vmatprep.subr.bf16.mxu1 %v10154_v60  ;;  %v10235_v59 = vld [vmem:[%s15173_s1 + $0x544] ss:$16 sps:$4 sm:$0xff]   ;;  %v10238_v60 = vld [vmem:[%s15173_s1 + $0x54c] ss:$16 sps:$4 sm:$0xff]  }
  0x73   :  { %6648 = vmatpush1.bf16.msra.mxu0 %v10149_v61  ;;  %7496 = vmatpush1.bf16.msra.mxu1 %v10152_v62  ;;  %v10233_v61 = vld [vmem:[%s15173_s1 + $0x540] ss:$16 sps:$4 sm:$0xff]   ;;  %v10236_v62 = vld [vmem:[%s15173_s1 + $0x548] ss:$16 sps:$4 sm:$0xff]  }
  0x74   :  { %6649 = vmatprep.subr.bf16.mxu0 %v10157_v63  ;;  %7497 = vmatprep.subr.bf16.mxu1 %v10160_v0  ;;  %v10241_v63 = vld [vmem:[%s15173_s1 + $0x564] ss:$16 sps:$4 sm:$0xff]   ;;  %v10244_v0 = vld [vmem:[%s15173_s1 + $0x56c] ss:$16 sps:$4 sm:$0xff]  }
  0x77   :  { %6650 = vmatpush1.bf16.msra.mxu0 %v10155_v1  ;;  %7498 = vmatpush1.bf16.msra.mxu1 %v10158_v2  ;;  %v10239_v1 = vld [vmem:[%s15173_s1 + $0x560] ss:$16 sps:$4 sm:$0xff]   ;;  %v10242_v2 = vld [vmem:[%s15173_s1 + $0x568] ss:$16 sps:$4 sm:$0xff]  }
  0x78   :  { %6651 = vmatprep.subr.bf16.mxu0 %v10163_v3  ;;  %7499 = vmatprep.subr.bf16.mxu1 %v10166_v4  ;;  %v10247_v3 = vld [vmem:[%s15173_s1 + $0x584] ss:$16 sps:$4 sm:$0xff]   ;;  %v10250_v4 = vld [vmem:[%s15173_s1 + $0x58c] ss:$16 sps:$4 sm:$0xff]  }
  0x7b   :  { %6652 = vmatpush1.bf16.msra.mxu0 %v10161_v5  ;;  %7500 = vmatpush1.bf16.msra.mxu1 %v10164_v6  ;;  %v10245_v5 = vld [vmem:[%s15173_s1 + $0x580] ss:$16 sps:$4 sm:$0xff]   ;;  %v10248_v6 = vld [vmem:[%s15173_s1 + $0x588] ss:$16 sps:$4 sm:$0xff]  }
  0x7c   :  { %6653 = vmatprep.subr.bf16.mxu0 %v10169_v7  ;;  %7501 = vmatprep.subr.bf16.mxu1 %v10172_v8  ;;  %v10253_v7 = vld [vmem:[%s15173_s1 + $0x5a4] ss:$16 sps:$4 sm:$0xff]   ;;  %v10256_v8 = vld [vmem:[%s15173_s1 + $0x5ac] ss:$16 sps:$4 sm:$0xff]  }
  0x7f   :  { %6654 = vmatpush1.bf16.msra.mxu0 %v10167_v9  ;;  %7502 = vmatpush1.bf16.msra.mxu1 %v10170_v10  ;;  %v10251_v9 = vld [vmem:[%s15173_s1 + $0x5a0] ss:$16 sps:$4 sm:$0xff]   ;;  %v10254_v10 = vld [vmem:[%s15173_s1 + $0x5a8] ss:$16 sps:$4 sm:$0xff]  }
  0x80   :  { %6676 = vmatprep.subr.bf16.mxu0 %v10175_v11  ;;  %7524 = vmatprep.subr.bf16.mxu1 %v10178_v12  ;;  %v10259_v11 = vld [vmem:[%s15173_s1 + $0x5c4] ss:$16 sps:$4 sm:$0xff]   ;;  %v10262_v12 = vld [vmem:[%s15173_s1 + $0x5cc] ss:$16 sps:$4 sm:$0xff]  }
  0x82   :  { %6656 = vmatmul.mubr.bf16.vlgmr.msra.gmra.mrb[0].mxu0 %v8621_v15  ;;  %7504 = vmatmul.mubr.bf16.vlgmr.msra.gmra.mrb[0].mxu1 %v8621_v15  ;;  %v10265_v15 = vld [vmem:[%s15173_s1 + $0x5e4] ss:$16 sps:$4 sm:$0xff]  }
  0x83   :  { %6677 = vmatpush1.bf16.msra.mxu0 %v10173_v13  ;;  %7525 = vmatpush1.bf16.msra.mxu1 %v10176_v14  ;;  %v10257_v13 = vld [vmem:[%s15173_s1 + $0x5c0] ss:$16 sps:$4 sm:$0xff]   ;;  %v10260_v14 = vld [vmem:[%s15173_s1 + $0x5c8] ss:$16 sps:$4 sm:$0xff]  }
  0x84   :  { %6678 = vmatprep.subr.bf16.mxu0 %v10181_v18  ;;  %7526 = vmatprep.subr.bf16.mxu1 %v10184_v19  ;;  %v10266_v18 = vld [vmem:[%s15173_s1 + $0x5e8] ss:$16 sps:$4 sm:$0xff]   ;;  %v10271_v19 = vld [vmem:[%s15173_s1 + $0x604] ss:$16 sps:$4 sm:$0xff]  }
  0x85   :  { %6665 = vmatprep.mubr.bf16.mxu0 %v8654_v20  ;;  %7513 = vmatprep.mubr.bf16.mxu1 %v8654_v20  ;;  %v10274_v20 = vld [vmem:[%s15173_s1 + $0x60c] ss:$16 sps:$4 sm:$0xff]  }
  0x87   :  { %6679 = vmatpush1.bf16.msra.mxu0 %v10179_v21  ;;  %7527 = vmatpush1.bf16.msra.mxu1 %v10182_v22  ;;  %v54_v21 = vld [vmem:[%s15174_s0 + $0x110] sm:$0xff]  ;;  %v8623_v22 = vcombine.low %v12005_v25, %v12010_v27  ;;  %v10280_v27 = vld [vmem:[%s15173_s1 + $0x62c] ss:$16 sps:$4 sm:$0xff]  }
  0x88   :  { %6680 = vmatprep.subr.bf16.mxu0 %v10187_v23  ;;  %7528 = vmatprep.subr.bf16.mxu1 %v10190_v24  ;;  %v70_v23 = vld [vmem:[%s15174_s0 + $0x190] sm:$0xff] }
  0x89   :  { %v10269_v24 = vld [vmem:[%s15173_s1 + $0x600] ss:$16 sps:$4 sm:$0xff]   ;;  %v10277_v25 = vld [vmem:[%s15173_s1 + $0x624] ss:$16 sps:$4 sm:$0xff]  }
  0x8a   :  { %6666 = vmatmul.mubr.bf16.gmra.mrb[4].mxu0 %v8653_v26  ;;  %7514 = vmatmul.mubr.bf16.gmra.mrb[4].mxu1 %v8653_v26  ;;  %v10272_v26 = vld [vmem:[%s15173_s1 + $0x608] ss:$16 sps:$4 sm:$0xff]  }
  0x8b   :  { %6681 = vmatpush1.bf16.msra.mxu0 %v10185_v28  ;;  %7529 = vmatpush1.bf16.msra.mxu1 %v10188_v29  ;;  %v8656_v28 = vcombine.high %v54_v21, %v70_v23  ;;  %v10275_v29 = vld [vmem:[%s15173_s1 + $0x620] ss:$16 sps:$4 sm:$0xff]  }
  0x8c   :  { %6682 = vmatprep.subr.bf16.mxu0 %v10193_v30  ;;  %7530 = vmatprep.subr.bf16.mxu1 %v10196_v31  ;;  %v10278_v30 = vld [vmem:[%s15173_s1 + $0x628] ss:$16 sps:$4 sm:$0xff]   ;;  %v10283_v31 = vld [vmem:[%s15173_s1 + $0x644] ss:$16 sps:$4 sm:$0xff]  }
  0x8d   :  { %6708 = vmatprep.mubr.bf16.mxu0 %v8624_v32  ;;  %7556 = vmatprep.mubr.bf16.mxu1 %v8624_v32  ;;  %v10286_v32 = vld [vmem:[%s15173_s1 + $0x64c] ss:$16 sps:$4 sm:$0xff]  }
  0x8f   :  { %6683 = vmatpush1.bf16.msra.mxu0 %v10191_v33  ;;  %7531 = vmatpush1.bf16.msra.mxu1 %v10194_v34  ;;  %v12217_v33 = vld [vmem:[%s15174_s0 + $0x18] sm:$0xff]  ;;  %v8655_v34 = vcombine.low %v54_v21, %v70_v23  ;;  %v10353_v21 = vld [vmem:[%s15173_s1 + $0x7c0] ss:$16 sps:$4 sm:$0xff]   ;;  %v10361_v23 = vld [vmem:[%s15173_s1 + $0x7e4] ss:$16 sps:$4 sm:$0xff]  }
  0x90   :  { %6684 = vmatprep.subr.bf16.mxu0 %v10199_v35  ;;  %7532 = vmatprep.subr.bf16.mxu1 %v10202_v36  ;;  %v12222_v35 = vld [vmem:[%s15174_s0 + $0x98] sm:$0xff]  ;;  %v10281_v36 = vld [vmem:[%s15173_s1 + $0x640] ss:$16 sps:$4 sm:$0xff]  }
  0x93   :  { %6685 = vmatpush1.bf16.msra.mxu0 %v10197_v37  ;;  %7533 = vmatpush1.bf16.msra.mxu1 %v10200_v38  ;;  %v10284_v37 = vld [vmem:[%s15173_s1 + $0x648] ss:$16 sps:$4 sm:$0xff]   ;;  %v10289_v38 = vld [vmem:[%s15173_s1 + $0x664] ss:$16 sps:$4 sm:$0xff]  }
  0x94   :  { %6686 = vmatprep.subr.bf16.mxu0 %v10205_v39  ;;  %7534 = vmatprep.subr.bf16.mxu1 %v10208_v40  ;;  %v10292_v39 = vld [vmem:[%s15173_s1 + $0x66c] ss:$16 sps:$4 sm:$0xff]   ;;  %v8626_v40 = vcombine.high %v12217_v33, %v12222_v35 }
  0x97   :  { %6687 = vmatpush1.bf16.msra.mxu0 %v10203_v41  ;;  %7535 = vmatpush1.bf16.msra.mxu1 %v10206_v42  ;;  %v10287_v41 = vld [vmem:[%s15173_s1 + $0x660] ss:$16 sps:$4 sm:$0xff]   ;;  %v10290_v42 = vld [vmem:[%s15173_s1 + $0x668] ss:$16 sps:$4 sm:$0xff]  }
  0x98   :  { %6688 = vmatprep.subr.bf16.mxu0 %v10211_v43  ;;  %7536 = vmatprep.subr.bf16.mxu1 %v10214_v44  ;;  %v10295_v43 = vld [vmem:[%s15173_s1 + $0x684] ss:$16 sps:$4 sm:$0xff]   ;;  %v10298_v44 = vld [vmem:[%s15173_s1 + $0x68c] ss:$16 sps:$4 sm:$0xff]  }
  0x9b   :  { %6689 = vmatpush1.bf16.msra.mxu0 %v10209_v45  ;;  %7537 = vmatpush1.bf16.msra.mxu1 %v10212_v46  ;;  %v10293_v45 = vld [vmem:[%s15173_s1 + $0x680] ss:$16 sps:$4 sm:$0xff]   ;;  %v10296_v46 = vld [vmem:[%s15173_s1 + $0x688] ss:$16 sps:$4 sm:$0xff]  }
  0x9c   :  { %6690 = vmatprep.subr.bf16.mxu0 %v10217_v47  ;;  %7538 = vmatprep.subr.bf16.mxu1 %v10220_v48  ;;  %v10301_v47 = vld [vmem:[%s15173_s1 + $0x6a4] ss:$16 sps:$4 sm:$0xff]   ;;  %v10304_v48 = vld [vmem:[%s15173_s1 + $0x6ac] ss:$16 sps:$4 sm:$0xff]  }
  0x9f   :  { %6691 = vmatpush1.bf16.msra.mxu0 %v10215_v49  ;;  %7539 = vmatpush1.bf16.msra.mxu1 %v10218_v50  ;;  %v10299_v49 = vld [vmem:[%s15173_s1 + $0x6a0] ss:$16 sps:$4 sm:$0xff]   ;;  %v10302_v50 = vld [vmem:[%s15173_s1 + $0x6a8] ss:$16 sps:$4 sm:$0xff]  }
  0xa0   :  { %6692 = vmatprep.subr.bf16.mxu0 %v10223_v51  ;;  %7540 = vmatprep.subr.bf16.mxu1 %v10226_v52  ;;  %v10307_v51 = vld [vmem:[%s15173_s1 + $0x6c4] ss:$16 sps:$4 sm:$0xff]   ;;  %v10310_v52 = vld [vmem:[%s15173_s1 + $0x6cc] ss:$16 sps:$4 sm:$0xff]  }
  0xa3   :  { %6693 = vmatpush1.bf16.msra.mxu0 %v10221_v53  ;;  %7541 = vmatpush1.bf16.msra.mxu1 %v10224_v54  ;;  %v10305_v53 = vld [vmem:[%s15173_s1 + $0x6c0] ss:$16 sps:$4 sm:$0xff]   ;;  %v10308_v54 = vld [vmem:[%s15173_s1 + $0x6c8] ss:$16 sps:$4 sm:$0xff]  }
  0xa4   :  { %6694 = vmatprep.subr.bf16.mxu0 %v10229_v55  ;;  %7542 = vmatprep.subr.bf16.mxu1 %v10232_v56  ;;  %v10313_v55 = vld [vmem:[%s15173_s1 + $0x6e4] ss:$16 sps:$4 sm:$0xff]   ;;  %v10316_v56 = vld [vmem:[%s15173_s1 + $0x6ec] ss:$16 sps:$4 sm:$0xff]  }
  0xa7   :  { %6695 = vmatpush1.bf16.msra.mxu0 %v10227_v57  ;;  %7543 = vmatpush1.bf16.msra.mxu1 %v10230_v58  ;;  %v10311_v57 = vld [vmem:[%s15173_s1 + $0x6e0] ss:$16 sps:$4 sm:$0xff]   ;;  %v10314_v58 = vld [vmem:[%s15173_s1 + $0x6e8] ss:$16 sps:$4 sm:$0xff]  }
  0xa8   :  { %6696 = vmatprep.subr.bf16.mxu0 %v10235_v59  ;;  %7544 = vmatprep.subr.bf16.mxu1 %v10238_v60  ;;  %v10319_v59 = vld [vmem:[%s15173_s1 + $0x704] ss:$16 sps:$4 sm:$0xff]   ;;  %v10322_v60 = vld [vmem:[%s15173_s1 + $0x70c] ss:$16 sps:$4 sm:$0xff]  }
  0xab   :  { %6697 = vmatpush1.bf16.msra.mxu0 %v10233_v61  ;;  %7545 = vmatpush1.bf16.msra.mxu1 %v10236_v62  ;;  %v10317_v61 = vld [vmem:[%s15173_s1 + $0x700] ss:$16 sps:$4 sm:$0xff]   ;;  %v10320_v62 = vld [vmem:[%s15173_s1 + $0x708] ss:$16 sps:$4 sm:$0xff]  }
  0xac   :  { %6698 = vmatprep.subr.bf16.mxu0 %v10241_v63  ;;  %7546 = vmatprep.subr.bf16.mxu1 %v10244_v0  ;;  %v10325_v63 = vld [vmem:[%s15173_s1 + $0x724] ss:$16 sps:$4 sm:$0xff]   ;;  %v10328_v0 = vld [vmem:[%s15173_s1 + $0x72c] ss:$16 sps:$4 sm:$0xff]  }
  0xaf   :  { %6699 = vmatpush1.bf16.msra.mxu0 %v10239_v1  ;;  %7547 = vmatpush1.bf16.msra.mxu1 %v10242_v2  ;;  %v10323_v1 = vld [vmem:[%s15173_s1 + $0x720] ss:$16 sps:$4 sm:$0xff]   ;;  %v10326_v2 = vld [vmem:[%s15173_s1 + $0x728] ss:$16 sps:$4 sm:$0xff]  }
  0xb0   :  { %6700 = vmatprep.subr.bf16.mxu0 %v10247_v3  ;;  %7548 = vmatprep.subr.bf16.mxu1 %v10250_v4  ;;  %v10331_v3 = vld [vmem:[%s15173_s1 + $0x744] ss:$16 sps:$4 sm:$0xff]   ;;  %v10334_v4 = vld [vmem:[%s15173_s1 + $0x74c] ss:$16 sps:$4 sm:$0xff]  }
  0xb3   :  { %6701 = vmatpush1.bf16.msra.mxu0 %v10245_v5  ;;  %7549 = vmatpush1.bf16.msra.mxu1 %v10248_v6  ;;  %v10329_v5 = vld [vmem:[%s15173_s1 + $0x740] ss:$16 sps:$4 sm:$0xff]   ;;  %v10332_v6 = vld [vmem:[%s15173_s1 + $0x748] ss:$16 sps:$4 sm:$0xff]  }
  0xb4   :  { %6702 = vmatprep.subr.bf16.mxu0 %v10253_v7  ;;  %7550 = vmatprep.subr.bf16.mxu1 %v10256_v8  ;;  %v10337_v7 = vld [vmem:[%s15173_s1 + $0x764] ss:$16 sps:$4 sm:$0xff]   ;;  %v10340_v8 = vld [vmem:[%s15173_s1 + $0x76c] ss:$16 sps:$4 sm:$0xff]  }
  0xb7   :  { %6703 = vmatpush1.bf16.msra.mxu0 %v10251_v9  ;;  %7551 = vmatpush1.bf16.msra.mxu1 %v10254_v10  ;;  %v10335_v9 = vld [vmem:[%s15173_s1 + $0x760] ss:$16 sps:$4 sm:$0xff]   ;;  %v10338_v10 = vld [vmem:[%s15173_s1 + $0x768] ss:$16 sps:$4 sm:$0xff]  }
  0xb8   :  { %6704 = vmatprep.subr.bf16.mxu0 %v10259_v11  ;;  %7552 = vmatprep.subr.bf16.mxu1 %v10262_v12  ;;  %v10343_v11 = vld [vmem:[%s15173_s1 + $0x784] ss:$16 sps:$4 sm:$0xff]   ;;  %v10346_v12 = vld [vmem:[%s15173_s1 + $0x78c] ss:$16 sps:$4 sm:$0xff]  }
  0xbb   :  { %6705 = vmatpush1.bf16.msra.mxu0 %v10257_v13  ;;  %7553 = vmatpush1.bf16.msra.mxu1 %v10260_v14  ;;  %v10341_v13 = vld [vmem:[%s15173_s1 + $0x780] ss:$16 sps:$4 sm:$0xff]   ;;  %v10344_v14 = vld [vmem:[%s15173_s1 + $0x788] ss:$16 sps:$4 sm:$0xff]  }
  0xbc   :  { %6706 = vmatprep.subr.bf16.mxu0 %v10265_v15  ;;  %7554 = vmatprep.subr.bf16.mxu1 %v10268_v16  ;;  %v10349_v15 = vld [vmem:[%s15173_s1 + $0x7a4] ss:$16 sps:$4 sm:$0xff]   ;;  %v10352_v16 = vld [vmem:[%s15173_s1 + $0x7ac] ss:$16 sps:$4 sm:$0xff]  }
  0xbf   :  { %6707 = vmatpush1.bf16.msra.mxu0 %v10263_v17  ;;  %7555 = vmatpush1.bf16.msra.mxu1 %v10266_v18  ;;  %v10347_v17 = vld [vmem:[%s15173_s1 + $0x7a0] ss:$16 sps:$4 sm:$0xff]   ;;  %v10350_v18 = vld [vmem:[%s15173_s1 + $0x7a8] ss:$16 sps:$4 sm:$0xff]  }
  0xc0   :  { %6729 = vmatprep.subr.bf16.mxu0 %v10271_v19  ;;  %7577 = vmatprep.subr.bf16.mxu1 %v10274_v20  ;;  %v10355_v19 = vld [vmem:[%s15173_s1 + $0x7c4] ss:$16 sps:$4 sm:$0xff]   ;;  %v10358_v20 = vld [vmem:[%s15173_s1 + $0x7cc] ss:$16 sps:$4 sm:$0xff]  }
  0xc2   :  { %6709 = vmatmul.mubr.bf16.vlgmr.msra.gmra.mrb[0].mxu0 %v8623_v22  ;;  %7557 = vmatmul.mubr.bf16.vlgmr.msra.gmra.mrb[0].mxu1 %v8623_v22  ;;  %v10356_v22 = vld [vmem:[%s15173_s1 + $0x7c8] ss:$16 sps:$4 sm:$0xff]  }
  0xc3   :  { %6730 = vmatpush1.bf16.msra.mxu0 %v10269_v24  ;;  %7578 = vmatpush1.bf16.msra.mxu1 %v10272_v26  ;;  %v10364_v24 = vld [vmem:[%s15173_s1 + $0x7ec] ss:$16 sps:$4 sm:$0xff]   ;;  %v10359_v26 = vld [vmem:[%s15173_s1 + $0x7e0] ss:$16 sps:$4 sm:$0xff]  }
  0xc4   :  { %6731 = vmatprep.subr.bf16.mxu0 %v10277_v25  ;;  %7579 = vmatprep.subr.bf16.mxu1 %v10280_v27  ;;  %v10362_v25 = vld [vmem:[%s15173_s1 + $0x7e8] ss:$16 sps:$4 sm:$0xff]   ;;  %v10367_v27 = vld [vmem:[%s15173_s1 + $0x804] ss:$16 sps:$4 sm:$0xff]  }
  0xc5   :  { %6718 = vmatprep.mubr.bf16.mxu0 %v8656_v28  ;;  %7566 = vmatprep.mubr.bf16.mxu1 %v8656_v28  ;;  %v10370_v28 = vld [vmem:[%s15173_s1 + $0x80c] ss:$16 sps:$4 sm:$0xff]  }
  0xc7   :  { %6732 = vmatpush1.bf16.msra.mxu0 %v10275_v29  ;;  %7580 = vmatpush1.bf16.msra.mxu1 %v10278_v30  ;;  %v55_v29 = vld [vmem:[%s15174_s0 + $0x118] sm:$0xff]  ;;  %v8625_v30 = vcombine.low %v12217_v33, %v12222_v35 }
  0xc8   :  { %6733 = vmatprep.subr.bf16.mxu0 %v10283_v31  ;;  %7581 = vmatprep.subr.bf16.mxu1 %v10286_v32  ;;  %v71_v31 = vld [vmem:[%s15174_s0 + $0x198] sm:$0xff]  ;;  %v10365_v32 = vld [vmem:[%s15173_s1 + $0x800] ss:$16 sps:$4 sm:$0xff]  }
  0xc9   :  { %v10376_v33 = vld [vmem:[%s15173_s1 + $0x82c] ss:$16 sps:$4 sm:$0xff]   ;;  %v8658_v35 = vcombine.high %v55_v29, %v71_v31 }
  0xca   :  { %6719 = vmatmul.mubr.bf16.gmra.mrb[4].mxu0 %v8655_v34  ;;  %7567 = vmatmul.mubr.bf16.gmra.mrb[4].mxu1 %v8655_v34  ;;  %v10368_v34 = vld [vmem:[%s15173_s1 + $0x808] ss:$16 sps:$4 sm:$0xff]  }
  0xcb   :  { %6734 = vmatpush1.bf16.msra.mxu0 %v10281_v36  ;;  %7582 = vmatpush1.bf16.msra.mxu1 %v10284_v37  ;;  %v10373_v36 = vld [vmem:[%s15173_s1 + $0x824] ss:$16 sps:$4 sm:$0xff]   ;;  %v10371_v37 = vld [vmem:[%s15173_s1 + $0x820] ss:$16 sps:$4 sm:$0xff]  }
  0xcc   :  { %6735 = vmatprep.subr.bf16.mxu0 %v10289_v38  ;;  %7583 = vmatprep.subr.bf16.mxu1 %v10292_v39  ;;  %v10374_v38 = vld [vmem:[%s15173_s1 + $0x828] ss:$16 sps:$4 sm:$0xff]   ;;  %v10379_v39 = vld [vmem:[%s15173_s1 + $0x844] ss:$16 sps:$4 sm:$0xff]  }
  0xcd   :  { %6761 = vmatprep.mubr.bf16.mxu0 %v8626_v40  ;;  %7609 = vmatprep.mubr.bf16.mxu1 %v8626_v40  ;;  %v10382_v40 = vld [vmem:[%s15173_s1 + $0x84c] ss:$16 sps:$4 sm:$0xff]  }
  0xcf   :  { %6736 = vmatpush1.bf16.msra.mxu0 %v10287_v41  ;;  %7584 = vmatpush1.bf16.msra.mxu1 %v10290_v42  ;;  %v12429_v41 = vld [vmem:[%s15174_s0 + $0x20] sm:$0xff]  ;;  %v8657_v42 = vcombine.low %v55_v29, %v71_v31 }
  0xd0   :  { %6737 = vmatprep.subr.bf16.mxu0 %v10295_v43  ;;  %7585 = vmatprep.subr.bf16.mxu1 %v10298_v44  ;;  %v12434_v43 = vld [vmem:[%s15174_s0 + $0xa0] sm:$0xff] }
  0xd1   :  { %v10377_v44 = vld [vmem:[%s15173_s1 + $0x840] ss:$16 sps:$4 sm:$0xff]   ;;  %v10457_v31 = vld [vmem:[%s15173_s1 + $0x9e4] ss:$16 sps:$4 sm:$0xff]  }
  0xd2   :  { %v10449_v29 = vld [vmem:[%s15173_s1 + $0x9c0] ss:$16 sps:$4 sm:$0xff]  }
  0xd3   :  { %6738 = vmatpush1.bf16.msra.mxu0 %v10293_v45  ;;  %7586 = vmatpush1.bf16.msra.mxu1 %v10296_v46  ;;  %v10380_v45 = vld [vmem:[%s15173_s1 + $0x848] ss:$16 sps:$4 sm:$0xff]   ;;  %v10385_v46 = vld [vmem:[%s15173_s1 + $0x864] ss:$16 sps:$4 sm:$0xff]  }
  0xd4   :  { %6739 = vmatprep.subr.bf16.mxu0 %v10301_v47  ;;  %7587 = vmatprep.subr.bf16.mxu1 %v10304_v48  ;;  %v10388_v47 = vld [vmem:[%s15173_s1 + $0x86c] ss:$16 sps:$4 sm:$0xff]   ;;  %v8628_v48 = vcombine.high %v12429_v41, %v12434_v43 }
  0xd7   :  { %6740 = vmatpush1.bf16.msra.mxu0 %v10299_v49  ;;  %7588 = vmatpush1.bf16.msra.mxu1 %v10302_v50  ;;  %v10383_v49 = vld [vmem:[%s15173_s1 + $0x860] ss:$16 sps:$4 sm:$0xff]   ;;  %v10386_v50 = vld [vmem:[%s15173_s1 + $0x868] ss:$16 sps:$4 sm:$0xff]  }
  0xd8   :  { %6741 = vmatprep.subr.bf16.mxu0 %v10307_v51  ;;  %7589 = vmatprep.subr.bf16.mxu1 %v10310_v52  ;;  %v10391_v51 = vld [vmem:[%s15173_s1 + $0x884] ss:$16 sps:$4 sm:$0xff]   ;;  %v10394_v52 = vld [vmem:[%s15173_s1 + $0x88c] ss:$16 sps:$4 sm:$0xff]  }
  0xdb   :  { %6742 = vmatpush1.bf16.msra.mxu0 %v10305_v53  ;;  %7590 = vmatpush1.bf16.msra.mxu1 %v10308_v54  ;;  %v10389_v53 = vld [vmem:[%s15173_s1 + $0x880] ss:$16 sps:$4 sm:$0xff]   ;;  %v10392_v54 = vld [vmem:[%s15173_s1 + $0x888] ss:$16 sps:$4 sm:$0xff]  }
  0xdc   :  { %6743 = vmatprep.subr.bf16.mxu0 %v10313_v55  ;;  %7591 = vmatprep.subr.bf16.mxu1 %v10316_v56  ;;  %v10397_v55 = vld [vmem:[%s15173_s1 + $0x8a4] ss:$16 sps:$4 sm:$0xff]   ;;  %v10400_v56 = vld [vmem:[%s15173_s1 + $0x8ac] ss:$16 sps:$4 sm:$0xff]  }
  0xdf   :  { %6744 = vmatpush1.bf16.msra.mxu0 %v10311_v57  ;;  %7592 = vmatpush1.bf16.msra.mxu1 %v10314_v58  ;;  %v10395_v57 = vld [vmem:[%s15173_s1 + $0x8a0] ss:$16 sps:$4 sm:$0xff]   ;;  %v10398_v58 = vld [vmem:[%s15173_s1 + $0x8a8] ss:$16 sps:$4 sm:$0xff]  }
  0xe0   :  { %6745 = vmatprep.subr.bf16.mxu0 %v10319_v59  ;;  %7593 = vmatprep.subr.bf16.mxu1 %v10322_v60  ;;  %v10403_v59 = vld [vmem:[%s15173_s1 + $0x8c4] ss:$16 sps:$4 sm:$0xff]   ;;  %v10406_v60 = vld [vmem:[%s15173_s1 + $0x8cc] ss:$16 sps:$4 sm:$0xff]  }
  0xe3   :  { %6746 = vmatpush1.bf16.msra.mxu0 %v10317_v61  ;;  %7594 = vmatpush1.bf16.msra.mxu1 %v10320_v62  ;;  %v10401_v61 = vld [vmem:[%s15173_s1 + $0x8c0] ss:$16 sps:$4 sm:$0xff]   ;;  %v10404_v62 = vld [vmem:[%s15173_s1 + $0x8c8] ss:$16 sps:$4 sm:$0xff]  }
  0xe4   :  { %6747 = vmatprep.subr.bf16.mxu0 %v10325_v63  ;;  %7595 = vmatprep.subr.bf16.mxu1 %v10328_v0  ;;  %v10409_v63 = vld [vmem:[%s15173_s1 + $0x8e4] ss:$16 sps:$4 sm:$0xff]   ;;  %v10412_v0 = vld [vmem:[%s15173_s1 + $0x8ec] ss:$16 sps:$4 sm:$0xff]  }
  0xe7   :  { %6748 = vmatpush1.bf16.msra.mxu0 %v10323_v1  ;;  %7596 = vmatpush1.bf16.msra.mxu1 %v10326_v2  ;;  %v10407_v1 = vld [vmem:[%s15173_s1 + $0x8e0] ss:$16 sps:$4 sm:$0xff]   ;;  %v10410_v2 = vld [vmem:[%s15173_s1 + $0x8e8] ss:$16 sps:$4 sm:$0xff]  }
  0xe8   :  { %6749 = vmatprep.subr.bf16.mxu0 %v10331_v3  ;;  %7597 = vmatprep.subr.bf16.mxu1 %v10334_v4  ;;  %v10415_v3 = vld [vmem:[%s15173_s1 + $0x904] ss:$16 sps:$4 sm:$0xff]   ;;  %v10418_v4 = vld [vmem:[%s15173_s1 + $0x90c] ss:$16 sps:$4 sm:$0xff]  }
  0xeb   :  { %6750 = vmatpush1.bf16.msra.mxu0 %v10329_v5  ;;  %7598 = vmatpush1.bf16.msra.mxu1 %v10332_v6  ;;  %v10413_v5 = vld [vmem:[%s15173_s1 + $0x900] ss:$16 sps:$4 sm:$0xff]   ;;  %v10416_v6 = vld [vmem:[%s15173_s1 + $0x908] ss:$16 sps:$4 sm:$0xff]  }
  0xec   :  { %6751 = vmatprep.subr.bf16.mxu0 %v10337_v7  ;;  %7599 = vmatprep.subr.bf16.mxu1 %v10340_v8  ;;  %v10421_v7 = vld [vmem:[%s15173_s1 + $0x924] ss:$16 sps:$4 sm:$0xff]   ;;  %v10424_v8 = vld [vmem:[%s15173_s1 + $0x92c] ss:$16 sps:$4 sm:$0xff]  }
  0xef   :  { %6752 = vmatpush1.bf16.msra.mxu0 %v10335_v9  ;;  %7600 = vmatpush1.bf16.msra.mxu1 %v10338_v10  ;;  %v10419_v9 = vld [vmem:[%s15173_s1 + $0x920] ss:$16 sps:$4 sm:$0xff]   ;;  %v10422_v10 = vld [vmem:[%s15173_s1 + $0x928] ss:$16 sps:$4 sm:$0xff]  }
  0xf0   :  { %6753 = vmatprep.subr.bf16.mxu0 %v10343_v11  ;;  %7601 = vmatprep.subr.bf16.mxu1 %v10346_v12  ;;  %v10427_v11 = vld [vmem:[%s15173_s1 + $0x944] ss:$16 sps:$4 sm:$0xff]   ;;  %v10430_v12 = vld [vmem:[%s15173_s1 + $0x94c] ss:$16 sps:$4 sm:$0xff]  }
  0xf3   :  { %6754 = vmatpush1.bf16.msra.mxu0 %v10341_v13  ;;  %7602 = vmatpush1.bf16.msra.mxu1 %v10344_v14  ;;  %v10425_v13 = vld [vmem:[%s15173_s1 + $0x940] ss:$16 sps:$4 sm:$0xff]   ;;  %v10428_v14 = vld [vmem:[%s15173_s1 + $0x948] ss:$16 sps:$4 sm:$0xff]  }
  0xf4   :  { %6755 = vmatprep.subr.bf16.mxu0 %v10349_v15  ;;  %7603 = vmatprep.subr.bf16.mxu1 %v10352_v16  ;;  %v10433_v15 = vld [vmem:[%s15173_s1 + $0x964] ss:$16 sps:$4 sm:$0xff]   ;;  %v10436_v16 = vld [vmem:[%s15173_s1 + $0x96c] ss:$16 sps:$4 sm:$0xff]  }
  0xf7   :  { %6756 = vmatpush1.bf16.msra.mxu0 %v10347_v17  ;;  %7604 = vmatpush1.bf16.msra.mxu1 %v10350_v18  ;;  %v10431_v17 = vld [vmem:[%s15173_s1 + $0x960] ss:$16 sps:$4 sm:$0xff]   ;;  %v10434_v18 = vld [vmem:[%s15173_s1 + $0x968] ss:$16 sps:$4 sm:$0xff]  }
  0xf8   :  { %6757 = vmatprep.subr.bf16.mxu0 %v10355_v19  ;;  %7605 = vmatprep.subr.bf16.mxu1 %v10358_v20  ;;  %v10439_v19 = vld [vmem:[%s15173_s1 + $0x984] ss:$16 sps:$4 sm:$0xff]   ;;  %v10442_v20 = vld [vmem:[%s15173_s1 + $0x98c] ss:$16 sps:$4 sm:$0xff]  }
  0xfb   :  { %6758 = vmatpush1.bf16.msra.mxu0 %v10353_v21  ;;  %7606 = vmatpush1.bf16.msra.mxu1 %v10356_v22  ;;  %v10437_v21 = vld [vmem:[%s15173_s1 + $0x980] ss:$16 sps:$4 sm:$0xff]   ;;  %v10440_v22 = vld [vmem:[%s15173_s1 + $0x988] ss:$16 sps:$4 sm:$0xff]  }
  0xfc   :  { %6759 = vmatprep.subr.bf16.mxu0 %v10361_v23  ;;  %7607 = vmatprep.subr.bf16.mxu1 %v10364_v24  ;;  %v10445_v23 = vld [vmem:[%s15173_s1 + $0x9a4] ss:$16 sps:$4 sm:$0xff]   ;;  %v10448_v24 = vld [vmem:[%s15173_s1 + $0x9ac] ss:$16 sps:$4 sm:$0xff]  }
  0xff   :  { %6760 = vmatpush1.bf16.msra.mxu0 %v10359_v26  ;;  %7608 = vmatpush1.bf16.msra.mxu1 %v10362_v25  ;;  %v10443_v26 = vld [vmem:[%s15173_s1 + $0x9a0] ss:$16 sps:$4 sm:$0xff]   ;;  %v10446_v25 = vld [vmem:[%s15173_s1 + $0x9a8] ss:$16 sps:$4 sm:$0xff]  }
 0x100   :  { %6782 = vmatprep.subr.bf16.mxu0 %v10367_v27  ;;  %7630 = vmatprep.subr.bf16.mxu1 %v10370_v28  ;;  %v10451_v27 = vld [vmem:[%s15173_s1 + $0x9c4] ss:$16 sps:$4 sm:$0xff]   ;;  %v10454_v28 = vld [vmem:[%s15173_s1 + $0x9cc] ss:$16 sps:$4 sm:$0xff]  }
 0x102   :  { %6762 = vmatmul.mubr.bf16.vlgmr.msra.gmra.mrb[0].mxu0 %v8625_v30  ;;  %7610 = vmatmul.mubr.bf16.vlgmr.msra.gmra.mrb[0].mxu1 %v8625_v30  ;;  %v10452_v30 = vld [vmem:[%s15173_s1 + $0x9c8] ss:$16 sps:$4 sm:$0xff]  }
 0x103   :  { %6783 = vmatpush1.bf16.msra.mxu0 %v10365_v32  ;;  %7631 = vmatpush1.bf16.msra.mxu1 %v10368_v34  ;;  %v10460_v32 = vld [vmem:[%s15173_s1 + $0x9ec] ss:$16 sps:$4 sm:$0xff]   ;;  %v10455_v34 = vld [vmem:[%s15173_s1 + $0x9e0] ss:$16 sps:$4 sm:$0xff]  }
 0x104   :  { %6784 = vmatprep.subr.bf16.mxu0 %v10373_v36  ;;  %7632 = vmatprep.subr.bf16.mxu1 %v10376_v33  ;;  %v10458_v36 = vld [vmem:[%s15173_s1 + $0x9e8] ss:$16 sps:$4 sm:$0xff]   ;;  %v10463_v33 = vld [vmem:[%s15173_s1 + $0xa04] ss:$16 sps:$4 sm:$0xff]  }
 0x105   :  { %6771 = vmatprep.mubr.bf16.mxu0 %v8658_v35  ;;  %7619 = vmatprep.mubr.bf16.mxu1 %v8658_v35  ;;  %v10466_v35 = vld [vmem:[%s15173_s1 + $0xa0c] ss:$16 sps:$4 sm:$0xff]  }
 0x107   :  { %6785 = vmatpush1.bf16.msra.mxu0 %v10371_v37  ;;  %7633 = vmatpush1.bf16.msra.mxu1 %v10374_v38  ;;  %v56_v37 = vld [vmem:[%s15174_s0 + $0x120] sm:$0xff] }
 0x108   :  { %6786 = vmatprep.subr.bf16.mxu0 %v10379_v39  ;;  %7634 = vmatprep.subr.bf16.mxu1 %v10382_v40  ;;  %v72_v38 = vld [vmem:[%s15174_s0 + $0x1a0] sm:$0xff]  ;;  %v8627_v39 = vcombine.low %v12429_v41, %v12434_v43  ;;  %v10472_v41 = vld [vmem:[%s15173_s1 + $0xa2c] ss:$16 sps:$4 sm:$0xff]  }
 0x109   :  { %v10461_v40 = vld [vmem:[%s15173_s1 + $0xa00] ss:$16 sps:$4 sm:$0xff]  }
 0x10a   :  { %6772 = vmatmul.mubr.bf16.gmra.mrb[4].mxu0 %v8657_v42  ;;  %7620 = vmatmul.mubr.bf16.gmra.mrb[4].mxu1 %v8657_v42  ;;  %v10464_v42 = vld [vmem:[%s15173_s1 + $0xa08] ss:$16 sps:$4 sm:$0xff]   ;;  %v10467_v43 = vld [vmem:[%s15173_s1 + $0xa20] ss:$16 sps:$4 sm:$0xff]  }
 0x10b   :  { %6787 = vmatpush1.bf16.msra.mxu0 %v10377_v44  ;;  %7635 = vmatpush1.bf16.msra.mxu1 %v10380_v45  ;;  %v10469_v44 = vld [vmem:[%s15173_s1 + $0xa24] ss:$16 sps:$4 sm:$0xff]   ;;  %v10470_v45 = vld [vmem:[%s15173_s1 + $0xa28] ss:$16 sps:$4 sm:$0xff]  }
 0x10c   :  { %6788 = vmatprep.subr.bf16.mxu0 %v10385_v46  ;;  %7636 = vmatprep.subr.bf16.mxu1 %v10388_v47  ;;  %v8660_v46 = vcombine.high %v56_v37, %v72_v38  ;;  %v10475_v47 = vld [vmem:[%s15173_s1 + $0xa44] ss:$16 sps:$4 sm:$0xff]  }
 0x10d   :  { %6814 = vmatprep.mubr.bf16.mxu0 %v8628_v48  ;;  %7662 = vmatprep.mubr.bf16.mxu1 %v8628_v48  ;;  %v10478_v48 = vld [vmem:[%s15173_s1 + $0xa4c] ss:$16 sps:$4 sm:$0xff]  }
 0x10f   :  { %6789 = vmatpush1.bf16.msra.mxu0 %v10383_v49  ;;  %7637 = vmatpush1.bf16.msra.mxu1 %v10386_v50  ;;  %v12641_v49 = vld [vmem:[%s15174_s0 + $0x28] sm:$0xff] }
 0x110   :  { %6790 = vmatprep.subr.bf16.mxu0 %v10391_v51  ;;  %7638 = vmatprep.subr.bf16.mxu1 %v10394_v52  ;;  %v12646_v50 = vld [vmem:[%s15174_s0 + $0xa8] sm:$0xff]  ;;  %v8659_v51 = vcombine.low %v56_v37, %v72_v38  ;;  %v10473_v52 = vld [vmem:[%s15173_s1 + $0xa40] ss:$16 sps:$4 sm:$0xff]  }
 0x111   :  { %v10545_v37 = vld [vmem:[%s15173_s1 + $0xbc0] ss:$16 sps:$4 sm:$0xff]   ;;  %v10548_v38 = vld [vmem:[%s15173_s1 + $0xbc8] ss:$16 sps:$4 sm:$0xff]  }
 0x113   :  { %6791 = vmatpush1.bf16.msra.mxu0 %v10389_v53  ;;  %7639 = vmatpush1.bf16.msra.mxu1 %v10392_v54  ;;  %v10476_v53 = vld [vmem:[%s15173_s1 + $0xa48] ss:$16 sps:$4 sm:$0xff]   ;;  %v10481_v54 = vld [vmem:[%s15173_s1 + $0xa64] ss:$16 sps:$4 sm:$0xff]  }
 0x114   :  { %6792 = vmatprep.subr.bf16.mxu0 %v10397_v55  ;;  %7640 = vmatprep.subr.bf16.mxu1 %v10400_v56  ;;  %v10484_v55 = vld [vmem:[%s15173_s1 + $0xa6c] ss:$16 sps:$4 sm:$0xff]   ;;  %v8630_v56 = vcombine.high %v12641_v49, %v12646_v50 }
 0x117   :  { %6793 = vmatpush1.bf16.msra.mxu0 %v10395_v57  ;;  %7641 = vmatpush1.bf16.msra.mxu1 %v10398_v58  ;;  %v10479_v57 = vld [vmem:[%s15173_s1 + $0xa60] ss:$16 sps:$4 sm:$0xff]   ;;  %v10482_v58 = vld [vmem:[%s15173_s1 + $0xa68] ss:$16 sps:$4 sm:$0xff]  }
 0x118   :  { %6794 = vmatprep.subr.bf16.mxu0 %v10403_v59  ;;  %7642 = vmatprep.subr.bf16.mxu1 %v10406_v60  ;;  %v10487_v59 = vld [vmem:[%s15173_s1 + $0xa84] ss:$16 sps:$4 sm:$0xff]   ;;  %v10490_v60 = vld [vmem:[%s15173_s1 + $0xa8c] ss:$16 sps:$4 sm:$0xff]  }
 0x11b   :  { %6795 = vmatpush1.bf16.msra.mxu0 %v10401_v61  ;;  %7643 = vmatpush1.bf16.msra.mxu1 %v10404_v62  ;;  %v10485_v61 = vld [vmem:[%s15173_s1 + $0xa80] ss:$16 sps:$4 sm:$0xff]   ;;  %v10488_v62 = vld [vmem:[%s15173_s1 + $0xa88] ss:$16 sps:$4 sm:$0xff]  }
 0x11c   :  { %6796 = vmatprep.subr.bf16.mxu0 %v10409_v63  ;;  %7644 = vmatprep.subr.bf16.mxu1 %v10412_v0  ;;  %v10493_v63 = vld [vmem:[%s15173_s1 + $0xaa4] ss:$16 sps:$4 sm:$0xff]   ;;  %v10496_v0 = vld [vmem:[%s15173_s1 + $0xaac] ss:$16 sps:$4 sm:$0xff]  }
 0x11f   :  { %6797 = vmatpush1.bf16.msra.mxu0 %v10407_v1  ;;  %7645 = vmatpush1.bf16.msra.mxu1 %v10410_v2  ;;  %v10491_v1 = vld [vmem:[%s15173_s1 + $0xaa0] ss:$16 sps:$4 sm:$0xff]   ;;  %v10494_v2 = vld [vmem:[%s15173_s1 + $0xaa8] ss:$16 sps:$4 sm:$0xff]  }
 0x120   :  { %6798 = vmatprep.subr.bf16.mxu0 %v10415_v3  ;;  %7646 = vmatprep.subr.bf16.mxu1 %v10418_v4  ;;  %v10499_v3 = vld [vmem:[%s15173_s1 + $0xac4] ss:$16 sps:$4 sm:$0xff]   ;;  %v10502_v4 = vld [vmem:[%s15173_s1 + $0xacc] ss:$16 sps:$4 sm:$0xff]  }
 0x123   :  { %6799 = vmatpush1.bf16.msra.mxu0 %v10413_v5  ;;  %7647 = vmatpush1.bf16.msra.mxu1 %v10416_v6  ;;  %v10497_v5 = vld [vmem:[%s15173_s1 + $0xac0] ss:$16 sps:$4 sm:$0xff]   ;;  %v10500_v6 = vld [vmem:[%s15173_s1 + $0xac8] ss:$16 sps:$4 sm:$0xff]  }
 0x124   :  { %6800 = vmatprep.subr.bf16.mxu0 %v10421_v7  ;;  %7648 = vmatprep.subr.bf16.mxu1 %v10424_v8  ;;  %v10505_v7 = vld [vmem:[%s15173_s1 + $0xae4] ss:$16 sps:$4 sm:$0xff]   ;;  %v10508_v8 = vld [vmem:[%s15173_s1 + $0xaec] ss:$16 sps:$4 sm:$0xff]  }
 0x127   :  { %6801 = vmatpush1.bf16.msra.mxu0 %v10419_v9  ;;  %7649 = vmatpush1.bf16.msra.mxu1 %v10422_v10  ;;  %v10503_v9 = vld [vmem:[%s15173_s1 + $0xae0] ss:$16 sps:$4 sm:$0xff]   ;;  %v10506_v10 = vld [vmem:[%s15173_s1 + $0xae8] ss:$16 sps:$4 sm:$0xff]  }
 0x128   :  { %6802 = vmatprep.subr.bf16.mxu0 %v10427_v11  ;;  %7650 = vmatprep.subr.bf16.mxu1 %v10430_v12  ;;  %v10511_v11 = vld [vmem:[%s15173_s1 + $0xb04] ss:$16 sps:$4 sm:$0xff]   ;;  %v10514_v12 = vld [vmem:[%s15173_s1 + $0xb0c] ss:$16 sps:$4 sm:$0xff]  }
 0x12b   :  { %6803 = vmatpush1.bf16.msra.mxu0 %v10425_v13  ;;  %7651 = vmatpush1.bf16.msra.mxu1 %v10428_v14  ;;  %v10509_v13 = vld [vmem:[%s15173_s1 + $0xb00] ss:$16 sps:$4 sm:$0xff]   ;;  %v10512_v14 = vld [vmem:[%s15173_s1 + $0xb08] ss:$16 sps:$4 sm:$0xff]  }
 0x12c   :  { %6804 = vmatprep.subr.bf16.mxu0 %v10433_v15  ;;  %7652 = vmatprep.subr.bf16.mxu1 %v10436_v16  ;;  %v10517_v15 = vld [vmem:[%s15173_s1 + $0xb24] ss:$16 sps:$4 sm:$0xff]   ;;  %v10520_v16 = vld [vmem:[%s15173_s1 + $0xb2c] ss:$16 sps:$4 sm:$0xff]  }
 0x12f   :  { %6805 = vmatpush1.bf16.msra.mxu0 %v10431_v17  ;;  %7653 = vmatpush1.bf16.msra.mxu1 %v10434_v18  ;;  %v10515_v17 = vld [vmem:[%s15173_s1 + $0xb20] ss:$16 sps:$4 sm:$0xff]   ;;  %v10518_v18 = vld [vmem:[%s15173_s1 + $0xb28] ss:$16 sps:$4 sm:$0xff]  }
 0x130   :  { %6806 = vmatprep.subr.bf16.mxu0 %v10439_v19  ;;  %7654 = vmatprep.subr.bf16.mxu1 %v10442_v20  ;;  %v10523_v19 = vld [vmem:[%s15173_s1 + $0xb44] ss:$16 sps:$4 sm:$0xff]   ;;  %v10526_v20 = vld [vmem:[%s15173_s1 + $0xb4c] ss:$16 sps:$4 sm:$0xff]  }
 0x133   :  { %6807 = vmatpush1.bf16.msra.mxu0 %v10437_v21  ;;  %7655 = vmatpush1.bf16.msra.mxu1 %v10440_v22  ;;  %v10521_v21 = vld [vmem:[%s15173_s1 + $0xb40] ss:$16 sps:$4 sm:$0xff]   ;;  %v10524_v22 = vld [vmem:[%s15173_s1 + $0xb48] ss:$16 sps:$4 sm:$0xff]  }
 0x134   :  { %6808 = vmatprep.subr.bf16.mxu0 %v10445_v23  ;;  %7656 = vmatprep.subr.bf16.mxu1 %v10448_v24  ;;  %v10529_v23 = vld [vmem:[%s15173_s1 + $0xb64] ss:$16 sps:$4 sm:$0xff]   ;;  %v10532_v24 = vld [vmem:[%s15173_s1 + $0xb6c] ss:$16 sps:$4 sm:$0xff]  }
 0x137   :  { %6809 = vmatpush1.bf16.msra.mxu0 %v10443_v26  ;;  %7657 = vmatpush1.bf16.msra.mxu1 %v10446_v25  ;;  %v10527_v26 = vld [vmem:[%s15173_s1 + $0xb60] ss:$16 sps:$4 sm:$0xff]   ;;  %v10530_v25 = vld [vmem:[%s15173_s1 + $0xb68] ss:$16 sps:$4 sm:$0xff]  }
 0x138   :  { %6810 = vmatprep.subr.bf16.mxu0 %v10451_v27  ;;  %7658 = vmatprep.subr.bf16.mxu1 %v10454_v28  ;;  %v10535_v27 = vld [vmem:[%s15173_s1 + $0xb84] ss:$16 sps:$4 sm:$0xff]   ;;  %v10538_v28 = vld [vmem:[%s15173_s1 + $0xb8c] ss:$16 sps:$4 sm:$0xff]  }
 0x13b   :  { %6811 = vmatpush1.bf16.msra.mxu0 %v10449_v29  ;;  %7659 = vmatpush1.bf16.msra.mxu1 %v10452_v30  ;;  %v10533_v29 = vld [vmem:[%s15173_s1 + $0xb80] ss:$16 sps:$4 sm:$0xff]   ;;  %v10536_v30 = vld [vmem:[%s15173_s1 + $0xb88] ss:$16 sps:$4 sm:$0xff]  }
 0x13c   :  { %6812 = vmatprep.subr.bf16.mxu0 %v10457_v31  ;;  %7660 = vmatprep.subr.bf16.mxu1 %v10460_v32  ;;  %v10541_v31 = vld [vmem:[%s15173_s1 + $0xba4] ss:$16 sps:$4 sm:$0xff]   ;;  %v10544_v32 = vld [vmem:[%s15173_s1 + $0xbac] ss:$16 sps:$4 sm:$0xff]  }
 0x13f   :  { %6813 = vmatpush1.bf16.msra.mxu0 %v10455_v34  ;;  %7661 = vmatpush1.bf16.msra.mxu1 %v10458_v36  ;;  %v10539_v34 = vld [vmem:[%s15173_s1 + $0xba0] ss:$16 sps:$4 sm:$0xff]   ;;  %v10542_v36 = vld [vmem:[%s15173_s1 + $0xba8] ss:$16 sps:$4 sm:$0xff]  }
 0x140   :  { %6835 = vmatprep.subr.bf16.mxu0 %v10463_v33  ;;  %7683 = vmatprep.subr.bf16.mxu1 %v10466_v35  ;;  %v10547_v33 = vld [vmem:[%s15173_s1 + $0xbc4] ss:$16 sps:$4 sm:$0xff]   ;;  %v10550_v35 = vld [vmem:[%s15173_s1 + $0xbcc] ss:$16 sps:$4 sm:$0xff]  }
 0x142   :  { %6815 = vmatmul.mubr.bf16.vlgmr.msra.gmra.mrb[0].mxu0 %v8627_v39  ;;  %7663 = vmatmul.mubr.bf16.vlgmr.msra.gmra.mrb[0].mxu1 %v8627_v39  ;;  %v10553_v39 = vld [vmem:[%s15173_s1 + $0xbe4] ss:$16 sps:$4 sm:$0xff]  }
 0x143   :  { %6836 = vmatpush1.bf16.msra.mxu0 %v10461_v40  ;;  %7684 = vmatpush1.bf16.msra.mxu1 %v10464_v42  ;;  %v10556_v40 = vld [vmem:[%s15173_s1 + $0xbec] ss:$16 sps:$4 sm:$0xff]   ;;  %v10551_v42 = vld [vmem:[%s15173_s1 + $0xbe0] ss:$16 sps:$4 sm:$0xff]  }
 0x144   :  { %6837 = vmatprep.subr.bf16.mxu0 %v10469_v44  ;;  %7685 = vmatprep.subr.bf16.mxu1 %v10472_v41  ;;  %v10554_v44 = vld [vmem:[%s15173_s1 + $0xbe8] ss:$16 sps:$4 sm:$0xff]   ;;  %v10559_v41 = vld [vmem:[%s15173_s1 + $0xc04] ss:$16 sps:$4 sm:$0xff]  }
 0x145   :  { %6824 = vmatprep.mubr.bf16.mxu0 %v8660_v46  ;;  %7672 = vmatprep.mubr.bf16.mxu1 %v8660_v46  ;;  %v73_v46 = vld [vmem:[%s15174_s0 + $0x1a8] sm:$0xff] }
 0x147   :  { %6838 = vmatpush1.bf16.msra.mxu0 %v10467_v43  ;;  %7686 = vmatpush1.bf16.msra.mxu1 %v10470_v45  ;;  %v10562_v43 = vld [vmem:[%s15173_s1 + $0xc0c] ss:$16 sps:$4 sm:$0xff]  }
 0x148   :  { %6839 = vmatprep.subr.bf16.mxu0 %v10475_v47  ;;  %7687 = vmatprep.subr.bf16.mxu1 %v10478_v48  ;;  %v57_v45 = vld [vmem:[%s15174_s0 + $0x128] sm:$0xff]  ;;  %v8629_v47 = vcombine.low %v12641_v49, %v12646_v50  ;;  %v10557_v48 = vld [vmem:[%s15173_s1 + $0xc00] ss:$16 sps:$4 sm:$0xff]  }
 0x149   :  { %v10568_v49 = vld [vmem:[%s15173_s1 + $0xc2c] ss:$16 sps:$4 sm:$0xff]   ;;  %v10563_v50 = vld [vmem:[%s15173_s1 + $0xc20] ss:$16 sps:$4 sm:$0xff]  }
 0x14a   :  { %6825 = vmatmul.mubr.bf16.gmra.mrb[4].mxu0 %v8659_v51  ;;  %7673 = vmatmul.mubr.bf16.gmra.mrb[4].mxu1 %v8659_v51  ;;  %v10560_v51 = vld [vmem:[%s15173_s1 + $0xc08] ss:$16 sps:$4 sm:$0xff]  }
 0x14b   :  { %6840 = vmatpush1.bf16.msra.mxu0 %v10473_v52  ;;  %7688 = vmatpush1.bf16.msra.mxu1 %v10476_v53  ;;  %v10565_v52 = vld [vmem:[%s15173_s1 + $0xc24] ss:$16 sps:$4 sm:$0xff]   ;;  %v10566_v53 = vld [vmem:[%s15173_s1 + $0xc28] ss:$16 sps:$4 sm:$0xff]  }
 0x14c   :  { %6841 = vmatprep.subr.bf16.mxu0 %v10481_v54  ;;  %7689 = vmatprep.subr.bf16.mxu1 %v10484_v55  ;;  %v8662_v54 = vcombine.high %v57_v45, %v73_v46  ;;  %v10571_v55 = vld [vmem:[%s15173_s1 + $0xc44] ss:$16 sps:$4 sm:$0xff]  }
 0x14d   :  { %6867 = vmatprep.mubr.bf16.mxu0 %v8630_v56  ;;  %7715 = vmatprep.mubr.bf16.mxu1 %v8630_v56  ;;  %v10574_v56 = vld [vmem:[%s15173_s1 + $0xc4c] ss:$16 sps:$4 sm:$0xff]  }
 0x14f   :  { %6842 = vmatpush1.bf16.msra.mxu0 %v10479_v57  ;;  %7690 = vmatpush1.bf16.msra.mxu1 %v10482_v58  ;;  %v12853_v57 = vld [vmem:[%s15174_s0 + $0x30] sm:$0xff] }
 0x150   :  { %6843 = vmatprep.subr.bf16.mxu0 %v10487_v59  ;;  %7691 = vmatprep.subr.bf16.mxu1 %v10490_v60  ;;  %v12858_v58 = vld [vmem:[%s15174_s0 + $0xb0] sm:$0xff]  ;;  %v8661_v59 = vcombine.low %v57_v45, %v73_v46  ;;  %v10644_v46 = vld [vmem:[%s15173_s1 + $0xdc8] ss:$16 sps:$4 sm:$0xff]  }
 0x151   :  { %v10569_v60 = vld [vmem:[%s15173_s1 + $0xc40] ss:$16 sps:$4 sm:$0xff]  }
 0x152   :  { %v10641_v45 = vld [vmem:[%s15173_s1 + $0xdc0] ss:$16 sps:$4 sm:$0xff]  }
 0x153   :  { %6844 = vmatpush1.bf16.msra.mxu0 %v10485_v61  ;;  %7692 = vmatpush1.bf16.msra.mxu1 %v10488_v62  ;;  %v10572_v61 = vld [vmem:[%s15173_s1 + $0xc48] ss:$16 sps:$4 sm:$0xff]   ;;  %v10577_v62 = vld [vmem:[%s15173_s1 + $0xc64] ss:$16 sps:$4 sm:$0xff]  }
 0x154   :  { %6845 = vmatprep.subr.bf16.mxu0 %v10493_v63  ;;  %7693 = vmatprep.subr.bf16.mxu1 %v10496_v0  ;;  %v10580_v63 = vld [vmem:[%s15173_s1 + $0xc6c] ss:$16 sps:$4 sm:$0xff]   ;;  %v8632_v0 = vcombine.high %v12853_v57, %v12858_v58 }
 0x157   :  { %6846 = vmatpush1.bf16.msra.mxu0 %v10491_v1  ;;  %7694 = vmatpush1.bf16.msra.mxu1 %v10494_v2  ;;  %v10575_v1 = vld [vmem:[%s15173_s1 + $0xc60] ss:$16 sps:$4 sm:$0xff]   ;;  %v10578_v2 = vld [vmem:[%s15173_s1 + $0xc68] ss:$16 sps:$4 sm:$0xff]  }
 0x158   :  { %6847 = vmatprep.subr.bf16.mxu0 %v10499_v3  ;;  %7695 = vmatprep.subr.bf16.mxu1 %v10502_v4  ;;  %v10583_v3 = vld [vmem:[%s15173_s1 + $0xc84] ss:$16 sps:$4 sm:$0xff]   ;;  %v10586_v4 = vld [vmem:[%s15173_s1 + $0xc8c] ss:$16 sps:$4 sm:$0xff]  }
 0x15b   :  { %6848 = vmatpush1.bf16.msra.mxu0 %v10497_v5  ;;  %7696 = vmatpush1.bf16.msra.mxu1 %v10500_v6  ;;  %v10581_v5 = vld [vmem:[%s15173_s1 + $0xc80] ss:$16 sps:$4 sm:$0xff]   ;;  %v10584_v6 = vld [vmem:[%s15173_s1 + $0xc88] ss:$16 sps:$4 sm:$0xff]  }
 0x15c   :  { %6849 = vmatprep.subr.bf16.mxu0 %v10505_v7  ;;  %7697 = vmatprep.subr.bf16.mxu1 %v10508_v8  ;;  %v10589_v7 = vld [vmem:[%s15173_s1 + $0xca4] ss:$16 sps:$4 sm:$0xff]   ;;  %v10592_v8 = vld [vmem:[%s15173_s1 + $0xcac] ss:$16 sps:$4 sm:$0xff]  }
 0x15f   :  { %6850 = vmatpush1.bf16.msra.mxu0 %v10503_v9  ;;  %7698 = vmatpush1.bf16.msra.mxu1 %v10506_v10  ;;  %v10587_v9 = vld [vmem:[%s15173_s1 + $0xca0] ss:$16 sps:$4 sm:$0xff]   ;;  %v10590_v10 = vld [vmem:[%s15173_s1 + $0xca8] ss:$16 sps:$4 sm:$0xff]  }
 0x160   :  { %6851 = vmatprep.subr.bf16.mxu0 %v10511_v11  ;;  %7699 = vmatprep.subr.bf16.mxu1 %v10514_v12  ;;  %v10595_v11 = vld [vmem:[%s15173_s1 + $0xcc4] ss:$16 sps:$4 sm:$0xff]   ;;  %v10598_v12 = vld [vmem:[%s15173_s1 + $0xccc] ss:$16 sps:$4 sm:$0xff]  }
 0x163   :  { %6852 = vmatpush1.bf16.msra.mxu0 %v10509_v13  ;;  %7700 = vmatpush1.bf16.msra.mxu1 %v10512_v14  ;;  %v10593_v13 = vld [vmem:[%s15173_s1 + $0xcc0] ss:$16 sps:$4 sm:$0xff]   ;;  %v10596_v14 = vld [vmem:[%s15173_s1 + $0xcc8] ss:$16 sps:$4 sm:$0xff]  }
 0x164   :  { %6853 = vmatprep.subr.bf16.mxu0 %v10517_v15  ;;  %7701 = vmatprep.subr.bf16.mxu1 %v10520_v16  ;;  %v10601_v15 = vld [vmem:[%s15173_s1 + $0xce4] ss:$16 sps:$4 sm:$0xff]   ;;  %v10604_v16 = vld [vmem:[%s15173_s1 + $0xcec] ss:$16 sps:$4 sm:$0xff]  }
 0x167   :  { %6854 = vmatpush1.bf16.msra.mxu0 %v10515_v17  ;;  %7702 = vmatpush1.bf16.msra.mxu1 %v10518_v18  ;;  %v10599_v17 = vld [vmem:[%s15173_s1 + $0xce0] ss:$16 sps:$4 sm:$0xff]   ;;  %v10602_v18 = vld [vmem:[%s15173_s1 + $0xce8] ss:$16 sps:$4 sm:$0xff]  }
 0x168   :  { %6855 = vmatprep.subr.bf16.mxu0 %v10523_v19  ;;  %7703 = vmatprep.subr.bf16.mxu1 %v10526_v20  ;;  %v10607_v19 = vld [vmem:[%s15173_s1 + $0xd04] ss:$16 sps:$4 sm:$0xff]   ;;  %v10610_v20 = vld [vmem:[%s15173_s1 + $0xd0c] ss:$16 sps:$4 sm:$0xff]  }
 0x16b   :  { %6856 = vmatpush1.bf16.msra.mxu0 %v10521_v21  ;;  %7704 = vmatpush1.bf16.msra.mxu1 %v10524_v22  ;;  %v10605_v21 = vld [vmem:[%s15173_s1 + $0xd00] ss:$16 sps:$4 sm:$0xff]   ;;  %v10608_v22 = vld [vmem:[%s15173_s1 + $0xd08] ss:$16 sps:$4 sm:$0xff]  }
 0x16c   :  { %6857 = vmatprep.subr.bf16.mxu0 %v10529_v23  ;;  %7705 = vmatprep.subr.bf16.mxu1 %v10532_v24  ;;  %v10613_v23 = vld [vmem:[%s15173_s1 + $0xd24] ss:$16 sps:$4 sm:$0xff]   ;;  %v10616_v24 = vld [vmem:[%s15173_s1 + $0xd2c] ss:$16 sps:$4 sm:$0xff]  }
 0x16f   :  { %6858 = vmatpush1.bf16.msra.mxu0 %v10527_v26  ;;  %7706 = vmatpush1.bf16.msra.mxu1 %v10530_v25  ;;  %v10611_v26 = vld [vmem:[%s15173_s1 + $0xd20] ss:$16 sps:$4 sm:$0xff]   ;;  %v10614_v25 = vld [vmem:[%s15173_s1 + $0xd28] ss:$16 sps:$4 sm:$0xff]  }
 0x170   :  { %6859 = vmatprep.subr.bf16.mxu0 %v10535_v27  ;;  %7707 = vmatprep.subr.bf16.mxu1 %v10538_v28  ;;  %v10619_v27 = vld [vmem:[%s15173_s1 + $0xd44] ss:$16 sps:$4 sm:$0xff]   ;;  %v10622_v28 = vld [vmem:[%s15173_s1 + $0xd4c] ss:$16 sps:$4 sm:$0xff]  }
 0x173   :  { %6860 = vmatpush1.bf16.msra.mxu0 %v10533_v29  ;;  %7708 = vmatpush1.bf16.msra.mxu1 %v10536_v30  ;;  %v10617_v29 = vld [vmem:[%s15173_s1 + $0xd40] ss:$16 sps:$4 sm:$0xff]   ;;  %v10620_v30 = vld [vmem:[%s15173_s1 + $0xd48] ss:$16 sps:$4 sm:$0xff]  }
 0x174   :  { %6861 = vmatprep.subr.bf16.mxu0 %v10541_v31  ;;  %7709 = vmatprep.subr.bf16.mxu1 %v10544_v32  ;;  %v10625_v31 = vld [vmem:[%s15173_s1 + $0xd64] ss:$16 sps:$4 sm:$0xff]   ;;  %v10628_v32 = vld [vmem:[%s15173_s1 + $0xd6c] ss:$16 sps:$4 sm:$0xff]  }
 0x177   :  { %6862 = vmatpush1.bf16.msra.mxu0 %v10539_v34  ;;  %7710 = vmatpush1.bf16.msra.mxu1 %v10542_v36  ;;  %v10623_v34 = vld [vmem:[%s15173_s1 + $0xd60] ss:$16 sps:$4 sm:$0xff]   ;;  %v10626_v36 = vld [vmem:[%s15173_s1 + $0xd68] ss:$16 sps:$4 sm:$0xff]  }
 0x178   :  { %6863 = vmatprep.subr.bf16.mxu0 %v10547_v33  ;;  %7711 = vmatprep.subr.bf16.mxu1 %v10550_v35  ;;  %v10631_v33 = vld [vmem:[%s15173_s1 + $0xd84] ss:$16 sps:$4 sm:$0xff]   ;;  %v10634_v35 = vld [vmem:[%s15173_s1 + $0xd8c] ss:$16 sps:$4 sm:$0xff]  }
 0x17b   :  { %6864 = vmatpush1.bf16.msra.mxu0 %v10545_v37  ;;  %7712 = vmatpush1.bf16.msra.mxu1 %v10548_v38  ;;  %v10629_v37 = vld [vmem:[%s15173_s1 + $0xd80] ss:$16 sps:$4 sm:$0xff]   ;;  %v10632_v38 = vld [vmem:[%s15173_s1 + $0xd88] ss:$16 sps:$4 sm:$0xff]  }
 0x17c   :  { %6865 = vmatprep.subr.bf16.mxu0 %v10553_v39  ;;  %7713 = vmatprep.subr.bf16.mxu1 %v10556_v40  ;;  %v10637_v39 = vld [vmem:[%s15173_s1 + $0xda4] ss:$16 sps:$4 sm:$0xff]   ;;  %v10640_v40 = vld [vmem:[%s15173_s1 + $0xdac] ss:$16 sps:$4 sm:$0xff]  }
 0x17f   :  { %6866 = vmatpush1.bf16.msra.mxu0 %v10551_v42  ;;  %7714 = vmatpush1.bf16.msra.mxu1 %v10554_v44  ;;  %v10635_v42 = vld [vmem:[%s15173_s1 + $0xda0] ss:$16 sps:$4 sm:$0xff]   ;;  %v10638_v44 = vld [vmem:[%s15173_s1 + $0xda8] ss:$16 sps:$4 sm:$0xff]  }
 0x180   :  { %6888 = vmatprep.subr.bf16.mxu0 %v10559_v41  ;;  %7736 = vmatprep.subr.bf16.mxu1 %v10562_v43  ;;  %v10643_v41 = vld [vmem:[%s15173_s1 + $0xdc4] ss:$16 sps:$4 sm:$0xff]   ;;  %v10646_v43 = vld [vmem:[%s15173_s1 + $0xdcc] ss:$16 sps:$4 sm:$0xff]  }
 0x182   :  { %6868 = vmatmul.mubr.bf16.vlgmr.msra.gmra.mrb[0].mxu0 %v8629_v47  ;;  %7716 = vmatmul.mubr.bf16.vlgmr.msra.gmra.mrb[0].mxu1 %v8629_v47  ;;  %v10649_v47 = vld [vmem:[%s15173_s1 + $0xde4] ss:$16 sps:$4 sm:$0xff]  }
 0x183   :  { %6889 = vmatpush1.bf16.msra.mxu0 %v10557_v48  ;;  %7737 = vmatpush1.bf16.msra.mxu1 %v10560_v51  ;;  %v10652_v48 = vld [vmem:[%s15173_s1 + $0xdec] ss:$16 sps:$4 sm:$0xff]   ;;  %v10647_v51 = vld [vmem:[%s15173_s1 + $0xde0] ss:$16 sps:$4 sm:$0xff]  }
 0x184   :  { %6890 = vmatprep.subr.bf16.mxu0 %v10565_v52  ;;  %7738 = vmatprep.subr.bf16.mxu1 %v10568_v49  ;;  %v10650_v52 = vld [vmem:[%s15173_s1 + $0xde8] ss:$16 sps:$4 sm:$0xff]   ;;  %v10655_v49 = vld [vmem:[%s15173_s1 + $0xe04] ss:$16 sps:$4 sm:$0xff]  }
 0x185   :  { %6877 = vmatprep.mubr.bf16.mxu0 %v8662_v54  ;;  %7725 = vmatprep.mubr.bf16.mxu1 %v8662_v54  ;;  %v74_v54 = vld [vmem:[%s15174_s0 + $0x1b0] sm:$0xff] }
 0x187   :  { %6891 = vmatpush1.bf16.msra.mxu0 %v10563_v50  ;;  %7739 = vmatpush1.bf16.msra.mxu1 %v10566_v53  ;;  %v10658_v50 = vld [vmem:[%s15173_s1 + $0xe0c] ss:$16 sps:$4 sm:$0xff]   ;;  %v58_v53 = vld [vmem:[%s15174_s0 + $0x130] sm:$0xff] }
 0x188   :  { %6892 = vmatprep.subr.bf16.mxu0 %v10571_v55  ;;  %7740 = vmatprep.subr.bf16.mxu1 %v10574_v56  ;;  %v8631_v55 = vcombine.low %v12853_v57, %v12858_v58  ;;  %v10653_v56 = vld [vmem:[%s15173_s1 + $0xe00] ss:$16 sps:$4 sm:$0xff]   ;;  %v10664_v57 = vld [vmem:[%s15173_s1 + $0xe2c] ss:$16 sps:$4 sm:$0xff]  }
 0x189   :  { %v10659_v58 = vld [vmem:[%s15173_s1 + $0xe20] ss:$16 sps:$4 sm:$0xff]  }
 0x18a   :  { %6878 = vmatmul.mubr.bf16.gmra.mrb[4].mxu0 %v8661_v59  ;;  %7726 = vmatmul.mubr.bf16.gmra.mrb[4].mxu1 %v8661_v59  ;;  %v10656_v59 = vld [vmem:[%s15173_s1 + $0xe08] ss:$16 sps:$4 sm:$0xff]  }
 0x18b   :  { %6893 = vmatpush1.bf16.msra.mxu0 %v10569_v60  ;;  %7741 = vmatpush1.bf16.msra.mxu1 %v10572_v61  ;;  %v10661_v60 = vld [vmem:[%s15173_s1 + $0xe24] ss:$16 sps:$4 sm:$0xff]   ;;  %v10662_v61 = vld [vmem:[%s15173_s1 + $0xe28] ss:$16 sps:$4 sm:$0xff]  }
 0x18c   :  { %6894 = vmatprep.subr.bf16.mxu0 %v10577_v62  ;;  %7742 = vmatprep.subr.bf16.mxu1 %v10580_v63  ;;  %v8664_v62 = vcombine.high %v58_v53, %v74_v54  ;;  %v10667_v63 = vld [vmem:[%s15173_s1 + $0xe44] ss:$16 sps:$4 sm:$0xff]  }
 0x18d   :  { %6920 = vmatprep.mubr.bf16.mxu0 %v8632_v0  ;;  %7768 = vmatprep.mubr.bf16.mxu1 %v8632_v0  ;;  %v10670_v0 = vld [vmem:[%s15173_s1 + $0xe4c] ss:$16 sps:$4 sm:$0xff]  }
 0x18f   :  { %6895 = vmatpush1.bf16.msra.mxu0 %v10575_v1  ;;  %7743 = vmatpush1.bf16.msra.mxu1 %v10578_v2  ;;  %v13065_v1 = vld [vmem:[%s15174_s0 + $0x38] sm:$0xff] }
 0x190   :  { %6896 = vmatprep.subr.bf16.mxu0 %v10583_v3  ;;  %7744 = vmatprep.subr.bf16.mxu1 %v10586_v4  ;;  %v13070_v2 = vld [vmem:[%s15174_s0 + $0xb8] sm:$0xff]  ;;  %v8663_v3 = vcombine.low %v58_v53, %v74_v54  ;;  %v10665_v4 = vld [vmem:[%s15173_s1 + $0xe40] ss:$16 sps:$4 sm:$0xff]  }
 0x191   :  { %v10737_v53 = vld [vmem:[%s15173_s1 + $0xfc0] ss:$16 sps:$4 sm:$0xff]   ;;  %v10740_v54 = vld [vmem:[%s15173_s1 + $0xfc8] ss:$16 sps:$4 sm:$0xff]  }
 0x193   :  { %6897 = vmatpush1.bf16.msra.mxu0 %v10581_v5  ;;  %7745 = vmatpush1.bf16.msra.mxu1 %v10584_v6  ;;  %v10668_v5 = vld [vmem:[%s15173_s1 + $0xe48] ss:$16 sps:$4 sm:$0xff]   ;;  %v10673_v6 = vld [vmem:[%s15173_s1 + $0xe64] ss:$16 sps:$4 sm:$0xff]  }
 0x194   :  { %6898 = vmatprep.subr.bf16.mxu0 %v10589_v7  ;;  %7746 = vmatprep.subr.bf16.mxu1 %v10592_v8  ;;  %v10676_v7 = vld [vmem:[%s15173_s1 + $0xe6c] ss:$16 sps:$4 sm:$0xff]   ;;  %v8634_v8 = vcombine.high %v13065_v1, %v13070_v2 }
 0x197   :  { %6899 = vmatpush1.bf16.msra.mxu0 %v10587_v9  ;;  %7747 = vmatpush1.bf16.msra.mxu1 %v10590_v10  ;;  %v10671_v9 = vld [vmem:[%s15173_s1 + $0xe60] ss:$16 sps:$4 sm:$0xff]   ;;  %v10674_v10 = vld [vmem:[%s15173_s1 + $0xe68] ss:$16 sps:$4 sm:$0xff]  }
 0x198   :  { %6900 = vmatprep.subr.bf16.mxu0 %v10595_v11  ;;  %7748 = vmatprep.subr.bf16.mxu1 %v10598_v12  ;;  %v10679_v11 = vld [vmem:[%s15173_s1 + $0xe84] ss:$16 sps:$4 sm:$0xff]   ;;  %v10682_v12 = vld [vmem:[%s15173_s1 + $0xe8c] ss:$16 sps:$4 sm:$0xff]  }
 0x19b   :  { %6901 = vmatpush1.bf16.msra.mxu0 %v10593_v13  ;;  %7749 = vmatpush1.bf16.msra.mxu1 %v10596_v14  ;;  %v10677_v13 = vld [vmem:[%s15173_s1 + $0xe80] ss:$16 sps:$4 sm:$0xff]   ;;  %v10680_v14 = vld [vmem:[%s15173_s1 + $0xe88] ss:$16 sps:$4 sm:$0xff]  }
 0x19c   :  { %6902 = vmatprep.subr.bf16.mxu0 %v10601_v15  ;;  %7750 = vmatprep.subr.bf16.mxu1 %v10604_v16  ;;  %v10685_v15 = vld [vmem:[%s15173_s1 + $0xea4] ss:$16 sps:$4 sm:$0xff]   ;;  %v10688_v16 = vld [vmem:[%s15173_s1 + $0xeac] ss:$16 sps:$4 sm:$0xff]  }
 0x19f   :  { %6903 = vmatpush1.bf16.msra.mxu0 %v10599_v17  ;;  %7751 = vmatpush1.bf16.msra.mxu1 %v10602_v18  ;;  %v10683_v17 = vld [vmem:[%s15173_s1 + $0xea0] ss:$16 sps:$4 sm:$0xff]   ;;  %v10686_v18 = vld [vmem:[%s15173_s1 + $0xea8] ss:$16 sps:$4 sm:$0xff]  }
 0x1a0   :  { %6904 = vmatprep.subr.bf16.mxu0 %v10607_v19  ;;  %7752 = vmatprep.subr.bf16.mxu1 %v10610_v20  ;;  %v10691_v19 = vld [vmem:[%s15173_s1 + $0xec4] ss:$16 sps:$4 sm:$0xff]   ;;  %v10694_v20 = vld [vmem:[%s15173_s1 + $0xecc] ss:$16 sps:$4 sm:$0xff]  }
 0x1a3   :  { %6905 = vmatpush1.bf16.msra.mxu0 %v10605_v21  ;;  %7753 = vmatpush1.bf16.msra.mxu1 %v10608_v22  ;;  %v10689_v21 = vld [vmem:[%s15173_s1 + $0xec0] ss:$16 sps:$4 sm:$0xff]   ;;  %v10692_v22 = vld [vmem:[%s15173_s1 + $0xec8] ss:$16 sps:$4 sm:$0xff]  }
 0x1a4   :  { %6906 = vmatprep.subr.bf16.mxu0 %v10613_v23  ;;  %7754 = vmatprep.subr.bf16.mxu1 %v10616_v24  ;;  %v10697_v23 = vld [vmem:[%s15173_s1 + $0xee4] ss:$16 sps:$4 sm:$0xff]   ;;  %v10700_v24 = vld [vmem:[%s15173_s1 + $0xeec] ss:$16 sps:$4 sm:$0xff]  }
 0x1a7   :  { %6907 = vmatpush1.bf16.msra.mxu0 %v10611_v26  ;;  %7755 = vmatpush1.bf16.msra.mxu1 %v10614_v25  ;;  %v10695_v26 = vld [vmem:[%s15173_s1 + $0xee0] ss:$16 sps:$4 sm:$0xff]   ;;  %v10698_v25 = vld [vmem:[%s15173_s1 + $0xee8] ss:$16 sps:$4 sm:$0xff]  }
 0x1a8   :  { %6908 = vmatprep.subr.bf16.mxu0 %v10619_v27  ;;  %7756 = vmatprep.subr.bf16.mxu1 %v10622_v28  ;;  %v10703_v27 = vld [vmem:[%s15173_s1 + $0xf04] ss:$16 sps:$4 sm:$0xff]   ;;  %v10706_v28 = vld [vmem:[%s15173_s1 + $0xf0c] ss:$16 sps:$4 sm:$0xff]  }
 0x1ab   :  { %6909 = vmatpush1.bf16.msra.mxu0 %v10617_v29  ;;  %7757 = vmatpush1.bf16.msra.mxu1 %v10620_v30  ;;  %v10701_v29 = vld [vmem:[%s15173_s1 + $0xf00] ss:$16 sps:$4 sm:$0xff]   ;;  %v10704_v30 = vld [vmem:[%s15173_s1 + $0xf08] ss:$16 sps:$4 sm:$0xff]  }
 0x1ac   :  { %6910 = vmatprep.subr.bf16.mxu0 %v10625_v31  ;;  %7758 = vmatprep.subr.bf16.mxu1 %v10628_v32  ;;  %v10709_v31 = vld [vmem:[%s15173_s1 + $0xf24] ss:$16 sps:$4 sm:$0xff]   ;;  %v10712_v32 = vld [vmem:[%s15173_s1 + $0xf2c] ss:$16 sps:$4 sm:$0xff]  }
 0x1af   :  { %6911 = vmatpush1.bf16.msra.mxu0 %v10623_v34  ;;  %7759 = vmatpush1.bf16.msra.mxu1 %v10626_v36  ;;  %v10707_v34 = vld [vmem:[%s15173_s1 + $0xf20] ss:$16 sps:$4 sm:$0xff]   ;;  %v10710_v36 = vld [vmem:[%s15173_s1 + $0xf28] ss:$16 sps:$4 sm:$0xff]  }
 0x1b0   :  { %6912 = vmatprep.subr.bf16.mxu0 %v10631_v33  ;;  %7760 = vmatprep.subr.bf16.mxu1 %v10634_v35  ;;  %v10715_v33 = vld [vmem:[%s15173_s1 + $0xf44] ss:$16 sps:$4 sm:$0xff]   ;;  %v10718_v35 = vld [vmem:[%s15173_s1 + $0xf4c] ss:$16 sps:$4 sm:$0xff]  }
 0x1b3   :  { %6913 = vmatpush1.bf16.msra.mxu0 %v10629_v37  ;;  %7761 = vmatpush1.bf16.msra.mxu1 %v10632_v38  ;;  %v10713_v37 = vld [vmem:[%s15173_s1 + $0xf40] ss:$16 sps:$4 sm:$0xff]   ;;  %v10716_v38 = vld [vmem:[%s15173_s1 + $0xf48] ss:$16 sps:$4 sm:$0xff]  }
 0x1b4   :  { %6914 = vmatprep.subr.bf16.mxu0 %v10637_v39  ;;  %7762 = vmatprep.subr.bf16.mxu1 %v10640_v40  ;;  %v10721_v39 = vld [vmem:[%s15173_s1 + $0xf64] ss:$16 sps:$4 sm:$0xff]   ;;  %v10724_v40 = vld [vmem:[%s15173_s1 + $0xf6c] ss:$16 sps:$4 sm:$0xff]  }
 0x1b7   :  { %6915 = vmatpush1.bf16.msra.mxu0 %v10635_v42  ;;  %7763 = vmatpush1.bf16.msra.mxu1 %v10638_v44  ;;  %v10719_v42 = vld [vmem:[%s15173_s1 + $0xf60] ss:$16 sps:$4 sm:$0xff]   ;;  %v10722_v44 = vld [vmem:[%s15173_s1 + $0xf68] ss:$16 sps:$4 sm:$0xff]  }
 0x1b8   :  { %6916 = vmatprep.subr.bf16.mxu0 %v10643_v41  ;;  %7764 = vmatprep.subr.bf16.mxu1 %v10646_v43  ;;  %v10727_v41 = vld [vmem:[%s15173_s1 + $0xf84] ss:$16 sps:$4 sm:$0xff]   ;;  %v10730_v43 = vld [vmem:[%s15173_s1 + $0xf8c] ss:$16 sps:$4 sm:$0xff]  }
 0x1bb   :  { %6917 = vmatpush1.bf16.msra.mxu0 %v10641_v45  ;;  %7765 = vmatpush1.bf16.msra.mxu1 %v10644_v46  ;;  %v10725_v45 = vld [vmem:[%s15173_s1 + $0xf80] ss:$16 sps:$4 sm:$0xff]   ;;  %v10728_v46 = vld [vmem:[%s15173_s1 + $0xf88] ss:$16 sps:$4 sm:$0xff]  }
 0x1bc   :  { %6918 = vmatprep.subr.bf16.mxu0 %v10649_v47  ;;  %7766 = vmatprep.subr.bf16.mxu1 %v10652_v48  ;;  %v10733_v47 = vld [vmem:[%s15173_s1 + $0xfa4] ss:$16 sps:$4 sm:$0xff]   ;;  %v10736_v48 = vld [vmem:[%s15173_s1 + $0xfac] ss:$16 sps:$4 sm:$0xff]  }
 0x1bf   :  { %6919 = vmatpush1.bf16.msra.mxu0 %v10647_v51  ;;  %7767 = vmatpush1.bf16.msra.mxu1 %v10650_v52  ;;  %v10731_v51 = vld [vmem:[%s15173_s1 + $0xfa0] ss:$16 sps:$4 sm:$0xff]   ;;  %v10734_v52 = vld [vmem:[%s15173_s1 + $0xfa8] ss:$16 sps:$4 sm:$0xff]  }
 0x1c0   :  { %6941 = vmatprep.subr.bf16.mxu0 %v10655_v49  ;;  %7789 = vmatprep.subr.bf16.mxu1 %v10658_v50  ;;  %v10739_v49 = vld [vmem:[%s15173_s1 + $0xfc4] ss:$16 sps:$4 sm:$0xff]   ;;  %v10742_v50 = vld [vmem:[%s15173_s1 + $0xfcc] ss:$16 sps:$4 sm:$0xff]  }
 0x1c2   :  { %6921 = vmatmul.mubr.bf16.vlgmr.msra.gmra.mrb[0].mxu0 %v8631_v55  ;;  %7769 = vmatmul.mubr.bf16.vlgmr.msra.gmra.mrb[0].mxu1 %v8631_v55  ;;  %v10745_v55 = vld [vmem:[%s15173_s1 + $0xfe4] ss:$16 sps:$4 sm:$0xff]  }
 0x1c3   :  { %6942 = vmatpush1.bf16.msra.mxu0 %v10653_v56  ;;  %7790 = vmatpush1.bf16.msra.mxu1 %v10656_v59  ;;  %v10748_v56 = vld [vmem:[%s15173_s1 + $0xfec] ss:$16 sps:$4 sm:$0xff]   ;;  %v10743_v59 = vld [vmem:[%s15173_s1 + $0xfe0] ss:$16 sps:$4 sm:$0xff]  }
 0x1c4   :  { %6943 = vmatprep.subr.bf16.mxu0 %v10661_v60  ;;  %7791 = vmatprep.subr.bf16.mxu1 %v10664_v57  ;;  %v10746_v60 = vld [vmem:[%s15173_s1 + $0xfe8] ss:$16 sps:$4 sm:$0xff]   ;;  %v10751_v57 = vld [vmem:[%s15173_s1 + $0x1004] ss:$16 sps:$4 sm:$0xff]  }
 0x1c5   :  { %6930 = vmatprep.mubr.bf16.mxu0 %v8664_v62  ;;  %7778 = vmatprep.mubr.bf16.mxu1 %v8664_v62  ;;  %v75_v62 = vld [vmem:[%s15174_s0 + $0x1b8] sm:$0xff] }
 0x1c7   :  { %6944 = vmatpush1.bf16.msra.mxu0 %v10659_v58  ;;  %7792 = vmatpush1.bf16.msra.mxu1 %v10662_v61  ;;  %v10754_v58 = vld [vmem:[%s15173_s1 + $0x100c] ss:$16 sps:$4 sm:$0xff]  }
 0x1c8   :  { %6945 = vmatprep.subr.bf16.mxu0 %v10667_v63  ;;  %7793 = vmatprep.subr.bf16.mxu1 %v10670_v0  ;;  %v59_v61 = vld [vmem:[%s15174_s0 + $0x138] sm:$0xff]  ;;  %v8633_v63 = vcombine.low %v13065_v1, %v13070_v2  ;;  %v10749_v0 = vld [vmem:[%s15173_s1 + $0x1000] ss:$16 sps:$4 sm:$0xff]  }
 0x1c9   :  { %v10760_v1 = vld [vmem:[%s15173_s1 + $0x102c] ss:$16 sps:$4 sm:$0xff]   ;;  %v10755_v2 = vld [vmem:[%s15173_s1 + $0x1020] ss:$16 sps:$4 sm:$0xff]  }
 0x1ca   :  { %6931 = vmatmul.mubr.bf16.gmra.mrb[4].mxu0 %v8663_v3  ;;  %7779 = vmatmul.mubr.bf16.gmra.mrb[4].mxu1 %v8663_v3  ;;  %v10752_v3 = vld [vmem:[%s15173_s1 + $0x1008] ss:$16 sps:$4 sm:$0xff]  }
 0x1cb   :  { %6946 = vmatpush1.bf16.msra.mxu0 %v10665_v4  ;;  %7794 = vmatpush1.bf16.msra.mxu1 %v10668_v5  ;;  %v10757_v4 = vld [vmem:[%s15173_s1 + $0x1024] ss:$16 sps:$4 sm:$0xff]   ;;  %v10758_v5 = vld [vmem:[%s15173_s1 + $0x1028] ss:$16 sps:$4 sm:$0xff]  }
 0x1cc   :  { %6947 = vmatprep.subr.bf16.mxu0 %v10673_v6  ;;  %7795 = vmatprep.subr.bf16.mxu1 %v10676_v7  ;;  %v8666_v6 = vcombine.high %v59_v61, %v75_v62  ;;  %v10763_v7 = vld [vmem:[%s15173_s1 + $0x1044] ss:$16 sps:$4 sm:$0xff]  }
 0x1cd   :  { %6973 = vmatprep.mubr.bf16.mxu0 %v8634_v8  ;;  %7821 = vmatprep.mubr.bf16.mxu1 %v8634_v8  ;;  %v10766_v8 = vld [vmem:[%s15173_s1 + $0x104c] ss:$16 sps:$4 sm:$0xff]  }
 0x1cf   :  { %6948 = vmatpush1.bf16.msra.mxu0 %v10671_v9  ;;  %7796 = vmatpush1.bf16.msra.mxu1 %v10674_v10  ;;  %v13277_v9 = vld [vmem:[%s15174_s0 + $0x40] sm:$0xff] }
 0x1d0   :  { %6949 = vmatprep.subr.bf16.mxu0 %v10679_v11  ;;  %7797 = vmatprep.subr.bf16.mxu1 %v10682_v12  ;;  %v13282_v10 = vld [vmem:[%s15174_s0 + $0xc0] sm:$0xff]  ;;  %v8665_v11 = vcombine.low %v59_v61, %v75_v62  ;;  %v10836_v62 = vld [vmem:[%s15173_s1 + $0x11c8] ss:$16 sps:$4 sm:$0xff]  }
 0x1d1   :  { %v10761_v12 = vld [vmem:[%s15173_s1 + $0x1040] ss:$16 sps:$4 sm:$0xff]  }
 0x1d2   :  { %v10833_v61 = vld [vmem:[%s15173_s1 + $0x11c0] ss:$16 sps:$4 sm:$0xff]  }
 0x1d3   :  { %6950 = vmatpush1.bf16.msra.mxu0 %v10677_v13  ;;  %7798 = vmatpush1.bf16.msra.mxu1 %v10680_v14  ;;  %v10764_v13 = vld [vmem:[%s15173_s1 + $0x1048] ss:$16 sps:$4 sm:$0xff]   ;;  %v10769_v14 = vld [vmem:[%s15173_s1 + $0x1064] ss:$16 sps:$4 sm:$0xff]  }
 0x1d4   :  { %6951 = vmatprep.subr.bf16.mxu0 %v10685_v15  ;;  %7799 = vmatprep.subr.bf16.mxu1 %v10688_v16  ;;  %v10772_v15 = vld [vmem:[%s15173_s1 + $0x106c] ss:$16 sps:$4 sm:$0xff]   ;;  %v8636_v16 = vcombine.high %v13277_v9, %v13282_v10 }
 0x1d7   :  { %6952 = vmatpush1.bf16.msra.mxu0 %v10683_v17  ;;  %7800 = vmatpush1.bf16.msra.mxu1 %v10686_v18  ;;  %v10767_v17 = vld [vmem:[%s15173_s1 + $0x1060] ss:$16 sps:$4 sm:$0xff]   ;;  %v10770_v18 = vld [vmem:[%s15173_s1 + $0x1068] ss:$16 sps:$4 sm:$0xff]  }
 0x1d8   :  { %6953 = vmatprep.subr.bf16.mxu0 %v10691_v19  ;;  %7801 = vmatprep.subr.bf16.mxu1 %v10694_v20  ;;  %v10775_v19 = vld [vmem:[%s15173_s1 + $0x1084] ss:$16 sps:$4 sm:$0xff]   ;;  %v10778_v20 = vld [vmem:[%s15173_s1 + $0x108c] ss:$16 sps:$4 sm:$0xff]  }
 0x1db   :  { %6954 = vmatpush1.bf16.msra.mxu0 %v10689_v21  ;;  %7802 = vmatpush1.bf16.msra.mxu1 %v10692_v22  ;;  %v10773_v21 = vld [vmem:[%s15173_s1 + $0x1080] ss:$16 sps:$4 sm:$0xff]   ;;  %v10776_v22 = vld [vmem:[%s15173_s1 + $0x1088] ss:$16 sps:$4 sm:$0xff]  }
 0x1dc   :  { %6955 = vmatprep.subr.bf16.mxu0 %v10697_v23  ;;  %7803 = vmatprep.subr.bf16.mxu1 %v10700_v24  ;;  %v10781_v23 = vld [vmem:[%s15173_s1 + $0x10a4] ss:$16 sps:$4 sm:$0xff]   ;;  %v10784_v24 = vld [vmem:[%s15173_s1 + $0x10ac] ss:$16 sps:$4 sm:$0xff]  }
 0x1df   :  { %6956 = vmatpush1.bf16.msra.mxu0 %v10695_v26  ;;  %7804 = vmatpush1.bf16.msra.mxu1 %v10698_v25  ;;  %v10779_v26 = vld [vmem:[%s15173_s1 + $0x10a0] ss:$16 sps:$4 sm:$0xff]   ;;  %v10782_v25 = vld [vmem:[%s15173_s1 + $0x10a8] ss:$16 sps:$4 sm:$0xff]  }
 0x1e0   :  { %6957 = vmatprep.subr.bf16.mxu0 %v10703_v27  ;;  %7805 = vmatprep.subr.bf16.mxu1 %v10706_v28  ;;  %v10787_v27 = vld [vmem:[%s15173_s1 + $0x10c4] ss:$16 sps:$4 sm:$0xff]   ;;  %v10790_v28 = vld [vmem:[%s15173_s1 + $0x10cc] ss:$16 sps:$4 sm:$0xff]  }
 0x1e3   :  { %6958 = vmatpush1.bf16.msra.mxu0 %v10701_v29  ;;  %7806 = vmatpush1.bf16.msra.mxu1 %v10704_v30  ;;  %v10785_v29 = vld [vmem:[%s15173_s1 + $0x10c0] ss:$16 sps:$4 sm:$0xff]   ;;  %v10788_v30 = vld [vmem:[%s15173_s1 + $0x10c8] ss:$16 sps:$4 sm:$0xff]  }
 0x1e4   :  { %6959 = vmatprep.subr.bf16.mxu0 %v10709_v31  ;;  %7807 = vmatprep.subr.bf16.mxu1 %v10712_v32  ;;  %v10793_v31 = vld [vmem:[%s15173_s1 + $0x10e4] ss:$16 sps:$4 sm:$0xff]   ;;  %v10796_v32 = vld [vmem:[%s15173_s1 + $0x10ec] ss:$16 sps:$4 sm:$0xff]  }
 0x1e7   :  { %6960 = vmatpush1.bf16.msra.mxu0 %v10707_v34  ;;  %7808 = vmatpush1.bf16.msra.mxu1 %v10710_v36  ;;  %v10791_v34 = vld [vmem:[%s15173_s1 + $0x10e0] ss:$16 sps:$4 sm:$0xff]   ;;  %v10794_v36 = vld [vmem:[%s15173_s1 + $0x10e8] ss:$16 sps:$4 sm:$0xff]  }
 0x1e8   :  { %6961 = vmatprep.subr.bf16.mxu0 %v10715_v33  ;;  %7809 = vmatprep.subr.bf16.mxu1 %v10718_v35  ;;  %v10799_v33 = vld [vmem:[%s15173_s1 + $0x1104] ss:$16 sps:$4 sm:$0xff]   ;;  %v10802_v35 = vld [vmem:[%s15173_s1 + $0x110c] ss:$16 sps:$4 sm:$0xff]  }
 0x1eb   :  { %6962 = vmatpush1.bf16.msra.mxu0 %v10713_v37  ;;  %7810 = vmatpush1.bf16.msra.mxu1 %v10716_v38  ;;  %v10797_v37 = vld [vmem:[%s15173_s1 + $0x1100] ss:$16 sps:$4 sm:$0xff]   ;;  %v10800_v38 = vld [vmem:[%s15173_s1 + $0x1108] ss:$16 sps:$4 sm:$0xff]  }
 0x1ec   :  { %6963 = vmatprep.subr.bf16.mxu0 %v10721_v39  ;;  %7811 = vmatprep.subr.bf16.mxu1 %v10724_v40  ;;  %v10805_v39 = vld [vmem:[%s15173_s1 + $0x1124] ss:$16 sps:$4 sm:$0xff]   ;;  %v10808_v40 = vld [vmem:[%s15173_s1 + $0x112c] ss:$16 sps:$4 sm:$0xff]  }
 0x1ef   :  { %6964 = vmatpush1.bf16.msra.mxu0 %v10719_v42  ;;  %7812 = vmatpush1.bf16.msra.mxu1 %v10722_v44  ;;  %v10803_v42 = vld [vmem:[%s15173_s1 + $0x1120] ss:$16 sps:$4 sm:$0xff]   ;;  %v10806_v44 = vld [vmem:[%s15173_s1 + $0x1128] ss:$16 sps:$4 sm:$0xff]  }
 0x1f0   :  { %6965 = vmatprep.subr.bf16.mxu0 %v10727_v41  ;;  %7813 = vmatprep.subr.bf16.mxu1 %v10730_v43  ;;  %v10811_v41 = vld [vmem:[%s15173_s1 + $0x1144] ss:$16 sps:$4 sm:$0xff]   ;;  %v10814_v43 = vld [vmem:[%s15173_s1 + $0x114c] ss:$16 sps:$4 sm:$0xff]  }
 0x1f3   :  { %6966 = vmatpush1.bf16.msra.mxu0 %v10725_v45  ;;  %7814 = vmatpush1.bf16.msra.mxu1 %v10728_v46  ;;  %v10809_v45 = vld [vmem:[%s15173_s1 + $0x1140] ss:$16 sps:$4 sm:$0xff]   ;;  %v10812_v46 = vld [vmem:[%s15173_s1 + $0x1148] ss:$16 sps:$4 sm:$0xff]  }
 0x1f4   :  { %6967 = vmatprep.subr.bf16.mxu0 %v10733_v47  ;;  %7815 = vmatprep.subr.bf16.mxu1 %v10736_v48  ;;  %v10817_v47 = vld [vmem:[%s15173_s1 + $0x1164] ss:$16 sps:$4 sm:$0xff]   ;;  %v10820_v48 = vld [vmem:[%s15173_s1 + $0x116c] ss:$16 sps:$4 sm:$0xff]  }
 0x1f7   :  { %6968 = vmatpush1.bf16.msra.mxu0 %v10731_v51  ;;  %7816 = vmatpush1.bf16.msra.mxu1 %v10734_v52  ;;  %v10815_v51 = vld [vmem:[%s15173_s1 + $0x1160] ss:$16 sps:$4 sm:$0xff]   ;;  %v10818_v52 = vld [vmem:[%s15173_s1 + $0x1168] ss:$16 sps:$4 sm:$0xff]  }
 0x1f8   :  { %6969 = vmatprep.subr.bf16.mxu0 %v10739_v49  ;;  %7817 = vmatprep.subr.bf16.mxu1 %v10742_v50  ;;  %v10823_v49 = vld [vmem:[%s15173_s1 + $0x1184] ss:$16 sps:$4 sm:$0xff]   ;;  %v10826_v50 = vld [vmem:[%s15173_s1 + $0x118c] ss:$16 sps:$4 sm:$0xff]  }
 0x1fb   :  { %6970 = vmatpush1.bf16.msra.mxu0 %v10737_v53  ;;  %7818 = vmatpush1.bf16.msra.mxu1 %v10740_v54  ;;  %v10821_v53 = vld [vmem:[%s15173_s1 + $0x1180] ss:$16 sps:$4 sm:$0xff]   ;;  %v10824_v54 = vld [vmem:[%s15173_s1 + $0x1188] ss:$16 sps:$4 sm:$0xff]  }
 0x1fc   :  { %6971 = vmatprep.subr.bf16.mxu0 %v10745_v55  ;;  %7819 = vmatprep.subr.bf16.mxu1 %v10748_v56  ;;  %v10829_v55 = vld [vmem:[%s15173_s1 + $0x11a4] ss:$16 sps:$4 sm:$0xff]   ;;  %v10832_v56 = vld [vmem:[%s15173_s1 + $0x11ac] ss:$16 sps:$4 sm:$0xff]  }
 0x1ff   :  { %6972 = vmatpush1.bf16.msra.mxu0 %v10743_v59  ;;  %7820 = vmatpush1.bf16.msra.mxu1 %v10746_v60  ;;  %v10827_v59 = vld [vmem:[%s15173_s1 + $0x11a0] ss:$16 sps:$4 sm:$0xff]   ;;  %v10830_v60 = vld [vmem:[%s15173_s1 + $0x11a8] ss:$16 sps:$4 sm:$0xff]  }
 0x200   :  { %6994 = vmatprep.subr.bf16.mxu0 %v10751_v57  ;;  %7842 = vmatprep.subr.bf16.mxu1 %v10754_v58  ;;  %v10835_v57 = vld [vmem:[%s15173_s1 + $0x11c4] ss:$16 sps:$4 sm:$0xff]   ;;  %v10838_v58 = vld [vmem:[%s15173_s1 + $0x11cc] ss:$16 sps:$4 sm:$0xff]  }
 0x202   :  { %6974 = vmatmul.mubr.bf16.vlgmr.msra.gmra.mrb[0].mxu0 %v8633_v63  ;;  %7822 = vmatmul.mubr.bf16.vlgmr.msra.gmra.mrb[0].mxu1 %v8633_v63  ;;  %v10841_v63 = vld [vmem:[%s15173_s1 + $0x11e4] ss:$16 sps:$4 sm:$0xff]  }
 0x203   :  { %6995 = vmatpush1.bf16.msra.mxu0 %v10749_v0  ;;  %7843 = vmatpush1.bf16.msra.mxu1 %v10752_v3  ;;  %v10844_v0 = vld [vmem:[%s15173_s1 + $0x11ec] ss:$16 sps:$4 sm:$0xff]   ;;  %v10839_v3 = vld [vmem:[%s15173_s1 + $0x11e0] ss:$16 sps:$4 sm:$0xff]  }
 0x204   :  { %6996 = vmatprep.subr.bf16.mxu0 %v10757_v4  ;;  %7844 = vmatprep.subr.bf16.mxu1 %v10760_v1  ;;  %v10842_v4 = vld [vmem:[%s15173_s1 + $0x11e8] ss:$16 sps:$4 sm:$0xff]   ;;  %v10847_v1 = vld [vmem:[%s15173_s1 + $0x1204] ss:$16 sps:$4 sm:$0xff]  }
 0x205   :  { %6983 = vmatprep.mubr.bf16.mxu0 %v8666_v6  ;;  %7831 = vmatprep.mubr.bf16.mxu1 %v8666_v6  ;;  %v76_v6 = vld [vmem:[%s15174_s0 + $0x1c0] sm:$0xff] }
 0x207   :  { %6997 = vmatpush1.bf16.msra.mxu0 %v10755_v2  ;;  %7845 = vmatpush1.bf16.msra.mxu1 %v10758_v5  ;;  %v10850_v2 = vld [vmem:[%s15173_s1 + $0x120c] ss:$16 sps:$4 sm:$0xff]   ;;  %v60_v5 = vld [vmem:[%s15174_s0 + $0x140] sm:$0xff] }
 0x208   :  { %6998 = vmatprep.subr.bf16.mxu0 %v10763_v7  ;;  %7846 = vmatprep.subr.bf16.mxu1 %v10766_v8  ;;  %v8635_v7 = vcombine.low %v13277_v9, %v13282_v10  ;;  %v10845_v8 = vld [vmem:[%s15173_s1 + $0x1200] ss:$16 sps:$4 sm:$0xff]   ;;  %v10856_v9 = vld [vmem:[%s15173_s1 + $0x122c] ss:$16 sps:$4 sm:$0xff]  }
 0x209   :  { %v10851_v10 = vld [vmem:[%s15173_s1 + $0x1220] ss:$16 sps:$4 sm:$0xff]  }
 0x20a   :  { %6984 = vmatmul.mubr.bf16.gmra.mrb[4].mxu0 %v8665_v11  ;;  %7832 = vmatmul.mubr.bf16.gmra.mrb[4].mxu1 %v8665_v11  ;;  %v10848_v11 = vld [vmem:[%s15173_s1 + $0x1208] ss:$16 sps:$4 sm:$0xff]  }
 0x20b   :  { %6999 = vmatpush1.bf16.msra.mxu0 %v10761_v12  ;;  %7847 = vmatpush1.bf16.msra.mxu1 %v10764_v13  ;;  %v10853_v12 = vld [vmem:[%s15173_s1 + $0x1224] ss:$16 sps:$4 sm:$0xff]   ;;  %v10854_v13 = vld [vmem:[%s15173_s1 + $0x1228] ss:$16 sps:$4 sm:$0xff]  }
 0x20c   :  { %7000 = vmatprep.subr.bf16.mxu0 %v10769_v14  ;;  %7848 = vmatprep.subr.bf16.mxu1 %v10772_v15  ;;  %v8668_v14 = vcombine.high %v60_v5, %v76_v6  ;;  %v10859_v15 = vld [vmem:[%s15173_s1 + $0x1244] ss:$16 sps:$4 sm:$0xff]  }
 0x20d   :  { %7026 = vmatprep.mubr.bf16.mxu0 %v8636_v16  ;;  %7874 = vmatprep.mubr.bf16.mxu1 %v8636_v16  ;;  %v10862_v16 = vld [vmem:[%s15173_s1 + $0x124c] ss:$16 sps:$4 sm:$0xff]  }
 0x20f   :  { %7001 = vmatpush1.bf16.msra.mxu0 %v10767_v17  ;;  %7849 = vmatpush1.bf16.msra.mxu1 %v10770_v18  ;;  %v13489_v17 = vld [vmem:[%s15174_s0 + $0x48] sm:$0xff] }
 0x210   :  { %7002 = vmatprep.subr.bf16.mxu0 %v10775_v19  ;;  %7850 = vmatprep.subr.bf16.mxu1 %v10778_v20  ;;  %v13494_v18 = vld [vmem:[%s15174_s0 + $0xc8] sm:$0xff]  ;;  %v8667_v19 = vcombine.low %v60_v5, %v76_v6  ;;  %v10857_v20 = vld [vmem:[%s15173_s1 + $0x1240] ss:$16 sps:$4 sm:$0xff]  }
 0x211   :  { %v10929_v5 = vld [vmem:[%s15173_s1 + $0x13c0] ss:$16 sps:$4 sm:$0xff]   ;;  %v10932_v6 = vld [vmem:[%s15173_s1 + $0x13c8] ss:$16 sps:$4 sm:$0xff]  }
 0x213   :  { %7003 = vmatpush1.bf16.msra.mxu0 %v10773_v21  ;;  %7851 = vmatpush1.bf16.msra.mxu1 %v10776_v22  ;;  %v10860_v21 = vld [vmem:[%s15173_s1 + $0x1248] ss:$16 sps:$4 sm:$0xff]   ;;  %v10865_v22 = vld [vmem:[%s15173_s1 + $0x1264] ss:$16 sps:$4 sm:$0xff]  }
 0x214   :  { %7004 = vmatprep.subr.bf16.mxu0 %v10781_v23  ;;  %7852 = vmatprep.subr.bf16.mxu1 %v10784_v24  ;;  %v10868_v23 = vld [vmem:[%s15173_s1 + $0x126c] ss:$16 sps:$4 sm:$0xff]   ;;  %v8638_v24 = vcombine.high %v13489_v17, %v13494_v18 }
 0x217   :  { %7005 = vmatpush1.bf16.msra.mxu0 %v10779_v26  ;;  %7853 = vmatpush1.bf16.msra.mxu1 %v10782_v25  ;;  %v10863_v26 = vld [vmem:[%s15173_s1 + $0x1260] ss:$16 sps:$4 sm:$0xff]   ;;  %v10866_v25 = vld [vmem:[%s15173_s1 + $0x1268] ss:$16 sps:$4 sm:$0xff]  }
 0x218   :  { %7006 = vmatprep.subr.bf16.mxu0 %v10787_v27  ;;  %7854 = vmatprep.subr.bf16.mxu1 %v10790_v28  ;;  %v10871_v27 = vld [vmem:[%s15173_s1 + $0x1284] ss:$16 sps:$4 sm:$0xff]   ;;  %v10874_v28 = vld [vmem:[%s15173_s1 + $0x128c] ss:$16 sps:$4 sm:$0xff]  }
 0x21b   :  { %7007 = vmatpush1.bf16.msra.mxu0 %v10785_v29  ;;  %7855 = vmatpush1.bf16.msra.mxu1 %v10788_v30  ;;  %v10869_v29 = vld [vmem:[%s15173_s1 + $0x1280] ss:$16 sps:$4 sm:$0xff]   ;;  %v10872_v30 = vld [vmem:[%s15173_s1 + $0x1288] ss:$16 sps:$4 sm:$0xff]  }
 0x21c   :  { %7008 = vmatprep.subr.bf16.mxu0 %v10793_v31  ;;  %7856 = vmatprep.subr.bf16.mxu1 %v10796_v32  ;;  %v10877_v31 = vld [vmem:[%s15173_s1 + $0x12a4] ss:$16 sps:$4 sm:$0xff]   ;;  %v10880_v32 = vld [vmem:[%s15173_s1 + $0x12ac] ss:$16 sps:$4 sm:$0xff]  }
 0x21f   :  { %7009 = vmatpush1.bf16.msra.mxu0 %v10791_v34  ;;  %7857 = vmatpush1.bf16.msra.mxu1 %v10794_v36  ;;  %v10875_v34 = vld [vmem:[%s15173_s1 + $0x12a0] ss:$16 sps:$4 sm:$0xff]   ;;  %v10878_v36 = vld [vmem:[%s15173_s1 + $0x12a8] ss:$16 sps:$4 sm:$0xff]  }
 0x220   :  { %7010 = vmatprep.subr.bf16.mxu0 %v10799_v33  ;;  %7858 = vmatprep.subr.bf16.mxu1 %v10802_v35  ;;  %v10883_v33 = vld [vmem:[%s15173_s1 + $0x12c4] ss:$16 sps:$4 sm:$0xff]   ;;  %v10886_v35 = vld [vmem:[%s15173_s1 + $0x12cc] ss:$16 sps:$4 sm:$0xff]  }
 0x223   :  { %7011 = vmatpush1.bf16.msra.mxu0 %v10797_v37  ;;  %7859 = vmatpush1.bf16.msra.mxu1 %v10800_v38  ;;  %v10881_v37 = vld [vmem:[%s15173_s1 + $0x12c0] ss:$16 sps:$4 sm:$0xff]   ;;  %v10884_v38 = vld [vmem:[%s15173_s1 + $0x12c8] ss:$16 sps:$4 sm:$0xff]  }
 0x224   :  { %7012 = vmatprep.subr.bf16.mxu0 %v10805_v39  ;;  %7860 = vmatprep.subr.bf16.mxu1 %v10808_v40  ;;  %v10889_v39 = vld [vmem:[%s15173_s1 + $0x12e4] ss:$16 sps:$4 sm:$0xff]   ;;  %v10892_v40 = vld [vmem:[%s15173_s1 + $0x12ec] ss:$16 sps:$4 sm:$0xff]  }
 0x227   :  { %7013 = vmatpush1.bf16.msra.mxu0 %v10803_v42  ;;  %7861 = vmatpush1.bf16.msra.mxu1 %v10806_v44  ;;  %v10887_v42 = vld [vmem:[%s15173_s1 + $0x12e0] ss:$16 sps:$4 sm:$0xff]   ;;  %v10890_v44 = vld [vmem:[%s15173_s1 + $0x12e8] ss:$16 sps:$4 sm:$0xff]  }
 0x228   :  { %7014 = vmatprep.subr.bf16.mxu0 %v10811_v41  ;;  %7862 = vmatprep.subr.bf16.mxu1 %v10814_v43  ;;  %v10895_v41 = vld [vmem:[%s15173_s1 + $0x1304] ss:$16 sps:$4 sm:$0xff]   ;;  %v10898_v43 = vld [vmem:[%s15173_s1 + $0x130c] ss:$16 sps:$4 sm:$0xff]  }
 0x22b   :  { %7015 = vmatpush1.bf16.msra.mxu0 %v10809_v45  ;;  %7863 = vmatpush1.bf16.msra.mxu1 %v10812_v46  ;;  %v10893_v45 = vld [vmem:[%s15173_s1 + $0x1300] ss:$16 sps:$4 sm:$0xff]   ;;  %v10896_v46 = vld [vmem:[%s15173_s1 + $0x1308] ss:$16 sps:$4 sm:$0xff]  }
 0x22c   :  { %7016 = vmatprep.subr.bf16.mxu0 %v10817_v47  ;;  %7864 = vmatprep.subr.bf16.mxu1 %v10820_v48  ;;  %v10901_v47 = vld [vmem:[%s15173_s1 + $0x1324] ss:$16 sps:$4 sm:$0xff]   ;;  %v10904_v48 = vld [vmem:[%s15173_s1 + $0x132c] ss:$16 sps:$4 sm:$0xff]  }
 0x22f   :  { %7017 = vmatpush1.bf16.msra.mxu0 %v10815_v51  ;;  %7865 = vmatpush1.bf16.msra.mxu1 %v10818_v52  ;;  %v10899_v51 = vld [vmem:[%s15173_s1 + $0x1320] ss:$16 sps:$4 sm:$0xff]   ;;  %v10902_v52 = vld [vmem:[%s15173_s1 + $0x1328] ss:$16 sps:$4 sm:$0xff]  }
 0x230   :  { %7018 = vmatprep.subr.bf16.mxu0 %v10823_v49  ;;  %7866 = vmatprep.subr.bf16.mxu1 %v10826_v50  ;;  %v10907_v49 = vld [vmem:[%s15173_s1 + $0x1344] ss:$16 sps:$4 sm:$0xff]   ;;  %v10910_v50 = vld [vmem:[%s15173_s1 + $0x134c] ss:$16 sps:$4 sm:$0xff]  }
 0x233   :  { %7019 = vmatpush1.bf16.msra.mxu0 %v10821_v53  ;;  %7867 = vmatpush1.bf16.msra.mxu1 %v10824_v54  ;;  %v10905_v53 = vld [vmem:[%s15173_s1 + $0x1340] ss:$16 sps:$4 sm:$0xff]   ;;  %v10908_v54 = vld [vmem:[%s15173_s1 + $0x1348] ss:$16 sps:$4 sm:$0xff]  }
 0x234   :  { %7020 = vmatprep.subr.bf16.mxu0 %v10829_v55  ;;  %7868 = vmatprep.subr.bf16.mxu1 %v10832_v56  ;;  %v10913_v55 = vld [vmem:[%s15173_s1 + $0x1364] ss:$16 sps:$4 sm:$0xff]   ;;  %v10916_v56 = vld [vmem:[%s15173_s1 + $0x136c] ss:$16 sps:$4 sm:$0xff]  }
 0x237   :  { %7021 = vmatpush1.bf16.msra.mxu0 %v10827_v59  ;;  %7869 = vmatpush1.bf16.msra.mxu1 %v10830_v60  ;;  %v10911_v59 = vld [vmem:[%s15173_s1 + $0x1360] ss:$16 sps:$4 sm:$0xff]   ;;  %v10914_v60 = vld [vmem:[%s15173_s1 + $0x1368] ss:$16 sps:$4 sm:$0xff]  }
 0x238   :  { %7022 = vmatprep.subr.bf16.mxu0 %v10835_v57  ;;  %7870 = vmatprep.subr.bf16.mxu1 %v10838_v58  ;;  %v10919_v57 = vld [vmem:[%s15173_s1 + $0x1384] ss:$16 sps:$4 sm:$0xff]   ;;  %v10922_v58 = vld [vmem:[%s15173_s1 + $0x138c] ss:$16 sps:$4 sm:$0xff]  }
 0x23b   :  { %7023 = vmatpush1.bf16.msra.mxu0 %v10833_v61  ;;  %7871 = vmatpush1.bf16.msra.mxu1 %v10836_v62  ;;  %v10917_v61 = vld [vmem:[%s15173_s1 + $0x1380] ss:$16 sps:$4 sm:$0xff]   ;;  %v10920_v62 = vld [vmem:[%s15173_s1 + $0x1388] ss:$16 sps:$4 sm:$0xff]  }
 0x23c   :  { %7024 = vmatprep.subr.bf16.mxu0 %v10841_v63  ;;  %7872 = vmatprep.subr.bf16.mxu1 %v10844_v0  ;;  %v10925_v63 = vld [vmem:[%s15173_s1 + $0x13a4] ss:$16 sps:$4 sm:$0xff]   ;;  %v10928_v0 = vld [vmem:[%s15173_s1 + $0x13ac] ss:$16 sps:$4 sm:$0xff]  }
 0x23f   :  { %7025 = vmatpush1.bf16.msra.mxu0 %v10839_v3  ;;  %7873 = vmatpush1.bf16.msra.mxu1 %v10842_v4  ;;  %v10923_v3 = vld [vmem:[%s15173_s1 + $0x13a0] ss:$16 sps:$4 sm:$0xff]   ;;  %v10926_v4 = vld [vmem:[%s15173_s1 + $0x13a8] ss:$16 sps:$4 sm:$0xff]  }
 0x240   :  { %7047 = vmatprep.subr.bf16.mxu0 %v10847_v1  ;;  %7895 = vmatprep.subr.bf16.mxu1 %v10850_v2  ;;  %v10931_v1 = vld [vmem:[%s15173_s1 + $0x13c4] ss:$16 sps:$4 sm:$0xff]   ;;  %v10934_v2 = vld [vmem:[%s15173_s1 + $0x13cc] ss:$16 sps:$4 sm:$0xff]  }
 0x242   :  { %7027 = vmatmul.mubr.bf16.vlgmr.msra.gmra.mrb[0].mxu0 %v8635_v7  ;;  %7875 = vmatmul.mubr.bf16.vlgmr.msra.gmra.mrb[0].mxu1 %v8635_v7  ;;  %v10937_v7 = vld [vmem:[%s15173_s1 + $0x13e4] ss:$16 sps:$4 sm:$0xff]  }
 0x243   :  { %7048 = vmatpush1.bf16.msra.mxu0 %v10845_v8  ;;  %7896 = vmatpush1.bf16.msra.mxu1 %v10848_v11  ;;  %v10940_v8 = vld [vmem:[%s15173_s1 + $0x13ec] ss:$16 sps:$4 sm:$0xff]   ;;  %v10935_v11 = vld [vmem:[%s15173_s1 + $0x13e0] ss:$16 sps:$4 sm:$0xff]  }
 0x244   :  { %7049 = vmatprep.subr.bf16.mxu0 %v10853_v12  ;;  %7897 = vmatprep.subr.bf16.mxu1 %v10856_v9  ;;  %v10938_v12 = vld [vmem:[%s15173_s1 + $0x13e8] ss:$16 sps:$4 sm:$0xff]   ;;  %v10943_v9 = vld [vmem:[%s15173_s1 + $0x1404] ss:$16 sps:$4 sm:$0xff]  }
 0x245   :  { %7036 = vmatprep.mubr.bf16.mxu0 %v8668_v14  ;;  %7884 = vmatprep.mubr.bf16.mxu1 %v8668_v14  ;;  %v61_v14 = vld [vmem:[%s15174_s0 + $0x148] sm:$0xff] }
 0x247   :  { %7050 = vmatpush1.bf16.msra.mxu0 %v10851_v10  ;;  %7898 = vmatpush1.bf16.msra.mxu1 %v10854_v13  ;;  %v10946_v10 = vld [vmem:[%s15173_s1 + $0x140c] ss:$16 sps:$4 sm:$0xff]   ;;  %v8637_v13 = vcombine.low %v13489_v17, %v13494_v18  ;;  %v10949_v17 = vld [vmem:[%s15173_s1 + $0x1424] ss:$16 sps:$4 sm:$0xff]  }
 0x248   :  { %7051 = vmatprep.subr.bf16.mxu0 %v10859_v15  ;;  %7899 = vmatprep.subr.bf16.mxu1 %v10862_v16  ;;  %v77_v15 = vld [vmem:[%s15174_s0 + $0x1c8] sm:$0xff]  ;;  %v10941_v16 = vld [vmem:[%s15173_s1 + $0x1400] ss:$16 sps:$4 sm:$0xff]  }
 0x249   :  { %v10952_v18 = vld [vmem:[%s15173_s1 + $0x142c] ss:$16 sps:$4 sm:$0xff]  }
 0x24a   :  { %7037 = vmatmul.mubr.bf16.gmra.mrb[4].mxu0 %v8667_v19  ;;  %7885 = vmatmul.mubr.bf16.gmra.mrb[4].mxu1 %v8667_v19  ;;  %v10944_v19 = vld [vmem:[%s15173_s1 + $0x1408] ss:$16 sps:$4 sm:$0xff]  }
 0x24b   :  { %7052 = vmatpush1.bf16.msra.mxu0 %v10857_v20  ;;  %7900 = vmatpush1.bf16.msra.mxu1 %v10860_v21  ;;  %v8670_v20 = vcombine.high %v61_v14, %v77_v15  ;;  %v10947_v21 = vld [vmem:[%s15173_s1 + $0x1420] ss:$16 sps:$4 sm:$0xff]  }
 0x24c   :  { %7053 = vmatprep.subr.bf16.mxu0 %v10865_v22  ;;  %7901 = vmatprep.subr.bf16.mxu1 %v10868_v23  ;;  %v10950_v22 = vld [vmem:[%s15173_s1 + $0x1428] ss:$16 sps:$4 sm:$0xff]   ;;  %v10955_v23 = vld [vmem:[%s15173_s1 + $0x1444] ss:$16 sps:$4 sm:$0xff]  }
 0x24d   :  { %7079 = vmatprep.mubr.bf16.mxu0 %v8638_v24  ;;  %7927 = vmatprep.mubr.bf16.mxu1 %v8638_v24  ;;  %v10958_v24 = vld [vmem:[%s15173_s1 + $0x144c] ss:$16 sps:$4 sm:$0xff]  }
 0x24f   :  { %7054 = vmatpush1.bf16.msra.mxu0 %v10863_v26  ;;  %7902 = vmatpush1.bf16.msra.mxu1 %v10866_v25  ;;  %v8669_v26 = vcombine.low %v61_v14, %v77_v15  ;;  %v13701_v25 = vld [vmem:[%s15174_s0 + $0x50] sm:$0xff]  ;;  %v11028_v14 = vld [vmem:[%s15173_s1 + $0x15c8] ss:$16 sps:$4 sm:$0xff]  }
 0x250   :  { %7055 = vmatprep.subr.bf16.mxu0 %v10871_v27  ;;  %7903 = vmatprep.subr.bf16.mxu1 %v10874_v28  ;;  %v13706_v27 = vld [vmem:[%s15174_s0 + $0xd0] sm:$0xff] }
 0x251   :  { %v10953_v28 = vld [vmem:[%s15173_s1 + $0x1440] ss:$16 sps:$4 sm:$0xff]   ;;  %v11033_v15 = vld [vmem:[%s15173_s1 + $0x15e4] ss:$16 sps:$4 sm:$0xff]  }
 0x253   :  { %7056 = vmatpush1.bf16.msra.mxu0 %v10869_v29  ;;  %7904 = vmatpush1.bf16.msra.mxu1 %v10872_v30  ;;  %v10956_v29 = vld [vmem:[%s15173_s1 + $0x1448] ss:$16 sps:$4 sm:$0xff]   ;;  %v10961_v30 = vld [vmem:[%s15173_s1 + $0x1464] ss:$16 sps:$4 sm:$0xff]  }
 0x254   :  { %7057 = vmatprep.subr.bf16.mxu0 %v10877_v31  ;;  %7905 = vmatprep.subr.bf16.mxu1 %v10880_v32  ;;  %v10964_v31 = vld [vmem:[%s15173_s1 + $0x146c] ss:$16 sps:$4 sm:$0xff]   ;;  %v8640_v32 = vcombine.high %v13701_v25, %v13706_v27 }
 0x257   :  { %7058 = vmatpush1.bf16.msra.mxu0 %v10875_v34  ;;  %7906 = vmatpush1.bf16.msra.mxu1 %v10878_v36  ;;  %v10959_v34 = vld [vmem:[%s15173_s1 + $0x1460] ss:$16 sps:$4 sm:$0xff]   ;;  %v10962_v36 = vld [vmem:[%s15173_s1 + $0x1468] ss:$16 sps:$4 sm:$0xff]  }
 0x258   :  { %7059 = vmatprep.subr.bf16.mxu0 %v10883_v33  ;;  %7907 = vmatprep.subr.bf16.mxu1 %v10886_v35  ;;  %v10967_v33 = vld [vmem:[%s15173_s1 + $0x1484] ss:$16 sps:$4 sm:$0xff]   ;;  %v10970_v35 = vld [vmem:[%s15173_s1 + $0x148c] ss:$16 sps:$4 sm:$0xff]  }
 0x25b   :  { %7060 = vmatpush1.bf16.msra.mxu0 %v10881_v37  ;;  %7908 = vmatpush1.bf16.msra.mxu1 %v10884_v38  ;;  %v10965_v37 = vld [vmem:[%s15173_s1 + $0x1480] ss:$16 sps:$4 sm:$0xff]   ;;  %v10968_v38 = vld [vmem:[%s15173_s1 + $0x1488] ss:$16 sps:$4 sm:$0xff]  }
 0x25c   :  { %7061 = vmatprep.subr.bf16.mxu0 %v10889_v39  ;;  %7909 = vmatprep.subr.bf16.mxu1 %v10892_v40  ;;  %v10973_v39 = vld [vmem:[%s15173_s1 + $0x14a4] ss:$16 sps:$4 sm:$0xff]   ;;  %v10976_v40 = vld [vmem:[%s15173_s1 + $0x14ac] ss:$16 sps:$4 sm:$0xff]  }
 0x25f   :  { %7062 = vmatpush1.bf16.msra.mxu0 %v10887_v42  ;;  %7910 = vmatpush1.bf16.msra.mxu1 %v10890_v44  ;;  %v10971_v42 = vld [vmem:[%s15173_s1 + $0x14a0] ss:$16 sps:$4 sm:$0xff]   ;;  %v10974_v44 = vld [vmem:[%s15173_s1 + $0x14a8] ss:$16 sps:$4 sm:$0xff]  }
 0x260   :  { %7063 = vmatprep.subr.bf16.mxu0 %v10895_v41  ;;  %7911 = vmatprep.subr.bf16.mxu1 %v10898_v43  ;;  %v10979_v41 = vld [vmem:[%s15173_s1 + $0x14c4] ss:$16 sps:$4 sm:$0xff]   ;;  %v10982_v43 = vld [vmem:[%s15173_s1 + $0x14cc] ss:$16 sps:$4 sm:$0xff]  }
 0x263   :  { %7064 = vmatpush1.bf16.msra.mxu0 %v10893_v45  ;;  %7912 = vmatpush1.bf16.msra.mxu1 %v10896_v46  ;;  %v10977_v45 = vld [vmem:[%s15173_s1 + $0x14c0] ss:$16 sps:$4 sm:$0xff]   ;;  %v10980_v46 = vld [vmem:[%s15173_s1 + $0x14c8] ss:$16 sps:$4 sm:$0xff]  }
 0x264   :  { %7065 = vmatprep.subr.bf16.mxu0 %v10901_v47  ;;  %7913 = vmatprep.subr.bf16.mxu1 %v10904_v48  ;;  %v10985_v47 = vld [vmem:[%s15173_s1 + $0x14e4] ss:$16 sps:$4 sm:$0xff]   ;;  %v10988_v48 = vld [vmem:[%s15173_s1 + $0x14ec] ss:$16 sps:$4 sm:$0xff]  }
 0x267   :  { %7066 = vmatpush1.bf16.msra.mxu0 %v10899_v51  ;;  %7914 = vmatpush1.bf16.msra.mxu1 %v10902_v52  ;;  %v10983_v51 = vld [vmem:[%s15173_s1 + $0x14e0] ss:$16 sps:$4 sm:$0xff]   ;;  %v10986_v52 = vld [vmem:[%s15173_s1 + $0x14e8] ss:$16 sps:$4 sm:$0xff]  }
 0x268   :  { %7067 = vmatprep.subr.bf16.mxu0 %v10907_v49  ;;  %7915 = vmatprep.subr.bf16.mxu1 %v10910_v50  ;;  %v10991_v49 = vld [vmem:[%s15173_s1 + $0x1504] ss:$16 sps:$4 sm:$0xff]   ;;  %v10994_v50 = vld [vmem:[%s15173_s1 + $0x150c] ss:$16 sps:$4 sm:$0xff]  }
 0x26b   :  { %7068 = vmatpush1.bf16.msra.mxu0 %v10905_v53  ;;  %7916 = vmatpush1.bf16.msra.mxu1 %v10908_v54  ;;  %v10989_v53 = vld [vmem:[%s15173_s1 + $0x1500] ss:$16 sps:$4 sm:$0xff]   ;;  %v10992_v54 = vld [vmem:[%s15173_s1 + $0x1508] ss:$16 sps:$4 sm:$0xff]  }
 0x26c   :  { %7069 = vmatprep.subr.bf16.mxu0 %v10913_v55  ;;  %7917 = vmatprep.subr.bf16.mxu1 %v10916_v56  ;;  %v10997_v55 = vld [vmem:[%s15173_s1 + $0x1524] ss:$16 sps:$4 sm:$0xff]   ;;  %v11000_v56 = vld [vmem:[%s15173_s1 + $0x152c] ss:$16 sps:$4 sm:$0xff]  }
 0x26f   :  { %7070 = vmatpush1.bf16.msra.mxu0 %v10911_v59  ;;  %7918 = vmatpush1.bf16.msra.mxu1 %v10914_v60  ;;  %v10995_v59 = vld [vmem:[%s15173_s1 + $0x1520] ss:$16 sps:$4 sm:$0xff]   ;;  %v10998_v60 = vld [vmem:[%s15173_s1 + $0x1528] ss:$16 sps:$4 sm:$0xff]  }
 0x270   :  { %7071 = vmatprep.subr.bf16.mxu0 %v10919_v57  ;;  %7919 = vmatprep.subr.bf16.mxu1 %v10922_v58  ;;  %v11003_v57 = vld [vmem:[%s15173_s1 + $0x1544] ss:$16 sps:$4 sm:$0xff]   ;;  %v11006_v58 = vld [vmem:[%s15173_s1 + $0x154c] ss:$16 sps:$4 sm:$0xff]  }
 0x273   :  { %7072 = vmatpush1.bf16.msra.mxu0 %v10917_v61  ;;  %7920 = vmatpush1.bf16.msra.mxu1 %v10920_v62  ;;  %v11001_v61 = vld [vmem:[%s15173_s1 + $0x1540] ss:$16 sps:$4 sm:$0xff]   ;;  %v11004_v62 = vld [vmem:[%s15173_s1 + $0x1548] ss:$16 sps:$4 sm:$0xff]  }
 0x274   :  { %7073 = vmatprep.subr.bf16.mxu0 %v10925_v63  ;;  %7921 = vmatprep.subr.bf16.mxu1 %v10928_v0  ;;  %v11009_v63 = vld [vmem:[%s15173_s1 + $0x1564] ss:$16 sps:$4 sm:$0xff]   ;;  %v11012_v0 = vld [vmem:[%s15173_s1 + $0x156c] ss:$16 sps:$4 sm:$0xff]  }
 0x277   :  { %7074 = vmatpush1.bf16.msra.mxu0 %v10923_v3  ;;  %7922 = vmatpush1.bf16.msra.mxu1 %v10926_v4  ;;  %v11007_v3 = vld [vmem:[%s15173_s1 + $0x1560] ss:$16 sps:$4 sm:$0xff]   ;;  %v11010_v4 = vld [vmem:[%s15173_s1 + $0x1568] ss:$16 sps:$4 sm:$0xff]  }
 0x278   :  { %7075 = vmatprep.subr.bf16.mxu0 %v10931_v1  ;;  %7923 = vmatprep.subr.bf16.mxu1 %v10934_v2  ;;  %v11015_v1 = vld [vmem:[%s15173_s1 + $0x1584] ss:$16 sps:$4 sm:$0xff]   ;;  %v11018_v2 = vld [vmem:[%s15173_s1 + $0x158c] ss:$16 sps:$4 sm:$0xff]  }
 0x27b   :  { %7076 = vmatpush1.bf16.msra.mxu0 %v10929_v5  ;;  %7924 = vmatpush1.bf16.msra.mxu1 %v10932_v6  ;;  %v11013_v5 = vld [vmem:[%s15173_s1 + $0x1580] ss:$16 sps:$4 sm:$0xff]   ;;  %v11016_v6 = vld [vmem:[%s15173_s1 + $0x1588] ss:$16 sps:$4 sm:$0xff]  }
 0x27c   :  { %7077 = vmatprep.subr.bf16.mxu0 %v10937_v7  ;;  %7925 = vmatprep.subr.bf16.mxu1 %v10940_v8  ;;  %v11021_v7 = vld [vmem:[%s15173_s1 + $0x15a4] ss:$16 sps:$4 sm:$0xff]   ;;  %v11024_v8 = vld [vmem:[%s15173_s1 + $0x15ac] ss:$16 sps:$4 sm:$0xff]  }
 0x27f   :  { %7078 = vmatpush1.bf16.msra.mxu0 %v10935_v11  ;;  %7926 = vmatpush1.bf16.msra.mxu1 %v10938_v12  ;;  %v11019_v11 = vld [vmem:[%s15173_s1 + $0x15a0] ss:$16 sps:$4 sm:$0xff]   ;;  %v11022_v12 = vld [vmem:[%s15173_s1 + $0x15a8] ss:$16 sps:$4 sm:$0xff]  }
 0x280   :  { %7100 = vmatprep.subr.bf16.mxu0 %v10943_v9  ;;  %7948 = vmatprep.subr.bf16.mxu1 %v10946_v10  ;;  %v11027_v9 = vld [vmem:[%s15173_s1 + $0x15c4] ss:$16 sps:$4 sm:$0xff]   ;;  %v11030_v10 = vld [vmem:[%s15173_s1 + $0x15cc] ss:$16 sps:$4 sm:$0xff]  }
 0x282   :  { %7080 = vmatmul.mubr.bf16.vlgmr.msra.gmra.mrb[0].mxu0 %v8637_v13  ;;  %7928 = vmatmul.mubr.bf16.vlgmr.msra.gmra.mrb[0].mxu1 %v8637_v13  ;;  %v11025_v13 = vld [vmem:[%s15173_s1 + $0x15c0] ss:$16 sps:$4 sm:$0xff]  }
 0x283   :  { %7101 = vmatpush1.bf16.msra.mxu0 %v10941_v16  ;;  %7949 = vmatpush1.bf16.msra.mxu1 %v10944_v19  ;;  %v11036_v16 = vld [vmem:[%s15173_s1 + $0x15ec] ss:$16 sps:$4 sm:$0xff]   ;;  %v11031_v19 = vld [vmem:[%s15173_s1 + $0x15e0] ss:$16 sps:$4 sm:$0xff]  }
 0x284   :  { %7102 = vmatprep.subr.bf16.mxu0 %v10949_v17  ;;  %7950 = vmatprep.subr.bf16.mxu1 %v10952_v18  ;;  %v11034_v17 = vld [vmem:[%s15173_s1 + $0x15e8] ss:$16 sps:$4 sm:$0xff]   ;;  %v11039_v18 = vld [vmem:[%s15173_s1 + $0x1604] ss:$16 sps:$4 sm:$0xff]  }
 0x285   :  { %7089 = vmatprep.mubr.bf16.mxu0 %v8670_v20  ;;  %7937 = vmatprep.mubr.bf16.mxu1 %v8670_v20  ;;  %v11042_v20 = vld [vmem:[%s15173_s1 + $0x160c] ss:$16 sps:$4 sm:$0xff]  }
 0x287   :  { %7103 = vmatpush1.bf16.msra.mxu0 %v10947_v21  ;;  %7951 = vmatpush1.bf16.msra.mxu1 %v10950_v22  ;;  %v8639_v21 = vcombine.low %v13701_v25, %v13706_v27  ;;  %v62_v22 = vld [vmem:[%s15174_s0 + $0x150] sm:$0xff]  ;;  %v11048_v27 = vld [vmem:[%s15173_s1 + $0x162c] ss:$16 sps:$4 sm:$0xff]  }
 0x288   :  { %7104 = vmatprep.subr.bf16.mxu0 %v10955_v23  ;;  %7952 = vmatprep.subr.bf16.mxu1 %v10958_v24  ;;  %v78_v23 = vld [vmem:[%s15174_s0 + $0x1d0] sm:$0xff] }
 0x289   :  { %v11037_v24 = vld [vmem:[%s15173_s1 + $0x1600] ss:$16 sps:$4 sm:$0xff]   ;;  %v11045_v25 = vld [vmem:[%s15173_s1 + $0x1624] ss:$16 sps:$4 sm:$0xff]  }
 0x28a   :  { %7090 = vmatmul.mubr.bf16.gmra.mrb[4].mxu0 %v8669_v26  ;;  %7938 = vmatmul.mubr.bf16.gmra.mrb[4].mxu1 %v8669_v26  ;;  %v11040_v26 = vld [vmem:[%s15173_s1 + $0x1608] ss:$16 sps:$4 sm:$0xff]  }
 0x28b   :  { %7105 = vmatpush1.bf16.msra.mxu0 %v10953_v28  ;;  %7953 = vmatpush1.bf16.msra.mxu1 %v10956_v29  ;;  %v8672_v28 = vcombine.high %v62_v22, %v78_v23  ;;  %v11043_v29 = vld [vmem:[%s15173_s1 + $0x1620] ss:$16 sps:$4 sm:$0xff]  }
 0x28c   :  { %7106 = vmatprep.subr.bf16.mxu0 %v10961_v30  ;;  %7954 = vmatprep.subr.bf16.mxu1 %v10964_v31  ;;  %v11046_v30 = vld [vmem:[%s15173_s1 + $0x1628] ss:$16 sps:$4 sm:$0xff]   ;;  %v11051_v31 = vld [vmem:[%s15173_s1 + $0x1644] ss:$16 sps:$4 sm:$0xff]  }
 0x28d   :  { %7132 = vmatprep.mubr.bf16.mxu0 %v8640_v32  ;;  %7980 = vmatprep.mubr.bf16.mxu1 %v8640_v32  ;;  %v11054_v32 = vld [vmem:[%s15173_s1 + $0x164c] ss:$16 sps:$4 sm:$0xff]  }
 0x28f   :  { %7107 = vmatpush1.bf16.msra.mxu0 %v10959_v34  ;;  %7955 = vmatpush1.bf16.msra.mxu1 %v10962_v36  ;;  %v8671_v34 = vcombine.low %v62_v22, %v78_v23  ;;  %v13913_v36 = vld [vmem:[%s15174_s0 + $0x58] sm:$0xff]  ;;  %v11129_v23 = vld [vmem:[%s15173_s1 + $0x17e4] ss:$16 sps:$4 sm:$0xff]  }
 0x290   :  { %7108 = vmatprep.subr.bf16.mxu0 %v10967_v33  ;;  %7956 = vmatprep.subr.bf16.mxu1 %v10970_v35  ;;  %v13918_v33 = vld [vmem:[%s15174_s0 + $0xd8] sm:$0xff]  ;;  %v11049_v35 = vld [vmem:[%s15173_s1 + $0x1640] ss:$16 sps:$4 sm:$0xff]  }
 0x291   :  { %v11124_v22 = vld [vmem:[%s15173_s1 + $0x17c8] ss:$16 sps:$4 sm:$0xff]  }
 0x293   :  { %7109 = vmatpush1.bf16.msra.mxu0 %v10965_v37  ;;  %7957 = vmatpush1.bf16.msra.mxu1 %v10968_v38  ;;  %v11052_v37 = vld [vmem:[%s15173_s1 + $0x1648] ss:$16 sps:$4 sm:$0xff]   ;;  %v11057_v38 = vld [vmem:[%s15173_s1 + $0x1664] ss:$16 sps:$4 sm:$0xff]  }
 0x294   :  { %7110 = vmatprep.subr.bf16.mxu0 %v10973_v39  ;;  %7958 = vmatprep.subr.bf16.mxu1 %v10976_v40  ;;  %v11060_v39 = vld [vmem:[%s15173_s1 + $0x166c] ss:$16 sps:$4 sm:$0xff]   ;;  %v8642_v40 = vcombine.high %v13913_v36, %v13918_v33 }
 0x297   :  { %7111 = vmatpush1.bf16.msra.mxu0 %v10971_v42  ;;  %7959 = vmatpush1.bf16.msra.mxu1 %v10974_v44  ;;  %v11055_v42 = vld [vmem:[%s15173_s1 + $0x1660] ss:$16 sps:$4 sm:$0xff]   ;;  %v11058_v44 = vld [vmem:[%s15173_s1 + $0x1668] ss:$16 sps:$4 sm:$0xff]  }
 0x298   :  { %7112 = vmatprep.subr.bf16.mxu0 %v10979_v41  ;;  %7960 = vmatprep.subr.bf16.mxu1 %v10982_v43  ;;  %v11063_v41 = vld [vmem:[%s15173_s1 + $0x1684] ss:$16 sps:$4 sm:$0xff]   ;;  %v11066_v43 = vld [vmem:[%s15173_s1 + $0x168c] ss:$16 sps:$4 sm:$0xff]  }
 0x29b   :  { %7113 = vmatpush1.bf16.msra.mxu0 %v10977_v45  ;;  %7961 = vmatpush1.bf16.msra.mxu1 %v10980_v46  ;;  %v11061_v45 = vld [vmem:[%s15173_s1 + $0x1680] ss:$16 sps:$4 sm:$0xff]   ;;  %v11064_v46 = vld [vmem:[%s15173_s1 + $0x1688] ss:$16 sps:$4 sm:$0xff]  }
 0x29c   :  { %7114 = vmatprep.subr.bf16.mxu0 %v10985_v47  ;;  %7962 = vmatprep.subr.bf16.mxu1 %v10988_v48  ;;  %v11069_v47 = vld [vmem:[%s15173_s1 + $0x16a4] ss:$16 sps:$4 sm:$0xff]   ;;  %v11072_v48 = vld [vmem:[%s15173_s1 + $0x16ac] ss:$16 sps:$4 sm:$0xff]  }
 0x29f   :  { %7115 = vmatpush1.bf16.msra.mxu0 %v10983_v51  ;;  %7963 = vmatpush1.bf16.msra.mxu1 %v10986_v52  ;;  %v11067_v51 = vld [vmem:[%s15173_s1 + $0x16a0] ss:$16 sps:$4 sm:$0xff]   ;;  %v11070_v52 = vld [vmem:[%s15173_s1 + $0x16a8] ss:$16 sps:$4 sm:$0xff]  }
 0x2a0   :  { %7116 = vmatprep.subr.bf16.mxu0 %v10991_v49  ;;  %7964 = vmatprep.subr.bf16.mxu1 %v10994_v50  ;;  %v11075_v49 = vld [vmem:[%s15173_s1 + $0x16c4] ss:$16 sps:$4 sm:$0xff]   ;;  %v11078_v50 = vld [vmem:[%s15173_s1 + $0x16cc] ss:$16 sps:$4 sm:$0xff]  }
 0x2a3   :  { %7117 = vmatpush1.bf16.msra.mxu0 %v10989_v53  ;;  %7965 = vmatpush1.bf16.msra.mxu1 %v10992_v54  ;;  %v11073_v53 = vld [vmem:[%s15173_s1 + $0x16c0] ss:$16 sps:$4 sm:$0xff]   ;;  %v11076_v54 = vld [vmem:[%s15173_s1 + $0x16c8] ss:$16 sps:$4 sm:$0xff]  }
 0x2a4   :  { %7118 = vmatprep.subr.bf16.mxu0 %v10997_v55  ;;  %7966 = vmatprep.subr.bf16.mxu1 %v11000_v56  ;;  %v11081_v55 = vld [vmem:[%s15173_s1 + $0x16e4] ss:$16 sps:$4 sm:$0xff]   ;;  %v11084_v56 = vld [vmem:[%s15173_s1 + $0x16ec] ss:$16 sps:$4 sm:$0xff]  }
 0x2a7   :  { %7119 = vmatpush1.bf16.msra.mxu0 %v10995_v59  ;;  %7967 = vmatpush1.bf16.msra.mxu1 %v10998_v60  ;;  %v11079_v59 = vld [vmem:[%s15173_s1 + $0x16e0] ss:$16 sps:$4 sm:$0xff]   ;;  %v11082_v60 = vld [vmem:[%s15173_s1 + $0x16e8] ss:$16 sps:$4 sm:$0xff]  }
 0x2a8   :  { %7120 = vmatprep.subr.bf16.mxu0 %v11003_v57  ;;  %7968 = vmatprep.subr.bf16.mxu1 %v11006_v58  ;;  %v11087_v57 = vld [vmem:[%s15173_s1 + $0x1704] ss:$16 sps:$4 sm:$0xff]   ;;  %v11090_v58 = vld [vmem:[%s15173_s1 + $0x170c] ss:$16 sps:$4 sm:$0xff]  }
 0x2ab   :  { %7121 = vmatpush1.bf16.msra.mxu0 %v11001_v61  ;;  %7969 = vmatpush1.bf16.msra.mxu1 %v11004_v62  ;;  %v11085_v61 = vld [vmem:[%s15173_s1 + $0x1700] ss:$16 sps:$4 sm:$0xff]   ;;  %v11088_v62 = vld [vmem:[%s15173_s1 + $0x1708] ss:$16 sps:$4 sm:$0xff]  }
 0x2ac   :  { %7122 = vmatprep.subr.bf16.mxu0 %v11009_v63  ;;  %7970 = vmatprep.subr.bf16.mxu1 %v11012_v0  ;;  %v11093_v63 = vld [vmem:[%s15173_s1 + $0x1724] ss:$16 sps:$4 sm:$0xff]   ;;  %v11096_v0 = vld [vmem:[%s15173_s1 + $0x172c] ss:$16 sps:$4 sm:$0xff]  }
 0x2af   :  { %7123 = vmatpush1.bf16.msra.mxu0 %v11007_v3  ;;  %7971 = vmatpush1.bf16.msra.mxu1 %v11010_v4  ;;  %v11091_v3 = vld [vmem:[%s15173_s1 + $0x1720] ss:$16 sps:$4 sm:$0xff]   ;;  %v11094_v4 = vld [vmem:[%s15173_s1 + $0x1728] ss:$16 sps:$4 sm:$0xff]  }
 0x2b0   :  { %7124 = vmatprep.subr.bf16.mxu0 %v11015_v1  ;;  %7972 = vmatprep.subr.bf16.mxu1 %v11018_v2  ;;  %v11099_v1 = vld [vmem:[%s15173_s1 + $0x1744] ss:$16 sps:$4 sm:$0xff]   ;;  %v11102_v2 = vld [vmem:[%s15173_s1 + $0x174c] ss:$16 sps:$4 sm:$0xff]  }
 0x2b3   :  { %7125 = vmatpush1.bf16.msra.mxu0 %v11013_v5  ;;  %7973 = vmatpush1.bf16.msra.mxu1 %v11016_v6  ;;  %v11097_v5 = vld [vmem:[%s15173_s1 + $0x1740] ss:$16 sps:$4 sm:$0xff]   ;;  %v11100_v6 = vld [vmem:[%s15173_s1 + $0x1748] ss:$16 sps:$4 sm:$0xff]  }
 0x2b4   :  { %7126 = vmatprep.subr.bf16.mxu0 %v11021_v7  ;;  %7974 = vmatprep.subr.bf16.mxu1 %v11024_v8  ;;  %v11105_v7 = vld [vmem:[%s15173_s1 + $0x1764] ss:$16 sps:$4 sm:$0xff]   ;;  %v11108_v8 = vld [vmem:[%s15173_s1 + $0x176c] ss:$16 sps:$4 sm:$0xff]  }
 0x2b7   :  { %7127 = vmatpush1.bf16.msra.mxu0 %v11019_v11  ;;  %7975 = vmatpush1.bf16.msra.mxu1 %v11022_v12  ;;  %v11103_v11 = vld [vmem:[%s15173_s1 + $0x1760] ss:$16 sps:$4 sm:$0xff]   ;;  %v11106_v12 = vld [vmem:[%s15173_s1 + $0x1768] ss:$16 sps:$4 sm:$0xff]  }
 0x2b8   :  { %7128 = vmatprep.subr.bf16.mxu0 %v11027_v9  ;;  %7976 = vmatprep.subr.bf16.mxu1 %v11030_v10  ;;  %v11111_v9 = vld [vmem:[%s15173_s1 + $0x1784] ss:$16 sps:$4 sm:$0xff]   ;;  %v11114_v10 = vld [vmem:[%s15173_s1 + $0x178c] ss:$16 sps:$4 sm:$0xff]  }
 0x2bb   :  { %7129 = vmatpush1.bf16.msra.mxu0 %v11025_v13  ;;  %7977 = vmatpush1.bf16.msra.mxu1 %v11028_v14  ;;  %v11109_v13 = vld [vmem:[%s15173_s1 + $0x1780] ss:$16 sps:$4 sm:$0xff]   ;;  %v11112_v14 = vld [vmem:[%s15173_s1 + $0x1788] ss:$16 sps:$4 sm:$0xff]  }
 0x2bc   :  { %7130 = vmatprep.subr.bf16.mxu0 %v11033_v15  ;;  %7978 = vmatprep.subr.bf16.mxu1 %v11036_v16  ;;  %v11117_v15 = vld [vmem:[%s15173_s1 + $0x17a4] ss:$16 sps:$4 sm:$0xff]   ;;  %v11120_v16 = vld [vmem:[%s15173_s1 + $0x17ac] ss:$16 sps:$4 sm:$0xff]  }
 0x2bf   :  { %7131 = vmatpush1.bf16.msra.mxu0 %v11031_v19  ;;  %7979 = vmatpush1.bf16.msra.mxu1 %v11034_v17  ;;  %v11115_v19 = vld [vmem:[%s15173_s1 + $0x17a0] ss:$16 sps:$4 sm:$0xff]   ;;  %v11118_v17 = vld [vmem:[%s15173_s1 + $0x17a8] ss:$16 sps:$4 sm:$0xff]  }
 0x2c0   :  { %7153 = vmatprep.subr.bf16.mxu0 %v11039_v18  ;;  %8001 = vmatprep.subr.bf16.mxu1 %v11042_v20  ;;  %v11123_v18 = vld [vmem:[%s15173_s1 + $0x17c4] ss:$16 sps:$4 sm:$0xff]   ;;  %v11126_v20 = vld [vmem:[%s15173_s1 + $0x17cc] ss:$16 sps:$4 sm:$0xff]  }
 0x2c2   :  { %7133 = vmatmul.mubr.bf16.vlgmr.msra.gmra.mrb[0].mxu0 %v8639_v21  ;;  %7981 = vmatmul.mubr.bf16.vlgmr.msra.gmra.mrb[0].mxu1 %v8639_v21  ;;  %v11121_v21 = vld [vmem:[%s15173_s1 + $0x17c0] ss:$16 sps:$4 sm:$0xff]  }
 0x2c3   :  { %7154 = vmatpush1.bf16.msra.mxu0 %v11037_v24  ;;  %8002 = vmatpush1.bf16.msra.mxu1 %v11040_v26  ;;  %v11132_v24 = vld [vmem:[%s15173_s1 + $0x17ec] ss:$16 sps:$4 sm:$0xff]   ;;  %v11127_v26 = vld [vmem:[%s15173_s1 + $0x17e0] ss:$16 sps:$4 sm:$0xff]  }
 0x2c4   :  { %7155 = vmatprep.subr.bf16.mxu0 %v11045_v25  ;;  %8003 = vmatprep.subr.bf16.mxu1 %v11048_v27  ;;  %v11130_v25 = vld [vmem:[%s15173_s1 + $0x17e8] ss:$16 sps:$4 sm:$0xff]   ;;  %v11135_v27 = vld [vmem:[%s15173_s1 + $0x1804] ss:$16 sps:$4 sm:$0xff]  }
 0x2c5   :  { %7142 = vmatprep.mubr.bf16.mxu0 %v8672_v28  ;;  %7990 = vmatprep.mubr.bf16.mxu1 %v8672_v28  ;;  %v11138_v28 = vld [vmem:[%s15173_s1 + $0x180c] ss:$16 sps:$4 sm:$0xff]  }
 0x2c7   :  { %7156 = vmatpush1.bf16.msra.mxu0 %v11043_v29  ;;  %8004 = vmatpush1.bf16.msra.mxu1 %v11046_v30  ;;  %v8641_v29 = vcombine.low %v13913_v36, %v13918_v33  ;;  %v63_v30 = vld [vmem:[%s15174_s0 + $0x158] sm:$0xff]  ;;  %v11141_v36 = vld [vmem:[%s15173_s1 + $0x1824] ss:$16 sps:$4 sm:$0xff]  }
 0x2c8   :  { %7157 = vmatprep.subr.bf16.mxu0 %v11051_v31  ;;  %8005 = vmatprep.subr.bf16.mxu1 %v11054_v32  ;;  %v79_v31 = vld [vmem:[%s15174_s0 + $0x1d8] sm:$0xff]  ;;  %v11133_v32 = vld [vmem:[%s15173_s1 + $0x1800] ss:$16 sps:$4 sm:$0xff]  }
 0x2c9   :  { %v11144_v33 = vld [vmem:[%s15173_s1 + $0x182c] ss:$16 sps:$4 sm:$0xff]  }
 0x2ca   :  { %7143 = vmatmul.mubr.bf16.gmra.mrb[4].mxu0 %v8671_v34  ;;  %7991 = vmatmul.mubr.bf16.gmra.mrb[4].mxu1 %v8671_v34  ;;  %v11136_v34 = vld [vmem:[%s15173_s1 + $0x1808] ss:$16 sps:$4 sm:$0xff]  }
 0x2cb   :  { %7158 = vmatpush1.bf16.msra.mxu0 %v11049_v35  ;;  %8006 = vmatpush1.bf16.msra.mxu1 %v11052_v37  ;;  %v8674_v35 = vcombine.high %v63_v30, %v79_v31  ;;  %v11139_v37 = vld [vmem:[%s15173_s1 + $0x1820] ss:$16 sps:$4 sm:$0xff]  }
 0x2cc   :  { %7159 = vmatprep.subr.bf16.mxu0 %v11057_v38  ;;  %8007 = vmatprep.subr.bf16.mxu1 %v11060_v39  ;;  %v11142_v38 = vld [vmem:[%s15173_s1 + $0x1828] ss:$16 sps:$4 sm:$0xff]   ;;  %v11147_v39 = vld [vmem:[%s15173_s1 + $0x1844] ss:$16 sps:$4 sm:$0xff]  }
 0x2cd   :  { %7185 = vmatprep.mubr.bf16.mxu0 %v8642_v40  ;;  %8033 = vmatprep.mubr.bf16.mxu1 %v8642_v40  ;;  %v11150_v40 = vld [vmem:[%s15173_s1 + $0x184c] ss:$16 sps:$4 sm:$0xff]  }
 0x2cf   :  { %7160 = vmatpush1.bf16.msra.mxu0 %v11055_v42  ;;  %8008 = vmatpush1.bf16.msra.mxu1 %v11058_v44  ;;  %v8673_v42 = vcombine.low %v63_v30, %v79_v31  ;;  %v14125_v44 = vld [vmem:[%s15174_s0 + $0x60] sm:$0xff]  ;;  %v11220_v30 = vld [vmem:[%s15173_s1 + $0x19c8] ss:$16 sps:$4 sm:$0xff]  }
 0x2d0   :  { %7161 = vmatprep.subr.bf16.mxu0 %v11063_v41  ;;  %8009 = vmatprep.subr.bf16.mxu1 %v11066_v43  ;;  %v14130_v41 = vld [vmem:[%s15174_s0 + $0xe0] sm:$0xff] }
 0x2d1   :  { %v11145_v43 = vld [vmem:[%s15173_s1 + $0x1840] ss:$16 sps:$4 sm:$0xff]   ;;  %v11225_v31 = vld [vmem:[%s15173_s1 + $0x19e4] ss:$16 sps:$4 sm:$0xff]  }
 0x2d3   :  { %7162 = vmatpush1.bf16.msra.mxu0 %v11061_v45  ;;  %8010 = vmatpush1.bf16.msra.mxu1 %v11064_v46  ;;  %v11148_v45 = vld [vmem:[%s15173_s1 + $0x1848] ss:$16 sps:$4 sm:$0xff]   ;;  %v11153_v46 = vld [vmem:[%s15173_s1 + $0x1864] ss:$16 sps:$4 sm:$0xff]  }
 0x2d4   :  { %7163 = vmatprep.subr.bf16.mxu0 %v11069_v47  ;;  %8011 = vmatprep.subr.bf16.mxu1 %v11072_v48  ;;  %v11156_v47 = vld [vmem:[%s15173_s1 + $0x186c] ss:$16 sps:$4 sm:$0xff]   ;;  %v8644_v48 = vcombine.high %v14125_v44, %v14130_v41 }
 0x2d7   :  { %7164 = vmatpush1.bf16.msra.mxu0 %v11067_v51  ;;  %8012 = vmatpush1.bf16.msra.mxu1 %v11070_v52  ;;  %v11151_v51 = vld [vmem:[%s15173_s1 + $0x1860] ss:$16 sps:$4 sm:$0xff]   ;;  %v11154_v52 = vld [vmem:[%s15173_s1 + $0x1868] ss:$16 sps:$4 sm:$0xff]  }
 0x2d8   :  { %7165 = vmatprep.subr.bf16.mxu0 %v11075_v49  ;;  %8013 = vmatprep.subr.bf16.mxu1 %v11078_v50  ;;  %v11159_v49 = vld [vmem:[%s15173_s1 + $0x1884] ss:$16 sps:$4 sm:$0xff]   ;;  %v11162_v50 = vld [vmem:[%s15173_s1 + $0x188c] ss:$16 sps:$4 sm:$0xff]  }
 0x2db   :  { %7166 = vmatpush1.bf16.msra.mxu0 %v11073_v53  ;;  %8014 = vmatpush1.bf16.msra.mxu1 %v11076_v54  ;;  %v11157_v53 = vld [vmem:[%s15173_s1 + $0x1880] ss:$16 sps:$4 sm:$0xff]   ;;  %v11160_v54 = vld [vmem:[%s15173_s1 + $0x1888] ss:$16 sps:$4 sm:$0xff]  }
 0x2dc   :  { %7167 = vmatprep.subr.bf16.mxu0 %v11081_v55  ;;  %8015 = vmatprep.subr.bf16.mxu1 %v11084_v56  ;;  %v11165_v55 = vld [vmem:[%s15173_s1 + $0x18a4] ss:$16 sps:$4 sm:$0xff]   ;;  %v11168_v56 = vld [vmem:[%s15173_s1 + $0x18ac] ss:$16 sps:$4 sm:$0xff]  }
 0x2df   :  { %7168 = vmatpush1.bf16.msra.mxu0 %v11079_v59  ;;  %8016 = vmatpush1.bf16.msra.mxu1 %v11082_v60  ;;  %v11163_v59 = vld [vmem:[%s15173_s1 + $0x18a0] ss:$16 sps:$4 sm:$0xff]   ;;  %v11166_v60 = vld [vmem:[%s15173_s1 + $0x18a8] ss:$16 sps:$4 sm:$0xff]  }
 0x2e0   :  { %7169 = vmatprep.subr.bf16.mxu0 %v11087_v57  ;;  %8017 = vmatprep.subr.bf16.mxu1 %v11090_v58  ;;  %v11171_v57 = vld [vmem:[%s15173_s1 + $0x18c4] ss:$16 sps:$4 sm:$0xff]   ;;  %v11174_v58 = vld [vmem:[%s15173_s1 + $0x18cc] ss:$16 sps:$4 sm:$0xff]  }
 0x2e3   :  { %7170 = vmatpush1.bf16.msra.mxu0 %v11085_v61  ;;  %8018 = vmatpush1.bf16.msra.mxu1 %v11088_v62  ;;  %v11169_v61 = vld [vmem:[%s15173_s1 + $0x18c0] ss:$16 sps:$4 sm:$0xff]   ;;  %v11172_v62 = vld [vmem:[%s15173_s1 + $0x18c8] ss:$16 sps:$4 sm:$0xff]  }
 0x2e4   :  { %7171 = vmatprep.subr.bf16.mxu0 %v11093_v63  ;;  %8019 = vmatprep.subr.bf16.mxu1 %v11096_v0  ;;  %v11177_v63 = vld [vmem:[%s15173_s1 + $0x18e4] ss:$16 sps:$4 sm:$0xff]   ;;  %v11180_v0 = vld [vmem:[%s15173_s1 + $0x18ec] ss:$16 sps:$4 sm:$0xff]  }
 0x2e7   :  { %7172 = vmatpush1.bf16.msra.mxu0 %v11091_v3  ;;  %8020 = vmatpush1.bf16.msra.mxu1 %v11094_v4  ;;  %v11175_v3 = vld [vmem:[%s15173_s1 + $0x18e0] ss:$16 sps:$4 sm:$0xff]   ;;  %v11178_v4 = vld [vmem:[%s15173_s1 + $0x18e8] ss:$16 sps:$4 sm:$0xff]  }
 0x2e8   :  { %7173 = vmatprep.subr.bf16.mxu0 %v11099_v1  ;;  %8021 = vmatprep.subr.bf16.mxu1 %v11102_v2  ;;  %v11183_v1 = vld [vmem:[%s15173_s1 + $0x1904] ss:$16 sps:$4 sm:$0xff]   ;;  %v11186_v2 = vld [vmem:[%s15173_s1 + $0x190c] ss:$16 sps:$4 sm:$0xff]  }
 0x2eb   :  { %7174 = vmatpush1.bf16.msra.mxu0 %v11097_v5  ;;  %8022 = vmatpush1.bf16.msra.mxu1 %v11100_v6  ;;  %v11181_v5 = vld [vmem:[%s15173_s1 + $0x1900] ss:$16 sps:$4 sm:$0xff]   ;;  %v11184_v6 = vld [vmem:[%s15173_s1 + $0x1908] ss:$16 sps:$4 sm:$0xff]  }
 0x2ec   :  { %7175 = vmatprep.subr.bf16.mxu0 %v11105_v7  ;;  %8023 = vmatprep.subr.bf16.mxu1 %v11108_v8  ;;  %v11189_v7 = vld [vmem:[%s15173_s1 + $0x1924] ss:$16 sps:$4 sm:$0xff]   ;;  %v11192_v8 = vld [vmem:[%s15173_s1 + $0x192c] ss:$16 sps:$4 sm:$0xff]  }
 0x2ef   :  { %7176 = vmatpush1.bf16.msra.mxu0 %v11103_v11  ;;  %8024 = vmatpush1.bf16.msra.mxu1 %v11106_v12  ;;  %v11187_v11 = vld [vmem:[%s15173_s1 + $0x1920] ss:$16 sps:$4 sm:$0xff]   ;;  %v11190_v12 = vld [vmem:[%s15173_s1 + $0x1928] ss:$16 sps:$4 sm:$0xff]  }
 0x2f0   :  { %7177 = vmatprep.subr.bf16.mxu0 %v11111_v9  ;;  %8025 = vmatprep.subr.bf16.mxu1 %v11114_v10  ;;  %v11195_v9 = vld [vmem:[%s15173_s1 + $0x1944] ss:$16 sps:$4 sm:$0xff]   ;;  %v11198_v10 = vld [vmem:[%s15173_s1 + $0x194c] ss:$16 sps:$4 sm:$0xff]  }
 0x2f3   :  { %7178 = vmatpush1.bf16.msra.mxu0 %v11109_v13  ;;  %8026 = vmatpush1.bf16.msra.mxu1 %v11112_v14  ;;  %v11193_v13 = vld [vmem:[%s15173_s1 + $0x1940] ss:$16 sps:$4 sm:$0xff]   ;;  %v11196_v14 = vld [vmem:[%s15173_s1 + $0x1948] ss:$16 sps:$4 sm:$0xff]  }
 0x2f4   :  { %7179 = vmatprep.subr.bf16.mxu0 %v11117_v15  ;;  %8027 = vmatprep.subr.bf16.mxu1 %v11120_v16  ;;  %v11201_v15 = vld [vmem:[%s15173_s1 + $0x1964] ss:$16 sps:$4 sm:$0xff]   ;;  %v11204_v16 = vld [vmem:[%s15173_s1 + $0x196c] ss:$16 sps:$4 sm:$0xff]  }
 0x2f7   :  { %7180 = vmatpush1.bf16.msra.mxu0 %v11115_v19  ;;  %8028 = vmatpush1.bf16.msra.mxu1 %v11118_v17  ;;  %v11199_v19 = vld [vmem:[%s15173_s1 + $0x1960] ss:$16 sps:$4 sm:$0xff]   ;;  %v11202_v17 = vld [vmem:[%s15173_s1 + $0x1968] ss:$16 sps:$4 sm:$0xff]  }
 0x2f8   :  { %7181 = vmatprep.subr.bf16.mxu0 %v11123_v18  ;;  %8029 = vmatprep.subr.bf16.mxu1 %v11126_v20  ;;  %v11207_v18 = vld [vmem:[%s15173_s1 + $0x1984] ss:$16 sps:$4 sm:$0xff]   ;;  %v11210_v20 = vld [vmem:[%s15173_s1 + $0x198c] ss:$16 sps:$4 sm:$0xff]  }
 0x2fb   :  { %7182 = vmatpush1.bf16.msra.mxu0 %v11121_v21  ;;  %8030 = vmatpush1.bf16.msra.mxu1 %v11124_v22  ;;  %v11205_v21 = vld [vmem:[%s15173_s1 + $0x1980] ss:$16 sps:$4 sm:$0xff]   ;;  %v11208_v22 = vld [vmem:[%s15173_s1 + $0x1988] ss:$16 sps:$4 sm:$0xff]  }
 0x2fc   :  { %7183 = vmatprep.subr.bf16.mxu0 %v11129_v23  ;;  %8031 = vmatprep.subr.bf16.mxu1 %v11132_v24  ;;  %v11213_v23 = vld [vmem:[%s15173_s1 + $0x19a4] ss:$16 sps:$4 sm:$0xff]   ;;  %v11216_v24 = vld [vmem:[%s15173_s1 + $0x19ac] ss:$16 sps:$4 sm:$0xff]  }
 0x2ff   :  { %7184 = vmatpush1.bf16.msra.mxu0 %v11127_v26  ;;  %8032 = vmatpush1.bf16.msra.mxu1 %v11130_v25  ;;  %v11211_v26 = vld [vmem:[%s15173_s1 + $0x19a0] ss:$16 sps:$4 sm:$0xff]   ;;  %v11214_v25 = vld [vmem:[%s15173_s1 + $0x19a8] ss:$16 sps:$4 sm:$0xff]  }
 0x300   :  { %7206 = vmatprep.subr.bf16.mxu0 %v11135_v27  ;;  %8054 = vmatprep.subr.bf16.mxu1 %v11138_v28  ;;  %v11219_v27 = vld [vmem:[%s15173_s1 + $0x19c4] ss:$16 sps:$4 sm:$0xff]   ;;  %v11222_v28 = vld [vmem:[%s15173_s1 + $0x19cc] ss:$16 sps:$4 sm:$0xff]  }
 0x302   :  { %7186 = vmatmul.mubr.bf16.vlgmr.msra.gmra.mrb[0].mxu0 %v8641_v29  ;;  %8034 = vmatmul.mubr.bf16.vlgmr.msra.gmra.mrb[0].mxu1 %v8641_v29  ;;  %v11217_v29 = vld [vmem:[%s15173_s1 + $0x19c0] ss:$16 sps:$4 sm:$0xff]  }
 0x303   :  { %7207 = vmatpush1.bf16.msra.mxu0 %v11133_v32  ;;  %8055 = vmatpush1.bf16.msra.mxu1 %v11136_v34  ;;  %v11228_v32 = vld [vmem:[%s15173_s1 + $0x19ec] ss:$16 sps:$4 sm:$0xff]   ;;  %v11223_v34 = vld [vmem:[%s15173_s1 + $0x19e0] ss:$16 sps:$4 sm:$0xff]  }
 0x304   :  { %7208 = vmatprep.subr.bf16.mxu0 %v11141_v36  ;;  %8056 = vmatprep.subr.bf16.mxu1 %v11144_v33  ;;  %v11226_v36 = vld [vmem:[%s15173_s1 + $0x19e8] ss:$16 sps:$4 sm:$0xff]   ;;  %v11231_v33 = vld [vmem:[%s15173_s1 + $0x1a04] ss:$16 sps:$4 sm:$0xff]  }
 0x305   :  { %7195 = vmatprep.mubr.bf16.mxu0 %v8674_v35  ;;  %8043 = vmatprep.mubr.bf16.mxu1 %v8674_v35  ;;  %v11234_v35 = vld [vmem:[%s15173_s1 + $0x1a0c] ss:$16 sps:$4 sm:$0xff]  }
 0x307   :  { %7209 = vmatpush1.bf16.msra.mxu0 %v11139_v37  ;;  %8057 = vmatpush1.bf16.msra.mxu1 %v11142_v38  ;;  %v8643_v37 = vcombine.low %v14125_v44, %v14130_v41  ;;  %v64_v38 = vld [vmem:[%s15174_s0 + $0x160] sm:$0xff]  ;;  %v11240_v41 = vld [vmem:[%s15173_s1 + $0x1a2c] ss:$16 sps:$4 sm:$0xff]  }
 0x308   :  { %7210 = vmatprep.subr.bf16.mxu0 %v11147_v39  ;;  %8058 = vmatprep.subr.bf16.mxu1 %v11150_v40  ;;  %v80_v39 = vld [vmem:[%s15174_s0 + $0x1e0] sm:$0xff] }
 0x309   :  { %v11229_v40 = vld [vmem:[%s15173_s1 + $0x1a00] ss:$16 sps:$4 sm:$0xff]   ;;  %v11237_v44 = vld [vmem:[%s15173_s1 + $0x1a24] ss:$16 sps:$4 sm:$0xff]  }
 0x30a   :  { %7196 = vmatmul.mubr.bf16.gmra.mrb[4].mxu0 %v8673_v42  ;;  %8044 = vmatmul.mubr.bf16.gmra.mrb[4].mxu1 %v8673_v42  ;;  %v11232_v42 = vld [vmem:[%s15173_s1 + $0x1a08] ss:$16 sps:$4 sm:$0xff]  }
 0x30b   :  { %7211 = vmatpush1.bf16.msra.mxu0 %v11145_v43  ;;  %8059 = vmatpush1.bf16.msra.mxu1 %v11148_v45  ;;  %v8676_v43 = vcombine.high %v64_v38, %v80_v39  ;;  %v11235_v45 = vld [vmem:[%s15173_s1 + $0x1a20] ss:$16 sps:$4 sm:$0xff]  }
 0x30c   :  { %7212 = vmatprep.subr.bf16.mxu0 %v11153_v46  ;;  %8060 = vmatprep.subr.bf16.mxu1 %v11156_v47  ;;  %v11238_v46 = vld [vmem:[%s15173_s1 + $0x1a28] ss:$16 sps:$4 sm:$0xff]   ;;  %v11243_v47 = vld [vmem:[%s15173_s1 + $0x1a44] ss:$16 sps:$4 sm:$0xff]  }
 0x30d   :  { %7238 = vmatprep.mubr.bf16.mxu0 %v8644_v48  ;;  %8086 = vmatprep.mubr.bf16.mxu1 %v8644_v48  ;;  %v11246_v48 = vld [vmem:[%s15173_s1 + $0x1a4c] ss:$16 sps:$4 sm:$0xff]  }
 0x30f   :  { %7213 = vmatpush1.bf16.msra.mxu0 %v11151_v51  ;;  %8061 = vmatpush1.bf16.msra.mxu1 %v11154_v52  ;;  %v8675_v51 = vcombine.low %v64_v38, %v80_v39  ;;  %v14337_v52 = vld [vmem:[%s15174_s0 + $0x68] sm:$0xff]  ;;  %v11321_v39 = vld [vmem:[%s15173_s1 + $0x1be4] ss:$16 sps:$4 sm:$0xff]  }
 0x310   :  { %7214 = vmatprep.subr.bf16.mxu0 %v11159_v49  ;;  %8062 = vmatprep.subr.bf16.mxu1 %v11162_v50  ;;  %v14342_v49 = vld [vmem:[%s15174_s0 + $0xe8] sm:$0xff]  ;;  %v11241_v50 = vld [vmem:[%s15173_s1 + $0x1a40] ss:$16 sps:$4 sm:$0xff]  }
 0x311   :  { %v11316_v38 = vld [vmem:[%s15173_s1 + $0x1bc8] ss:$16 sps:$4 sm:$0xff]  }
 0x313   :  { %7215 = vmatpush1.bf16.msra.mxu0 %v11157_v53  ;;  %8063 = vmatpush1.bf16.msra.mxu1 %v11160_v54  ;;  %v11244_v53 = vld [vmem:[%s15173_s1 + $0x1a48] ss:$16 sps:$4 sm:$0xff]   ;;  %v11249_v54 = vld [vmem:[%s15173_s1 + $0x1a64] ss:$16 sps:$4 sm:$0xff]  }
 0x314   :  { %7216 = vmatprep.subr.bf16.mxu0 %v11165_v55  ;;  %8064 = vmatprep.subr.bf16.mxu1 %v11168_v56  ;;  %v11252_v55 = vld [vmem:[%s15173_s1 + $0x1a6c] ss:$16 sps:$4 sm:$0xff]   ;;  %v8646_v56 = vcombine.high %v14337_v52, %v14342_v49 }
 0x317   :  { %7217 = vmatpush1.bf16.msra.mxu0 %v11163_v59  ;;  %8065 = vmatpush1.bf16.msra.mxu1 %v11166_v60  ;;  %v11247_v59 = vld [vmem:[%s15173_s1 + $0x1a60] ss:$16 sps:$4 sm:$0xff]   ;;  %v11250_v60 = vld [vmem:[%s15173_s1 + $0x1a68] ss:$16 sps:$4 sm:$0xff]  }
 0x318   :  { %7218 = vmatprep.subr.bf16.mxu0 %v11171_v57  ;;  %8066 = vmatprep.subr.bf16.mxu1 %v11174_v58  ;;  %v11255_v57 = vld [vmem:[%s15173_s1 + $0x1a84] ss:$16 sps:$4 sm:$0xff]   ;;  %v11258_v58 = vld [vmem:[%s15173_s1 + $0x1a8c] ss:$16 sps:$4 sm:$0xff]  }
 0x31b   :  { %7219 = vmatpush1.bf16.msra.mxu0 %v11169_v61  ;;  %8067 = vmatpush1.bf16.msra.mxu1 %v11172_v62  ;;  %v11253_v61 = vld [vmem:[%s15173_s1 + $0x1a80] ss:$16 sps:$4 sm:$0xff]   ;;  %v11256_v62 = vld [vmem:[%s15173_s1 + $0x1a88] ss:$16 sps:$4 sm:$0xff]  }
 0x31c   :  { %7220 = vmatprep.subr.bf16.mxu0 %v11177_v63  ;;  %8068 = vmatprep.subr.bf16.mxu1 %v11180_v0  ;;  %v11261_v63 = vld [vmem:[%s15173_s1 + $0x1aa4] ss:$16 sps:$4 sm:$0xff]   ;;  %v11264_v0 = vld [vmem:[%s15173_s1 + $0x1aac] ss:$16 sps:$4 sm:$0xff]  }
 0x31f   :  { %7221 = vmatpush1.bf16.msra.mxu0 %v11175_v3  ;;  %8069 = vmatpush1.bf16.msra.mxu1 %v11178_v4  ;;  %v11259_v3 = vld [vmem:[%s15173_s1 + $0x1aa0] ss:$16 sps:$4 sm:$0xff]   ;;  %v11262_v4 = vld [vmem:[%s15173_s1 + $0x1aa8] ss:$16 sps:$4 sm:$0xff]  }
 0x320   :  { %7222 = vmatprep.subr.bf16.mxu0 %v11183_v1  ;;  %8070 = vmatprep.subr.bf16.mxu1 %v11186_v2  ;;  %v11267_v1 = vld [vmem:[%s15173_s1 + $0x1ac4] ss:$16 sps:$4 sm:$0xff]   ;;  %v11270_v2 = vld [vmem:[%s15173_s1 + $0x1acc] ss:$16 sps:$4 sm:$0xff]  }
 0x323   :  { %7223 = vmatpush1.bf16.msra.mxu0 %v11181_v5  ;;  %8071 = vmatpush1.bf16.msra.mxu1 %v11184_v6  ;;  %v11265_v5 = vld [vmem:[%s15173_s1 + $0x1ac0] ss:$16 sps:$4 sm:$0xff]   ;;  %v11268_v6 = vld [vmem:[%s15173_s1 + $0x1ac8] ss:$16 sps:$4 sm:$0xff]  }
 0x324   :  { %7224 = vmatprep.subr.bf16.mxu0 %v11189_v7  ;;  %8072 = vmatprep.subr.bf16.mxu1 %v11192_v8  ;;  %v11273_v7 = vld [vmem:[%s15173_s1 + $0x1ae4] ss:$16 sps:$4 sm:$0xff]   ;;  %v11276_v8 = vld [vmem:[%s15173_s1 + $0x1aec] ss:$16 sps:$4 sm:$0xff]  }
 0x327   :  { %7225 = vmatpush1.bf16.msra.mxu0 %v11187_v11  ;;  %8073 = vmatpush1.bf16.msra.mxu1 %v11190_v12  ;;  %v11271_v11 = vld [vmem:[%s15173_s1 + $0x1ae0] ss:$16 sps:$4 sm:$0xff]   ;;  %v11274_v12 = vld [vmem:[%s15173_s1 + $0x1ae8] ss:$16 sps:$4 sm:$0xff]  }
 0x328   :  { %7226 = vmatprep.subr.bf16.mxu0 %v11195_v9  ;;  %8074 = vmatprep.subr.bf16.mxu1 %v11198_v10  ;;  %v11279_v9 = vld [vmem:[%s15173_s1 + $0x1b04] ss:$16 sps:$4 sm:$0xff]   ;;  %v11282_v10 = vld [vmem:[%s15173_s1 + $0x1b0c] ss:$16 sps:$4 sm:$0xff]  }
 0x32b   :  { %7227 = vmatpush1.bf16.msra.mxu0 %v11193_v13  ;;  %8075 = vmatpush1.bf16.msra.mxu1 %v11196_v14  ;;  %v11277_v13 = vld [vmem:[%s15173_s1 + $0x1b00] ss:$16 sps:$4 sm:$0xff]   ;;  %v11280_v14 = vld [vmem:[%s15173_s1 + $0x1b08] ss:$16 sps:$4 sm:$0xff]  }
 0x32c   :  { %7228 = vmatprep.subr.bf16.mxu0 %v11201_v15  ;;  %8076 = vmatprep.subr.bf16.mxu1 %v11204_v16  ;;  %v11285_v15 = vld [vmem:[%s15173_s1 + $0x1b24] ss:$16 sps:$4 sm:$0xff]   ;;  %v11288_v16 = vld [vmem:[%s15173_s1 + $0x1b2c] ss:$16 sps:$4 sm:$0xff]  }
 0x32f   :  { %7229 = vmatpush1.bf16.msra.mxu0 %v11199_v19  ;;  %8077 = vmatpush1.bf16.msra.mxu1 %v11202_v17  ;;  %v11283_v19 = vld [vmem:[%s15173_s1 + $0x1b20] ss:$16 sps:$4 sm:$0xff]   ;;  %v11286_v17 = vld [vmem:[%s15173_s1 + $0x1b28] ss:$16 sps:$4 sm:$0xff]  }
 0x330   :  { %7230 = vmatprep.subr.bf16.mxu0 %v11207_v18  ;;  %8078 = vmatprep.subr.bf16.mxu1 %v11210_v20  ;;  %v11291_v18 = vld [vmem:[%s15173_s1 + $0x1b44] ss:$16 sps:$4 sm:$0xff]   ;;  %v11294_v20 = vld [vmem:[%s15173_s1 + $0x1b4c] ss:$16 sps:$4 sm:$0xff]  }
 0x333   :  { %7231 = vmatpush1.bf16.msra.mxu0 %v11205_v21  ;;  %8079 = vmatpush1.bf16.msra.mxu1 %v11208_v22  ;;  %v11289_v21 = vld [vmem:[%s15173_s1 + $0x1b40] ss:$16 sps:$4 sm:$0xff]   ;;  %v11292_v22 = vld [vmem:[%s15173_s1 + $0x1b48] ss:$16 sps:$4 sm:$0xff]  }
 0x334   :  { %7232 = vmatprep.subr.bf16.mxu0 %v11213_v23  ;;  %8080 = vmatprep.subr.bf16.mxu1 %v11216_v24  ;;  %v11297_v23 = vld [vmem:[%s15173_s1 + $0x1b64] ss:$16 sps:$4 sm:$0xff]   ;;  %v11300_v24 = vld [vmem:[%s15173_s1 + $0x1b6c] ss:$16 sps:$4 sm:$0xff]  }
 0x337   :  { %7233 = vmatpush1.bf16.msra.mxu0 %v11211_v26  ;;  %8081 = vmatpush1.bf16.msra.mxu1 %v11214_v25  ;;  %v11295_v26 = vld [vmem:[%s15173_s1 + $0x1b60] ss:$16 sps:$4 sm:$0xff]   ;;  %v11298_v25 = vld [vmem:[%s15173_s1 + $0x1b68] ss:$16 sps:$4 sm:$0xff]  }
 0x338   :  { %7234 = vmatprep.subr.bf16.mxu0 %v11219_v27  ;;  %8082 = vmatprep.subr.bf16.mxu1 %v11222_v28  ;;  %v11303_v27 = vld [vmem:[%s15173_s1 + $0x1b84] ss:$16 sps:$4 sm:$0xff]   ;;  %v11306_v28 = vld [vmem:[%s15173_s1 + $0x1b8c] ss:$16 sps:$4 sm:$0xff]  }
 0x33b   :  { %7235 = vmatpush1.bf16.msra.mxu0 %v11217_v29  ;;  %8083 = vmatpush1.bf16.msra.mxu1 %v11220_v30  ;;  %v11301_v29 = vld [vmem:[%s15173_s1 + $0x1b80] ss:$16 sps:$4 sm:$0xff]   ;;  %v11304_v30 = vld [vmem:[%s15173_s1 + $0x1b88] ss:$16 sps:$4 sm:$0xff]  }
 0x33c   :  { %7236 = vmatprep.subr.bf16.mxu0 %v11225_v31  ;;  %8084 = vmatprep.subr.bf16.mxu1 %v11228_v32  ;;  %v11309_v31 = vld [vmem:[%s15173_s1 + $0x1ba4] ss:$16 sps:$4 sm:$0xff]   ;;  %v11312_v32 = vld [vmem:[%s15173_s1 + $0x1bac] ss:$16 sps:$4 sm:$0xff]  }
 0x33f   :  { %7237 = vmatpush1.bf16.msra.mxu0 %v11223_v34  ;;  %8085 = vmatpush1.bf16.msra.mxu1 %v11226_v36  ;;  %v11307_v34 = vld [vmem:[%s15173_s1 + $0x1ba0] ss:$16 sps:$4 sm:$0xff]   ;;  %v11310_v36 = vld [vmem:[%s15173_s1 + $0x1ba8] ss:$16 sps:$4 sm:$0xff]  }
 0x340   :  { %7259 = vmatprep.subr.bf16.mxu0 %v11231_v33  ;;  %8107 = vmatprep.subr.bf16.mxu1 %v11234_v35  ;;  %v11315_v33 = vld [vmem:[%s15173_s1 + $0x1bc4] ss:$16 sps:$4 sm:$0xff]   ;;  %v11318_v35 = vld [vmem:[%s15173_s1 + $0x1bcc] ss:$16 sps:$4 sm:$0xff]  }
 0x342   :  { %7239 = vmatmul.mubr.bf16.vlgmr.msra.gmra.mrb[0].mxu0 %v8643_v37  ;;  %8087 = vmatmul.mubr.bf16.vlgmr.msra.gmra.mrb[0].mxu1 %v8643_v37  ;;  %v11313_v37 = vld [vmem:[%s15173_s1 + $0x1bc0] ss:$16 sps:$4 sm:$0xff]  }
 0x343   :  { %7260 = vmatpush1.bf16.msra.mxu0 %v11229_v40  ;;  %8108 = vmatpush1.bf16.msra.mxu1 %v11232_v42  ;;  %v11324_v40 = vld [vmem:[%s15173_s1 + $0x1bec] ss:$16 sps:$4 sm:$0xff]   ;;  %v11319_v42 = vld [vmem:[%s15173_s1 + $0x1be0] ss:$16 sps:$4 sm:$0xff]  }
 0x344   :  { %7261 = vmatprep.subr.bf16.mxu0 %v11237_v44  ;;  %8109 = vmatprep.subr.bf16.mxu1 %v11240_v41  ;;  %v11322_v44 = vld [vmem:[%s15173_s1 + $0x1be8] ss:$16 sps:$4 sm:$0xff]   ;;  %v11327_v41 = vld [vmem:[%s15173_s1 + $0x1c04] ss:$16 sps:$4 sm:$0xff]  }
 0x345   :  { %7248 = vmatprep.mubr.bf16.mxu0 %v8676_v43  ;;  %8096 = vmatprep.mubr.bf16.mxu1 %v8676_v43  ;;  %v11330_v43 = vld [vmem:[%s15173_s1 + $0x1c0c] ss:$16 sps:$4 sm:$0xff]  }
 0x347   :  { %7262 = vmatpush1.bf16.msra.mxu0 %v11235_v45  ;;  %8110 = vmatpush1.bf16.msra.mxu1 %v11238_v46  ;;  %v8645_v45 = vcombine.low %v14337_v52, %v14342_v49  ;;  %v65_v46 = vld [vmem:[%s15174_s0 + $0x168] sm:$0xff]  ;;  %v11333_v52 = vld [vmem:[%s15173_s1 + $0x1c24] ss:$16 sps:$4 sm:$0xff]  }
 0x348   :  { %7263 = vmatprep.subr.bf16.mxu0 %v11243_v47  ;;  %8111 = vmatprep.subr.bf16.mxu1 %v11246_v48  ;;  %v81_v47 = vld [vmem:[%s15174_s0 + $0x1e8] sm:$0xff]  ;;  %v11325_v48 = vld [vmem:[%s15173_s1 + $0x1c00] ss:$16 sps:$4 sm:$0xff]  }
 0x349   :  { %v11336_v49 = vld [vmem:[%s15173_s1 + $0x1c2c] ss:$16 sps:$4 sm:$0xff]  }
 0x34a   :  { %7249 = vmatmul.mubr.bf16.gmra.mrb[4].mxu0 %v8675_v51  ;;  %8097 = vmatmul.mubr.bf16.gmra.mrb[4].mxu1 %v8675_v51  ;;  %v11328_v51 = vld [vmem:[%s15173_s1 + $0x1c08] ss:$16 sps:$4 sm:$0xff]  }
 0x34b   :  { %7264 = vmatpush1.bf16.msra.mxu0 %v11241_v50  ;;  %8112 = vmatpush1.bf16.msra.mxu1 %v11244_v53  ;;  %v8678_v50 = vcombine.high %v65_v46, %v81_v47  ;;  %v11331_v53 = vld [vmem:[%s15173_s1 + $0x1c20] ss:$16 sps:$4 sm:$0xff]  }
 0x34c   :  { %7265 = vmatprep.subr.bf16.mxu0 %v11249_v54  ;;  %8113 = vmatprep.subr.bf16.mxu1 %v11252_v55  ;;  %v11334_v54 = vld [vmem:[%s15173_s1 + $0x1c28] ss:$16 sps:$4 sm:$0xff]   ;;  %v11339_v55 = vld [vmem:[%s15173_s1 + $0x1c44] ss:$16 sps:$4 sm:$0xff]  }
 0x34d   :  { %7291 = vmatprep.mubr.bf16.mxu0 %v8646_v56  ;;  %8139 = vmatprep.mubr.bf16.mxu1 %v8646_v56  ;;  %v11342_v56 = vld [vmem:[%s15173_s1 + $0x1c4c] ss:$16 sps:$4 sm:$0xff]  }
 0x34f   :  { %7266 = vmatpush1.bf16.msra.mxu0 %v11247_v59  ;;  %8114 = vmatpush1.bf16.msra.mxu1 %v11250_v60  ;;  %v8677_v59 = vcombine.low %v65_v46, %v81_v47  ;;  %v14549_v60 = vld [vmem:[%s15174_s0 + $0x70] sm:$0xff]  ;;  %v11412_v46 = vld [vmem:[%s15173_s1 + $0x1dc8] ss:$16 sps:$4 sm:$0xff]  }
 0x350   :  { %7267 = vmatprep.subr.bf16.mxu0 %v11255_v57  ;;  %8115 = vmatprep.subr.bf16.mxu1 %v11258_v58  ;;  %v14554_v57 = vld [vmem:[%s15174_s0 + $0xf0] sm:$0xff] }
 0x351   :  { %v11337_v58 = vld [vmem:[%s15173_s1 + $0x1c40] ss:$16 sps:$4 sm:$0xff]   ;;  %v11417_v47 = vld [vmem:[%s15173_s1 + $0x1de4] ss:$16 sps:$4 sm:$0xff]  }
 0x353   :  { %7268 = vmatpush1.bf16.msra.mxu0 %v11253_v61  ;;  %8116 = vmatpush1.bf16.msra.mxu1 %v11256_v62  ;;  %v11340_v61 = vld [vmem:[%s15173_s1 + $0x1c48] ss:$16 sps:$4 sm:$0xff]   ;;  %v11345_v62 = vld [vmem:[%s15173_s1 + $0x1c64] ss:$16 sps:$4 sm:$0xff]  }
 0x354   :  { %7269 = vmatprep.subr.bf16.mxu0 %v11261_v63  ;;  %8117 = vmatprep.subr.bf16.mxu1 %v11264_v0  ;;  %v11348_v63 = vld [vmem:[%s15173_s1 + $0x1c6c] ss:$16 sps:$4 sm:$0xff]   ;;  %v8648_v0 = vcombine.high %v14549_v60, %v14554_v57 }
 0x357   :  { %7270 = vmatpush1.bf16.msra.mxu0 %v11259_v3  ;;  %8118 = vmatpush1.bf16.msra.mxu1 %v11262_v4  ;;  %v11343_v3 = vld [vmem:[%s15173_s1 + $0x1c60] ss:$16 sps:$4 sm:$0xff]   ;;  %v11346_v4 = vld [vmem:[%s15173_s1 + $0x1c68] ss:$16 sps:$4 sm:$0xff]  }
 0x358   :  { %7271 = vmatprep.subr.bf16.mxu0 %v11267_v1  ;;  %8119 = vmatprep.subr.bf16.mxu1 %v11270_v2  ;;  %v11351_v1 = vld [vmem:[%s15173_s1 + $0x1c84] ss:$16 sps:$4 sm:$0xff]   ;;  %v11354_v2 = vld [vmem:[%s15173_s1 + $0x1c8c] ss:$16 sps:$4 sm:$0xff]  }
 0x35b   :  { %7272 = vmatpush1.bf16.msra.mxu0 %v11265_v5  ;;  %8120 = vmatpush1.bf16.msra.mxu1 %v11268_v6  ;;  %v11349_v5 = vld [vmem:[%s15173_s1 + $0x1c80] ss:$16 sps:$4 sm:$0xff]   ;;  %v11352_v6 = vld [vmem:[%s15173_s1 + $0x1c88] ss:$16 sps:$4 sm:$0xff]  }
 0x35c   :  { %7273 = vmatprep.subr.bf16.mxu0 %v11273_v7  ;;  %8121 = vmatprep.subr.bf16.mxu1 %v11276_v8  ;;  %v11357_v7 = vld [vmem:[%s15173_s1 + $0x1ca4] ss:$16 sps:$4 sm:$0xff]   ;;  %v11360_v8 = vld [vmem:[%s15173_s1 + $0x1cac] ss:$16 sps:$4 sm:$0xff]  }
 0x35f   :  { %7274 = vmatpush1.bf16.msra.mxu0 %v11271_v11  ;;  %8122 = vmatpush1.bf16.msra.mxu1 %v11274_v12  ;;  %v11355_v11 = vld [vmem:[%s15173_s1 + $0x1ca0] ss:$16 sps:$4 sm:$0xff]   ;;  %v11358_v12 = vld [vmem:[%s15173_s1 + $0x1ca8] ss:$16 sps:$4 sm:$0xff]  }
 0x360   :  { %7275 = vmatprep.subr.bf16.mxu0 %v11279_v9  ;;  %8123 = vmatprep.subr.bf16.mxu1 %v11282_v10  ;;  %v11363_v9 = vld [vmem:[%s15173_s1 + $0x1cc4] ss:$16 sps:$4 sm:$0xff]   ;;  %v11366_v10 = vld [vmem:[%s15173_s1 + $0x1ccc] ss:$16 sps:$4 sm:$0xff]  }
 0x363   :  { %7276 = vmatpush1.bf16.msra.mxu0 %v11277_v13  ;;  %8124 = vmatpush1.bf16.msra.mxu1 %v11280_v14  ;;  %v11361_v13 = vld [vmem:[%s15173_s1 + $0x1cc0] ss:$16 sps:$4 sm:$0xff]   ;;  %v11364_v14 = vld [vmem:[%s15173_s1 + $0x1cc8] ss:$16 sps:$4 sm:$0xff]  }
 0x364   :  { %7277 = vmatprep.subr.bf16.mxu0 %v11285_v15  ;;  %8125 = vmatprep.subr.bf16.mxu1 %v11288_v16  ;;  %v11369_v15 = vld [vmem:[%s15173_s1 + $0x1ce4] ss:$16 sps:$4 sm:$0xff]   ;;  %v11372_v16 = vld [vmem:[%s15173_s1 + $0x1cec] ss:$16 sps:$4 sm:$0xff]  }
 0x367   :  { %7278 = vmatpush1.bf16.msra.mxu0 %v11283_v19  ;;  %8126 = vmatpush1.bf16.msra.mxu1 %v11286_v17  ;;  %v11367_v19 = vld [vmem:[%s15173_s1 + $0x1ce0] ss:$16 sps:$4 sm:$0xff]   ;;  %v11370_v17 = vld [vmem:[%s15173_s1 + $0x1ce8] ss:$16 sps:$4 sm:$0xff]  }
 0x368   :  { %7279 = vmatprep.subr.bf16.mxu0 %v11291_v18  ;;  %8127 = vmatprep.subr.bf16.mxu1 %v11294_v20  ;;  %v11375_v18 = vld [vmem:[%s15173_s1 + $0x1d04] ss:$16 sps:$4 sm:$0xff]   ;;  %v11378_v20 = vld [vmem:[%s15173_s1 + $0x1d0c] ss:$16 sps:$4 sm:$0xff]  }
 0x36b   :  { %7280 = vmatpush1.bf16.msra.mxu0 %v11289_v21  ;;  %8128 = vmatpush1.bf16.msra.mxu1 %v11292_v22  ;;  %v11373_v21 = vld [vmem:[%s15173_s1 + $0x1d00] ss:$16 sps:$4 sm:$0xff]   ;;  %v11376_v22 = vld [vmem:[%s15173_s1 + $0x1d08] ss:$16 sps:$4 sm:$0xff]  }
 0x36c   :  { %7281 = vmatprep.subr.bf16.mxu0 %v11297_v23  ;;  %8129 = vmatprep.subr.bf16.mxu1 %v11300_v24  ;;  %v11381_v23 = vld [vmem:[%s15173_s1 + $0x1d24] ss:$16 sps:$4 sm:$0xff]   ;;  %v11384_v24 = vld [vmem:[%s15173_s1 + $0x1d2c] ss:$16 sps:$4 sm:$0xff]  }
 0x36f   :  { %7282 = vmatpush1.bf16.msra.mxu0 %v11295_v26  ;;  %8130 = vmatpush1.bf16.msra.mxu1 %v11298_v25  ;;  %v11379_v26 = vld [vmem:[%s15173_s1 + $0x1d20] ss:$16 sps:$4 sm:$0xff]   ;;  %v11382_v25 = vld [vmem:[%s15173_s1 + $0x1d28] ss:$16 sps:$4 sm:$0xff]  }
 0x370   :  { %7283 = vmatprep.subr.bf16.mxu0 %v11303_v27  ;;  %8131 = vmatprep.subr.bf16.mxu1 %v11306_v28  ;;  %v11387_v27 = vld [vmem:[%s15173_s1 + $0x1d44] ss:$16 sps:$4 sm:$0xff]   ;;  %v11390_v28 = vld [vmem:[%s15173_s1 + $0x1d4c] ss:$16 sps:$4 sm:$0xff]  }
 0x373   :  { %7284 = vmatpush1.bf16.msra.mxu0 %v11301_v29  ;;  %8132 = vmatpush1.bf16.msra.mxu1 %v11304_v30  ;;  %v11385_v29 = vld [vmem:[%s15173_s1 + $0x1d40] ss:$16 sps:$4 sm:$0xff]   ;;  %v11388_v30 = vld [vmem:[%s15173_s1 + $0x1d48] ss:$16 sps:$4 sm:$0xff]  }
 0x374   :  { %7285 = vmatprep.subr.bf16.mxu0 %v11309_v31  ;;  %8133 = vmatprep.subr.bf16.mxu1 %v11312_v32  ;;  %v11393_v31 = vld [vmem:[%s15173_s1 + $0x1d64] ss:$16 sps:$4 sm:$0xff]   ;;  %v11396_v32 = vld [vmem:[%s15173_s1 + $0x1d6c] ss:$16 sps:$4 sm:$0xff]  }
 0x377   :  { %7286 = vmatpush1.bf16.msra.mxu0 %v11307_v34  ;;  %8134 = vmatpush1.bf16.msra.mxu1 %v11310_v36  ;;  %v11391_v34 = vld [vmem:[%s15173_s1 + $0x1d60] ss:$16 sps:$4 sm:$0xff]   ;;  %v11394_v36 = vld [vmem:[%s15173_s1 + $0x1d68] ss:$16 sps:$4 sm:$0xff]  }
 0x378   :  { %7287 = vmatprep.subr.bf16.mxu0 %v11315_v33  ;;  %8135 = vmatprep.subr.bf16.mxu1 %v11318_v35  ;;  %v11399_v33 = vld [vmem:[%s15173_s1 + $0x1d84] ss:$16 sps:$4 sm:$0xff]   ;;  %v11402_v35 = vld [vmem:[%s15173_s1 + $0x1d8c] ss:$16 sps:$4 sm:$0xff]  }
 0x37b   :  { %7288 = vmatpush1.bf16.msra.mxu0 %v11313_v37  ;;  %8136 = vmatpush1.bf16.msra.mxu1 %v11316_v38  ;;  %v11397_v37 = vld [vmem:[%s15173_s1 + $0x1d80] ss:$16 sps:$4 sm:$0xff]   ;;  %v11400_v38 = vld [vmem:[%s15173_s1 + $0x1d88] ss:$16 sps:$4 sm:$0xff]  }
 0x37c   :  { %7289 = vmatprep.subr.bf16.mxu0 %v11321_v39  ;;  %8137 = vmatprep.subr.bf16.mxu1 %v11324_v40  ;;  %v11405_v39 = vld [vmem:[%s15173_s1 + $0x1da4] ss:$16 sps:$4 sm:$0xff]   ;;  %v11408_v40 = vld [vmem:[%s15173_s1 + $0x1dac] ss:$16 sps:$4 sm:$0xff]  }
 0x37f   :  { %7290 = vmatpush1.bf16.msra.mxu0 %v11319_v42  ;;  %8138 = vmatpush1.bf16.msra.mxu1 %v11322_v44  ;;  %v11403_v42 = vld [vmem:[%s15173_s1 + $0x1da0] ss:$16 sps:$4 sm:$0xff]   ;;  %v11406_v44 = vld [vmem:[%s15173_s1 + $0x1da8] ss:$16 sps:$4 sm:$0xff]  }
 0x380   :  { %7312 = vmatprep.subr.bf16.mxu0 %v11327_v41  ;;  %8160 = vmatprep.subr.bf16.mxu1 %v11330_v43  ;;  %v11411_v41 = vld [vmem:[%s15173_s1 + $0x1dc4] ss:$16 sps:$4 sm:$0xff]   ;;  %v11414_v43 = vld [vmem:[%s15173_s1 + $0x1dcc] ss:$16 sps:$4 sm:$0xff]  }
 0x382   :  { %7292 = vmatmul.mubr.bf16.vlgmr.msra.gmra.mrb[0].mxu0 %v8645_v45  ;;  %8140 = vmatmul.mubr.bf16.vlgmr.msra.gmra.mrb[0].mxu1 %v8645_v45  ;;  %v11409_v45 = vld [vmem:[%s15173_s1 + $0x1dc0] ss:$16 sps:$4 sm:$0xff]  }
 0x383   :  { %7313 = vmatpush1.bf16.msra.mxu0 %v11325_v48  ;;  %8161 = vmatpush1.bf16.msra.mxu1 %v11328_v51  ;;  %v11420_v48 = vld [vmem:[%s15173_s1 + $0x1dec] ss:$16 sps:$4 sm:$0xff]   ;;  %v11415_v51 = vld [vmem:[%s15173_s1 + $0x1de0] ss:$16 sps:$4 sm:$0xff]  }
 0x384   :  { %7314 = vmatprep.subr.bf16.mxu0 %v11333_v52  ;;  %8162 = vmatprep.subr.bf16.mxu1 %v11336_v49  ;;  %v11418_v52 = vld [vmem:[%s15173_s1 + $0x1de8] ss:$16 sps:$4 sm:$0xff]   ;;  %v11423_v49 = vld [vmem:[%s15173_s1 + $0x1e04] ss:$16 sps:$4 sm:$0xff]  }
 0x385   :  { %7301 = vmatprep.mubr.bf16.mxu0 %v8678_v50  ;;  %8149 = vmatprep.mubr.bf16.mxu1 %v8678_v50  ;;  %v11426_v50 = vld [vmem:[%s15173_s1 + $0x1e0c] ss:$16 sps:$4 sm:$0xff]  }
 0x387   :  { %7315 = vmatpush1.bf16.msra.mxu0 %v11331_v53  ;;  %8163 = vmatpush1.bf16.msra.mxu1 %v11334_v54  ;;  %v8647_v53 = vcombine.low %v14549_v60, %v14554_v57  ;;  %v66_v54 = vld [vmem:[%s15174_s0 + $0x170] sm:$0xff]  ;;  %v11432_v57 = vld [vmem:[%s15173_s1 + $0x1e2c] ss:$16 sps:$4 sm:$0xff]  }
 0x388   :  { %7316 = vmatprep.subr.bf16.mxu0 %v11339_v55  ;;  %8164 = vmatprep.subr.bf16.mxu1 %v11342_v56  ;;  %v82_v55 = vld [vmem:[%s15174_s0 + $0x1f0] sm:$0xff] }
 0x389   :  { %v11421_v56 = vld [vmem:[%s15173_s1 + $0x1e00] ss:$16 sps:$4 sm:$0xff]   ;;  %v11429_v60 = vld [vmem:[%s15173_s1 + $0x1e24] ss:$16 sps:$4 sm:$0xff]  }
 0x38a   :  { %7302 = vmatmul.mubr.bf16.gmra.mrb[4].mxu0 %v8677_v59  ;;  %8150 = vmatmul.mubr.bf16.gmra.mrb[4].mxu1 %v8677_v59  ;;  %v11424_v59 = vld [vmem:[%s15173_s1 + $0x1e08] ss:$16 sps:$4 sm:$0xff]  }
 0x38b   :  { %7317 = vmatpush1.bf16.msra.mxu0 %v11337_v58  ;;  %8165 = vmatpush1.bf16.msra.mxu1 %v11340_v61  ;;  %v8680_v58 = vcombine.high %v66_v54, %v82_v55  ;;  %v11427_v61 = vld [vmem:[%s15173_s1 + $0x1e20] ss:$16 sps:$4 sm:$0xff]  }
 0x38c   :  { %7318 = vmatprep.subr.bf16.mxu0 %v11345_v62  ;;  %8166 = vmatprep.subr.bf16.mxu1 %v11348_v63  ;;  %v11430_v62 = vld [vmem:[%s15173_s1 + $0x1e28] ss:$16 sps:$4 sm:$0xff]   ;;  %v11435_v63 = vld [vmem:[%s15173_s1 + $0x1e44] ss:$16 sps:$4 sm:$0xff]  }
 0x38d   :  { %7344 = vmatprep.mubr.bf16.mxu0 %v8648_v0  ;;  %8192 = vmatprep.mubr.bf16.mxu1 %v8648_v0  ;;  %v11438_v0 = vld [vmem:[%s15173_s1 + $0x1e4c] ss:$16 sps:$4 sm:$0xff]  }
 0x38f   :  { %7319 = vmatpush1.bf16.msra.mxu0 %v11343_v3  ;;  %8167 = vmatpush1.bf16.msra.mxu1 %v11346_v4  ;;  %v8679_v3 = vcombine.low %v66_v54, %v82_v55  ;;  %v14761_v4 = vld [vmem:[%s15174_s0 + $0x78] sm:$0xff]  ;;  %v11513_v55 = vld [vmem:[%s15173_s1 + $0x1fe4] ss:$16 sps:$4 sm:$0xff]  }
 0x390   :  { %7320 = vmatprep.subr.bf16.mxu0 %v11351_v1  ;;  %8168 = vmatprep.subr.bf16.mxu1 %v11354_v2  ;;  %v14766_v1 = vld [vmem:[%s15174_s0 + $0xf8] sm:$0xff]  ;;  %v11433_v2 = vld [vmem:[%s15173_s1 + $0x1e40] ss:$16 sps:$4 sm:$0xff]  }
 0x391   :  { %v11508_v54 = vld [vmem:[%s15173_s1 + $0x1fc8] ss:$16 sps:$4 sm:$0xff]  }
 0x393   :  { %7321 = vmatpush1.bf16.msra.mxu0 %v11349_v5  ;;  %8169 = vmatpush1.bf16.msra.mxu1 %v11352_v6  ;;  %v11436_v5 = vld [vmem:[%s15173_s1 + $0x1e48] ss:$16 sps:$4 sm:$0xff]   ;;  %v11441_v6 = vld [vmem:[%s15173_s1 + $0x1e64] ss:$16 sps:$4 sm:$0xff]  }
 0x394   :  { %7322 = vmatprep.subr.bf16.mxu0 %v11357_v7  ;;  %8170 = vmatprep.subr.bf16.mxu1 %v11360_v8  ;;  %v11444_v7 = vld [vmem:[%s15173_s1 + $0x1e6c] ss:$16 sps:$4 sm:$0xff]   ;;  %v8650_v8 = vcombine.high %v14761_v4, %v14766_v1 }
 0x397   :  { %7323 = vmatpush1.bf16.msra.mxu0 %v11355_v11  ;;  %8171 = vmatpush1.bf16.msra.mxu1 %v11358_v12  ;;  %v11439_v11 = vld [vmem:[%s15173_s1 + $0x1e60] ss:$16 sps:$4 sm:$0xff]   ;;  %v11442_v12 = vld [vmem:[%s15173_s1 + $0x1e68] ss:$16 sps:$4 sm:$0xff]  }
 0x398   :  { %7324 = vmatprep.subr.bf16.mxu0 %v11363_v9  ;;  %8172 = vmatprep.subr.bf16.mxu1 %v11366_v10  ;;  %v11447_v9 = vld [vmem:[%s15173_s1 + $0x1e84] ss:$16 sps:$4 sm:$0xff]   ;;  %v11450_v10 = vld [vmem:[%s15173_s1 + $0x1e8c] ss:$16 sps:$4 sm:$0xff]  }
 0x39b   :  { %7325 = vmatpush1.bf16.msra.mxu0 %v11361_v13  ;;  %8173 = vmatpush1.bf16.msra.mxu1 %v11364_v14  ;;  %v11445_v13 = vld [vmem:[%s15173_s1 + $0x1e80] ss:$16 sps:$4 sm:$0xff]   ;;  %v11448_v14 = vld [vmem:[%s15173_s1 + $0x1e88] ss:$16 sps:$4 sm:$0xff]  }
 0x39c   :  { %7326 = vmatprep.subr.bf16.mxu0 %v11369_v15  ;;  %8174 = vmatprep.subr.bf16.mxu1 %v11372_v16  ;;  %v11453_v15 = vld [vmem:[%s15173_s1 + $0x1ea4] ss:$16 sps:$4 sm:$0xff]   ;;  %v11456_v16 = vld [vmem:[%s15173_s1 + $0x1eac] ss:$16 sps:$4 sm:$0xff]  }
 0x39f   :  { %7327 = vmatpush1.bf16.msra.mxu0 %v11367_v19  ;;  %8175 = vmatpush1.bf16.msra.mxu1 %v11370_v17  ;;  %v11451_v19 = vld [vmem:[%s15173_s1 + $0x1ea0] ss:$16 sps:$4 sm:$0xff]   ;;  %v11454_v17 = vld [vmem:[%s15173_s1 + $0x1ea8] ss:$16 sps:$4 sm:$0xff]  }
 0x3a0   :  { %7328 = vmatprep.subr.bf16.mxu0 %v11375_v18  ;;  %8176 = vmatprep.subr.bf16.mxu1 %v11378_v20  ;;  %v11459_v18 = vld [vmem:[%s15173_s1 + $0x1ec4] ss:$16 sps:$4 sm:$0xff]   ;;  %v11462_v20 = vld [vmem:[%s15173_s1 + $0x1ecc] ss:$16 sps:$4 sm:$0xff]  }
 0x3a3   :  { %7329 = vmatpush1.bf16.msra.mxu0 %v11373_v21  ;;  %8177 = vmatpush1.bf16.msra.mxu1 %v11376_v22  ;;  %v11457_v21 = vld [vmem:[%s15173_s1 + $0x1ec0] ss:$16 sps:$4 sm:$0xff]   ;;  %v11460_v22 = vld [vmem:[%s15173_s1 + $0x1ec8] ss:$16 sps:$4 sm:$0xff]  }
 0x3a4   :  { %7330 = vmatprep.subr.bf16.mxu0 %v11381_v23  ;;  %8178 = vmatprep.subr.bf16.mxu1 %v11384_v24  ;;  %v11465_v23 = vld [vmem:[%s15173_s1 + $0x1ee4] ss:$16 sps:$4 sm:$0xff]   ;;  %v11468_v24 = vld [vmem:[%s15173_s1 + $0x1eec] ss:$16 sps:$4 sm:$0xff]  }
 0x3a7   :  { %7331 = vmatpush1.bf16.msra.mxu0 %v11379_v26  ;;  %8179 = vmatpush1.bf16.msra.mxu1 %v11382_v25  ;;  %v11463_v26 = vld [vmem:[%s15173_s1 + $0x1ee0] ss:$16 sps:$4 sm:$0xff]   ;;  %v11466_v25 = vld [vmem:[%s15173_s1 + $0x1ee8] ss:$16 sps:$4 sm:$0xff]  }
 0x3a8   :  { %7332 = vmatprep.subr.bf16.mxu0 %v11387_v27  ;;  %8180 = vmatprep.subr.bf16.mxu1 %v11390_v28  ;;  %v11471_v27 = vld [vmem:[%s15173_s1 + $0x1f04] ss:$16 sps:$4 sm:$0xff]   ;;  %v11474_v28 = vld [vmem:[%s15173_s1 + $0x1f0c] ss:$16 sps:$4 sm:$0xff]  }
 0x3ab   :  { %7333 = vmatpush1.bf16.msra.mxu0 %v11385_v29  ;;  %8181 = vmatpush1.bf16.msra.mxu1 %v11388_v30  ;;  %v11469_v29 = vld [vmem:[%s15173_s1 + $0x1f00] ss:$16 sps:$4 sm:$0xff]   ;;  %v11472_v30 = vld [vmem:[%s15173_s1 + $0x1f08] ss:$16 sps:$4 sm:$0xff]  }
 0x3ac   :  { %7334 = vmatprep.subr.bf16.mxu0 %v11393_v31  ;;  %8182 = vmatprep.subr.bf16.mxu1 %v11396_v32  ;;  %v11477_v31 = vld [vmem:[%s15173_s1 + $0x1f24] ss:$16 sps:$4 sm:$0xff]   ;;  %v11480_v32 = vld [vmem:[%s15173_s1 + $0x1f2c] ss:$16 sps:$4 sm:$0xff]  }
 0x3af   :  { %7335 = vmatpush1.bf16.msra.mxu0 %v11391_v34  ;;  %8183 = vmatpush1.bf16.msra.mxu1 %v11394_v36  ;;  %v11475_v34 = vld [vmem:[%s15173_s1 + $0x1f20] ss:$16 sps:$4 sm:$0xff]   ;;  %v11478_v36 = vld [vmem:[%s15173_s1 + $0x1f28] ss:$16 sps:$4 sm:$0xff]  }
 0x3b0   :  { %7336 = vmatprep.subr.bf16.mxu0 %v11399_v33  ;;  %8184 = vmatprep.subr.bf16.mxu1 %v11402_v35  ;;  %v11483_v33 = vld [vmem:[%s15173_s1 + $0x1f44] ss:$16 sps:$4 sm:$0xff]   ;;  %v11486_v35 = vld [vmem:[%s15173_s1 + $0x1f4c] ss:$16 sps:$4 sm:$0xff]  }
 0x3b3   :  { %7337 = vmatpush1.bf16.msra.mxu0 %v11397_v37  ;;  %8185 = vmatpush1.bf16.msra.mxu1 %v11400_v38  ;;  %v11481_v37 = vld [vmem:[%s15173_s1 + $0x1f40] ss:$16 sps:$4 sm:$0xff]   ;;  %v11484_v38 = vld [vmem:[%s15173_s1 + $0x1f48] ss:$16 sps:$4 sm:$0xff]  }
 0x3b4   :  { %7338 = vmatprep.subr.bf16.mxu0 %v11405_v39  ;;  %8186 = vmatprep.subr.bf16.mxu1 %v11408_v40  ;;  %v11489_v39 = vld [vmem:[%s15173_s1 + $0x1f64] ss:$16 sps:$4 sm:$0xff]   ;;  %v11492_v40 = vld [vmem:[%s15173_s1 + $0x1f6c] ss:$16 sps:$4 sm:$0xff]  }
 0x3b7   :  { %7339 = vmatpush1.bf16.msra.mxu0 %v11403_v42  ;;  %8187 = vmatpush1.bf16.msra.mxu1 %v11406_v44  ;;  %v11487_v42 = vld [vmem:[%s15173_s1 + $0x1f60] ss:$16 sps:$4 sm:$0xff]   ;;  %v11490_v44 = vld [vmem:[%s15173_s1 + $0x1f68] ss:$16 sps:$4 sm:$0xff]  }
 0x3b8   :  { %7340 = vmatprep.subr.bf16.mxu0 %v11411_v41  ;;  %8188 = vmatprep.subr.bf16.mxu1 %v11414_v43  ;;  %v11495_v41 = vld [vmem:[%s15173_s1 + $0x1f84] ss:$16 sps:$4 sm:$0xff]   ;;  %v11498_v43 = vld [vmem:[%s15173_s1 + $0x1f8c] ss:$16 sps:$4 sm:$0xff]  }
 0x3bb   :  { %7341 = vmatpush1.bf16.msra.mxu0 %v11409_v45  ;;  %8189 = vmatpush1.bf16.msra.mxu1 %v11412_v46  ;;  %v11493_v45 = vld [vmem:[%s15173_s1 + $0x1f80] ss:$16 sps:$4 sm:$0xff]   ;;  %v11496_v46 = vld [vmem:[%s15173_s1 + $0x1f88] ss:$16 sps:$4 sm:$0xff]  }
 0x3bc   :  { %7342 = vmatprep.subr.bf16.mxu0 %v11417_v47  ;;  %8190 = vmatprep.subr.bf16.mxu1 %v11420_v48  ;;  %v11501_v47 = vld [vmem:[%s15173_s1 + $0x1fa4] ss:$16 sps:$4 sm:$0xff]   ;;  %v11504_v48 = vld [vmem:[%s15173_s1 + $0x1fac] ss:$16 sps:$4 sm:$0xff]  }
 0x3bf   :  { %7343 = vmatpush1.bf16.msra.mxu0 %v11415_v51  ;;  %8191 = vmatpush1.bf16.msra.mxu1 %v11418_v52  ;;  %v11499_v51 = vld [vmem:[%s15173_s1 + $0x1fa0] ss:$16 sps:$4 sm:$0xff]   ;;  %v11502_v52 = vld [vmem:[%s15173_s1 + $0x1fa8] ss:$16 sps:$4 sm:$0xff]  }
 0x3c0   :  { %7365 = vmatprep.subr.bf16.mxu0 %v11423_v49  ;;  %8213 = vmatprep.subr.bf16.mxu1 %v11426_v50  ;;  %v11507_v49 = vld [vmem:[%s15173_s1 + $0x1fc4] ss:$16 sps:$4 sm:$0xff]   ;;  %v11510_v50 = vld [vmem:[%s15173_s1 + $0x1fcc] ss:$16 sps:$4 sm:$0xff]  }
 0x3c2   :  { %7345 = vmatmul.mubr.bf16.vlgmr.msra.gmra.mrb[0].mxu0 %v8647_v53  ;;  %8193 = vmatmul.mubr.bf16.vlgmr.msra.gmra.mrb[0].mxu1 %v8647_v53  ;;  %v11505_v53 = vld [vmem:[%s15173_s1 + $0x1fc0] ss:$16 sps:$4 sm:$0xff]  }
 0x3c3   :  { %7366 = vmatpush1.bf16.msra.mxu0 %v11421_v56  ;;  %8214 = vmatpush1.bf16.msra.mxu1 %v11424_v59  ;;  %v11516_v56 = vld [vmem:[%s15173_s1 + $0x1fec] ss:$16 sps:$4 sm:$0xff]   ;;  %v11511_v59 = vld [vmem:[%s15173_s1 + $0x1fe0] ss:$16 sps:$4 sm:$0xff]  }
 0x3c4   :  { %7367 = vmatprep.subr.bf16.mxu0 %v11429_v60  ;;  %8215 = vmatprep.subr.bf16.mxu1 %v11432_v57  ;;  %v11514_v60 = vld [vmem:[%s15173_s1 + $0x1fe8] ss:$16 sps:$4 sm:$0xff]  }
 0x3c5   :  { %7354 = vmatprep.mubr.bf16.mxu0 %v8680_v58  ;;  %8202 = vmatprep.mubr.bf16.mxu1 %v8680_v58  ;;  %v67_v57 = vld [vmem:[%s15174_s0 + $0x178] sm:$0xff] }
 0x3c6   :  { %v83_v58 = vld [vmem:[%s15174_s0 + $0x1f8] sm:$0xff] }
 0x3c7   :  { %7368 = vmatpush1.bf16.msra.mxu0 %v11427_v61  ;;  %8216 = vmatpush1.bf16.msra.mxu1 %v11430_v62  ;;  %v8649_v61 = vcombine.low %v14761_v4, %v14766_v1  ;;  %v8682_v62 = vcombine.high %v67_v57, %v83_v58  ;;  %v1108_v4 = vld [vmem:[%s15175_s2] sm:$0xf] }
 0x3c8   :  { %7369 = vmatprep.subr.bf16.mxu0 %v11435_v63  ;;  %8217 = vmatprep.subr.bf16.mxu1 %v11438_v0  ;;  %v8681_v63 = vcombine.low %v67_v57, %v83_v58  ;;  %v1110_v0 = vlaneseq }
 0x3ca   :  { %7355 = vmatmul.mubr.bf16.gmra.mrb[4].mxu0 %v8679_v3  ;;  %8203 = vmatmul.mubr.bf16.gmra.mrb[4].mxu1 %v8679_v3  ;;  %v1111_v3 = vshrl.u32 %v1110_v0, 7 }
 0x3cb   :  { %7370 = vmatpush1.bf16.msra.mxu0 %v11433_v2  ;;  %8218 = vmatpush1.bf16.msra.mxu1 %v11436_v5 }
 0x3cc   :  { %7371 = vmatprep.subr.bf16.mxu0 %v11441_v6  ;;  %8219 = vmatprep.subr.bf16.mxu1 %v11444_v7  ;;  %v14940_v2 = vsub.s32 0, %v1111_v3  ;;  %v14942_v5 = vsub.s32 2, %v1111_v3  ;;  %v14947_v1 = vsub.s32 1, %v1111_v3  ;;  %v14949_v6 = vsub.s32 3, %v1111_v3 }
 0x3cd   :  { %7397 = vmatprep.mubr.bf16.mxu0 %v8650_v8  ;;  %8245 = vmatprep.mubr.bf16.mxu1 %v8650_v8 }
 0x3ce   :  { %v1113_v7 = vrot.slane %v1108_v4, %v14940_v2  ;;  %v1121_v8 = vrot.slane %v1108_v4, %v14942_v5 }
 0x3cf   :  { %7372 = vmatpush1.bf16.msra.mxu0 %v11439_v11  ;;  %8220 = vmatpush1.bf16.msra.mxu1 %v11442_v12 }
 0x3d0   :  { %7373 = vmatprep.subr.bf16.mxu0 %v11447_v9  ;;  %8221 = vmatprep.subr.bf16.mxu1 %v11450_v10  ;;  %v1117_v9 = vrot.slane %v1108_v4, %v14947_v1  ;;  %v1125_v10 = vrot.slane %v1108_v4, %v14949_v6 }
 0x3d3   :  { %7374 = vmatpush1.bf16.msra.mxu0 %v11445_v13  ;;  %8222 = vmatpush1.bf16.msra.mxu1 %v11448_v14 }
 0x3d4   :  { %7375 = vmatprep.subr.bf16.mxu0 %v11453_v15  ;;  %8223 = vmatprep.subr.bf16.mxu1 %v11456_v16  ;;  %v8269_v15 = vadd.s32 16, %v1111_v3 }
 0x3d6   :  { %vm8273_vm0 = vcmp.lt.s32.totalorder %v8269_v15, 18 }
 0x3d7   :  { %7376 = vmatpush1.bf16.msra.mxu0 %v11451_v19  ;;  %8224 = vmatpush1.bf16.msra.mxu1 %v11454_v17 }
 0x3d8   :  { %7377 = vmatprep.subr.bf16.mxu0 %v11459_v18  ;;  %8225 = vmatprep.subr.bf16.mxu1 %v11462_v20 }
 0x3db   :  { %7378 = vmatpush1.bf16.msra.mxu0 %v11457_v21  ;;  %8226 = vmatpush1.bf16.msra.mxu1 %v11460_v22 }
 0x3dc   :  { %7379 = vmatprep.subr.bf16.mxu0 %v11465_v23  ;;  %8227 = vmatprep.subr.bf16.mxu1 %v11468_v24 }
 0x3df   :  { %7380 = vmatpush1.bf16.msra.mxu0 %v11463_v26  ;;  %8228 = vmatpush1.bf16.msra.mxu1 %v11466_v25 }
 0x3e0   :  { %7381 = vmatprep.subr.bf16.mxu0 %v11471_v27  ;;  %8229 = vmatprep.subr.bf16.mxu1 %v11474_v28 }
 0x3e3   :  { %7382 = vmatpush1.bf16.msra.mxu0 %v11469_v29  ;;  %8230 = vmatpush1.bf16.msra.mxu1 %v11472_v30 }
 0x3e4   :  { %7383 = vmatprep.subr.bf16.mxu0 %v11477_v31  ;;  %8231 = vmatprep.subr.bf16.mxu1 %v11480_v32 }
 0x3e7   :  { %7384 = vmatpush1.bf16.msra.mxu0 %v11475_v34  ;;  %8232 = vmatpush1.bf16.msra.mxu1 %v11478_v36  ;;  %v11525_v34 = vmov 0.0  }
 0x3e8   :  { %7385 = vmatprep.subr.bf16.mxu0 %v11483_v33  ;;  %8233 = vmatprep.subr.bf16.mxu1 %v11486_v35  ;;  %v14979_v36 = vsel %vm8273_vm0, 1.0, %v11525_v34 }
 0x3eb   :  { %7386 = vmatpush1.bf16.msra.mxu0 %v11481_v37  ;;  %8234 = vmatpush1.bf16.msra.mxu1 %v11484_v38 }
 0x3ec   :  { %7387 = vmatprep.subr.bf16.mxu0 %v11489_v39  ;;  %8235 = vmatprep.subr.bf16.mxu1 %v11492_v40 }
 0x3ef   :  { %7388 = vmatpush1.bf16.msra.mxu0 %v11487_v42  ;;  %8236 = vmatpush1.bf16.msra.mxu1 %v11490_v44 }
 0x3f0   :  { %7389 = vmatprep.subr.bf16.mxu0 %v11495_v41  ;;  %8237 = vmatprep.subr.bf16.mxu1 %v11498_v43 }
 0x3f3   :  { %7390 = vmatpush1.bf16.msra.mxu0 %v11493_v45  ;;  %8238 = vmatpush1.bf16.msra.mxu1 %v11496_v46 }
 0x3f4   :  { %7391 = vmatprep.subr.bf16.mxu0 %v11501_v47  ;;  %8239 = vmatprep.subr.bf16.mxu1 %v11504_v48 }
 0x3f7   :  { %7392 = vmatpush1.bf16.msra.mxu0 %v11499_v51  ;;  %8240 = vmatpush1.bf16.msra.mxu1 %v11502_v52 }
 0x3f8   :  { %7393 = vmatprep.subr.bf16.mxu0 %v11507_v49  ;;  %8241 = vmatprep.subr.bf16.mxu1 %v11510_v50 }
 0x3fb   :  { %7394 = vmatpush1.bf16.msra.mxu0 %v11505_v53  ;;  %8242 = vmatpush1.bf16.msra.mxu1 %v11508_v54 }
 0x3fc   :  { %7395 = vmatprep.subr.bf16.mxu0 %v11513_v55  ;;  %8243 = vmatprep.subr.bf16.mxu1 %v11516_v56 }
 0x3ff   :  { %7396 = vmatpush1.bf16.msra.mxu0 %v11511_v59  ;;  %8244 = vmatpush1.bf16.msra.mxu1 %v11514_v60 }
 0x402   :  { %7398 = vmatmul.mubr.bf16.vlgmr.msra.gmra.mrb[0].mxu0 %v8649_v61  ;;  %8246 = vmatmul.mubr.bf16.vlgmr.msra.gmra.mrb[0].mxu1 %v8649_v61 }
 0x403   :  { %7407 = vmatprep.mubr.bf16.mxu0 %v8682_v62  ;;  %8255 = vmatprep.mubr.bf16.mxu1 %v8682_v62 }
 0x40a   :  { %7408 = vmatmul.mubr.bf16.gmra.mrb[4].mxu0 %v8681_v63  ;;  %8256 = vmatmul.mubr.bf16.gmra.mrb[4].mxu1 %v8681_v63 }
 0x4d5   :  { %v7399_v11 = vpop.f32.mrb[0].mxu0  ;;  %v8247_v12 = vpop.f32.mrb[0].mxu1 }
 0x4d6   :  { %v7401_v13 = vpop.f32.mrb[1].mxu0  ;;  %v8249_v14 = vpop.f32.mrb[1].mxu1  ;;  %v14955_v17 = vadd.f32 %v7399_v11, %v1113_v7  ;;  %v14957_v18 = vadd.f32 %v8247_v12, %v1121_v8 }
 0x4d7   :  { %v7403_v16 = vpop.f32.mrb[2].mxu0  ;;  %v8251_v19 = vpop.f32.mrb[2].mxu1  ;;  %v14963_v24 = vadd.f32 %v7401_v13, %v1117_v9  ;;  %v14965_v26 = vadd.f32 %v8249_v14, %v1125_v10 }
 0x4d8   :  { %v14959_v20 = vadd.f32 %v7403_v16, %v1113_v7  ;;  %v14961_v21 = vadd.f32 %v8251_v19, %v1121_v8  ;;  %v7405_v22 = vpop.f32.mrb[3].mxu0  ;;  %v8253_v23 = vpop.f32.mrb[3].mxu1 }
 0x4d9   :  { %v14967_v25 = vadd.f32 %v7405_v22, %v1117_v9  ;;  %v14969_v27 = vadd.f32 %v8253_v23, %v1125_v10 }
 0x4da   :  { %v8299_v28 = vadd.f32 %v14959_v20, %v14955_v17  ;;  %v8317_v29 = vadd.f32 %v14961_v21, %v14957_v18 }
 0x4db   :  { %v8308_v30 = vadd.f32 %v14967_v25, %v14963_v24  ;;  %v8326_v31 = vadd.f32 %v14969_v27, %v14965_v26 }
 0x4dd   :  { %v7409_v32 = vpop.f32.mrb[4].mxu0  ;;  %v8257_v33 = vpop.f32.mrb[4].mxu1 }
 0x4de   :  { %v9728_v35 = vadd.f32 %v7409_v32, %v1113_v7  ;;  %v14981_v37 = vadd.f32 %v8257_v33, %v1121_v8  ;;  %v7411_v38 = vpop.f32.mrb[5].mxu0  ;;  %v8259_v39 = vpop.f32.mrb[5].mxu1 }
 0x4df   :  { %v14983_v40 = vadd.f32 %v7411_v38, %v1117_v9  ;;  %v14985_v42 = vadd.f32 %v8259_v39, %v1125_v10  ;;  %v7413_v44 = vpop.f32.mrb[6].mxu0  ;;  %v8261_v41 = vpop.f32.mrb[6].mxu1 }
 0x4e0   :  { %v8291_v43 = vmul.f32 %v9728_v35, %v14979_v36  ;;  %v8293_v45 = vmul.f32 %v14981_v37, %v14979_v36  ;;  %v9730_v46 = vadd.f32 %v7413_v44, %v1113_v7  ;;  %v9738_v47 = vadd.f32 %v8261_v41, %v1121_v8  ;;  %v7415_v48 = vpop.f32.mrb[7].mxu0  ;;  %v8263_v51 = vpop.f32.mrb[7].mxu1 }
 0x4e1   :  { %v8292_v52 = vmul.f32 %v14983_v40, %v14979_v36  ;;  %v8294_v49 = vmul.f32 %v14985_v42, %v14979_v36  ;;  %v14994_v50 = vadd.f32 %v7415_v48, %v1117_v9  ;;  %v14996_v53 = vadd.f32 %v8263_v51, %v1125_v10 }
 0x4e2   :  { %v8300_v54 = vadd.f32 %v8299_v28, %v8291_v43  ;;  %v8318_v55 = vadd.f32 %v8317_v29, %v8293_v45  ;;  %v8295_v56 = vmul.f32 0.0, %v9730_v46  ;;  %v8297_v59 = vmul.f32 0.0, %v9738_v47 }
 0x4e3   :  { %v8309_v60 = vadd.f32 %v8308_v30, %v8292_v52  ;;  %v8327_v57 = vadd.f32 %v8326_v31, %v8294_v49  ;;  %v8296_v58 = vmul.f32 0.0, %v14994_v50  ;;  %v8298_v61 = vmul.f32 0.0, %v14996_v53 }
 0x4e4   :  { %v8301_v62 = vadd.f32 %v8300_v54, %v8295_v56  ;;  %v8319_v63 = vadd.f32 %v8318_v55, %v8297_v59 }
 0x4e5   :  { %v8310_v0 = vadd.f32 %v8309_v60, %v8296_v58  ;;  %v8328_v3 = vadd.f32 %v8327_v57, %v8298_v61 }
 0x4e6   :  { %v8302_v4 = vrot.slane %v8301_v62, 4  ;;  %v8320_v7 = vrot.slane %v8319_v63, 4 }
 0x4e7   :  { %v8311_v8 = vrot.slane %v8310_v0, 4  ;;  %v8329_v11 = vrot.slane %v8328_v3, 4 }
 0x4e8   :  { %v8303_v12 = vadd.f32 %v8302_v4, %v8301_v62  ;;  %v8321_v9 = vadd.f32 %v8320_v7, %v8319_v63 }
 0x4e9   :  { %v8312_v10 = vadd.f32 %v8311_v8, %v8310_v0  ;;  %v8330_v13 = vadd.f32 %v8329_v11, %v8328_v3 }
 0x4ea   :  { %v8304_v14 = vrot.slane %v8303_v12, 2  ;;  %v8322_v15 = vrot.slane %v8321_v9, 2 }
 0x4eb   :  { %v8313_v16 = vrot.slane %v8312_v10, 2  ;;  %v8331_v19 = vrot.slane %v8330_v13, 2 }
 0x4ec   :  { %v8305_v22 = vadd.f32 %v8304_v14, %v8303_v12  ;;  %v8323_v23 = vadd.f32 %v8322_v15, %v8321_v9 }
 0x4ed   :  { %v8314_v28 = vadd.f32 %v8313_v16, %v8312_v10  ;;  %v8332_v29 = vadd.f32 %v8331_v19, %v8330_v13 }
 0x4ee   :  { %v8306_v30 = vrot.slane %v8305_v22, 1  ;;  %v8324_v31 = vrot.slane %v8323_v23, 1 }
 0x4ef   :  { %v8315_v32 = vrot.slane %v8314_v28, 1  ;;  %v8333_v34 = vrot.slane %v8332_v29, 1 }
 0x4f0   :  { %v8307_v33 = vadd.f32 %v8306_v30, %v8305_v22  ;;  %v8325_v38 = vadd.f32 %v8324_v31, %v8323_v23 }
 0x4f1   :  { %v8316_v39 = vadd.f32 %v8315_v32, %v8314_v28  ;;  %v8334_v44 = vadd.f32 %v8333_v34, %v8332_v29 }
 0x4f2   :  { %v8335_v41 = vmul.f32 0.055555556, %v8307_v33  ;;  %v8337_v43 = vmul.f32 0.055555556, %v8325_v38 }
 0x4f3   :  { %v8336_v45 = vmul.f32 0.055555556, %v8316_v39  ;;  %v8338_v48 = vmul.f32 0.055555556, %v8334_v44 }
 0x4f4   :  { %v15001_v51 = vsub.f32 %v14955_v17, %v8335_v41  ;;  %v15004_v52 = vsub.f32 %v14959_v20, %v8335_v41  ;;  %v15006_v49 = vsub.f32 %v9728_v35, %v8335_v41  ;;  %v15008_v54 = vsub.f32 %v9730_v46, %v8335_v41 }
 0x4f5   :  { %v15011_v55 = vsub.f32 %v14957_v18, %v8337_v43  ;;  %v15014_v56 = vsub.f32 %v14961_v21, %v8337_v43  ;;  %v15017_v59 = vsub.f32 %v14981_v37, %v8337_v43  ;;  %v15019_v60 = vsub.f32 %v9738_v47, %v8337_v43 }
 0x4f6   :  { %v8363_v17 = vmul.f32 %v14979_v36, %v15006_v49  ;;  %v8367_v20 = vmul.f32 0.0, %v15008_v54  ;;  %v8371_v35 = vmul.f32 %v15001_v51, %v15001_v51  ;;  %v8375_v18 = vmul.f32 %v15004_v52, %v15004_v52 }
 0x4f7   :  { %v8365_v21 = vmul.f32 %v14979_v36, %v15017_v59  ;;  %v8369_v46 = vmul.f32 0.0, %v15019_v60  ;;  %v8373_v37 = vmul.f32 %v15011_v55, %v15011_v55  ;;  %v8377_v47 = vmul.f32 %v15014_v56, %v15014_v56 }
 0x4f8   :  { %v8379_v57 = vmul.f32 %v8363_v17, %v8363_v17  ;;  %v8383_v58 = vmul.f32 %v8367_v20, %v8367_v20  ;;  %v8387_v61 = vadd.f32 %v8375_v18, %v8371_v35  ;;  %v15036_v62 = vsub.f32 %v14963_v24, %v8336_v45 }
 0x4f9   :  { %v8381_v63 = vmul.f32 %v8365_v21, %v8365_v21  ;;  %v8385_v0 = vmul.f32 %v8369_v46, %v8369_v46  ;;  %v8405_v3 = vadd.f32 %v8377_v47, %v8373_v37  ;;  %v15039_v4 = vsub.f32 %v14967_v25, %v8336_v45 }
 0x4fa   :  { %v8388_v7 = vadd.f32 %v8387_v61, %v8379_v57  ;;  %v15042_v8 = vsub.f32 %v14983_v40, %v8336_v45  ;;  %v15045_v11 = vsub.f32 %v14994_v50, %v8336_v45  ;;  %v8372_v12 = vmul.f32 %v15036_v62, %v15036_v62 }
 0x4fb   :  { %v8406_v9 = vadd.f32 %v8405_v3, %v8381_v63  ;;  %v8376_v24 = vmul.f32 %v15039_v4, %v15039_v4  ;;  %v15052_v10 = vsub.f32 %v14965_v26, %v8338_v48  ;;  %v15055_v25 = vsub.f32 %v14969_v27, %v8338_v48 }
 0x4fc   :  { %v8389_v13 = vadd.f32 %v8388_v7, %v8383_v58  ;;  %v8364_v40 = vmul.f32 %v14979_v36, %v15042_v8  ;;  %v8368_v50 = vmul.f32 0.0, %v15045_v11  ;;  %v15061_v14 = vsub.f32 %v14985_v42, %v8338_v48 }
 0x4fd   :  { %v8407_v15 = vadd.f32 %v8406_v9, %v8385_v0  ;;  %v8396_v16 = vadd.f32 %v8376_v24, %v8372_v12  ;;  %v15064_v19 = vsub.f32 %v14996_v53, %v8338_v48  ;;  %v8374_v26 = vmul.f32 %v15052_v10, %v15052_v10 }
 0x4fe   :  { %v8390_v22 = vrot.slane %v8389_v13, 4  ;;  %v8380_v27 = vmul.f32 %v8364_v40, %v8364_v40  ;;  %v8366_v23 = vmul.f32 %v14979_v36, %v15061_v14  ;;  %v8378_v42 = vmul.f32 %v15055_v25, %v15055_v25 }
 0x4ff   :  { %v8408_v28 = vrot.slane %v8407_v15, 4  ;;  %v8370_v29 = vmul.f32 0.0, %v15064_v19  ;;  %v8384_v31 = vmul.f32 %v8368_v50, %v8368_v50 }
 0x500   :  { %v8391_v30 = vadd.f32 %v8390_v22, %v8389_v13  ;;  %v8397_v32 = vadd.f32 %v8396_v16, %v8380_v27  ;;  %v8382_v34 = vmul.f32 %v8366_v23, %v8366_v23  ;;  %v8414_v33 = vadd.f32 %v8378_v42, %v8374_v26  ;;  %v8451_v16 = vld [vmem:[%s15176_s3] sm:$0xf] }
 0x501   :  { %v8409_v53 = vadd.f32 %v8408_v28, %v8407_v15  ;;  %v8386_v41 = vmul.f32 %v8370_v29, %v8370_v29  ;;  %v8489_v22 = vld [vmem:[%s15177_s4] sm:$0xf]  ;;  %v8456_v23 = vrot.slane %v8451_v16, %v14940_v2  ;;  %v8464_v29 = vrot.slane %v8451_v16, %v14942_v5 }
 0x502   :  { %v8392_v38 = vrot.slane %v8391_v30, 2  ;;  %v8398_v39 = vadd.f32 %v8397_v32, %v8384_v31  ;;  %v8415_v43 = vadd.f32 %v8414_v33, %v8382_v34  ;;  %v8494_v28 = vrot.slane %v8489_v22, %v14940_v2 }
 0x503   :  { %v8410_v44 = vrot.slane %v8409_v53, 2  ;;  %v8502_v42 = vrot.slane %v8489_v22, %v14942_v5  ;;  %v8460_v31 = vrot.slane %v8451_v16, %v14947_v1  ;;  %v15085_v32 = vrot.slane %v8489_v22, %v14947_v1 }
 0x504   :  { %v8393_v45 = vadd.f32 %v8392_v38, %v8391_v30  ;;  %v8399_v48 = vrot.slane %v8398_v39, 4  ;;  %v8416_v17 = vadd.f32 %v8415_v43, %v8386_v41  ;;  %v15088_v34 = vrot.slane %v8451_v16, %v14949_v6 }
 0x505   :  { %v8411_v36 = vadd.f32 %v8410_v44, %v8409_v53  ;;  %v15091_v53 = vrot.slane %v8489_v22, %v14949_v6 }
 0x506   :  { %v8394_v20 = vrot.slane %v8393_v45, 1  ;;  %v8400_v35 = vadd.f32 %v8399_v48, %v8398_v39  ;;  %v8417_v21 = vrot.slane %v8416_v17, 4 }
 0x507   :  { %v8412_v18 = vrot.slane %v8411_v36, 1 }
 0x508   :  { %v8395_v46 = vadd.f32 %v8394_v20, %v8393_v45  ;;  %v8401_v37 = vrot.slane %v8400_v35, 2  ;;  %v8418_v57 = vadd.f32 %v8417_v21, %v8416_v17 }
 0x509   :  { %v8413_v47 = vadd.f32 %v8412_v18, %v8411_v36 }
 0x50a   :  { %v8423_v58 = vmul.f32 0.055555556, %v8395_v46  ;;  %v8402_v61 = vadd.f32 %v8401_v37, %v8400_v35  ;;  %v8419_v0 = vrot.slane %v8418_v57, 2 }
 0x50b   :  { %v8425_v63 = vmul.f32 0.055555556, %v8413_v47 }
 0x50c   :  { %v8427_v3 = vadd.f32 1e-05, %v8423_v58  ;;  %v8403_v7 = vrot.slane %v8402_v61, 1  ;;  %v8420_v9 = vadd.f32 %v8419_v0, %v8418_v57 }
 0x50d   :  { %v8429_v12 = vadd.f32 1e-05, %v8425_v63 }
 0x50e   :  { %11517 = vrsqrt.f32 %v8427_v3  ;;  %v8404_v24 = vadd.f32 %v8403_v7, %v8402_v61  ;;  %v8421_v13 = vrot.slane %v8420_v9, 1 }
 0x50f   :  { %11519 = vrsqrt.f32 %v8429_v12 }
 0x510   :  { %v8424_v40 = vmul.f32 0.055555556, %v8404_v24  ;;  %v8422_v50 = vadd.f32 %v8421_v13, %v8420_v9 }
 0x512   :  { %v8428_v15 = vadd.f32 1e-05, %v8424_v40  ;;  %v8426_v26 = vmul.f32 0.055555556, %v8422_v50 }
 0x514   :  { %11521 = vrsqrt.f32 %v8428_v15  ;;  %v8430_v27 = vadd.f32 1e-05, %v8426_v26 }
 0x516   :  { %11523 = vrsqrt.f32 %v8430_v27 }
 0x518   :  { %v11518_v30 = vpop.eup %11517 }
 0x519   :  { %v11520_v33 = vpop.eup %11519  ;;  %v8435_v2 = vmul.f32 %v11518_v30, %v15001_v51  ;;  %v8439_v38 = vmul.f32 %v11518_v30, %v15004_v52  ;;  %v8443_v5 = vmul.f32 %v11518_v30, %v15006_v49  ;;  %v8447_v39 = vmul.f32 %v11518_v30, %v15008_v54 }
 0x51a   :  { %v8437_v44 = vmul.f32 %v11520_v33, %v15011_v55  ;;  %v8441_v1 = vmul.f32 %v11520_v33, %v15014_v56  ;;  %v8445_v41 = vmul.f32 %v11520_v33, %v15017_v59  ;;  %v8449_v43 = vmul.f32 %v11520_v33, %v15019_v60 }
 0x51b   :  { %v8473_v45 = vmul.f32 %v8456_v23, %v8435_v2  ;;  %v8477_v6 = vmul.f32 %v8456_v23, %v8439_v38  ;;  %v8481_v48 = vmul.f32 %v8456_v23, %v8443_v5  ;;  %v8485_v36 = vmul.f32 %v8456_v23, %v8447_v39 }
 0x51c   :  { %v8475_v17 = vmul.f32 %v8464_v29, %v8437_v44  ;;  %v8479_v51 = vmul.f32 %v8464_v29, %v8441_v1  ;;  %v8483_v20 = vmul.f32 %v8464_v29, %v8445_v41  ;;  %v8487_v52 = vmul.f32 %v8464_v29, %v8449_v43 }
 0x51d   :  { %v8511_v35 = vadd.f32 %v8494_v28, %v8473_v45  ;;  %v15101_v49 = vadd.f32 %v8494_v28, %v8477_v6  ;;  %v15103_v54 = vadd.f32 %v8494_v28, %v8481_v48  ;;  %v15105_v55 = vadd.f32 %v8494_v28, %v8485_v36 }
 0x51e   :  { %v11522_v56 = vpop.eup %11521  ;;  %v15107_v18 = vadd.f32 %v8502_v42, %v8475_v17  ;;  %v15109_v59 = vadd.f32 %v8502_v42, %v8479_v51  ;;  %v15111_v60 = vadd.f32 %v8502_v42, %v8483_v20  ;;  %v15113_v21 = vadd.f32 %v8502_v42, %v8487_v52 }
 0x51f   :  { %v8527_v46 = vmul.f32 0.2, %v8511_v35  ;;  %v8531_v37 = vmul.f32 0.2, %v15101_v49  ;;  %v8535_v47 = vmul.f32 0.2, %v15103_v54  ;;  %v8436_v57 = vmul.f32 %v11522_v56, %v15036_v62 }
 0x520   :  { %v8539_v58 = vmul.f32 0.2, %v15105_v55  ;;  %v8529_v61 = vmul.f32 0.2, %v15107_v18  ;;  %v8533_v63 = vmul.f32 0.2, %v15109_v59  ;;  %v8440_v0 = vmul.f32 %v11522_v56, %v15039_v4  ;;  %v11524_v3 = vpop.eup %11523 }
 0x521   :  { %v8543_v7 = vmax.f32 %v8511_v35, %v8527_v46  ;;  %v8547_v12 = vmax.f32 %v15101_v49, %v8531_v37  ;;  %v8551_v9 = vmax.f32 %v15103_v54, %v8535_v47  ;;  %v8537_v24 = vmul.f32 0.2, %v15111_v60 }
 0x522   :  { %v8555_v13 = vmax.f32 %v15105_v55, %v8539_v58  ;;  %v8541_v62 = vmul.f32 0.2, %v15113_v21  ;;  %v8545_v40 = vmax.f32 %v15107_v18, %v8529_v61  ;;  %v8549_v50 = vmax.f32 %v15109_v59, %v8533_v63 }
 0x523   :  { %v8553_v15 = vmax.f32 %v15111_v60, %v8537_v24  ;;  %v8444_v4 = vmul.f32 %v11522_v56, %v15042_v8  ;;  %v8448_v16 = vmul.f32 %v11522_v56, %v15045_v11  ;;  %v8474_v26 = vmul.f32 %v8460_v31, %v8436_v57 }
 0x524   :  { %v8557_v22 = vmax.f32 %v15113_v21, %v8541_v62  ;;  %v8478_v27 = vmul.f32 %v8460_v31, %v8440_v0  ;;  %v8438_v23 = vmul.f32 %v11524_v3, %v15052_v10  ;;  %v8442_v28 = vmul.f32 %v11524_v3, %v15055_v25 }
 0x525   :  { %v8482_v29 = vmul.f32 %v8460_v31, %v8444_v4  ;;  %v8486_v42 = vmul.f32 %v8460_v31, %v8448_v16  ;;  %v8512_v30 = vadd.f32 %v15085_v32, %v8474_v26  ;;  %v8446_v33 = vmul.f32 %v11524_v3, %v15061_v14 }
 0x526   :  { %v8516_v2 = vadd.f32 %v15085_v32, %v8478_v27  ;;  %v8450_v8 = vmul.f32 %v11524_v3, %v15064_v19  ;;  %v8476_v11 = vmul.f32 %v15088_v34, %v8438_v23  ;;  %v8480_v38 = vmul.f32 %v15088_v34, %v8442_v28 }
 0x527   :  { %v8520_v5 = vadd.f32 %v15085_v32, %v8482_v29  ;;  %v8524_v10 = vadd.f32 %v15085_v32, %v8486_v42  ;;  %v8528_v39 = vmul.f32 0.2, %v8512_v30  ;;  %v8484_v25 = vmul.f32 %v15088_v34, %v8446_v33 }
 0x528   :  { %v8532_v31 = vmul.f32 0.2, %v8516_v2  ;;  %v8488_v44 = vmul.f32 %v15088_v34, %v8450_v8  ;;  %v8514_v14 = vadd.f32 %v15091_v53, %v8476_v11  ;;  %v8518_v1 = vadd.f32 %v15091_v53, %v8480_v38 }
 0x529   :  { %v8536_v41 = vmul.f32 0.2, %v8520_v5  ;;  %v8540_v19 = vmul.f32 0.2, %v8524_v10  ;;  %v8544_v43 = vmax.f32 %v8512_v30, %v8528_v39  ;;  %v8522_v45 = vadd.f32 %v15091_v53, %v8484_v25 }
 0x52a   :  { %v8548_v6 = vmax.f32 %v8516_v2, %v8532_v31  ;;  %v8526_v48 = vadd.f32 %v15091_v53, %v8488_v44  ;;  %v8530_v36 = vmul.f32 0.2, %v8514_v14  ;;  %v8534_v32 = vmul.f32 0.2, %v8518_v1 }
 0x52b   :  { %v8552_v17 = vmax.f32 %v8520_v5, %v8536_v41  ;;  %v8556_v51 = vmax.f32 %v8524_v10, %v8540_v19  ;;  %v9716_v20 = vpack.c.bf16 %v8544_v43, %v8543_v7  ;;  %v8538_v52 = vmul.f32 0.2, %v8522_v45 }
 0x52c   :  { %v9718_v35 = vpack.c.bf16 %v8548_v6, %v8547_v12  ;;  %v8542_v34 = vmul.f32 0.2, %v8526_v48  ;;  %v8546_v49 = vmax.f32 %v8514_v14, %v8530_v36  ;;  %v8550_v54 = vmax.f32 %v8518_v1, %v8534_v32 }
 0x52d   :  { %v9720_v55 = vpack.c.bf16 %v8552_v17, %v8551_v9  ;;  %v9722_v56 = vpack.c.bf16 %v8556_v51, %v8555_v13  ;;  %8607 = vst [vmem:[%s15178_s5] sm:$0xff] %v9716_v20  ;;  %v8554_v18 = vmax.f32 %v8522_v45, %v8538_v52 }
 0x52e   :  { %8609 = vst [vmem:[%s15178_s5 + $0x10] sm:$0xff] %v9718_v35  ;;  %v8558_v53 = vmax.f32 %v8526_v48, %v8542_v34  ;;  %v9717_v59 = vpack.c.bf16 %v8546_v49, %v8545_v40  ;;  %v9719_v60 = vpack.c.bf16 %v8550_v54, %v8549_v50 }
 0x52f   :  { %8611 = vst [vmem:[%s15178_s5 + $0x20] sm:$0xff] %v9720_v55  ;;  %8613 = vst [vmem:[%s15178_s5 + $0x30] sm:$0xff] %v9722_v56  ;;  %v9721_v21 = vpack.c.bf16 %v8554_v18, %v8553_v15 }
 0x530   :  { %v9723_v46 = vpack.c.bf16 %v8558_v53, %v8557_v22  ;;  %8608 = vst [vmem:[%s15178_s5 + $0x8] sm:$0xff] %v9717_v59  ;;  %8610 = vst [vmem:[%s15178_s5 + $0x18] sm:$0xff] %v9719_v60 }
 0x531   :  { %8612 = vst [vmem:[%s15178_s5 + $0x28] sm:$0xff] %v9721_v21 }
 0x532   :  { %8614 = vst [vmem:[%s15178_s5 + $0x38] sm:$0xff] %v9723_v46 }

// kernel: _lambda_.9
= control target key start
LH: loop header
LB: loop body
LE: loop exit
PB: predicated region body
PF: predicated region fallthrough
CT: control target
= control target key end

     0   :  { %s9434_s1 = inlined_call_operand.vmem [shape: bf16[8192,128], index: 1, kind: input, shape index: {}]   ;;  %s9435_s3 = inlined_call_operand.vmem [shape: f32[1,128], index: 3, kind: input, shape index: {}]   ;;  %s9436_s4 = inlined_call_operand.vmem [shape: f32[1,128], index: 4, kind: input, shape index: {}]   ;;  %s9437_s0 = inlined_call_operand.vmem [shape: bf16[16,8192], index: 0, kind: input, shape index: {}]   ;;  %s9438_s2 = inlined_call_operand.vmem [shape: f32[1,128], index: 2, kind: input, shape index: {}]   ;;  %s9439_s5 = inlined_call_operand.vmem [shape: f32[16,128], index: 5, kind: output, shape index: {}]  }
   0x1   :  { %v7107_v0 = vld [vmem:[%s9434_s1 + $0x40] sm:$0xff]   ;;  %v7111_v4 = vld [vmem:[%s9434_s1 + $0x48] sm:$0xff]   ;;  %v7115_v8 = vld [vmem:[%s9434_s1 + $0x50] sm:$0xff]  }
   0x2   :  { %v7108_v1 = vld [vmem:[%s9434_s1 + $0xc0] sm:$0xff]   ;;  %6403 = vmatprep.subr.bf16.mxu0 %v7107_v0  ;;  %v7112_v5 = vld [vmem:[%s9434_s1 + $0xc8] sm:$0xff]   ;;  %v7116_v9 = vld [vmem:[%s9434_s1 + $0xd0] sm:$0xff]  }
   0x3   :  { %v7109_v2 = vld [vmem:[%s9434_s1] sm:$0xff]   ;;  %6425 = vmatprep.subr.bf16.mxu1 %v7108_v1  ;;  %v7113_v6 = vld [vmem:[%s9434_s1 + $0x8] sm:$0xff]   ;;  %v7117_v10 = vld [vmem:[%s9434_s1 + $0x10] sm:$0xff]  }
   0x4   :  { %v7110_v3 = vld [vmem:[%s9434_s1 + $0x80] sm:$0xff]   ;;  %6404 = vmatpush3.bf16.msra.mxu0 %v7109_v2  ;;  %v7114_v7 = vld [vmem:[%s9434_s1 + $0x88] sm:$0xff]   ;;  %v7118_v11 = vld [vmem:[%s9434_s1 + $0x90] sm:$0xff]  }
   0x5   :  { %6426 = vmatpush3.bf16.msra.mxu1 %v7110_v3  ;;  %6405 = vmatprep.subr.bf16.mxu0 %v7111_v4  ;;  %v7119_v12 = vld [vmem:[%s9434_s1 + $0x58] sm:$0xff]   ;;  %v7123_v16 = vld [vmem:[%s9434_s1 + $0x60] sm:$0xff]   ;;  %v7127_v20 = vld [vmem:[%s9434_s1 + $0x68] sm:$0xff]  }
   0x6   :  { %6427 = vmatprep.subr.bf16.mxu1 %v7112_v5  ;;  %v7120_v13 = vld [vmem:[%s9434_s1 + $0xd8] sm:$0xff]   ;;  %v7124_v17 = vld [vmem:[%s9434_s1 + $0xe0] sm:$0xff]   ;;  %v7128_v21 = vld [vmem:[%s9434_s1 + $0xe8] sm:$0xff]  }
   0x7   :  { %v7121_v14 = vld [vmem:[%s9434_s1 + $0x18] sm:$0xff]   ;;  %v7125_v18 = vld [vmem:[%s9434_s1 + $0x20] sm:$0xff]   ;;  %v7129_v22 = vld [vmem:[%s9434_s1 + $0x28] sm:$0xff]  }
   0x8   :  { %6406 = vmatpush3.bf16.msra.mxu0 %v7113_v6  ;;  %v7122_v15 = vld [vmem:[%s9434_s1 + $0x98] sm:$0xff]   ;;  %v7126_v19 = vld [vmem:[%s9434_s1 + $0xa0] sm:$0xff]   ;;  %v7130_v23 = vld [vmem:[%s9434_s1 + $0xa8] sm:$0xff]  }
   0x9   :  { %6428 = vmatpush3.bf16.msra.mxu1 %v7114_v7  ;;  %6407 = vmatprep.subr.bf16.mxu0 %v7115_v8  ;;  %v7131_v24 = vld [vmem:[%s9434_s1 + $0x70] sm:$0xff]   ;;  %v7135_v28 = vld [vmem:[%s9434_s1 + $0x78] sm:$0xff]   ;;  %v21_v32 = vld [vmem:[%s9437_s0] sm:$0xff] }
   0xa   :  { %6429 = vmatprep.subr.bf16.mxu1 %v7116_v9  ;;  %v7132_v25 = vld [vmem:[%s9434_s1 + $0xf0] sm:$0xff]   ;;  %v7136_v29 = vld [vmem:[%s9434_s1 + $0xf8] sm:$0xff]   ;;  %v53_v33 = vld [vmem:[%s9437_s0 + $0x100] sm:$0xff] }
   0xb   :  { %v7133_v26 = vld [vmem:[%s9434_s1 + $0x30] sm:$0xff]   ;;  %v7137_v30 = vld [vmem:[%s9434_s1 + $0x38] sm:$0xff]   ;;  %v22_v34 = vld [vmem:[%s9437_s0 + $0x8] sm:$0xff]  ;;  %v5827_v35 = vcombine.low %v21_v32, %v53_v33  ;;  %v5828_v36 = vcombine.high %v21_v32, %v53_v33 }
   0xc   :  { %6408 = vmatpush3.bf16.msra.mxu0 %v7117_v10  ;;  %v7134_v27 = vld [vmem:[%s9434_s1 + $0xb0] sm:$0xff]   ;;  %v7138_v31 = vld [vmem:[%s9434_s1 + $0xb8] sm:$0xff]   ;;  %v54_v37 = vld [vmem:[%s9437_s0 + $0x108] sm:$0xff] }
   0xd   :  { %6430 = vmatpush3.bf16.msra.mxu1 %v7118_v11  ;;  %6409 = vmatprep.subr.bf16.mxu0 %v7119_v12  ;;  %v5829_v38 = vcombine.low %v22_v34, %v54_v37  ;;  %v5830_v39 = vcombine.high %v22_v34, %v54_v37  ;;  %v7139_v40 = vld [vmem:[%s9434_s1 + $0x140] sm:$0xff]   ;;  %v7143_v44 = vld [vmem:[%s9434_s1 + $0x148] sm:$0xff]   ;;  %v7147_v48 = vld [vmem:[%s9434_s1 + $0x150] sm:$0xff]  }
   0xe   :  { %6431 = vmatprep.subr.bf16.mxu1 %v7120_v13  ;;  %4540 = vmatprep.mubr.bf16.mxu0 %v5828_v36  ;;  %v7140_v41 = vld [vmem:[%s9434_s1 + $0x1c0] sm:$0xff]   ;;  %v7144_v45 = vld [vmem:[%s9434_s1 + $0x1c8] sm:$0xff]   ;;  %v7148_v49 = vld [vmem:[%s9434_s1 + $0x1d0] sm:$0xff]  }
   0xf   :  { %4581 = vmatprep.mubr.bf16.mxu1 %v5830_v39  ;;  %v7141_v42 = vld [vmem:[%s9434_s1 + $0x100] sm:$0xff]   ;;  %v7145_v46 = vld [vmem:[%s9434_s1 + $0x108] sm:$0xff]   ;;  %v7149_v50 = vld [vmem:[%s9434_s1 + $0x110] sm:$0xff]  }
  0x10   :  { %6410 = vmatpush3.bf16.msra.mxu0 %v7121_v14  ;;  %v7142_v43 = vld [vmem:[%s9434_s1 + $0x180] sm:$0xff]   ;;  %v7146_v47 = vld [vmem:[%s9434_s1 + $0x188] sm:$0xff]   ;;  %v7150_v51 = vld [vmem:[%s9434_s1 + $0x190] sm:$0xff]  }
  0x11   :  { %6432 = vmatpush3.bf16.msra.mxu1 %v7122_v15  ;;  %6411 = vmatprep.subr.bf16.mxu0 %v7123_v16  ;;  %v7151_v52 = vld [vmem:[%s9434_s1 + $0x158] sm:$0xff]   ;;  %v7155_v56 = vld [vmem:[%s9434_s1 + $0x160] sm:$0xff]   ;;  %v7159_v60 = vld [vmem:[%s9434_s1 + $0x168] sm:$0xff]  }
  0x12   :  { %6433 = vmatprep.subr.bf16.mxu1 %v7124_v17  ;;  %v7152_v53 = vld [vmem:[%s9434_s1 + $0x1d8] sm:$0xff]   ;;  %v7156_v57 = vld [vmem:[%s9434_s1 + $0x1e0] sm:$0xff]   ;;  %v7160_v61 = vld [vmem:[%s9434_s1 + $0x1e8] sm:$0xff]  }
  0x13   :  { %v7153_v54 = vld [vmem:[%s9434_s1 + $0x118] sm:$0xff]   ;;  %v7157_v58 = vld [vmem:[%s9434_s1 + $0x120] sm:$0xff]   ;;  %v7161_v62 = vld [vmem:[%s9434_s1 + $0x128] sm:$0xff]  }
  0x14   :  { %6412 = vmatpush3.bf16.msra.mxu0 %v7125_v18  ;;  %v7154_v55 = vld [vmem:[%s9434_s1 + $0x198] sm:$0xff]   ;;  %v7158_v59 = vld [vmem:[%s9434_s1 + $0x1a0] sm:$0xff]   ;;  %v7162_v63 = vld [vmem:[%s9434_s1 + $0x1a8] sm:$0xff]  }
  0x15   :  { %6434 = vmatpush3.bf16.msra.mxu1 %v7126_v19  ;;  %6413 = vmatprep.subr.bf16.mxu0 %v7127_v20  ;;  %v7163_v0 = vld [vmem:[%s9434_s1 + $0x170] sm:$0xff]   ;;  %v7167_v4 = vld [vmem:[%s9434_s1 + $0x178] sm:$0xff]   ;;  %v7171_v16 = vld [vmem:[%s9434_s1 + $0x240] sm:$0xff]  }
  0x16   :  { %6435 = vmatprep.subr.bf16.mxu1 %v7128_v21  ;;  %v7164_v1 = vld [vmem:[%s9434_s1 + $0x1f0] sm:$0xff]   ;;  %v7168_v5 = vld [vmem:[%s9434_s1 + $0x1f8] sm:$0xff]   ;;  %v7172_v17 = vld [vmem:[%s9434_s1 + $0x2c0] sm:$0xff]  }
  0x17   :  { %v7165_v2 = vld [vmem:[%s9434_s1 + $0x130] sm:$0xff]   ;;  %v7169_v6 = vld [vmem:[%s9434_s1 + $0x138] sm:$0xff]   ;;  %v7173_v18 = vld [vmem:[%s9434_s1 + $0x200] sm:$0xff]  }
  0x18   :  { %6414 = vmatpush3.bf16.msra.mxu0 %v7129_v22  ;;  %v7166_v3 = vld [vmem:[%s9434_s1 + $0x1b0] sm:$0xff]   ;;  %v7170_v7 = vld [vmem:[%s9434_s1 + $0x1b8] sm:$0xff]   ;;  %v7174_v19 = vld [vmem:[%s9434_s1 + $0x280] sm:$0xff]  }
  0x19   :  { %6436 = vmatpush3.bf16.msra.mxu1 %v7130_v23  ;;  %6415 = vmatprep.subr.bf16.mxu0 %v7131_v24  ;;  %v23_v8 = vld [vmem:[%s9437_s0 + $0x10] sm:$0xff]  ;;  %v24_v12 = vld [vmem:[%s9437_s0 + $0x18] sm:$0xff]  ;;  %v7175_v20 = vld [vmem:[%s9434_s1 + $0x248] sm:$0xff]  }
  0x1a   :  { %6437 = vmatprep.subr.bf16.mxu1 %v7132_v25  ;;  %v55_v9 = vld [vmem:[%s9437_s0 + $0x110] sm:$0xff]  ;;  %v56_v13 = vld [vmem:[%s9437_s0 + $0x118] sm:$0xff]  ;;  %v7176_v21 = vld [vmem:[%s9434_s1 + $0x2c8] sm:$0xff]  }
  0x1b   :  { %v5831_v10 = vcombine.low %v23_v8, %v55_v9  ;;  %v5832_v11 = vcombine.high %v23_v8, %v55_v9  ;;  %v5833_v14 = vcombine.low %v24_v12, %v56_v13  ;;  %v5834_v15 = vcombine.high %v24_v12, %v56_v13  ;;  %v7177_v22 = vld [vmem:[%s9434_s1 + $0x208] sm:$0xff]   ;;  %v7179_v24 = vld [vmem:[%s9434_s1 + $0x250] sm:$0xff]   ;;  %v7187_v32 = vld [vmem:[%s9434_s1 + $0x260] sm:$0xff]  }
  0x1c   :  { %6416 = vmatpush3.bf16.msra.mxu0 %v7133_v26  ;;  %v7178_v23 = vld [vmem:[%s9434_s1 + $0x288] sm:$0xff]   ;;  %v7180_v25 = vld [vmem:[%s9434_s1 + $0x2d0] sm:$0xff]   ;;  %v7188_v33 = vld [vmem:[%s9434_s1 + $0x2e0] sm:$0xff]  }
  0x1d   :  { %6438 = vmatpush3.bf16.msra.mxu1 %v7134_v27  ;;  %6417 = vmatprep.subr.bf16.mxu0 %v7135_v28  ;;  %v7181_v26 = vld [vmem:[%s9434_s1 + $0x210] sm:$0xff]   ;;  %v7183_v28 = vld [vmem:[%s9434_s1 + $0x258] sm:$0xff]   ;;  %v7189_v34 = vld [vmem:[%s9434_s1 + $0x220] sm:$0xff]  }
  0x1e   :  { %6439 = vmatprep.subr.bf16.mxu1 %v7136_v29  ;;  %v7182_v27 = vld [vmem:[%s9434_s1 + $0x290] sm:$0xff]   ;;  %v7184_v29 = vld [vmem:[%s9434_s1 + $0x2d8] sm:$0xff]   ;;  %v7191_v36 = vld [vmem:[%s9434_s1 + $0x268] sm:$0xff]  }
  0x1f   :  { %v7192_v37 = vld [vmem:[%s9434_s1 + $0x2e8] sm:$0xff]   ;;  %v7219_v8 = vld [vmem:[%s9434_s1 + $0x360] sm:$0xff]  }
  0x20   :  { %6418 = vmatpush3.bf16.msra.mxu0 %v7137_v30  ;;  %v7185_v30 = vld [vmem:[%s9434_s1 + $0x218] sm:$0xff]   ;;  %v7194_v39 = vld [vmem:[%s9434_s1 + $0x2a8] sm:$0xff]   ;;  %v7220_v9 = vld [vmem:[%s9434_s1 + $0x3e0] sm:$0xff]  }
  0x21   :  { %6440 = vmatpush3.bf16.msra.mxu1 %v7138_v31  ;;  %6447 = vmatprep.subr.bf16.mxu0 %v7139_v40  ;;  %v7186_v31 = vld [vmem:[%s9434_s1 + $0x298] sm:$0xff]   ;;  %v7195_v40 = vld [vmem:[%s9434_s1 + $0x270] sm:$0xff]   ;;  %v7223_v12 = vld [vmem:[%s9434_s1 + $0x368] sm:$0xff]  }
  0x22   :  { %6469 = vmatprep.subr.bf16.mxu1 %v7140_v41  ;;  %v7196_v41 = vld [vmem:[%s9434_s1 + $0x2f0] sm:$0xff]   ;;  %v7224_v13 = vld [vmem:[%s9434_s1 + $0x3e8] sm:$0xff]  }
  0x23   :  { %4541 = vmatmul.mubr.bf16.vlgmr.msra.gmra.mrb[0].mxu0 %v5827_v35  ;;  %v7190_v35 = vld [vmem:[%s9434_s1 + $0x2a0] sm:$0xff]  }
  0x24   :  { %4582 = vmatmul.mubr.bf16.vlgmr.msra.gmra.mrb[0].mxu1 %v5829_v38  ;;  %6448 = vmatpush3.bf16.msra.mxu0 %v7141_v42  ;;  %v7193_v38 = vld [vmem:[%s9434_s1 + $0x228] sm:$0xff]   ;;  %v7197_v42 = vld [vmem:[%s9434_s1 + $0x230] sm:$0xff]  }
  0x25   :  { %6470 = vmatpush3.bf16.msra.mxu1 %v7142_v43  ;;  %6449 = vmatprep.subr.bf16.mxu0 %v7143_v44  ;;  %v7198_v43 = vld [vmem:[%s9434_s1 + $0x2b0] sm:$0xff]   ;;  %v7199_v44 = vld [vmem:[%s9434_s1 + $0x278] sm:$0xff]  }
  0x26   :  { %6471 = vmatprep.subr.bf16.mxu1 %v7144_v45  ;;  %4622 = vmatprep.mubr.bf16.mxu0 %v5832_v11  ;;  %v7200_v45 = vld [vmem:[%s9434_s1 + $0x2f8] sm:$0xff]   ;;  %v7222_v11 = vld [vmem:[%s9434_s1 + $0x3a0] sm:$0xff]  }
  0x27   :  { %4663 = vmatprep.mubr.bf16.mxu1 %v5834_v15  ;;  %v7226_v15 = vld [vmem:[%s9434_s1 + $0x3a8] sm:$0xff]  }
  0x28   :  { %6450 = vmatpush3.bf16.msra.mxu0 %v7145_v46  ;;  %v7201_v46 = vld [vmem:[%s9434_s1 + $0x238] sm:$0xff]  }
  0x29   :  { %6472 = vmatpush3.bf16.msra.mxu1 %v7146_v47  ;;  %6451 = vmatprep.subr.bf16.mxu0 %v7147_v48  ;;  %v7202_v47 = vld [vmem:[%s9434_s1 + $0x2b8] sm:$0xff]   ;;  %v25_v48 = vld [vmem:[%s9437_s0 + $0x20] sm:$0xff] }
  0x2a   :  { %6473 = vmatprep.subr.bf16.mxu1 %v7148_v49  ;;  %v57_v49 = vld [vmem:[%s9437_s0 + $0x120] sm:$0xff] }
  0x2c   :  { %6452 = vmatpush3.bf16.msra.mxu0 %v7149_v50  ;;  %v26_v50 = vld [vmem:[%s9437_s0 + $0x28] sm:$0xff] }
  0x2d   :  { %6474 = vmatpush3.bf16.msra.mxu1 %v7150_v51  ;;  %6453 = vmatprep.subr.bf16.mxu0 %v7151_v52  ;;  %v58_v51 = vld [vmem:[%s9437_s0 + $0x128] sm:$0xff]  ;;  %v5835_v52 = vcombine.low %v25_v48, %v57_v49 }
  0x2e   :  { %6475 = vmatprep.subr.bf16.mxu1 %v7152_v53  ;;  %v5836_v53 = vcombine.high %v25_v48, %v57_v49  ;;  %v7251_v48 = vld [vmem:[%s9434_s1 + $0x460] sm:$0xff]  }
  0x2f   :  { %v7252_v49 = vld [vmem:[%s9434_s1 + $0x4e0] sm:$0xff]  }
  0x30   :  { %6454 = vmatpush3.bf16.msra.mxu0 %v7153_v54  ;;  %v5837_v54 = vcombine.low %v26_v50, %v58_v51 }
  0x31   :  { %6476 = vmatpush3.bf16.msra.mxu1 %v7154_v55  ;;  %6455 = vmatprep.subr.bf16.mxu0 %v7155_v56  ;;  %v5838_v55 = vcombine.high %v26_v50, %v58_v51  ;;  %v7203_v56 = vld [vmem:[%s9434_s1 + $0x340] sm:$0xff]  }
  0x32   :  { %6477 = vmatprep.subr.bf16.mxu1 %v7156_v57  ;;  %v7204_v57 = vld [vmem:[%s9434_s1 + $0x3c0] sm:$0xff]  }
  0x33   :  { %v7253_v50 = vld [vmem:[%s9434_s1 + $0x420] sm:$0xff]  }
  0x34   :  { %6456 = vmatpush3.bf16.msra.mxu0 %v7157_v58  ;;  %v7205_v58 = vld [vmem:[%s9434_s1 + $0x300] sm:$0xff]  }
  0x35   :  { %6478 = vmatpush3.bf16.msra.mxu1 %v7158_v59  ;;  %6457 = vmatprep.subr.bf16.mxu0 %v7159_v60  ;;  %v7206_v59 = vld [vmem:[%s9434_s1 + $0x380] sm:$0xff]   ;;  %v7207_v60 = vld [vmem:[%s9434_s1 + $0x348] sm:$0xff]  }
  0x36   :  { %6479 = vmatprep.subr.bf16.mxu1 %v7160_v61  ;;  %v7208_v61 = vld [vmem:[%s9434_s1 + $0x3c8] sm:$0xff]   ;;  %v7254_v51 = vld [vmem:[%s9434_s1 + $0x4a0] sm:$0xff]  }
  0x38   :  { %6458 = vmatpush3.bf16.msra.mxu0 %v7161_v62  ;;  %v7209_v62 = vld [vmem:[%s9434_s1 + $0x308] sm:$0xff]  }
  0x39   :  { %6480 = vmatpush3.bf16.msra.mxu1 %v7162_v63  ;;  %6459 = vmatprep.subr.bf16.mxu0 %v7163_v0  ;;  %v7210_v63 = vld [vmem:[%s9434_s1 + $0x388] sm:$0xff]   ;;  %v7211_v0 = vld [vmem:[%s9434_s1 + $0x350] sm:$0xff]  }
  0x3a   :  { %6481 = vmatprep.subr.bf16.mxu1 %v7164_v1  ;;  %v7212_v1 = vld [vmem:[%s9434_s1 + $0x3d0] sm:$0xff]  }
  0x3c   :  { %6460 = vmatpush3.bf16.msra.mxu0 %v7165_v2  ;;  %v7213_v2 = vld [vmem:[%s9434_s1 + $0x310] sm:$0xff]  }
  0x3d   :  { %6482 = vmatpush3.bf16.msra.mxu1 %v7166_v3  ;;  %6461 = vmatprep.subr.bf16.mxu0 %v7167_v4  ;;  %v7214_v3 = vld [vmem:[%s9434_s1 + $0x390] sm:$0xff]   ;;  %v7215_v4 = vld [vmem:[%s9434_s1 + $0x358] sm:$0xff]  }
  0x3e   :  { %6483 = vmatprep.subr.bf16.mxu1 %v7168_v5  ;;  %v7216_v5 = vld [vmem:[%s9434_s1 + $0x3d8] sm:$0xff]  }
  0x40   :  { %6462 = vmatpush3.bf16.msra.mxu0 %v7169_v6  ;;  %v7217_v6 = vld [vmem:[%s9434_s1 + $0x318] sm:$0xff]  }
  0x41   :  { %6484 = vmatpush3.bf16.msra.mxu1 %v7170_v7  ;;  %6491 = vmatprep.subr.bf16.mxu0 %v7171_v16  ;;  %v7218_v7 = vld [vmem:[%s9434_s1 + $0x398] sm:$0xff]   ;;  %v7227_v16 = vld [vmem:[%s9434_s1 + $0x370] sm:$0xff]  }
  0x42   :  { %6513 = vmatprep.subr.bf16.mxu1 %v7172_v17  ;;  %v7228_v17 = vld [vmem:[%s9434_s1 + $0x3f0] sm:$0xff]  }
  0x43   :  { %4623 = vmatmul.mubr.bf16.vlgmr.msra.gmra.mrb[4].mxu0 %v5831_v10  ;;  %v7221_v10 = vld [vmem:[%s9434_s1 + $0x320] sm:$0xff]  }
  0x44   :  { %4664 = vmatmul.mubr.bf16.vlgmr.msra.gmra.mrb[4].mxu1 %v5833_v14  ;;  %6492 = vmatpush3.bf16.msra.mxu0 %v7173_v18  ;;  %v7225_v14 = vld [vmem:[%s9434_s1 + $0x328] sm:$0xff]   ;;  %v7229_v18 = vld [vmem:[%s9434_s1 + $0x330] sm:$0xff]  }
  0x45   :  { %6514 = vmatpush3.bf16.msra.mxu1 %v7174_v19  ;;  %6493 = vmatprep.subr.bf16.mxu0 %v7175_v20  ;;  %v7230_v19 = vld [vmem:[%s9434_s1 + $0x3b0] sm:$0xff]   ;;  %v7231_v20 = vld [vmem:[%s9434_s1 + $0x378] sm:$0xff]  }
  0x46   :  { %6515 = vmatprep.subr.bf16.mxu1 %v7176_v21  ;;  %4704 = vmatprep.mubr.bf16.mxu0 %v5836_v53  ;;  %v7232_v21 = vld [vmem:[%s9434_s1 + $0x3f8] sm:$0xff]   ;;  %v7256_v53 = vld [vmem:[%s9434_s1 + $0x4e8] sm:$0xff]  }
  0x47   :  { %4745 = vmatprep.mubr.bf16.mxu1 %v5838_v55  ;;  %v7258_v55 = vld [vmem:[%s9434_s1 + $0x4a8] sm:$0xff]  }
  0x48   :  { %6494 = vmatpush3.bf16.msra.mxu0 %v7177_v22  ;;  %v7233_v22 = vld [vmem:[%s9434_s1 + $0x338] sm:$0xff]  }
  0x49   :  { %6516 = vmatpush3.bf16.msra.mxu1 %v7178_v23  ;;  %6495 = vmatprep.subr.bf16.mxu0 %v7179_v24  ;;  %v7234_v23 = vld [vmem:[%s9434_s1 + $0x3b8] sm:$0xff]   ;;  %v27_v24 = vld [vmem:[%s9437_s0 + $0x30] sm:$0xff] }
  0x4a   :  { %6517 = vmatprep.subr.bf16.mxu1 %v7180_v25  ;;  %v59_v25 = vld [vmem:[%s9437_s0 + $0x130] sm:$0xff] }
  0x4c   :  { %6496 = vmatpush3.bf16.msra.mxu0 %v7181_v26  ;;  %v28_v26 = vld [vmem:[%s9437_s0 + $0x38] sm:$0xff] }
  0x4d   :  { %6518 = vmatpush3.bf16.msra.mxu1 %v7182_v27  ;;  %6497 = vmatprep.subr.bf16.mxu0 %v7183_v28  ;;  %v5839_v27 = vcombine.low %v27_v24, %v59_v25  ;;  %v5840_v28 = vcombine.high %v27_v24, %v59_v25  ;;  %v7283_v24 = vld [vmem:[%s9434_s1 + $0x560] sm:$0xff]  }
  0x4e   :  { %6519 = vmatprep.subr.bf16.mxu1 %v7184_v29  ;;  %v60_v29 = vld [vmem:[%s9437_s0 + $0x138] sm:$0xff]  ;;  %v7284_v25 = vld [vmem:[%s9434_s1 + $0x5e0] sm:$0xff]  }
  0x50   :  { %6498 = vmatpush3.bf16.msra.mxu0 %v7185_v30  ;;  %v5841_v30 = vcombine.low %v28_v26, %v60_v29 }
  0x51   :  { %6520 = vmatpush3.bf16.msra.mxu1 %v7186_v31  ;;  %6499 = vmatprep.subr.bf16.mxu0 %v7187_v32  ;;  %v5842_v31 = vcombine.high %v28_v26, %v60_v29  ;;  %v7235_v32 = vld [vmem:[%s9434_s1 + $0x440] sm:$0xff]   ;;  %v7288_v29 = vld [vmem:[%s9434_s1 + $0x5e8] sm:$0xff]  }
  0x52   :  { %6521 = vmatprep.subr.bf16.mxu1 %v7188_v33  ;;  %v7236_v33 = vld [vmem:[%s9434_s1 + $0x4c0] sm:$0xff]  }
  0x53   :  { %v7285_v26 = vld [vmem:[%s9434_s1 + $0x520] sm:$0xff]  }
  0x54   :  { %6500 = vmatpush3.bf16.msra.mxu0 %v7189_v34  ;;  %v7237_v34 = vld [vmem:[%s9434_s1 + $0x400] sm:$0xff]  }
  0x55   :  { %6522 = vmatpush3.bf16.msra.mxu1 %v7190_v35  ;;  %6501 = vmatprep.subr.bf16.mxu0 %v7191_v36  ;;  %v7238_v35 = vld [vmem:[%s9434_s1 + $0x480] sm:$0xff]   ;;  %v7239_v36 = vld [vmem:[%s9434_s1 + $0x448] sm:$0xff]  }
  0x56   :  { %6523 = vmatprep.subr.bf16.mxu1 %v7192_v37  ;;  %v7240_v37 = vld [vmem:[%s9434_s1 + $0x4c8] sm:$0xff]  }
  0x58   :  { %6502 = vmatpush3.bf16.msra.mxu0 %v7193_v38  ;;  %v7241_v38 = vld [vmem:[%s9434_s1 + $0x408] sm:$0xff]  }
  0x59   :  { %6524 = vmatpush3.bf16.msra.mxu1 %v7194_v39  ;;  %6503 = vmatprep.subr.bf16.mxu0 %v7195_v40  ;;  %v7242_v39 = vld [vmem:[%s9434_s1 + $0x488] sm:$0xff]   ;;  %v7243_v40 = vld [vmem:[%s9434_s1 + $0x450] sm:$0xff]  }
  0x5a   :  { %6525 = vmatprep.subr.bf16.mxu1 %v7196_v41  ;;  %v7244_v41 = vld [vmem:[%s9434_s1 + $0x4d0] sm:$0xff]  }
  0x5c   :  { %6504 = vmatpush3.bf16.msra.mxu0 %v7197_v42  ;;  %v7245_v42 = vld [vmem:[%s9434_s1 + $0x410] sm:$0xff]  }
  0x5d   :  { %6526 = vmatpush3.bf16.msra.mxu1 %v7198_v43  ;;  %6505 = vmatprep.subr.bf16.mxu0 %v7199_v44  ;;  %v7246_v43 = vld [vmem:[%s9434_s1 + $0x490] sm:$0xff]   ;;  %v7247_v44 = vld [vmem:[%s9434_s1 + $0x458] sm:$0xff]  }
  0x5e   :  { %6527 = vmatprep.subr.bf16.mxu1 %v7200_v45  ;;  %v7248_v45 = vld [vmem:[%s9434_s1 + $0x4d8] sm:$0xff]  }
  0x60   :  { %6506 = vmatpush3.bf16.msra.mxu0 %v7201_v46  ;;  %v7249_v46 = vld [vmem:[%s9434_s1 + $0x418] sm:$0xff]  }
  0x61   :  { %6528 = vmatpush3.bf16.msra.mxu1 %v7202_v47  ;;  %6535 = vmatprep.subr.bf16.mxu0 %v7203_v56  ;;  %v7250_v47 = vld [vmem:[%s9434_s1 + $0x498] sm:$0xff]   ;;  %v7259_v56 = vld [vmem:[%s9434_s1 + $0x470] sm:$0xff]  }
  0x62   :  { %6557 = vmatprep.subr.bf16.mxu1 %v7204_v57  ;;  %v7260_v57 = vld [vmem:[%s9434_s1 + $0x4f0] sm:$0xff]  }
  0x63   :  { %4705 = vmatmul.mubr.bf16.vlgmr.msra.gmra.mrb[8].mxu0 %v5835_v52  ;;  %v7255_v52 = vld [vmem:[%s9434_s1 + $0x468] sm:$0xff]  }
  0x64   :  { %4746 = vmatmul.mubr.bf16.vlgmr.msra.gmra.mrb[8].mxu1 %v5837_v54  ;;  %6536 = vmatpush3.bf16.msra.mxu0 %v7205_v58  ;;  %v7257_v54 = vld [vmem:[%s9434_s1 + $0x428] sm:$0xff]   ;;  %v7261_v58 = vld [vmem:[%s9434_s1 + $0x430] sm:$0xff]  }
  0x65   :  { %6558 = vmatpush3.bf16.msra.mxu1 %v7206_v59  ;;  %6537 = vmatprep.subr.bf16.mxu0 %v7207_v60  ;;  %v7262_v59 = vld [vmem:[%s9434_s1 + $0x4b0] sm:$0xff]   ;;  %v7263_v60 = vld [vmem:[%s9434_s1 + $0x478] sm:$0xff]  }
  0x66   :  { %6559 = vmatprep.subr.bf16.mxu1 %v7208_v61  ;;  %4786 = vmatprep.mubr.bf16.mxu0 %v5840_v28  ;;  %v7264_v61 = vld [vmem:[%s9434_s1 + $0x4f8] sm:$0xff]   ;;  %v7287_v28 = vld [vmem:[%s9434_s1 + $0x568] sm:$0xff]  }
  0x67   :  { %4827 = vmatprep.mubr.bf16.mxu1 %v5842_v31  ;;  %v7290_v31 = vld [vmem:[%s9434_s1 + $0x5a8] sm:$0xff]  }
  0x68   :  { %6538 = vmatpush3.bf16.msra.mxu0 %v7209_v62  ;;  %v7265_v62 = vld [vmem:[%s9434_s1 + $0x438] sm:$0xff]  }
  0x69   :  { %6560 = vmatpush3.bf16.msra.mxu1 %v7210_v63  ;;  %6539 = vmatprep.subr.bf16.mxu0 %v7211_v0  ;;  %v7266_v63 = vld [vmem:[%s9434_s1 + $0x4b8] sm:$0xff]   ;;  %v29_v0 = vld [vmem:[%s9437_s0 + $0x40] sm:$0xff] }
  0x6a   :  { %6561 = vmatprep.subr.bf16.mxu1 %v7212_v1  ;;  %v61_v1 = vld [vmem:[%s9437_s0 + $0x140] sm:$0xff] }
  0x6c   :  { %6540 = vmatpush3.bf16.msra.mxu0 %v7213_v2  ;;  %v5843_v2 = vcombine.low %v29_v0, %v61_v1 }
  0x6d   :  { %6562 = vmatpush3.bf16.msra.mxu1 %v7214_v3  ;;  %6541 = vmatprep.subr.bf16.mxu0 %v7215_v4  ;;  %v5844_v3 = vcombine.high %v29_v0, %v61_v1  ;;  %v30_v4 = vld [vmem:[%s9437_s0 + $0x48] sm:$0xff]  ;;  %v7315_v0 = vld [vmem:[%s9434_s1 + $0x660] sm:$0xff]  }
  0x6e   :  { %6563 = vmatprep.subr.bf16.mxu1 %v7216_v5  ;;  %v62_v5 = vld [vmem:[%s9437_s0 + $0x148] sm:$0xff]  ;;  %v7316_v1 = vld [vmem:[%s9434_s1 + $0x6e0] sm:$0xff]  }
  0x70   :  { %6542 = vmatpush3.bf16.msra.mxu0 %v7217_v6  ;;  %v5845_v6 = vcombine.low %v30_v4, %v62_v5 }
  0x71   :  { %6564 = vmatpush3.bf16.msra.mxu1 %v7218_v7  ;;  %6543 = vmatprep.subr.bf16.mxu0 %v7219_v8  ;;  %v5846_v7 = vcombine.high %v30_v4, %v62_v5  ;;  %v7267_v8 = vld [vmem:[%s9434_s1 + $0x540] sm:$0xff]   ;;  %v7319_v4 = vld [vmem:[%s9434_s1 + $0x668] sm:$0xff]  }
  0x72   :  { %6565 = vmatprep.subr.bf16.mxu1 %v7220_v9  ;;  %v7268_v9 = vld [vmem:[%s9434_s1 + $0x5c0] sm:$0xff]   ;;  %v7320_v5 = vld [vmem:[%s9434_s1 + $0x6e8] sm:$0xff]  }
  0x74   :  { %6544 = vmatpush3.bf16.msra.mxu0 %v7221_v10  ;;  %v7269_v10 = vld [vmem:[%s9434_s1 + $0x500] sm:$0xff]  }
  0x75   :  { %6566 = vmatpush3.bf16.msra.mxu1 %v7222_v11  ;;  %6545 = vmatprep.subr.bf16.mxu0 %v7223_v12  ;;  %v7270_v11 = vld [vmem:[%s9434_s1 + $0x580] sm:$0xff]   ;;  %v7271_v12 = vld [vmem:[%s9434_s1 + $0x548] sm:$0xff]  }
  0x76   :  { %6567 = vmatprep.subr.bf16.mxu1 %v7224_v13  ;;  %v7272_v13 = vld [vmem:[%s9434_s1 + $0x5c8] sm:$0xff]  }
  0x78   :  { %6546 = vmatpush3.bf16.msra.mxu0 %v7225_v14  ;;  %v7273_v14 = vld [vmem:[%s9434_s1 + $0x508] sm:$0xff]  }
  0x79   :  { %6568 = vmatpush3.bf16.msra.mxu1 %v7226_v15  ;;  %6547 = vmatprep.subr.bf16.mxu0 %v7227_v16  ;;  %v7274_v15 = vld [vmem:[%s9434_s1 + $0x588] sm:$0xff]   ;;  %v7275_v16 = vld [vmem:[%s9434_s1 + $0x550] sm:$0xff]  }
  0x7a   :  { %6569 = vmatprep.subr.bf16.mxu1 %v7228_v17  ;;  %v7276_v17 = vld [vmem:[%s9434_s1 + $0x5d0] sm:$0xff]  }
  0x7c   :  { %6548 = vmatpush3.bf16.msra.mxu0 %v7229_v18  ;;  %v7277_v18 = vld [vmem:[%s9434_s1 + $0x510] sm:$0xff]  }
  0x7d   :  { %6570 = vmatpush3.bf16.msra.mxu1 %v7230_v19  ;;  %6549 = vmatprep.subr.bf16.mxu0 %v7231_v20  ;;  %v7278_v19 = vld [vmem:[%s9434_s1 + $0x590] sm:$0xff]   ;;  %v7279_v20 = vld [vmem:[%s9434_s1 + $0x558] sm:$0xff]  }
  0x7e   :  { %6571 = vmatprep.subr.bf16.mxu1 %v7232_v21  ;;  %v7280_v21 = vld [vmem:[%s9434_s1 + $0x5d8] sm:$0xff]  }
  0x80   :  { %6550 = vmatpush3.bf16.msra.mxu0 %v7233_v22  ;;  %v7281_v22 = vld [vmem:[%s9434_s1 + $0x518] sm:$0xff]  }
  0x81   :  { %6572 = vmatpush3.bf16.msra.mxu1 %v7234_v23  ;;  %6579 = vmatprep.subr.bf16.mxu0 %v7235_v32  ;;  %v7282_v23 = vld [vmem:[%s9434_s1 + $0x598] sm:$0xff]   ;;  %v7291_v32 = vld [vmem:[%s9434_s1 + $0x570] sm:$0xff]  }
  0x82   :  { %6601 = vmatprep.subr.bf16.mxu1 %v7236_v33  ;;  %v7292_v33 = vld [vmem:[%s9434_s1 + $0x5f0] sm:$0xff]  }
  0x83   :  { %4787 = vmatmul.mubr.bf16.vlgmr.msra.gmra.mrb[12].mxu0 %v5839_v27  ;;  %v7286_v27 = vld [vmem:[%s9434_s1 + $0x5a0] sm:$0xff]  }
  0x84   :  { %4828 = vmatmul.mubr.bf16.vlgmr.msra.gmra.mrb[12].mxu1 %v5841_v30  ;;  %6580 = vmatpush3.bf16.msra.mxu0 %v7237_v34  ;;  %v7289_v30 = vld [vmem:[%s9434_s1 + $0x528] sm:$0xff]   ;;  %v7293_v34 = vld [vmem:[%s9434_s1 + $0x530] sm:$0xff]  }
  0x85   :  { %6602 = vmatpush3.bf16.msra.mxu1 %v7238_v35  ;;  %6581 = vmatprep.subr.bf16.mxu0 %v7239_v36  ;;  %v7294_v35 = vld [vmem:[%s9434_s1 + $0x5b0] sm:$0xff]   ;;  %v7295_v36 = vld [vmem:[%s9434_s1 + $0x578] sm:$0xff]  }
  0x86   :  { %6603 = vmatprep.subr.bf16.mxu1 %v7240_v37  ;;  %4868 = vmatprep.mubr.bf16.mxu0 %v5844_v3  ;;  %v7296_v37 = vld [vmem:[%s9434_s1 + $0x5f8] sm:$0xff]   ;;  %v7318_v3 = vld [vmem:[%s9434_s1 + $0x6a0] sm:$0xff]  }
  0x87   :  { %4909 = vmatprep.mubr.bf16.mxu1 %v5846_v7  ;;  %v7322_v7 = vld [vmem:[%s9434_s1 + $0x6a8] sm:$0xff]  }
  0x88   :  { %6582 = vmatpush3.bf16.msra.mxu0 %v7241_v38  ;;  %v7297_v38 = vld [vmem:[%s9434_s1 + $0x538] sm:$0xff]  }
  0x89   :  { %6604 = vmatpush3.bf16.msra.mxu1 %v7242_v39  ;;  %6583 = vmatprep.subr.bf16.mxu0 %v7243_v40  ;;  %v7298_v39 = vld [vmem:[%s9434_s1 + $0x5b8] sm:$0xff]   ;;  %v31_v40 = vld [vmem:[%s9437_s0 + $0x50] sm:$0xff] }
  0x8a   :  { %6605 = vmatprep.subr.bf16.mxu1 %v7244_v41  ;;  %v63_v41 = vld [vmem:[%s9437_s0 + $0x150] sm:$0xff] }
  0x8c   :  { %6584 = vmatpush3.bf16.msra.mxu0 %v7245_v42  ;;  %v32_v42 = vld [vmem:[%s9437_s0 + $0x58] sm:$0xff] }
  0x8d   :  { %6606 = vmatpush3.bf16.msra.mxu1 %v7246_v43  ;;  %6585 = vmatprep.subr.bf16.mxu0 %v7247_v44  ;;  %v64_v43 = vld [vmem:[%s9437_s0 + $0x158] sm:$0xff]  ;;  %v5847_v44 = vcombine.low %v31_v40, %v63_v41 }
  0x8e   :  { %6607 = vmatprep.subr.bf16.mxu1 %v7248_v45  ;;  %v5848_v45 = vcombine.high %v31_v40, %v63_v41  ;;  %v7346_v41 = vld [vmem:[%s9434_s1 + $0x798] sm:$0xff]  }
  0x90   :  { %6586 = vmatpush3.bf16.msra.mxu0 %v7249_v46  ;;  %v5849_v46 = vcombine.low %v32_v42, %v64_v43 }
  0x91   :  { %6608 = vmatpush3.bf16.msra.mxu1 %v7250_v47  ;;  %6587 = vmatprep.subr.bf16.mxu0 %v7251_v48  ;;  %v5850_v47 = vcombine.high %v32_v42, %v64_v43  ;;  %v7299_v48 = vld [vmem:[%s9434_s1 + $0x640] sm:$0xff]  }
  0x92   :  { %6609 = vmatprep.subr.bf16.mxu1 %v7252_v49  ;;  %v7300_v49 = vld [vmem:[%s9434_s1 + $0x6c0] sm:$0xff]  }
  0x93   :  { %v7347_v43 = vld [vmem:[%s9434_s1 + $0x760] sm:$0xff]  }
  0x94   :  { %6588 = vmatpush3.bf16.msra.mxu0 %v7253_v50  ;;  %v7301_v50 = vld [vmem:[%s9434_s1 + $0x600] sm:$0xff]  }
  0x95   :  { %6610 = vmatpush3.bf16.msra.mxu1 %v7254_v51  ;;  %6589 = vmatprep.subr.bf16.mxu0 %v7255_v52  ;;  %v7302_v51 = vld [vmem:[%s9434_s1 + $0x680] sm:$0xff]   ;;  %v7303_v52 = vld [vmem:[%s9434_s1 + $0x648] sm:$0xff]  }
  0x96   :  { %6611 = vmatprep.subr.bf16.mxu1 %v7256_v53  ;;  %v7304_v53 = vld [vmem:[%s9434_s1 + $0x6c8] sm:$0xff]  }
  0x98   :  { %6590 = vmatpush3.bf16.msra.mxu0 %v7257_v54  ;;  %v7305_v54 = vld [vmem:[%s9434_s1 + $0x608] sm:$0xff]  }
  0x99   :  { %6612 = vmatpush3.bf16.msra.mxu1 %v7258_v55  ;;  %6591 = vmatprep.subr.bf16.mxu0 %v7259_v56  ;;  %v7306_v55 = vld [vmem:[%s9434_s1 + $0x688] sm:$0xff]   ;;  %v7307_v56 = vld [vmem:[%s9434_s1 + $0x650] sm:$0xff]  }
  0x9a   :  { %6613 = vmatprep.subr.bf16.mxu1 %v7260_v57  ;;  %v7308_v57 = vld [vmem:[%s9434_s1 + $0x6d0] sm:$0xff]  }
  0x9c   :  { %6592 = vmatpush3.bf16.msra.mxu0 %v7261_v58  ;;  %v7309_v58 = vld [vmem:[%s9434_s1 + $0x610] sm:$0xff]  }
  0x9d   :  { %6614 = vmatpush3.bf16.msra.mxu1 %v7262_v59  ;;  %6593 = vmatprep.subr.bf16.mxu0 %v7263_v60  ;;  %v7310_v59 = vld [vmem:[%s9434_s1 + $0x690] sm:$0xff]   ;;  %v7311_v60 = vld [vmem:[%s9434_s1 + $0x658] sm:$0xff]  }
  0x9e   :  { %6615 = vmatprep.subr.bf16.mxu1 %v7264_v61  ;;  %v7312_v61 = vld [vmem:[%s9434_s1 + $0x6d8] sm:$0xff]  }
  0xa0   :  { %6594 = vmatpush3.bf16.msra.mxu0 %v7265_v62  ;;  %v7313_v62 = vld [vmem:[%s9434_s1 + $0x618] sm:$0xff]  }
  0xa1   :  { %6616 = vmatpush3.bf16.msra.mxu1 %v7266_v63  ;;  %6623 = vmatprep.subr.bf16.mxu0 %v7267_v8  ;;  %v7314_v63 = vld [vmem:[%s9434_s1 + $0x698] sm:$0xff]   ;;  %v7323_v8 = vld [vmem:[%s9434_s1 + $0x670] sm:$0xff]  }
  0xa2   :  { %6645 = vmatprep.subr.bf16.mxu1 %v7268_v9  ;;  %v7324_v9 = vld [vmem:[%s9434_s1 + $0x6f0] sm:$0xff]  }
  0xa3   :  { %4869 = vmatmul.mubr.bf16.vlgmr.msra.gmra.mrb[16].mxu0 %v5843_v2  ;;  %v7317_v2 = vld [vmem:[%s9434_s1 + $0x620] sm:$0xff]  }
  0xa4   :  { %4910 = vmatmul.mubr.bf16.vlgmr.msra.gmra.mrb[16].mxu1 %v5845_v6  ;;  %6624 = vmatpush3.bf16.msra.mxu0 %v7269_v10  ;;  %v7321_v6 = vld [vmem:[%s9434_s1 + $0x628] sm:$0xff]   ;;  %v7325_v10 = vld [vmem:[%s9434_s1 + $0x630] sm:$0xff]  }
  0xa5   :  { %6646 = vmatpush3.bf16.msra.mxu1 %v7270_v11  ;;  %6625 = vmatprep.subr.bf16.mxu0 %v7271_v12  ;;  %v7326_v11 = vld [vmem:[%s9434_s1 + $0x6b0] sm:$0xff]   ;;  %v7327_v12 = vld [vmem:[%s9434_s1 + $0x678] sm:$0xff]  }
  0xa6   :  { %6647 = vmatprep.subr.bf16.mxu1 %v7272_v13  ;;  %4950 = vmatprep.mubr.bf16.mxu0 %v5848_v45  ;;  %v7328_v13 = vld [vmem:[%s9434_s1 + $0x6f8] sm:$0xff]  }
  0xa7   :  { %4991 = vmatprep.mubr.bf16.mxu1 %v5850_v47 }
  0xa8   :  { %6626 = vmatpush3.bf16.msra.mxu0 %v7273_v14  ;;  %v7329_v14 = vld [vmem:[%s9434_s1 + $0x638] sm:$0xff]  }
  0xa9   :  { %6648 = vmatpush3.bf16.msra.mxu1 %v7274_v15  ;;  %6627 = vmatprep.subr.bf16.mxu0 %v7275_v16  ;;  %v7330_v15 = vld [vmem:[%s9434_s1 + $0x6b8] sm:$0xff]   ;;  %v33_v16 = vld [vmem:[%s9437_s0 + $0x60] sm:$0xff] }
  0xaa   :  { %6649 = vmatprep.subr.bf16.mxu1 %v7276_v17  ;;  %v65_v17 = vld [vmem:[%s9437_s0 + $0x160] sm:$0xff] }
  0xac   :  { %6628 = vmatpush3.bf16.msra.mxu0 %v7277_v18  ;;  %v34_v18 = vld [vmem:[%s9437_s0 + $0x68] sm:$0xff] }
  0xad   :  { %6650 = vmatpush3.bf16.msra.mxu1 %v7278_v19  ;;  %6629 = vmatprep.subr.bf16.mxu0 %v7279_v20  ;;  %v5851_v19 = vcombine.low %v33_v16, %v65_v17  ;;  %v5852_v20 = vcombine.high %v33_v16, %v65_v17  ;;  %v7363_v17 = vld [vmem:[%s9434_s1 + $0x840] sm:$0xff]  }
  0xae   :  { %6651 = vmatprep.subr.bf16.mxu1 %v7280_v21  ;;  %v66_v21 = vld [vmem:[%s9437_s0 + $0x168] sm:$0xff] }
  0xb0   :  { %6630 = vmatpush3.bf16.msra.mxu0 %v7281_v22  ;;  %v5853_v22 = vcombine.low %v34_v18, %v66_v21 }
  0xb1   :  { %6652 = vmatpush3.bf16.msra.mxu1 %v7282_v23  ;;  %6631 = vmatprep.subr.bf16.mxu0 %v7283_v24  ;;  %v5854_v23 = vcombine.high %v34_v18, %v66_v21  ;;  %v7331_v24 = vld [vmem:[%s9434_s1 + $0x740] sm:$0xff]   ;;  %v7367_v21 = vld [vmem:[%s9434_s1 + $0x848] sm:$0xff]  }
  0xb2   :  { %6653 = vmatprep.subr.bf16.mxu1 %v7284_v25  ;;  %v7332_v25 = vld [vmem:[%s9434_s1 + $0x7c0] sm:$0xff]  }
  0xb3   :  { %v7364_v18 = vld [vmem:[%s9434_s1 + $0x8c0] sm:$0xff]  }
  0xb4   :  { %6632 = vmatpush3.bf16.msra.mxu0 %v7285_v26  ;;  %v7333_v26 = vld [vmem:[%s9434_s1 + $0x700] sm:$0xff]  }
  0xb5   :  { %6654 = vmatpush3.bf16.msra.mxu1 %v7286_v27  ;;  %6633 = vmatprep.subr.bf16.mxu0 %v7287_v28  ;;  %v7334_v27 = vld [vmem:[%s9434_s1 + $0x780] sm:$0xff]   ;;  %v7335_v28 = vld [vmem:[%s9434_s1 + $0x748] sm:$0xff]  }
  0xb6   :  { %6655 = vmatprep.subr.bf16.mxu1 %v7288_v29  ;;  %v7336_v29 = vld [vmem:[%s9434_s1 + $0x7c8] sm:$0xff]  }
  0xb8   :  { %6634 = vmatpush3.bf16.msra.mxu0 %v7289_v30  ;;  %v7337_v30 = vld [vmem:[%s9434_s1 + $0x708] sm:$0xff]  }
  0xb9   :  { %6656 = vmatpush3.bf16.msra.mxu1 %v7290_v31  ;;  %6635 = vmatprep.subr.bf16.mxu0 %v7291_v32  ;;  %v7338_v31 = vld [vmem:[%s9434_s1 + $0x788] sm:$0xff]   ;;  %v7339_v32 = vld [vmem:[%s9434_s1 + $0x750] sm:$0xff]  }
  0xba   :  { %6657 = vmatprep.subr.bf16.mxu1 %v7292_v33  ;;  %v7340_v33 = vld [vmem:[%s9434_s1 + $0x7d0] sm:$0xff]  }
  0xbc   :  { %6636 = vmatpush3.bf16.msra.mxu0 %v7293_v34  ;;  %v7341_v34 = vld [vmem:[%s9434_s1 + $0x710] sm:$0xff]  }
  0xbd   :  { %6658 = vmatpush3.bf16.msra.mxu1 %v7294_v35  ;;  %6637 = vmatprep.subr.bf16.mxu0 %v7295_v36  ;;  %v7342_v35 = vld [vmem:[%s9434_s1 + $0x790] sm:$0xff]   ;;  %v7343_v36 = vld [vmem:[%s9434_s1 + $0x758] sm:$0xff]  }
  0xbe   :  { %6659 = vmatprep.subr.bf16.mxu1 %v7296_v37  ;;  %v7344_v37 = vld [vmem:[%s9434_s1 + $0x7d8] sm:$0xff]  }
  0xc0   :  { %6638 = vmatpush3.bf16.msra.mxu0 %v7297_v38 }
  0xc1   :  { %6660 = vmatpush3.bf16.msra.mxu1 %v7298_v39  ;;  %6667 = vmatprep.subr.bf16.mxu0 %v7299_v48  ;;  %v7345_v39 = vld [vmem:[%s9434_s1 + $0x718] sm:$0xff]  }
  0xc2   :  { %6689 = vmatprep.subr.bf16.mxu1 %v7300_v49  ;;  %v7349_v49 = vld [vmem:[%s9434_s1 + $0x720] sm:$0xff]  }
  0xc3   :  { %4951 = vmatmul.mubr.bf16.vlgmr.msra.gmra.mrb[20].mxu0 %v5847_v44 }
  0xc4   :  { %4992 = vmatmul.mubr.bf16.vlgmr.msra.gmra.mrb[20].mxu1 %v5849_v46  ;;  %6668 = vmatpush3.bf16.msra.mxu0 %v7301_v50  ;;  %v7348_v46 = vld [vmem:[%s9434_s1 + $0x7e0] sm:$0xff]  }
  0xc5   :  { %6690 = vmatpush3.bf16.msra.mxu1 %v7302_v51  ;;  %6669 = vmatprep.subr.bf16.mxu0 %v7303_v52  ;;  %v7350_v51 = vld [vmem:[%s9434_s1 + $0x7a0] sm:$0xff]  }
  0xc6   :  { %6691 = vmatprep.subr.bf16.mxu1 %v7304_v53  ;;  %5032 = vmatprep.mubr.bf16.mxu0 %v5852_v20  ;;  %v5826_v52 = vld [vmem:[%s9438_s2] ss:$0 sm:$0xff] }
  0xc7   :  { %5073 = vmatprep.mubr.bf16.mxu1 %v5854_v23  ;;  %v7366_v20 = vld [vmem:[%s9434_s1 + $0x880] sm:$0xff]   ;;  %v7369_v23 = vld [vmem:[%s9434_s1 + $0x808] sm:$0xff]  }
  0xc8   :  { %6670 = vmatpush3.bf16.msra.mxu0 %v7305_v54 }
  0xc9   :  { %6692 = vmatpush3.bf16.msra.mxu1 %v7306_v55  ;;  %6671 = vmatprep.subr.bf16.mxu0 %v7307_v56  ;;  %v7351_v55 = vld [vmem:[%s9434_s1 + $0x768] sm:$0xff]  }
  0xca   :  { %6693 = vmatprep.subr.bf16.mxu1 %v7308_v57 }
  0xcc   :  { %6672 = vmatpush3.bf16.msra.mxu0 %v7309_v58  ;;  %v7352_v58 = vld [vmem:[%s9434_s1 + $0x7e8] sm:$0xff]  }
  0xcd   :  { %6694 = vmatpush3.bf16.msra.mxu1 %v7310_v59  ;;  %6673 = vmatprep.subr.bf16.mxu0 %v7311_v60 }
  0xce   :  { %6695 = vmatprep.subr.bf16.mxu1 %v7312_v61  ;;  %v7353_v61 = vld [vmem:[%s9434_s1 + $0x728] sm:$0xff]  }
  0xd0   :  { %6674 = vmatpush3.bf16.msra.mxu0 %v7313_v62 }
  0xd1   :  { %6696 = vmatpush3.bf16.msra.mxu1 %v7314_v63  ;;  %6675 = vmatprep.subr.bf16.mxu0 %v7315_v0  ;;  %v7354_v63 = vld [vmem:[%s9434_s1 + $0x7a8] sm:$0xff]  }
  0xd2   :  { %6697 = vmatprep.subr.bf16.mxu1 %v7316_v1  ;;  %v7355_v1 = vld [vmem:[%s9434_s1 + $0x770] sm:$0xff]  }
  0xd4   :  { %6676 = vmatpush3.bf16.msra.mxu0 %v7317_v2  ;;  %v7356_v2 = vld [vmem:[%s9434_s1 + $0x7f0] sm:$0xff]  }
  0xd5   :  { %6698 = vmatpush3.bf16.msra.mxu1 %v7318_v3  ;;  %6677 = vmatprep.subr.bf16.mxu0 %v7319_v4  ;;  %v7357_v3 = vld [vmem:[%s9434_s1 + $0x730] sm:$0xff]  }
  0xd6   :  { %6699 = vmatprep.subr.bf16.mxu1 %v7320_v5  ;;  %v7358_v4 = vld [vmem:[%s9434_s1 + $0x7b0] sm:$0xff]   ;;  %v7359_v5 = vld [vmem:[%s9434_s1 + $0x778] sm:$0xff]  }
  0xd8   :  { %6678 = vmatpush3.bf16.msra.mxu0 %v7321_v6  ;;  %v7360_v6 = vld [vmem:[%s9434_s1 + $0x7f8] sm:$0xff]  }
  0xd9   :  { %6700 = vmatpush3.bf16.msra.mxu1 %v7322_v7  ;;  %6679 = vmatprep.subr.bf16.mxu0 %v7323_v8  ;;  %v7361_v7 = vld [vmem:[%s9434_s1 + $0x738] sm:$0xff]  }
  0xda   :  { %6701 = vmatprep.subr.bf16.mxu1 %v7324_v9  ;;  %v7362_v8 = vld [vmem:[%s9434_s1 + $0x7b8] sm:$0xff]   ;;  %v35_v9 = vld [vmem:[%s9437_s0 + $0x70] sm:$0xff] }
  0xdc   :  { %6680 = vmatpush3.bf16.msra.mxu0 %v7325_v10  ;;  %v67_v10 = vld [vmem:[%s9437_s0 + $0x170] sm:$0xff] }
  0xdd   :  { %6702 = vmatpush3.bf16.msra.mxu1 %v7326_v11  ;;  %6681 = vmatprep.subr.bf16.mxu0 %v7327_v12  ;;  %v36_v11 = vld [vmem:[%s9437_s0 + $0x78] sm:$0xff] }
  0xde   :  { %6703 = vmatprep.subr.bf16.mxu1 %v7328_v13  ;;  %v68_v12 = vld [vmem:[%s9437_s0 + $0x178] sm:$0xff]  ;;  %v5855_v13 = vcombine.low %v35_v9, %v67_v10 }
  0xdf   :  { %v5858_v16 = vcombine.high %v36_v11, %v68_v12 }
  0xe0   :  { %6682 = vmatpush3.bf16.msra.mxu0 %v7329_v14  ;;  %v5856_v14 = vcombine.high %v35_v9, %v67_v10  ;;  %v7395_v9 = vld [vmem:[%s9434_s1 + $0x940] sm:$0xff]  }
  0xe1   :  { %6704 = vmatpush3.bf16.msra.mxu1 %v7330_v15  ;;  %6711 = vmatprep.subr.bf16.mxu0 %v7331_v24  ;;  %v5857_v15 = vcombine.low %v36_v11, %v68_v12  ;;  %v7370_v24 = vld [vmem:[%s9434_s1 + $0x888] sm:$0xff]   ;;  %v7396_v10 = vld [vmem:[%s9434_s1 + $0x9c0] sm:$0xff]  }
  0xe2   :  { %6733 = vmatprep.subr.bf16.mxu1 %v7332_v25  ;;  %v7371_v25 = vld [vmem:[%s9434_s1 + $0x850] sm:$0xff]   ;;  %v7397_v11 = vld [vmem:[%s9434_s1 + $0x900] sm:$0xff]  }
  0xe3   :  { %5033 = vmatmul.mubr.bf16.vlgmr.msra.gmra.mrb[24].mxu0 %v5851_v19  ;;  %v7365_v19 = vld [vmem:[%s9434_s1 + $0x800] sm:$0xff]  }
  0xe4   :  { %5074 = vmatmul.mubr.bf16.vlgmr.msra.gmra.mrb[24].mxu1 %v5853_v22  ;;  %6712 = vmatpush3.bf16.msra.mxu0 %v7333_v26  ;;  %v7368_v22 = vld [vmem:[%s9434_s1 + $0x8c8] sm:$0xff]   ;;  %v7372_v26 = vld [vmem:[%s9434_s1 + $0x8d0] sm:$0xff]   ;;  %v7398_v12 = vld [vmem:[%s9434_s1 + $0x980] sm:$0xff]  }
  0xe5   :  { %6734 = vmatpush3.bf16.msra.mxu1 %v7334_v27  ;;  %6713 = vmatprep.subr.bf16.mxu0 %v7335_v28  ;;  %v7373_v27 = vld [vmem:[%s9434_s1 + $0x810] sm:$0xff]  }
  0xe6   :  { %6735 = vmatprep.subr.bf16.mxu1 %v7336_v29  ;;  %5114 = vmatprep.mubr.bf16.mxu0 %v5856_v14  ;;  %v7374_v28 = vld [vmem:[%s9434_s1 + $0x890] sm:$0xff]   ;;  %v7375_v29 = vld [vmem:[%s9434_s1 + $0x858] sm:$0xff]   ;;  %v7400_v14 = vld [vmem:[%s9434_s1 + $0x9c8] sm:$0xff]  }
  0xe7   :  { %5155 = vmatprep.mubr.bf16.mxu1 %v5858_v16  ;;  %v7402_v16 = vld [vmem:[%s9434_s1 + $0x988] sm:$0xff]  }
  0xe8   :  { %6714 = vmatpush3.bf16.msra.mxu0 %v7337_v30  ;;  %v7376_v30 = vld [vmem:[%s9434_s1 + $0x8d8] sm:$0xff]  }
  0xe9   :  { %6736 = vmatpush3.bf16.msra.mxu1 %v7338_v31  ;;  %6715 = vmatprep.subr.bf16.mxu0 %v7339_v32  ;;  %v7377_v32 = vld [vmem:[%s9434_s1 + $0x818] sm:$0xff]  }
  0xea   :  { %6737 = vmatprep.subr.bf16.mxu1 %v7340_v33 }
  0xec   :  { %6716 = vmatpush3.bf16.msra.mxu0 %v7341_v34  ;;  %v7378_v34 = vld [vmem:[%s9434_s1 + $0x898] sm:$0xff]  }
  0xed   :  { %6738 = vmatpush3.bf16.msra.mxu1 %v7342_v35  ;;  %6717 = vmatprep.subr.bf16.mxu0 %v7343_v36  ;;  %v7379_v36 = vld [vmem:[%s9434_s1 + $0x860] sm:$0xff]  }
  0xee   :  { %6739 = vmatprep.subr.bf16.mxu1 %v7344_v37 }
  0xf0   :  { %6718 = vmatpush3.bf16.msra.mxu0 %v7345_v39  ;;  %v7380_v39 = vld [vmem:[%s9434_s1 + $0x8e0] sm:$0xff]  }
  0xf1   :  { %6740 = vmatpush3.bf16.msra.mxu1 %v7346_v41  ;;  %6719 = vmatprep.subr.bf16.mxu0 %v7347_v43 }
  0xf2   :  { %6741 = vmatprep.subr.bf16.mxu1 %v7348_v46 }
  0xf4   :  { %6720 = vmatpush3.bf16.msra.mxu0 %v7349_v49 }
  0xf5   :  { %6742 = vmatpush3.bf16.msra.mxu1 %v7350_v51  ;;  %6721 = vmatprep.subr.bf16.mxu0 %v7351_v55  ;;  %v7384_v51 = vld [vmem:[%s9434_s1 + $0x8e8] sm:$0xff]  }
  0xf6   :  { %v6419_v38 = vpop.f32.mrb[0].mxu0  ;;  %6743 = vmatprep.subr.bf16.mxu1 %v7352_v58  ;;  %v7386_v55 = vld [vmem:[%s9434_s1 + $0x8a8] sm:$0xff]   ;;  %v7388_v58 = vld [vmem:[%s9434_s1 + $0x8f0] sm:$0xff]  }
  0xf7   :  { %v6441_v40 = vpop.f32.mrb[0].mxu1  ;;  %v6420_v42 = vpop.f32.mrb[1].mxu0 }
  0xf8   :  { %v6421_v44 = vadd.f32 %v6420_v42, %v6419_v38  ;;  %v6442_v45 = vpop.f32.mrb[1].mxu1  ;;  %v6422_v48 = vpop.f32.mrb[2].mxu0  ;;  %6722 = vmatpush3.bf16.msra.mxu0 %v7353_v61  ;;  %v7381_v42 = vld [vmem:[%s9434_s1 + $0x820] sm:$0xff]   ;;  %v7391_v61 = vld [vmem:[%s9434_s1 + $0x878] sm:$0xff]  }
  0xf9   :  { %v6443_v47 = vadd.f32 %v6442_v45, %v6441_v40  ;;  %v6444_v50 = vpop.f32.mrb[2].mxu1  ;;  %v6423_v53 = vpop.f32.mrb[3].mxu0  ;;  %6744 = vmatpush3.bf16.msra.mxu1 %v7354_v63  ;;  %6723 = vmatprep.subr.bf16.mxu0 %v7355_v1  ;;  %v7382_v45 = vld [vmem:[%s9434_s1 + $0x8a0] sm:$0xff]   ;;  %v7393_v63 = vld [vmem:[%s9434_s1 + $0x838] sm:$0xff]  }
  0xfa   :  { %v4543_v54 = vadd.f32 %v6421_v44, %v5826_v52  ;;  %v6424_v56 = vadd.f32 %v6423_v53, %v6422_v48  ;;  %v6445_v57 = vpop.f32.mrb[3].mxu1  ;;  %6745 = vmatprep.subr.bf16.mxu1 %v7356_v2  ;;  %v7383_v48 = vld [vmem:[%s9434_s1 + $0x868] sm:$0xff]   ;;  %v37_v1 = vld [vmem:[%s9437_s0 + $0x80] sm:$0xff] }
  0xfb   :  { %v6446_v59 = vadd.f32 %v6445_v57, %v6444_v50  ;;  %v7385_v53 = vld [vmem:[%s9434_s1 + $0x828] sm:$0xff]   ;;  %v7387_v57 = vld [vmem:[%s9434_s1 + $0x870] sm:$0xff]   ;;  %v69_v2 = vld [vmem:[%s9437_s0 + $0x180] sm:$0xff] }
  0xfc   :  { %v8474_v60 = vadd.f32 %v6443_v47, %v4543_v54  ;;  %v4546_v62 = vadd.f32 %v6424_v56, %v5826_v52  ;;  %6724 = vmatpush3.bf16.msra.mxu0 %v7357_v3  ;;  %v38_v3 = vld [vmem:[%s9437_s0 + $0x88] sm:$0xff] }
  0xfd   :  { %6746 = vmatpush3.bf16.msra.mxu1 %v7358_v4  ;;  %6725 = vmatprep.subr.bf16.mxu0 %v7359_v5  ;;  %v5859_v4 = vcombine.low %v37_v1, %v69_v2  ;;  %v5860_v5 = vcombine.high %v37_v1, %v69_v2  ;;  %v7427_v1 = vld [vmem:[%s9434_s1 + $0xa40] sm:$0xff]  }
  0xfe   :  { %v8482_v0 = vadd.f32 %v6446_v59, %v4546_v62  ;;  %6747 = vmatprep.subr.bf16.mxu1 %v7360_v6  ;;  %v7389_v59 = vld [vmem:[%s9434_s1 + $0x830] sm:$0xff]   ;;  %v7392_v62 = vld [vmem:[%s9434_s1 + $0x8f8] sm:$0xff]   ;;  %v70_v6 = vld [vmem:[%s9437_s0 + $0x188] sm:$0xff] }
  0xff   :  { %v7428_v2 = vld [vmem:[%s9434_s1 + $0xac0] sm:$0xff]  }
 0x100   :  { %6726 = vmatpush3.bf16.msra.mxu0 %v7361_v7  ;;  %v5861_v7 = vcombine.low %v38_v3, %v70_v6 }
 0x101   :  { %6748 = vmatpush3.bf16.msra.mxu1 %v7362_v8  ;;  %6755 = vmatprep.subr.bf16.mxu0 %v7363_v17  ;;  %v5862_v8 = vcombine.high %v38_v3, %v70_v6  ;;  %v7403_v17 = vld [vmem:[%s9434_s1 + $0x950] sm:$0xff]   ;;  %v7429_v3 = vld [vmem:[%s9434_s1 + $0xa00] sm:$0xff]   ;;  %v7432_v6 = vld [vmem:[%s9434_s1 + $0xac8] sm:$0xff]  }
 0x102   :  { %6777 = vmatprep.subr.bf16.mxu1 %v7364_v18  ;;  %v7404_v18 = vld [vmem:[%s9434_s1 + $0x9d0] sm:$0xff]  }
 0x103   :  { %5115 = vmatmul.mubr.bf16.vlgmr.msra.gmra.mrb[28].mxu0 %v5855_v13  ;;  %v7399_v13 = vld [vmem:[%s9434_s1 + $0x948] sm:$0xff]  }
 0x104   :  { %5156 = vmatmul.mubr.bf16.vlgmr.msra.gmra.mrb[28].mxu1 %v5857_v15  ;;  %6756 = vmatpush3.bf16.msra.mxu0 %v7365_v19  ;;  %v7401_v15 = vld [vmem:[%s9434_s1 + $0x908] sm:$0xff]   ;;  %v7405_v19 = vld [vmem:[%s9434_s1 + $0x910] sm:$0xff]  }
 0x105   :  { %6778 = vmatpush3.bf16.msra.mxu1 %v7366_v20  ;;  %6757 = vmatprep.subr.bf16.mxu0 %v7367_v21  ;;  %v7406_v20 = vld [vmem:[%s9434_s1 + $0x990] sm:$0xff]   ;;  %v7407_v21 = vld [vmem:[%s9434_s1 + $0x958] sm:$0xff]  }
 0x106   :  { %6779 = vmatprep.subr.bf16.mxu1 %v7368_v22  ;;  %5196 = vmatprep.mubr.bf16.mxu0 %v5860_v5  ;;  %v7408_v22 = vld [vmem:[%s9434_s1 + $0x9d8] sm:$0xff]   ;;  %v7431_v5 = vld [vmem:[%s9434_s1 + $0xa48] sm:$0xff]  }
 0x107   :  { %5237 = vmatprep.mubr.bf16.mxu1 %v5862_v8  ;;  %v7434_v8 = vld [vmem:[%s9434_s1 + $0xa88] sm:$0xff]  }
 0x108   :  { %6758 = vmatpush3.bf16.msra.mxu0 %v7369_v23 }
 0x109   :  { %6780 = vmatpush3.bf16.msra.mxu1 %v7370_v24  ;;  %6759 = vmatprep.subr.bf16.mxu0 %v7371_v25  ;;  %v7409_v24 = vld [vmem:[%s9434_s1 + $0x918] sm:$0xff]  }
 0x10a   :  { %6781 = vmatprep.subr.bf16.mxu1 %v7372_v26  ;;  %v7410_v26 = vld [vmem:[%s9434_s1 + $0x998] sm:$0xff]  }
 0x10c   :  { %6760 = vmatpush3.bf16.msra.mxu0 %v7373_v27 }
 0x10d   :  { %6782 = vmatpush3.bf16.msra.mxu1 %v7374_v28  ;;  %6761 = vmatprep.subr.bf16.mxu0 %v7375_v29  ;;  %v7411_v28 = vld [vmem:[%s9434_s1 + $0x960] sm:$0xff]  }
 0x10e   :  { %6783 = vmatprep.subr.bf16.mxu1 %v7376_v30 }
 0x110   :  { %6762 = vmatpush3.bf16.msra.mxu0 %v7377_v32 }
 0x111   :  { %6784 = vmatpush3.bf16.msra.mxu1 %v7378_v34  ;;  %6763 = vmatprep.subr.bf16.mxu0 %v7379_v36  ;;  %v7413_v34 = vld [vmem:[%s9434_s1 + $0x920] sm:$0xff]  }
 0x112   :  { %6785 = vmatprep.subr.bf16.mxu1 %v7380_v39 }
 0x114   :  { %6764 = vmatpush3.bf16.msra.mxu0 %v7381_v42 }
 0x115   :  { %6786 = vmatpush3.bf16.msra.mxu1 %v7382_v45  ;;  %6765 = vmatprep.subr.bf16.mxu0 %v7383_v48  ;;  %v7417_v45 = vld [vmem:[%s9434_s1 + $0x928] sm:$0xff]  }
 0x116   :  { %v6463_v31 = vpop.f32.mrb[4].mxu0  ;;  %6787 = vmatprep.subr.bf16.mxu1 %v7384_v51  ;;  %v7421_v51 = vld [vmem:[%s9434_s1 + $0x930] sm:$0xff]  }
 0x117   :  { %v6485_v33 = vpop.f32.mrb[4].mxu1  ;;  %v6464_v35 = vpop.f32.mrb[5].mxu0 }
 0x118   :  { %v6465_v37 = vadd.f32 %v6464_v35, %v6463_v31  ;;  %v6486_v38 = vpop.f32.mrb[5].mxu1  ;;  %v6466_v41 = vpop.f32.mrb[6].mxu0  ;;  %6766 = vmatpush3.bf16.msra.mxu0 %v7385_v53  ;;  %v7412_v31 = vld [vmem:[%s9434_s1 + $0x9e0] sm:$0xff]   ;;  %v7423_v53 = vld [vmem:[%s9434_s1 + $0x978] sm:$0xff]  }
 0x119   :  { %v6487_v40 = vadd.f32 %v6486_v38, %v6485_v33  ;;  %v6488_v44 = vpop.f32.mrb[6].mxu1  ;;  %v6467_v46 = vpop.f32.mrb[7].mxu0  ;;  %6788 = vmatpush3.bf16.msra.mxu1 %v7386_v55  ;;  %6767 = vmatprep.subr.bf16.mxu0 %v7387_v57  ;;  %v7425_v55 = vld [vmem:[%s9434_s1 + $0x938] sm:$0xff]   ;;  %v39_v57 = vld [vmem:[%s9437_s0 + $0x90] sm:$0xff] }
 0x11a   :  { %v4625_v43 = vadd.f32 %v6465_v37, %v8474_v60  ;;  %v6468_v49 = vadd.f32 %v6467_v46, %v6466_v41  ;;  %v6489_v50 = vpop.f32.mrb[7].mxu1  ;;  %6789 = vmatprep.subr.bf16.mxu1 %v7388_v58  ;;  %v7390_v60 = vld [vmem:[%s9434_s1 + $0x8b0] sm:$0xff]   ;;  %v7414_v37 = vld [vmem:[%s9434_s1 + $0x9a0] sm:$0xff]  }
 0x11b   :  { %v6490_v52 = vadd.f32 %v6489_v50, %v6488_v44  ;;  %v7420_v50 = vld [vmem:[%s9434_s1 + $0x9f0] sm:$0xff]  }
 0x11c   :  { %v8581_v47 = vadd.f32 %v6487_v40, %v4625_v43  ;;  %v4628_v54 = vadd.f32 %v6468_v49, %v8482_v0  ;;  %6768 = vmatpush3.bf16.msra.mxu0 %v7389_v59  ;;  %v7394_v0 = vld [vmem:[%s9434_s1 + $0x8b8] sm:$0xff]   ;;  %v7415_v40 = vld [vmem:[%s9434_s1 + $0x968] sm:$0xff]   ;;  %v7419_v49 = vld [vmem:[%s9434_s1 + $0x970] sm:$0xff]  }
 0x11d   :  { %6790 = vmatpush3.bf16.msra.mxu1 %v7390_v60  ;;  %6769 = vmatprep.subr.bf16.mxu0 %v7391_v61  ;;  %v7416_v43 = vld [vmem:[%s9434_s1 + $0x9e8] sm:$0xff]   ;;  %v71_v58 = vld [vmem:[%s9437_s0 + $0x190] sm:$0xff]  ;;  %v40_v61 = vld [vmem:[%s9437_s0 + $0x98] sm:$0xff] }
 0x11e   :  { %v8596_v56 = vadd.f32 %v6490_v52, %v4628_v54  ;;  %6791 = vmatprep.subr.bf16.mxu1 %v7392_v62  ;;  %v7422_v52 = vld [vmem:[%s9434_s1 + $0x9b0] sm:$0xff]   ;;  %v7424_v54 = vld [vmem:[%s9434_s1 + $0x9f8] sm:$0xff]   ;;  %v5863_v59 = vcombine.low %v39_v57, %v71_v58  ;;  %v5864_v60 = vcombine.high %v39_v57, %v71_v58  ;;  %v7459_v57 = vld [vmem:[%s9434_s1 + $0xb40] sm:$0xff]  }
 0x11f   :  { %v72_v62 = vld [vmem:[%s9437_s0 + $0x198] sm:$0xff]  ;;  %v7460_v58 = vld [vmem:[%s9434_s1 + $0xbc0] sm:$0xff]  }
 0x120   :  { %6770 = vmatpush3.bf16.msra.mxu0 %v7393_v63  ;;  %v5865_v63 = vcombine.low %v40_v61, %v72_v62 }
 0x121   :  { %6792 = vmatpush3.bf16.msra.mxu1 %v7394_v0  ;;  %6799 = vmatprep.subr.bf16.mxu0 %v7395_v9  ;;  %v5866_v0 = vcombine.high %v40_v61, %v72_v62  ;;  %v7435_v9 = vld [vmem:[%s9434_s1 + $0xa50] sm:$0xff]   ;;  %v7463_v61 = vld [vmem:[%s9434_s1 + $0xb48] sm:$0xff]  }
 0x122   :  { %6821 = vmatprep.subr.bf16.mxu1 %v7396_v10  ;;  %v7436_v10 = vld [vmem:[%s9434_s1 + $0xad0] sm:$0xff]   ;;  %v7464_v62 = vld [vmem:[%s9434_s1 + $0xbc8] sm:$0xff]  }
 0x123   :  { %5197 = vmatmul.mubr.bf16.vlgmr.msra.gmra.mrb[32].mxu0 %v5859_v4  ;;  %v7430_v4 = vld [vmem:[%s9434_s1 + $0xa80] sm:$0xff]  }
 0x124   :  { %5238 = vmatmul.mubr.bf16.vlgmr.msra.gmra.mrb[32].mxu1 %v5861_v7  ;;  %6800 = vmatpush3.bf16.msra.mxu0 %v7397_v11  ;;  %v7433_v7 = vld [vmem:[%s9434_s1 + $0xa08] sm:$0xff]   ;;  %v7437_v11 = vld [vmem:[%s9434_s1 + $0xa10] sm:$0xff]  }
 0x125   :  { %6822 = vmatpush3.bf16.msra.mxu1 %v7398_v12  ;;  %6801 = vmatprep.subr.bf16.mxu0 %v7399_v13  ;;  %v7438_v12 = vld [vmem:[%s9434_s1 + $0xa90] sm:$0xff]   ;;  %v7439_v13 = vld [vmem:[%s9434_s1 + $0xa58] sm:$0xff]  }
 0x126   :  { %6823 = vmatprep.subr.bf16.mxu1 %v7400_v14  ;;  %5278 = vmatprep.mubr.bf16.mxu0 %v5864_v60  ;;  %v7440_v14 = vld [vmem:[%s9434_s1 + $0xad8] sm:$0xff]   ;;  %v7462_v60 = vld [vmem:[%s9434_s1 + $0xb80] sm:$0xff]  }
 0x127   :  { %5319 = vmatprep.mubr.bf16.mxu1 %v5866_v0  ;;  %v7466_v0 = vld [vmem:[%s9434_s1 + $0xb88] sm:$0xff]  }
 0x128   :  { %6802 = vmatpush3.bf16.msra.mxu0 %v7401_v15 }
 0x129   :  { %6824 = vmatpush3.bf16.msra.mxu1 %v7402_v16  ;;  %6803 = vmatprep.subr.bf16.mxu0 %v7403_v17  ;;  %v7441_v16 = vld [vmem:[%s9434_s1 + $0xa18] sm:$0xff]  }
 0x12a   :  { %6825 = vmatprep.subr.bf16.mxu1 %v7404_v18  ;;  %v7442_v18 = vld [vmem:[%s9434_s1 + $0xa98] sm:$0xff]  }
 0x12c   :  { %6804 = vmatpush3.bf16.msra.mxu0 %v7405_v19 }
 0x12d   :  { %6826 = vmatpush3.bf16.msra.mxu1 %v7406_v20  ;;  %6805 = vmatprep.subr.bf16.mxu0 %v7407_v21  ;;  %v7443_v20 = vld [vmem:[%s9434_s1 + $0xa60] sm:$0xff]  }
 0x12e   :  { %6827 = vmatprep.subr.bf16.mxu1 %v7408_v22 }
 0x130   :  { %6806 = vmatpush3.bf16.msra.mxu0 %v7409_v24 }
 0x131   :  { %6828 = vmatpush3.bf16.msra.mxu1 %v7410_v26  ;;  %6807 = vmatprep.subr.bf16.mxu0 %v7411_v28  ;;  %v7445_v26 = vld [vmem:[%s9434_s1 + $0xa20] sm:$0xff]  }
 0x132   :  { %6829 = vmatprep.subr.bf16.mxu1 %v7412_v31 }
 0x134   :  { %6808 = vmatpush3.bf16.msra.mxu0 %v7413_v34 }
 0x135   :  { %6830 = vmatpush3.bf16.msra.mxu1 %v7414_v37  ;;  %6809 = vmatprep.subr.bf16.mxu0 %v7415_v40  ;;  %v7449_v37 = vld [vmem:[%s9434_s1 + $0xa28] sm:$0xff]  }
 0x136   :  { %v6507_v23 = vpop.f32.mrb[8].mxu0  ;;  %6831 = vmatprep.subr.bf16.mxu1 %v7416_v43  ;;  %v7453_v43 = vld [vmem:[%s9434_s1 + $0xa30] sm:$0xff]  }
 0x137   :  { %v6529_v25 = vpop.f32.mrb[8].mxu1  ;;  %v6508_v27 = vpop.f32.mrb[9].mxu0 }
 0x138   :  { %v6509_v29 = vadd.f32 %v6508_v27, %v6507_v23  ;;  %v6530_v30 = vpop.f32.mrb[9].mxu1  ;;  %v6510_v33 = vpop.f32.mrb[10].mxu0  ;;  %6810 = vmatpush3.bf16.msra.mxu0 %v7417_v45  ;;  %v7444_v23 = vld [vmem:[%s9434_s1 + $0xae0] sm:$0xff]   ;;  %v7455_v45 = vld [vmem:[%s9434_s1 + $0xa78] sm:$0xff]  }
 0x139   :  { %v6531_v32 = vadd.f32 %v6530_v30, %v6529_v25  ;;  %v6532_v36 = vpop.f32.mrb[10].mxu1  ;;  %v6511_v38 = vpop.f32.mrb[11].mxu0  ;;  %6811 = vmatprep.subr.bf16.mxu0 %v7419_v49  ;;  %v41_v49 = vld [vmem:[%s9437_s0 + $0xa0] sm:$0xff] }
 0x13a   :  { %v4707_v35 = vadd.f32 %v6509_v29, %v8581_v47  ;;  %v6512_v41 = vadd.f32 %v6511_v38, %v6510_v33  ;;  %v6533_v42 = vpop.f32.mrb[11].mxu1  ;;  %v7418_v47 = vld [vmem:[%s9434_s1 + $0x9a8] sm:$0xff]   ;;  %v7446_v29 = vld [vmem:[%s9434_s1 + $0xaa0] sm:$0xff]  }
 0x13b   :  { %v6534_v44 = vadd.f32 %v6533_v42, %v6532_v36  ;;  %6832 = vmatpush3.bf16.msra.mxu1 %v7418_v47  ;;  %v7452_v42 = vld [vmem:[%s9434_s1 + $0xaf0] sm:$0xff]   ;;  %v7457_v47 = vld [vmem:[%s9434_s1 + $0xa38] sm:$0xff]  }
 0x13c   :  { %v8695_v39 = vadd.f32 %v6531_v32, %v4707_v35  ;;  %v4710_v46 = vadd.f32 %v6512_v41, %v8596_v56  ;;  %6833 = vmatprep.subr.bf16.mxu1 %v7420_v50  ;;  %6812 = vmatpush3.bf16.msra.mxu0 %v7421_v51  ;;  %v7426_v56 = vld [vmem:[%s9434_s1 + $0x9b8] sm:$0xff]   ;;  %v7447_v32 = vld [vmem:[%s9434_s1 + $0xa68] sm:$0xff]   ;;  %v7451_v41 = vld [vmem:[%s9434_s1 + $0xa70] sm:$0xff]  }
 0x13d   :  { %6813 = vmatprep.subr.bf16.mxu0 %v7423_v53  ;;  %v7448_v35 = vld [vmem:[%s9434_s1 + $0xae8] sm:$0xff]   ;;  %v73_v50 = vld [vmem:[%s9437_s0 + $0x1a0] sm:$0xff] }
 0x13e   :  { %v8710_v48 = vadd.f32 %v6534_v44, %v4710_v46  ;;  %v7454_v44 = vld [vmem:[%s9434_s1 + $0xab0] sm:$0xff]   ;;  %v7456_v46 = vld [vmem:[%s9434_s1 + $0xaf8] sm:$0xff]   ;;  %v42_v51 = vld [vmem:[%s9437_s0 + $0xa8] sm:$0xff]  ;;  %v5867_v53 = vcombine.low %v41_v49, %v73_v50 }
 0x13f   :  { %6834 = vmatpush3.bf16.msra.mxu1 %v7422_v52  ;;  %v74_v52 = vld [vmem:[%s9437_s0 + $0x1a8] sm:$0xff] }
 0x140   :  { %6835 = vmatprep.subr.bf16.mxu1 %v7424_v54  ;;  %6814 = vmatpush3.bf16.msra.mxu0 %v7425_v55  ;;  %v5868_v54 = vcombine.high %v41_v49, %v73_v50  ;;  %v5869_v55 = vcombine.low %v42_v51, %v74_v52  ;;  %v7491_v49 = vld [vmem:[%s9434_s1 + $0xc40] sm:$0xff]  }
 0x141   :  { %6843 = vmatprep.subr.bf16.mxu0 %v7427_v1  ;;  %v7467_v1 = vld [vmem:[%s9434_s1 + $0xb50] sm:$0xff]   ;;  %v7492_v50 = vld [vmem:[%s9434_s1 + $0xcc0] sm:$0xff]  }
 0x143   :  { %6836 = vmatpush3.bf16.msra.mxu1 %v7426_v56  ;;  %5279 = vmatmul.mubr.bf16.vlgmr.msra.gmra.mrb[36].mxu0 %v5863_v59  ;;  %v5870_v56 = vcombine.high %v42_v51, %v74_v52  ;;  %v7461_v59 = vld [vmem:[%s9434_s1 + $0xb00] sm:$0xff]  }
 0x144   :  { %6865 = vmatprep.subr.bf16.mxu1 %v7428_v2  ;;  %6844 = vmatpush3.bf16.msra.mxu0 %v7429_v3  ;;  %v7468_v2 = vld [vmem:[%s9434_s1 + $0xbd0] sm:$0xff]   ;;  %v7493_v51 = vld [vmem:[%s9434_s1 + $0xc00] sm:$0xff]  }
 0x145   :  { %6845 = vmatprep.subr.bf16.mxu0 %v7431_v5  ;;  %5360 = vmatprep.mubr.bf16.mxu0 %v5868_v54  ;;  %v7469_v3 = vld [vmem:[%s9434_s1 + $0xb10] sm:$0xff]   ;;  %v7471_v5 = vld [vmem:[%s9434_s1 + $0xb58] sm:$0xff]   ;;  %v7494_v52 = vld [vmem:[%s9434_s1 + $0xc80] sm:$0xff]  }
 0x146   :  { %5320 = vmatmul.mubr.bf16.vlgmr.msra.gmra.mrb[36].mxu1 %v5865_v63  ;;  %v7465_v63 = vld [vmem:[%s9434_s1 + $0xb08] sm:$0xff]  }
 0x147   :  { %6866 = vmatpush3.bf16.msra.mxu1 %v7430_v4  ;;  %5401 = vmatprep.mubr.bf16.mxu1 %v5870_v56  ;;  %v7470_v4 = vld [vmem:[%s9434_s1 + $0xb90] sm:$0xff]   ;;  %v7496_v54 = vld [vmem:[%s9434_s1 + $0xcc8] sm:$0xff]  }
 0x148   :  { %6867 = vmatprep.subr.bf16.mxu1 %v7432_v6  ;;  %6846 = vmatpush3.bf16.msra.mxu0 %v7433_v7  ;;  %v7472_v6 = vld [vmem:[%s9434_s1 + $0xbd8] sm:$0xff]   ;;  %v7498_v56 = vld [vmem:[%s9434_s1 + $0xc88] sm:$0xff]  }
 0x149   :  { %6847 = vmatprep.subr.bf16.mxu0 %v7435_v9 }
 0x14b   :  { %6868 = vmatpush3.bf16.msra.mxu1 %v7434_v8  ;;  %v7473_v8 = vld [vmem:[%s9434_s1 + $0xb18] sm:$0xff]  }
 0x14c   :  { %6869 = vmatprep.subr.bf16.mxu1 %v7436_v10  ;;  %6848 = vmatpush3.bf16.msra.mxu0 %v7437_v11  ;;  %v7474_v10 = vld [vmem:[%s9434_s1 + $0xb98] sm:$0xff]  }
 0x14d   :  { %6849 = vmatprep.subr.bf16.mxu0 %v7439_v13 }
 0x14f   :  { %6870 = vmatpush3.bf16.msra.mxu1 %v7438_v12  ;;  %v7475_v12 = vld [vmem:[%s9434_s1 + $0xb60] sm:$0xff]  }
 0x150   :  { %6871 = vmatprep.subr.bf16.mxu1 %v7440_v14  ;;  %6850 = vmatpush3.bf16.msra.mxu0 %v7441_v16 }
 0x151   :  { %6851 = vmatprep.subr.bf16.mxu0 %v7443_v20 }
 0x153   :  { %6872 = vmatpush3.bf16.msra.mxu1 %v7442_v18  ;;  %v7477_v18 = vld [vmem:[%s9434_s1 + $0xb20] sm:$0xff]  }
 0x154   :  { %6873 = vmatprep.subr.bf16.mxu1 %v7444_v23  ;;  %6852 = vmatpush3.bf16.msra.mxu0 %v7445_v26 }
 0x155   :  { %6853 = vmatprep.subr.bf16.mxu0 %v7447_v32 }
 0x156   :  { %v6551_v15 = vpop.f32.mrb[12].mxu0 }
 0x157   :  { %v6573_v17 = vpop.f32.mrb[12].mxu1  ;;  %v6552_v19 = vpop.f32.mrb[13].mxu0  ;;  %6874 = vmatpush3.bf16.msra.mxu1 %v7446_v29  ;;  %v7481_v29 = vld [vmem:[%s9434_s1 + $0xb28] sm:$0xff]  }
 0x158   :  { %v6553_v21 = vadd.f32 %v6552_v19, %v6551_v15  ;;  %v6574_v22 = vpop.f32.mrb[13].mxu1  ;;  %v6554_v25 = vpop.f32.mrb[14].mxu0  ;;  %6875 = vmatprep.subr.bf16.mxu1 %v7448_v35  ;;  %6854 = vmatpush3.bf16.msra.mxu0 %v7449_v37  ;;  %v7476_v15 = vld [vmem:[%s9434_s1 + $0xbe0] sm:$0xff]   ;;  %v7485_v35 = vld [vmem:[%s9434_s1 + $0xb30] sm:$0xff]   ;;  %v7487_v37 = vld [vmem:[%s9434_s1 + $0xb78] sm:$0xff]  }
 0x159   :  { %v6575_v24 = vadd.f32 %v6574_v22, %v6573_v17  ;;  %v6576_v28 = vpop.f32.mrb[14].mxu1  ;;  %v6555_v30 = vpop.f32.mrb[15].mxu0  ;;  %6855 = vmatprep.subr.bf16.mxu0 %v7451_v41  ;;  %v43_v41 = vld [vmem:[%s9437_s0 + $0xb0] sm:$0xff] }
 0x15a   :  { %v4789_v27 = vadd.f32 %v6553_v21, %v8695_v39  ;;  %v6556_v33 = vadd.f32 %v6555_v30, %v6554_v25  ;;  %v6577_v34 = vpop.f32.mrb[15].mxu1  ;;  %v7450_v39 = vld [vmem:[%s9434_s1 + $0xaa8] sm:$0xff]   ;;  %v7478_v21 = vld [vmem:[%s9434_s1 + $0xba0] sm:$0xff]  }
 0x15b   :  { %v6578_v36 = vadd.f32 %v6577_v34, %v6576_v28  ;;  %6876 = vmatpush3.bf16.msra.mxu1 %v7450_v39  ;;  %v7484_v34 = vld [vmem:[%s9434_s1 + $0xbf0] sm:$0xff]   ;;  %v7489_v39 = vld [vmem:[%s9434_s1 + $0xb38] sm:$0xff]  }
 0x15c   :  { %v8809_v31 = vadd.f32 %v6575_v24, %v4789_v27  ;;  %v4792_v38 = vadd.f32 %v6556_v33, %v8710_v48  ;;  %6877 = vmatprep.subr.bf16.mxu1 %v7452_v42  ;;  %6856 = vmatpush3.bf16.msra.mxu0 %v7453_v43  ;;  %v7458_v48 = vld [vmem:[%s9434_s1 + $0xab8] sm:$0xff]   ;;  %v7479_v24 = vld [vmem:[%s9434_s1 + $0xb68] sm:$0xff]   ;;  %v7483_v33 = vld [vmem:[%s9434_s1 + $0xb70] sm:$0xff]  }
 0x15d   :  { %6857 = vmatprep.subr.bf16.mxu0 %v7455_v45  ;;  %v7480_v27 = vld [vmem:[%s9434_s1 + $0xbe8] sm:$0xff]   ;;  %v75_v42 = vld [vmem:[%s9437_s0 + $0x1b0] sm:$0xff]  ;;  %v44_v43 = vld [vmem:[%s9437_s0 + $0xb8] sm:$0xff] }
 0x15e   :  { %v8824_v40 = vadd.f32 %v6578_v36, %v4792_v38  ;;  %v7486_v36 = vld [vmem:[%s9434_s1 + $0xbb0] sm:$0xff]   ;;  %v7488_v38 = vld [vmem:[%s9434_s1 + $0xbf8] sm:$0xff]   ;;  %v5872_v45 = vcombine.high %v43_v41, %v75_v42 }
 0x15f   :  { %6878 = vmatpush3.bf16.msra.mxu1 %v7454_v44  ;;  %v5871_v44 = vcombine.low %v43_v41, %v75_v42  ;;  %v7523_v41 = vld [vmem:[%s9434_s1 + $0xd40] sm:$0xff]  }
 0x160   :  { %6879 = vmatprep.subr.bf16.mxu1 %v7456_v46  ;;  %6858 = vmatpush3.bf16.msra.mxu0 %v7457_v47  ;;  %v76_v46 = vld [vmem:[%s9437_s0 + $0x1b8] sm:$0xff]  ;;  %v7524_v42 = vld [vmem:[%s9434_s1 + $0xdc0] sm:$0xff]  }
 0x161   :  { %6887 = vmatprep.subr.bf16.mxu0 %v7459_v57  ;;  %v5873_v47 = vcombine.low %v44_v43, %v76_v46  ;;  %v7499_v57 = vld [vmem:[%s9434_s1 + $0xc50] sm:$0xff]  }
 0x163   :  { %6880 = vmatpush3.bf16.msra.mxu1 %v7458_v48  ;;  %5361 = vmatmul.mubr.bf16.vlgmr.msra.gmra.mrb[40].mxu0 %v5867_v53  ;;  %v5874_v48 = vcombine.high %v44_v43, %v76_v46  ;;  %v7495_v53 = vld [vmem:[%s9434_s1 + $0xc48] sm:$0xff]   ;;  %v7525_v43 = vld [vmem:[%s9434_s1 + $0xd00] sm:$0xff]  }
 0x164   :  { %6909 = vmatprep.subr.bf16.mxu1 %v7460_v58  ;;  %6888 = vmatpush3.bf16.msra.mxu0 %v7461_v59  ;;  %v7500_v58 = vld [vmem:[%s9434_s1 + $0xcd0] sm:$0xff]   ;;  %v7528_v46 = vld [vmem:[%s9434_s1 + $0xdc8] sm:$0xff]  }
 0x165   :  { %6889 = vmatprep.subr.bf16.mxu0 %v7463_v61  ;;  %5442 = vmatprep.mubr.bf16.mxu0 %v5872_v45  ;;  %v7501_v59 = vld [vmem:[%s9434_s1 + $0xc10] sm:$0xff]   ;;  %v7503_v61 = vld [vmem:[%s9434_s1 + $0xc58] sm:$0xff]   ;;  %v7527_v45 = vld [vmem:[%s9434_s1 + $0xd48] sm:$0xff]  }
 0x166   :  { %5402 = vmatmul.mubr.bf16.vlgmr.msra.gmra.mrb[40].mxu1 %v5869_v55  ;;  %v7497_v55 = vld [vmem:[%s9434_s1 + $0xc08] sm:$0xff]  }
 0x167   :  { %6910 = vmatpush3.bf16.msra.mxu1 %v7462_v60  ;;  %5483 = vmatprep.mubr.bf16.mxu1 %v5874_v48  ;;  %v7502_v60 = vld [vmem:[%s9434_s1 + $0xc90] sm:$0xff]   ;;  %v7530_v48 = vld [vmem:[%s9434_s1 + $0xd88] sm:$0xff]  }
 0x168   :  { %6911 = vmatprep.subr.bf16.mxu1 %v7464_v62  ;;  %6890 = vmatpush3.bf16.msra.mxu0 %v7465_v63  ;;  %v7504_v62 = vld [vmem:[%s9434_s1 + $0xcd8] sm:$0xff]  }
 0x169   :  { %6891 = vmatprep.subr.bf16.mxu0 %v7467_v1 }
 0x16b   :  { %6912 = vmatpush3.bf16.msra.mxu1 %v7466_v0  ;;  %v7505_v0 = vld [vmem:[%s9434_s1 + $0xc18] sm:$0xff]  }
 0x16c   :  { %6913 = vmatprep.subr.bf16.mxu1 %v7468_v2  ;;  %6892 = vmatpush3.bf16.msra.mxu0 %v7469_v3  ;;  %v7506_v2 = vld [vmem:[%s9434_s1 + $0xc98] sm:$0xff]  }
 0x16d   :  { %6893 = vmatprep.subr.bf16.mxu0 %v7471_v5 }
 0x16f   :  { %6914 = vmatpush3.bf16.msra.mxu1 %v7470_v4  ;;  %v7507_v4 = vld [vmem:[%s9434_s1 + $0xc60] sm:$0xff]  }
 0x170   :  { %6915 = vmatprep.subr.bf16.mxu1 %v7472_v6  ;;  %6894 = vmatpush3.bf16.msra.mxu0 %v7473_v8 }
 0x171   :  { %6895 = vmatprep.subr.bf16.mxu0 %v7475_v12 }
 0x173   :  { %6916 = vmatpush3.bf16.msra.mxu1 %v7474_v10  ;;  %v7509_v10 = vld [vmem:[%s9434_s1 + $0xc20] sm:$0xff]  }
 0x174   :  { %6917 = vmatprep.subr.bf16.mxu1 %v7476_v15  ;;  %6896 = vmatpush3.bf16.msra.mxu0 %v7477_v18 }
 0x175   :  { %6897 = vmatprep.subr.bf16.mxu0 %v7479_v24 }
 0x176   :  { %v6595_v7 = vpop.f32.mrb[16].mxu0 }
 0x177   :  { %v6617_v9 = vpop.f32.mrb[16].mxu1  ;;  %v6596_v11 = vpop.f32.mrb[17].mxu0  ;;  %6918 = vmatpush3.bf16.msra.mxu1 %v7478_v21  ;;  %v7513_v21 = vld [vmem:[%s9434_s1 + $0xc28] sm:$0xff]  }
 0x178   :  { %v6597_v13 = vadd.f32 %v6596_v11, %v6595_v7  ;;  %v6618_v14 = vpop.f32.mrb[17].mxu1  ;;  %v6598_v17 = vpop.f32.mrb[18].mxu0  ;;  %6919 = vmatprep.subr.bf16.mxu1 %v7480_v27  ;;  %6898 = vmatpush3.bf16.msra.mxu0 %v7481_v29  ;;  %v7508_v7 = vld [vmem:[%s9434_s1 + $0xce0] sm:$0xff]   ;;  %v7517_v27 = vld [vmem:[%s9434_s1 + $0xc30] sm:$0xff]   ;;  %v7519_v29 = vld [vmem:[%s9434_s1 + $0xc78] sm:$0xff]  }
 0x179   :  { %v6619_v16 = vadd.f32 %v6618_v14, %v6617_v9  ;;  %v6620_v20 = vpop.f32.mrb[18].mxu1  ;;  %v6599_v22 = vpop.f32.mrb[19].mxu0  ;;  %6899 = vmatprep.subr.bf16.mxu0 %v7483_v33  ;;  %v45_v33 = vld [vmem:[%s9437_s0 + $0xc0] sm:$0xff] }
 0x17a   :  { %v4871_v19 = vadd.f32 %v6597_v13, %v8809_v31  ;;  %v6600_v25 = vadd.f32 %v6599_v22, %v6598_v17  ;;  %v6621_v26 = vpop.f32.mrb[19].mxu1  ;;  %v7482_v31 = vld [vmem:[%s9434_s1 + $0xba8] sm:$0xff]   ;;  %v7510_v13 = vld [vmem:[%s9434_s1 + $0xca0] sm:$0xff]  }
 0x17b   :  { %v6622_v28 = vadd.f32 %v6621_v26, %v6620_v20  ;;  %6920 = vmatpush3.bf16.msra.mxu1 %v7482_v31  ;;  %v7516_v26 = vld [vmem:[%s9434_s1 + $0xcf0] sm:$0xff]   ;;  %v7521_v31 = vld [vmem:[%s9434_s1 + $0xc38] sm:$0xff]  }
 0x17c   :  { %v8923_v23 = vadd.f32 %v6619_v16, %v4871_v19  ;;  %v4874_v30 = vadd.f32 %v6600_v25, %v8824_v40  ;;  %6921 = vmatprep.subr.bf16.mxu1 %v7484_v34  ;;  %6900 = vmatpush3.bf16.msra.mxu0 %v7485_v35  ;;  %v7490_v40 = vld [vmem:[%s9434_s1 + $0xbb8] sm:$0xff]   ;;  %v7511_v16 = vld [vmem:[%s9434_s1 + $0xc68] sm:$0xff]   ;;  %v7515_v25 = vld [vmem:[%s9434_s1 + $0xc70] sm:$0xff]  }
 0x17d   :  { %6901 = vmatprep.subr.bf16.mxu0 %v7487_v37  ;;  %v7512_v19 = vld [vmem:[%s9434_s1 + $0xce8] sm:$0xff]   ;;  %v77_v34 = vld [vmem:[%s9437_s0 + $0x1c0] sm:$0xff] }
 0x17e   :  { %v8938_v32 = vadd.f32 %v6622_v28, %v4874_v30  ;;  %v7518_v28 = vld [vmem:[%s9434_s1 + $0xcb0] sm:$0xff]   ;;  %v7520_v30 = vld [vmem:[%s9434_s1 + $0xcf8] sm:$0xff]   ;;  %v5875_v35 = vcombine.low %v45_v33, %v77_v34  ;;  %v46_v37 = vld [vmem:[%s9437_s0 + $0xc8] sm:$0xff] }
 0x17f   :  { %6922 = vmatpush3.bf16.msra.mxu1 %v7486_v36  ;;  %v5876_v36 = vcombine.high %v45_v33, %v77_v34  ;;  %v7555_v33 = vld [vmem:[%s9434_s1 + $0xe40] sm:$0xff]  }
 0x180   :  { %6923 = vmatprep.subr.bf16.mxu1 %v7488_v38  ;;  %6902 = vmatpush3.bf16.msra.mxu0 %v7489_v39  ;;  %v78_v38 = vld [vmem:[%s9437_s0 + $0x1c8] sm:$0xff]  ;;  %v7556_v34 = vld [vmem:[%s9434_s1 + $0xec0] sm:$0xff]  }
 0x181   :  { %6931 = vmatprep.subr.bf16.mxu0 %v7491_v49  ;;  %v5877_v39 = vcombine.low %v46_v37, %v78_v38  ;;  %v7531_v49 = vld [vmem:[%s9434_s1 + $0xd50] sm:$0xff]  }
 0x183   :  { %6924 = vmatpush3.bf16.msra.mxu1 %v7490_v40  ;;  %5443 = vmatmul.mubr.bf16.vlgmr.msra.gmra.mrb[44].mxu0 %v5871_v44  ;;  %v5878_v40 = vcombine.high %v46_v37, %v78_v38  ;;  %v7526_v44 = vld [vmem:[%s9434_s1 + $0xd80] sm:$0xff]   ;;  %v7559_v37 = vld [vmem:[%s9434_s1 + $0xe48] sm:$0xff]  }
 0x184   :  { %6953 = vmatprep.subr.bf16.mxu1 %v7492_v50  ;;  %6932 = vmatpush3.bf16.msra.mxu0 %v7493_v51  ;;  %v7532_v50 = vld [vmem:[%s9434_s1 + $0xdd0] sm:$0xff]   ;;  %v7560_v38 = vld [vmem:[%s9434_s1 + $0xec8] sm:$0xff]  }
 0x185   :  { %6933 = vmatprep.subr.bf16.mxu0 %v7495_v53  ;;  %5524 = vmatprep.mubr.bf16.mxu0 %v5876_v36  ;;  %v7533_v51 = vld [vmem:[%s9434_s1 + $0xd10] sm:$0xff]   ;;  %v7535_v53 = vld [vmem:[%s9434_s1 + $0xd58] sm:$0xff]   ;;  %v7558_v36 = vld [vmem:[%s9434_s1 + $0xe80] sm:$0xff]  }
 0x186   :  { %5484 = vmatmul.mubr.bf16.vlgmr.msra.gmra.mrb[44].mxu1 %v5873_v47  ;;  %v7529_v47 = vld [vmem:[%s9434_s1 + $0xd08] sm:$0xff]  }
 0x187   :  { %6954 = vmatpush3.bf16.msra.mxu1 %v7494_v52  ;;  %5565 = vmatprep.mubr.bf16.mxu1 %v5878_v40  ;;  %v7534_v52 = vld [vmem:[%s9434_s1 + $0xd90] sm:$0xff]   ;;  %v7562_v40 = vld [vmem:[%s9434_s1 + $0xe88] sm:$0xff]  }
 0x188   :  { %6955 = vmatprep.subr.bf16.mxu1 %v7496_v54  ;;  %6934 = vmatpush3.bf16.msra.mxu0 %v7497_v55  ;;  %v7536_v54 = vld [vmem:[%s9434_s1 + $0xdd8] sm:$0xff]  }
 0x189   :  { %6935 = vmatprep.subr.bf16.mxu0 %v7499_v57 }
 0x18b   :  { %6956 = vmatpush3.bf16.msra.mxu1 %v7498_v56  ;;  %v7537_v56 = vld [vmem:[%s9434_s1 + $0xd18] sm:$0xff]  }
 0x18c   :  { %6957 = vmatprep.subr.bf16.mxu1 %v7500_v58  ;;  %6936 = vmatpush3.bf16.msra.mxu0 %v7501_v59  ;;  %v7538_v58 = vld [vmem:[%s9434_s1 + $0xd98] sm:$0xff]  }
 0x18d   :  { %6937 = vmatprep.subr.bf16.mxu0 %v7503_v61 }
 0x18f   :  { %6958 = vmatpush3.bf16.msra.mxu1 %v7502_v60  ;;  %v7539_v60 = vld [vmem:[%s9434_s1 + $0xd60] sm:$0xff]  }
 0x190   :  { %6959 = vmatprep.subr.bf16.mxu1 %v7504_v62  ;;  %6938 = vmatpush3.bf16.msra.mxu0 %v7505_v0 }
 0x191   :  { %6939 = vmatprep.subr.bf16.mxu0 %v7507_v4 }
 0x193   :  { %6960 = vmatpush3.bf16.msra.mxu1 %v7506_v2  ;;  %v7541_v2 = vld [vmem:[%s9434_s1 + $0xd20] sm:$0xff]  }
 0x194   :  { %6961 = vmatprep.subr.bf16.mxu1 %v7508_v7  ;;  %6940 = vmatpush3.bf16.msra.mxu0 %v7509_v10 }
 0x195   :  { %6941 = vmatprep.subr.bf16.mxu0 %v7511_v16 }
 0x196   :  { %v6639_v63 = vpop.f32.mrb[20].mxu0 }
 0x197   :  { %v6661_v1 = vpop.f32.mrb[20].mxu1  ;;  %v6640_v3 = vpop.f32.mrb[21].mxu0  ;;  %6962 = vmatpush3.bf16.msra.mxu1 %v7510_v13  ;;  %v7545_v13 = vld [vmem:[%s9434_s1 + $0xd28] sm:$0xff]  }
 0x198   :  { %v6641_v5 = vadd.f32 %v6640_v3, %v6639_v63  ;;  %v6662_v6 = vpop.f32.mrb[21].mxu1  ;;  %v6642_v9 = vpop.f32.mrb[22].mxu0  ;;  %6963 = vmatprep.subr.bf16.mxu1 %v7512_v19  ;;  %6942 = vmatpush3.bf16.msra.mxu0 %v7513_v21  ;;  %v7540_v63 = vld [vmem:[%s9434_s1 + $0xde0] sm:$0xff]   ;;  %v7549_v19 = vld [vmem:[%s9434_s1 + $0xd30] sm:$0xff]   ;;  %v7551_v21 = vld [vmem:[%s9434_s1 + $0xd78] sm:$0xff]  }
 0x199   :  { %v6663_v8 = vadd.f32 %v6662_v6, %v6661_v1  ;;  %v6664_v12 = vpop.f32.mrb[22].mxu1  ;;  %v6643_v14 = vpop.f32.mrb[23].mxu0  ;;  %6943 = vmatprep.subr.bf16.mxu0 %v7515_v25  ;;  %v47_v25 = vld [vmem:[%s9437_s0 + $0xd0] sm:$0xff] }
 0x19a   :  { %v4953_v11 = vadd.f32 %v6641_v5, %v8923_v23  ;;  %v6644_v17 = vadd.f32 %v6643_v14, %v6642_v9  ;;  %v6665_v18 = vpop.f32.mrb[23].mxu1  ;;  %v7514_v23 = vld [vmem:[%s9434_s1 + $0xca8] sm:$0xff]   ;;  %v7542_v5 = vld [vmem:[%s9434_s1 + $0xda0] sm:$0xff]  }
 0x19b   :  { %v6666_v20 = vadd.f32 %v6665_v18, %v6664_v12  ;;  %6964 = vmatpush3.bf16.msra.mxu1 %v7514_v23  ;;  %v7548_v18 = vld [vmem:[%s9434_s1 + $0xdf0] sm:$0xff]   ;;  %v7553_v23 = vld [vmem:[%s9434_s1 + $0xd38] sm:$0xff]  }
 0x19c   :  { %v9037_v15 = vadd.f32 %v6663_v8, %v4953_v11  ;;  %v4956_v22 = vadd.f32 %v6644_v17, %v8938_v32  ;;  %6965 = vmatprep.subr.bf16.mxu1 %v7516_v26  ;;  %6944 = vmatpush3.bf16.msra.mxu0 %v7517_v27  ;;  %v7522_v32 = vld [vmem:[%s9434_s1 + $0xcb8] sm:$0xff]   ;;  %v7543_v8 = vld [vmem:[%s9434_s1 + $0xd68] sm:$0xff]   ;;  %v7547_v17 = vld [vmem:[%s9434_s1 + $0xd70] sm:$0xff]  }
 0x19d   :  { %6945 = vmatprep.subr.bf16.mxu0 %v7519_v29  ;;  %v7544_v11 = vld [vmem:[%s9434_s1 + $0xde8] sm:$0xff]   ;;  %v79_v26 = vld [vmem:[%s9437_s0 + $0x1d0] sm:$0xff]  ;;  %v48_v27 = vld [vmem:[%s9437_s0 + $0xd8] sm:$0xff] }
 0x19e   :  { %v9052_v24 = vadd.f32 %v6666_v20, %v4956_v22  ;;  %v7550_v20 = vld [vmem:[%s9434_s1 + $0xdb0] sm:$0xff]   ;;  %v7552_v22 = vld [vmem:[%s9434_s1 + $0xdf8] sm:$0xff]   ;;  %v5879_v29 = vcombine.low %v47_v25, %v79_v26 }
 0x19f   :  { %6966 = vmatpush3.bf16.msra.mxu1 %v7518_v28  ;;  %v80_v28 = vld [vmem:[%s9437_s0 + $0x1d8] sm:$0xff] }
 0x1a0   :  { %6967 = vmatprep.subr.bf16.mxu1 %v7520_v30  ;;  %6946 = vmatpush3.bf16.msra.mxu0 %v7521_v31  ;;  %v5880_v30 = vcombine.high %v47_v25, %v79_v26  ;;  %v5881_v31 = vcombine.low %v48_v27, %v80_v28  ;;  %v7587_v25 = vld [vmem:[%s9434_s1 + $0xf40] sm:$0xff]  }
 0x1a1   :  { %6975 = vmatprep.subr.bf16.mxu0 %v7523_v41  ;;  %v7563_v41 = vld [vmem:[%s9434_s1 + $0xe50] sm:$0xff]   ;;  %v7588_v26 = vld [vmem:[%s9434_s1 + $0xfc0] sm:$0xff]  }
 0x1a3   :  { %6968 = vmatpush3.bf16.msra.mxu1 %v7522_v32  ;;  %5525 = vmatmul.mubr.bf16.vlgmr.msra.gmra.mrb[48].mxu0 %v5875_v35  ;;  %v5882_v32 = vcombine.high %v48_v27, %v80_v28  ;;  %v7557_v35 = vld [vmem:[%s9434_s1 + $0xe00] sm:$0xff]  }
 0x1a4   :  { %6997 = vmatprep.subr.bf16.mxu1 %v7524_v42  ;;  %6976 = vmatpush3.bf16.msra.mxu0 %v7525_v43  ;;  %v7564_v42 = vld [vmem:[%s9434_s1 + $0xed0] sm:$0xff]   ;;  %v7589_v27 = vld [vmem:[%s9434_s1 + $0xf00] sm:$0xff]  }
 0x1a5   :  { %6977 = vmatprep.subr.bf16.mxu0 %v7527_v45  ;;  %5606 = vmatprep.mubr.bf16.mxu0 %v5880_v30  ;;  %v7565_v43 = vld [vmem:[%s9434_s1 + $0xe10] sm:$0xff]   ;;  %v7567_v45 = vld [vmem:[%s9434_s1 + $0xe58] sm:$0xff]   ;;  %v7590_v28 = vld [vmem:[%s9434_s1 + $0xf80] sm:$0xff]  }
 0x1a6   :  { %5566 = vmatmul.mubr.bf16.vlgmr.msra.gmra.mrb[48].mxu1 %v5877_v39  ;;  %v7561_v39 = vld [vmem:[%s9434_s1 + $0xe08] sm:$0xff]  }
 0x1a7   :  { %6998 = vmatpush3.bf16.msra.mxu1 %v7526_v44  ;;  %5647 = vmatprep.mubr.bf16.mxu1 %v5882_v32  ;;  %v7566_v44 = vld [vmem:[%s9434_s1 + $0xe90] sm:$0xff]   ;;  %v7592_v30 = vld [vmem:[%s9434_s1 + $0xfc8] sm:$0xff]  }
 0x1a8   :  { %6999 = vmatprep.subr.bf16.mxu1 %v7528_v46  ;;  %6978 = vmatpush3.bf16.msra.mxu0 %v7529_v47  ;;  %v7568_v46 = vld [vmem:[%s9434_s1 + $0xed8] sm:$0xff]   ;;  %v7594_v32 = vld [vmem:[%s9434_s1 + $0xf88] sm:$0xff]  }
 0x1a9   :  { %6979 = vmatprep.subr.bf16.mxu0 %v7531_v49  ;;  %v7569_v47 = vld [vmem:[%s9434_s1 + $0xe18] sm:$0xff]  }
 0x1aa   :  { %v7570_v49 = vld [vmem:[%s9434_s1 + $0xe98] sm:$0xff]  }
 0x1ab   :  { %7000 = vmatpush3.bf16.msra.mxu1 %v7530_v48 }
 0x1ac   :  { %7001 = vmatprep.subr.bf16.mxu1 %v7532_v50  ;;  %6980 = vmatpush3.bf16.msra.mxu0 %v7533_v51  ;;  %v7571_v51 = vld [vmem:[%s9434_s1 + $0xe60] sm:$0xff]  }
 0x1ad   :  { %6981 = vmatprep.subr.bf16.mxu0 %v7535_v53  ;;  %v7572_v53 = vld [vmem:[%s9434_s1 + $0xee0] sm:$0xff]  }
 0x1af   :  { %7002 = vmatpush3.bf16.msra.mxu1 %v7534_v52 }
 0x1b0   :  { %7003 = vmatprep.subr.bf16.mxu1 %v7536_v54  ;;  %6982 = vmatpush3.bf16.msra.mxu0 %v7537_v56  ;;  %v7573_v56 = vld [vmem:[%s9434_s1 + $0xe20] sm:$0xff]  }
 0x1b1   :  { %6983 = vmatprep.subr.bf16.mxu0 %v7539_v60 }
 0x1b3   :  { %7004 = vmatpush3.bf16.msra.mxu1 %v7538_v58 }
 0x1b4   :  { %7005 = vmatprep.subr.bf16.mxu1 %v7540_v63  ;;  %6984 = vmatpush3.bf16.msra.mxu0 %v7541_v2 }
 0x1b5   :  { %6985 = vmatprep.subr.bf16.mxu0 %v7543_v8  ;;  %v7579_v8 = vld [vmem:[%s9434_s1 + $0xe70] sm:$0xff]  }
 0x1b6   :  { %v6683_v55 = vpop.f32.mrb[24].mxu0 }
 0x1b7   :  { %v6705_v57 = vpop.f32.mrb[24].mxu1  ;;  %v6684_v59 = vpop.f32.mrb[25].mxu0  ;;  %7006 = vmatpush3.bf16.msra.mxu1 %v7542_v5 }
 0x1b8   :  { %v6685_v61 = vadd.f32 %v6684_v59, %v6683_v55  ;;  %v6706_v62 = vpop.f32.mrb[25].mxu1  ;;  %v6686_v1 = vpop.f32.mrb[26].mxu0  ;;  %7007 = vmatprep.subr.bf16.mxu1 %v7544_v11  ;;  %6986 = vmatpush3.bf16.msra.mxu0 %v7545_v13  ;;  %v7574_v59 = vld [vmem:[%s9434_s1 + $0xea0] sm:$0xff]   ;;  %v7581_v11 = vld [vmem:[%s9434_s1 + $0xe30] sm:$0xff]   ;;  %v7583_v13 = vld [vmem:[%s9434_s1 + $0xe78] sm:$0xff]  }
 0x1b9   :  { %v6707_v0 = vadd.f32 %v6706_v62, %v6705_v57  ;;  %v6708_v4 = vpop.f32.mrb[26].mxu1  ;;  %v6687_v6 = vpop.f32.mrb[27].mxu0  ;;  %6987 = vmatprep.subr.bf16.mxu0 %v7547_v17  ;;  %v7575_v62 = vld [vmem:[%s9434_s1 + $0xe68] sm:$0xff]   ;;  %v49_v17 = vld [vmem:[%s9437_s0 + $0xe0] sm:$0xff] }
 0x1ba   :  { %v5035_v3 = vadd.f32 %v6685_v61, %v9037_v15  ;;  %v6688_v9 = vadd.f32 %v6687_v6, %v6686_v1  ;;  %v6709_v10 = vpop.f32.mrb[27].mxu1  ;;  %v7546_v15 = vld [vmem:[%s9434_s1 + $0xda8] sm:$0xff]  }
 0x1bb   :  { %v6710_v12 = vadd.f32 %v6709_v10, %v6708_v4  ;;  %7008 = vmatpush3.bf16.msra.mxu1 %v7546_v15  ;;  %v7576_v1 = vld [vmem:[%s9434_s1 + $0xee8] sm:$0xff]   ;;  %v7580_v10 = vld [vmem:[%s9434_s1 + $0xef0] sm:$0xff]   ;;  %v7585_v15 = vld [vmem:[%s9434_s1 + $0xe38] sm:$0xff]  }
 0x1bc   :  { %v9151_v7 = vadd.f32 %v6707_v0, %v5035_v3  ;;  %v5038_v14 = vadd.f32 %v6688_v9, %v9052_v24  ;;  %7009 = vmatprep.subr.bf16.mxu1 %v7548_v18  ;;  %6988 = vmatpush3.bf16.msra.mxu0 %v7549_v19  ;;  %v7554_v24 = vld [vmem:[%s9434_s1 + $0xdb8] sm:$0xff]   ;;  %v7577_v4 = vld [vmem:[%s9434_s1 + $0xe28] sm:$0xff]   ;;  %v81_v18 = vld [vmem:[%s9437_s0 + $0x1e0] sm:$0xff] }
 0x1bd   :  { %6989 = vmatprep.subr.bf16.mxu0 %v7551_v21  ;;  %v7578_v6 = vld [vmem:[%s9434_s1 + $0xea8] sm:$0xff]   ;;  %v5884_v21 = vcombine.high %v49_v17, %v81_v18 }
 0x1be   :  { %v9166_v16 = vadd.f32 %v6710_v12, %v5038_v14  ;;  %v7582_v12 = vld [vmem:[%s9434_s1 + $0xeb0] sm:$0xff]   ;;  %v7584_v14 = vld [vmem:[%s9434_s1 + $0xef8] sm:$0xff]   ;;  %v50_v19 = vld [vmem:[%s9437_s0 + $0xe8] sm:$0xff] }
 0x1bf   :  { %7010 = vmatpush3.bf16.msra.mxu1 %v7550_v20  ;;  %v5883_v20 = vcombine.low %v49_v17, %v81_v18 }
 0x1c0   :  { %7011 = vmatprep.subr.bf16.mxu1 %v7552_v22  ;;  %6990 = vmatpush3.bf16.msra.mxu0 %v7553_v23  ;;  %v82_v22 = vld [vmem:[%s9437_s0 + $0x1e8] sm:$0xff] }
 0x1c1   :  { %7019 = vmatprep.subr.bf16.mxu0 %v7555_v33  ;;  %v5885_v23 = vcombine.low %v50_v19, %v82_v22  ;;  %v7595_v33 = vld [vmem:[%s9434_s1 + $0xf50] sm:$0xff]  }
 0x1c3   :  { %7012 = vmatpush3.bf16.msra.mxu1 %v7554_v24  ;;  %5607 = vmatmul.mubr.bf16.vlgmr.msra.gmra.mrb[52].mxu0 %v5879_v29  ;;  %v5886_v24 = vcombine.high %v50_v19, %v82_v22  ;;  %v7591_v29 = vld [vmem:[%s9434_s1 + $0xf48] sm:$0xff]  }
 0x1c4   :  { %7041 = vmatprep.subr.bf16.mxu1 %v7556_v34  ;;  %7020 = vmatpush3.bf16.msra.mxu0 %v7557_v35  ;;  %v7596_v34 = vld [vmem:[%s9434_s1 + $0xfd0] sm:$0xff]  }
 0x1c5   :  { %7021 = vmatprep.subr.bf16.mxu0 %v7559_v37  ;;  %5688 = vmatprep.mubr.bf16.mxu0 %v5884_v21  ;;  %v7597_v35 = vld [vmem:[%s9434_s1 + $0xf10] sm:$0xff]   ;;  %v7599_v37 = vld [vmem:[%s9434_s1 + $0xf58] sm:$0xff]  }
 0x1c6   :  { %5648 = vmatmul.mubr.bf16.vlgmr.msra.gmra.mrb[52].mxu1 %v5881_v31  ;;  %v7593_v31 = vld [vmem:[%s9434_s1 + $0xf08] sm:$0xff]  }
 0x1c7   :  { %7042 = vmatpush3.bf16.msra.mxu1 %v7558_v36  ;;  %5729 = vmatprep.mubr.bf16.mxu1 %v5886_v24  ;;  %v7598_v36 = vld [vmem:[%s9434_s1 + $0xf90] sm:$0xff]  }
 0x1c8   :  { %7043 = vmatprep.subr.bf16.mxu1 %v7560_v38  ;;  %7022 = vmatpush3.bf16.msra.mxu0 %v7561_v39  ;;  %v7600_v38 = vld [vmem:[%s9434_s1 + $0xfd8] sm:$0xff]  }
 0x1c9   :  { %7023 = vmatprep.subr.bf16.mxu0 %v7563_v41 }
 0x1cb   :  { %7044 = vmatpush3.bf16.msra.mxu1 %v7562_v40  ;;  %v7601_v40 = vld [vmem:[%s9434_s1 + $0xf18] sm:$0xff]  }
 0x1cc   :  { %7045 = vmatprep.subr.bf16.mxu1 %v7564_v42  ;;  %7024 = vmatpush3.bf16.msra.mxu0 %v7565_v43  ;;  %v7602_v42 = vld [vmem:[%s9434_s1 + $0xf98] sm:$0xff]  }
 0x1cd   :  { %7025 = vmatprep.subr.bf16.mxu0 %v7567_v45 }
 0x1cf   :  { %7046 = vmatpush3.bf16.msra.mxu1 %v7566_v44  ;;  %v7603_v44 = vld [vmem:[%s9434_s1 + $0xf60] sm:$0xff]  }
 0x1d0   :  { %7047 = vmatprep.subr.bf16.mxu1 %v7568_v46  ;;  %7026 = vmatpush3.bf16.msra.mxu0 %v7569_v47  ;;  %v7604_v47 = vld [vmem:[%s9434_s1 + $0xfe0] sm:$0xff]  }
 0x1d1   :  { %7027 = vmatprep.subr.bf16.mxu0 %v7571_v51 }
 0x1d3   :  { %7048 = vmatpush3.bf16.msra.mxu1 %v7570_v49 }
 0x1d4   :  { %7049 = vmatprep.subr.bf16.mxu1 %v7572_v53  ;;  %7028 = vmatpush3.bf16.msra.mxu0 %v7573_v56  ;;  %v7606_v53 = vld [vmem:[%s9434_s1 + $0xfa0] sm:$0xff]   ;;  %v7607_v56 = vld [vmem:[%s9434_s1 + $0xf68] sm:$0xff]  }
 0x1d5   :  { %7029 = vmatprep.subr.bf16.mxu0 %v7575_v62 }
 0x1d6   :  { %v6727_v48 = vpop.f32.mrb[28].mxu0 }
 0x1d7   :  { %v6749_v50 = vpop.f32.mrb[28].mxu1  ;;  %v6728_v52 = vpop.f32.mrb[29].mxu0  ;;  %7050 = vmatpush3.bf16.msra.mxu1 %v7574_v59  ;;  %v7608_v59 = vld [vmem:[%s9434_s1 + $0xfe8] sm:$0xff]  }
 0x1d8   :  { %v6729_v54 = vadd.f32 %v6728_v52, %v6727_v48  ;;  %v6750_v55 = vpop.f32.mrb[29].mxu1  ;;  %v6730_v58 = vpop.f32.mrb[30].mxu0  ;;  %7051 = vmatprep.subr.bf16.mxu1 %v7576_v1  ;;  %7030 = vmatpush3.bf16.msra.mxu0 %v7577_v4  ;;  %v7611_v1 = vld [vmem:[%s9434_s1 + $0xf70] sm:$0xff]  }
 0x1d9   :  { %v6751_v57 = vadd.f32 %v6750_v55, %v6749_v50  ;;  %v6752_v61 = vpop.f32.mrb[30].mxu1  ;;  %v6731_v63 = vpop.f32.mrb[31].mxu0  ;;  %7031 = vmatprep.subr.bf16.mxu0 %v7579_v8  ;;  %v7605_v50 = vld [vmem:[%s9434_s1 + $0xf20] sm:$0xff]   ;;  %v7614_v4 = vld [vmem:[%s9434_s1 + $0xfb0] sm:$0xff]   ;;  %v7618_v8 = vld [vmem:[%s9434_s1 + $0xfb8] sm:$0xff]  }
 0x1da   :  { %v5117_v60 = vadd.f32 %v6729_v54, %v9151_v7  ;;  %v6732_v2 = vadd.f32 %v6731_v63, %v6730_v58  ;;  %v6753_v3 = vpop.f32.mrb[31].mxu1  ;;  %v7610_v63 = vld [vmem:[%s9434_s1 + $0xfa8] sm:$0xff]  }
 0x1db   :  { %v6754_v5 = vadd.f32 %v6753_v3, %v6752_v61  ;;  %7052 = vmatpush3.bf16.msra.mxu1 %v7578_v6  ;;  %v7609_v61 = vld [vmem:[%s9434_s1 + $0xf28] sm:$0xff]   ;;  %v7613_v3 = vld [vmem:[%s9434_s1 + $0xf30] sm:$0xff]   ;;  %v7616_v6 = vld [vmem:[%s9434_s1 + $0xff8] sm:$0xff]  }
 0x1dc   :  { %v9268_v0 = vadd.f32 %v6751_v57, %v5117_v60  ;;  %v5120_v7 = vadd.f32 %v6732_v2, %v9166_v16  ;;  %7053 = vmatprep.subr.bf16.mxu1 %v7580_v10  ;;  %7032 = vmatpush3.bf16.msra.mxu0 %v7581_v11  ;;  %v7586_v16 = vld [vmem:[%s9434_s1 + $0xeb8] sm:$0xff]   ;;  %v7612_v2 = vld [vmem:[%s9434_s1 + $0xff0] sm:$0xff]  }
 0x1dd   :  { %7033 = vmatprep.subr.bf16.mxu0 %v7583_v13  ;;  %v83_v10 = vld [vmem:[%s9437_s0 + $0x1f0] sm:$0xff]  ;;  %v52_v13 = vld [vmem:[%s9437_s0 + $0xf8] sm:$0xff] }
 0x1de   :  { %v9283_v9 = vadd.f32 %v6754_v5, %v5120_v7  ;;  %v7615_v5 = vld [vmem:[%s9434_s1 + $0xf78] sm:$0xff]  }
 0x1df   :  { %7054 = vmatpush3.bf16.msra.mxu1 %v7582_v12  ;;  %v7617_v7 = vld [vmem:[%s9434_s1 + $0xf38] sm:$0xff]  }
 0x1e0   :  { %7055 = vmatprep.subr.bf16.mxu1 %v7584_v14  ;;  %7034 = vmatpush3.bf16.msra.mxu0 %v7585_v15  ;;  %v84_v14 = vld [vmem:[%s9437_s0 + $0x1f8] sm:$0xff] }
 0x1e1   :  { %7063 = vmatprep.subr.bf16.mxu0 %v7587_v25  ;;  %v5889_v15 = vcombine.low %v52_v13, %v84_v14 }
 0x1e3   :  { %7056 = vmatpush3.bf16.msra.mxu1 %v7586_v16  ;;  %5689 = vmatmul.mubr.bf16.vlgmr.msra.gmra.mrb[56].mxu0 %v5883_v20  ;;  %v5890_v16 = vcombine.high %v52_v13, %v84_v14 }
 0x1e4   :  { %7085 = vmatprep.subr.bf16.mxu1 %v7588_v26  ;;  %7064 = vmatpush3.bf16.msra.mxu0 %v7589_v27 }
 0x1e5   :  { %7065 = vmatprep.subr.bf16.mxu0 %v7591_v29 }
 0x1e6   :  { %5730 = vmatmul.mubr.bf16.vlgmr.msra.gmra.mrb[56].mxu1 %v5885_v23 }
 0x1e7   :  { %7086 = vmatpush3.bf16.msra.mxu1 %v7590_v28  ;;  %5811 = vmatprep.mubr.bf16.mxu1 %v5890_v16 }
 0x1e8   :  { %7087 = vmatprep.subr.bf16.mxu1 %v7592_v30  ;;  %7066 = vmatpush3.bf16.msra.mxu0 %v7593_v31 }
 0x1e9   :  { %7067 = vmatprep.subr.bf16.mxu0 %v7595_v33 }
 0x1eb   :  { %7088 = vmatpush3.bf16.msra.mxu1 %v7594_v32 }
 0x1ec   :  { %7089 = vmatprep.subr.bf16.mxu1 %v7596_v34  ;;  %7068 = vmatpush3.bf16.msra.mxu0 %v7597_v35 }
 0x1ed   :  { %7069 = vmatprep.subr.bf16.mxu0 %v7599_v37 }
 0x1ef   :  { %7090 = vmatpush3.bf16.msra.mxu1 %v7598_v36 }
 0x1f0   :  { %7091 = vmatprep.subr.bf16.mxu1 %v7600_v38  ;;  %7070 = vmatpush3.bf16.msra.mxu0 %v7601_v40 }
 0x1f1   :  { %7071 = vmatprep.subr.bf16.mxu0 %v7603_v44 }
 0x1f3   :  { %7092 = vmatpush3.bf16.msra.mxu1 %v7602_v42 }
 0x1f4   :  { %7093 = vmatprep.subr.bf16.mxu1 %v7604_v47  ;;  %7072 = vmatpush3.bf16.msra.mxu0 %v7605_v50 }
 0x1f5   :  { %7073 = vmatprep.subr.bf16.mxu0 %v7607_v56 }
 0x1f6   :  { %v6771_v39 = vpop.f32.mrb[32].mxu0 }
 0x1f7   :  { %v6793_v41 = vpop.f32.mrb[32].mxu1  ;;  %v6772_v43 = vpop.f32.mrb[33].mxu0  ;;  %7094 = vmatpush3.bf16.msra.mxu1 %v7606_v53 }
 0x1f8   :  { %v6773_v45 = vadd.f32 %v6772_v43, %v6771_v39  ;;  %v6794_v46 = vpop.f32.mrb[33].mxu1  ;;  %v6774_v49 = vpop.f32.mrb[34].mxu0  ;;  %7095 = vmatprep.subr.bf16.mxu1 %v7608_v59  ;;  %7074 = vmatpush3.bf16.msra.mxu0 %v7609_v61 }
 0x1f9   :  { %v6795_v48 = vadd.f32 %v6794_v46, %v6793_v41  ;;  %v6796_v52 = vpop.f32.mrb[34].mxu1  ;;  %v6775_v54 = vpop.f32.mrb[35].mxu0  ;;  %7075 = vmatprep.subr.bf16.mxu0 %v7611_v1 }
 0x1fa   :  { %v5199_v51 = vadd.f32 %v6773_v45, %v9268_v0  ;;  %v6776_v57 = vadd.f32 %v6775_v54, %v6774_v49  ;;  %v6797_v58 = vpop.f32.mrb[35].mxu1 }
 0x1fb   :  { %v6798_v60 = vadd.f32 %v6797_v58, %v6796_v52  ;;  %7096 = vmatpush3.bf16.msra.mxu1 %v7610_v63 }
 0x1fc   :  { %v5240_v55 = vadd.f32 %v6795_v48, %v5199_v51  ;;  %v5202_v62 = vadd.f32 %v6776_v57, %v9283_v9  ;;  %7097 = vmatprep.subr.bf16.mxu1 %v7612_v2  ;;  %7076 = vmatpush3.bf16.msra.mxu0 %v7613_v3  ;;  %v51_v9 = vld [vmem:[%s9437_s0 + $0xf0] sm:$0xff] }
 0x1fd   :  { %7077 = vmatprep.subr.bf16.mxu0 %v7615_v5  ;;  %v5887_v11 = vcombine.low %v51_v9, %v83_v10  ;;  %v5888_v12 = vcombine.high %v51_v9, %v83_v10 }
 0x1fe   :  { %v5243_v0 = vadd.f32 %v6798_v60, %v5202_v62 }
 0x1ff   :  { %7098 = vmatpush3.bf16.msra.mxu1 %v7614_v4  ;;  %5770 = vmatprep.mubr.bf16.mxu0 %v5888_v12 }
 0x200   :  { %7099 = vmatprep.subr.bf16.mxu1 %v7616_v6  ;;  %7078 = vmatpush3.bf16.msra.mxu0 %v7617_v7 }
 0x203   :  { %7100 = vmatpush3.bf16.msra.mxu1 %v7618_v8  ;;  %5771 = vmatmul.mubr.bf16.vlgmr.msra.gmra.mrb[60].mxu0 %v5887_v11 }
 0x206   :  { %5812 = vmatmul.mubr.bf16.vlgmr.msra.gmra.mrb[60].mxu1 %v5889_v15 }
 0x216   :  { %v6815_v17 = vpop.f32.mrb[36].mxu0 }
 0x217   :  { %v6816_v19 = vpop.f32.mrb[37].mxu0 }
 0x218   :  { %v6817_v20 = vadd.f32 %v6816_v19, %v6815_v17  ;;  %v6818_v22 = vpop.f32.mrb[38].mxu0 }
 0x219   :  { %v6837_v18 = vpop.f32.mrb[36].mxu1  ;;  %v6819_v25 = vpop.f32.mrb[39].mxu0 }
 0x21a   :  { %v6838_v21 = vpop.f32.mrb[37].mxu1  ;;  %v5281_v26 = vadd.f32 %v6817_v20, %v5240_v55  ;;  %v6820_v27 = vadd.f32 %v6819_v25, %v6818_v22 }
 0x21b   :  { %v6839_v23 = vadd.f32 %v6838_v21, %v6837_v18  ;;  %v6840_v24 = vpop.f32.mrb[38].mxu1 }
 0x21c   :  { %v6841_v28 = vpop.f32.mrb[39].mxu1  ;;  %v5284_v31 = vadd.f32 %v6820_v27, %v5243_v0 }
 0x21d   :  { %v6842_v29 = vadd.f32 %v6841_v28, %v6840_v24  ;;  %v5322_v30 = vadd.f32 %v6839_v23, %v5281_v26 }
 0x21f   :  { %v5325_v32 = vadd.f32 %v6842_v29, %v5284_v31 }
 0x236   :  { %v6859_v33 = vpop.f32.mrb[40].mxu0 }
 0x237   :  { %v6860_v35 = vpop.f32.mrb[41].mxu0 }
 0x238   :  { %v6861_v37 = vadd.f32 %v6860_v35, %v6859_v33  ;;  %v6862_v39 = vpop.f32.mrb[42].mxu0 }
 0x239   :  { %v6881_v34 = vpop.f32.mrb[40].mxu1  ;;  %v6863_v41 = vpop.f32.mrb[43].mxu0 }
 0x23a   :  { %v6882_v36 = vpop.f32.mrb[41].mxu1  ;;  %v5363_v43 = vadd.f32 %v6861_v37, %v5322_v30  ;;  %v6864_v44 = vadd.f32 %v6863_v41, %v6862_v39 }
 0x23b   :  { %v6883_v38 = vadd.f32 %v6882_v36, %v6881_v34  ;;  %v6884_v40 = vpop.f32.mrb[42].mxu1 }
 0x23c   :  { %v6885_v42 = vpop.f32.mrb[43].mxu1  ;;  %v5366_v47 = vadd.f32 %v6864_v44, %v5325_v32 }
 0x23d   :  { %v6886_v45 = vadd.f32 %v6885_v42, %v6884_v40  ;;  %v5404_v46 = vadd.f32 %v6883_v38, %v5363_v43 }
 0x23f   :  { %v5407_v48 = vadd.f32 %v6886_v45, %v5366_v47 }
 0x256   :  { %v6903_v49 = vpop.f32.mrb[44].mxu0 }
 0x257   :  { %v6904_v51 = vpop.f32.mrb[45].mxu0 }
 0x258   :  { %v6905_v52 = vadd.f32 %v6904_v51, %v6903_v49  ;;  %v6906_v54 = vpop.f32.mrb[46].mxu0 }
 0x259   :  { %v6925_v50 = vpop.f32.mrb[44].mxu1  ;;  %v6907_v57 = vpop.f32.mrb[47].mxu0 }
 0x25a   :  { %v6926_v53 = vpop.f32.mrb[45].mxu1  ;;  %v5445_v58 = vadd.f32 %v6905_v52, %v5404_v46  ;;  %v6908_v59 = vadd.f32 %v6907_v57, %v6906_v54 }
 0x25b   :  { %v6927_v55 = vadd.f32 %v6926_v53, %v6925_v50  ;;  %v6928_v56 = vpop.f32.mrb[46].mxu1 }
 0x25c   :  { %v6929_v60 = vpop.f32.mrb[47].mxu1  ;;  %v5448_v63 = vadd.f32 %v6908_v59, %v5407_v48 }
 0x25d   :  { %v6930_v61 = vadd.f32 %v6929_v60, %v6928_v56  ;;  %v5486_v62 = vadd.f32 %v6927_v55, %v5445_v58 }
 0x25f   :  { %v5489_v0 = vadd.f32 %v6930_v61, %v5448_v63 }
 0x276   :  { %v6947_v1 = vpop.f32.mrb[48].mxu0 }
 0x277   :  { %v6948_v3 = vpop.f32.mrb[49].mxu0 }
 0x278   :  { %v6949_v4 = vadd.f32 %v6948_v3, %v6947_v1  ;;  %v6950_v6 = vpop.f32.mrb[50].mxu0 }
 0x279   :  { %v6969_v2 = vpop.f32.mrb[48].mxu1  ;;  %v6951_v9 = vpop.f32.mrb[51].mxu0 }
 0x27a   :  { %v6970_v5 = vpop.f32.mrb[49].mxu1  ;;  %v5527_v10 = vadd.f32 %v6949_v4, %v5486_v62  ;;  %v6952_v11 = vadd.f32 %v6951_v9, %v6950_v6 }
 0x27b   :  { %v6971_v7 = vadd.f32 %v6970_v5, %v6969_v2  ;;  %v6972_v8 = vpop.f32.mrb[50].mxu1 }
 0x27c   :  { %v6973_v12 = vpop.f32.mrb[51].mxu1  ;;  %v5530_v15 = vadd.f32 %v6952_v11, %v5489_v0 }
 0x27d   :  { %v6974_v13 = vadd.f32 %v6973_v12, %v6972_v8  ;;  %v5568_v14 = vadd.f32 %v6971_v7, %v5527_v10 }
 0x27f   :  { %v5571_v16 = vadd.f32 %v6974_v13, %v5530_v15 }
 0x296   :  { %v6991_v17 = vpop.f32.mrb[52].mxu0 }
 0x297   :  { %v6992_v19 = vpop.f32.mrb[53].mxu0 }
 0x298   :  { %v6993_v21 = vadd.f32 %v6992_v19, %v6991_v17  ;;  %v6994_v23 = vpop.f32.mrb[54].mxu0 }
 0x299   :  { %v7013_v18 = vpop.f32.mrb[52].mxu1  ;;  %v6995_v25 = vpop.f32.mrb[55].mxu0 }
 0x29a   :  { %v7014_v20 = vpop.f32.mrb[53].mxu1  ;;  %v5609_v27 = vadd.f32 %v6993_v21, %v5568_v14  ;;  %v6996_v28 = vadd.f32 %v6995_v25, %v6994_v23 }
 0x29b   :  { %v7015_v22 = vadd.f32 %v7014_v20, %v7013_v18  ;;  %v7016_v24 = vpop.f32.mrb[54].mxu1 }
 0x29c   :  { %v7017_v26 = vpop.f32.mrb[55].mxu1  ;;  %v5612_v31 = vadd.f32 %v6996_v28, %v5571_v16 }
 0x29d   :  { %v7018_v29 = vadd.f32 %v7017_v26, %v7016_v24  ;;  %v5650_v30 = vadd.f32 %v7015_v22, %v5609_v27 }
 0x29f   :  { %v5653_v32 = vadd.f32 %v7018_v29, %v5612_v31 }
 0x2b6   :  { %v7035_v33 = vpop.f32.mrb[56].mxu0 }
 0x2b7   :  { %v7036_v35 = vpop.f32.mrb[57].mxu0 }
 0x2b8   :  { %v7037_v36 = vadd.f32 %v7036_v35, %v7035_v33  ;;  %v7038_v38 = vpop.f32.mrb[58].mxu0 }
 0x2b9   :  { %v7057_v34 = vpop.f32.mrb[56].mxu1  ;;  %v7039_v41 = vpop.f32.mrb[59].mxu0 }
 0x2ba   :  { %v7058_v37 = vpop.f32.mrb[57].mxu1  ;;  %v5691_v42 = vadd.f32 %v7037_v36, %v5650_v30  ;;  %v7040_v43 = vadd.f32 %v7039_v41, %v7038_v38 }
 0x2bb   :  { %v7059_v39 = vadd.f32 %v7058_v37, %v7057_v34  ;;  %v7060_v40 = vpop.f32.mrb[58].mxu1 }
 0x2bc   :  { %v7061_v44 = vpop.f32.mrb[59].mxu1  ;;  %v5694_v47 = vadd.f32 %v7040_v43, %v5653_v32 }
 0x2bd   :  { %v7062_v45 = vadd.f32 %v7061_v44, %v7060_v40  ;;  %v5732_v46 = vadd.f32 %v7059_v39, %v5691_v42 }
 0x2bf   :  { %v5735_v48 = vadd.f32 %v7062_v45, %v5694_v47 }
 0x2d6   :  { %v7079_v49 = vpop.f32.mrb[60].mxu0 }
 0x2d7   :  { %v7080_v51 = vpop.f32.mrb[61].mxu0 }
 0x2d8   :  { %v7081_v52 = vadd.f32 %v7080_v51, %v7079_v49  ;;  %v7082_v54 = vpop.f32.mrb[62].mxu0 }
 0x2d9   :  { %v7101_v50 = vpop.f32.mrb[60].mxu1  ;;  %v7083_v57 = vpop.f32.mrb[63].mxu0 }
 0x2da   :  { %v7102_v53 = vpop.f32.mrb[61].mxu1  ;;  %v5773_v58 = vadd.f32 %v7081_v52, %v5732_v46  ;;  %v7084_v59 = vadd.f32 %v7083_v57, %v7082_v54 }
 0x2db   :  { %v7103_v55 = vadd.f32 %v7102_v53, %v7101_v50  ;;  %v7104_v56 = vpop.f32.mrb[62].mxu1 }
 0x2dc   :  { %v7105_v60 = vpop.f32.mrb[63].mxu1  ;;  %v5776_v63 = vadd.f32 %v7084_v59, %v5735_v48 }
 0x2dd   :  { %v7106_v61 = vadd.f32 %v7105_v60, %v7104_v56  ;;  %v5814_v62 = vadd.f32 %v7103_v55, %v5773_v58 }
 0x2df   :  { %5820 = vst [vmem:[%s9439_s5] sm:$0xff] %v5814_v62  ;;  %v5817_v0 = vadd.f32 %v7106_v61, %v5776_v63 }
 0x2e1   :  { %5821 = vst [vmem:[%s9439_s5 + $0x8] sm:$0xff] %v5817_v0 }

</bundles_post_ra>
